<compile_context>
chip_gen: v7x
topology: tpu7x:2x2x1
jax: 0.10.0
libtpu: 0.0.40
codegen_flags: <defaults>
</compile_context>

<pallas_src>
import numpy as np

import jax
import jax.numpy as jnp
from jax import lax
from jax.experimental import pallas as pl
from jax.experimental.pallas import tpu as pltpu

NEG_SLOPE = 0.01            # nn.LeakyReLU() default
C, H, W = 3, 32, 32
NUM_LAYERS = 16
HIDDEN = 1000
HIDDEN_PAD = 1024           # pad hidden 1000 -> 1024 lanes
OUT = 10
OUT_PAD = 128               # lane-dense FC output, sliced to 10 outside
IN_FEATS = C * H * W        # 3072
SUB = 8                     # each 32x32 plane packs to (8, 128)
LANE = 128
TAPS = 27                   # 3 ic * 3 ky * 3 kx


def _leaky(x):
    # Exact for 0 < slope < 1, and one VALU op cheaper than compare+select.
    return jnp.maximum(x, NEG_SLOPE * x)


# ----------------------------------------------------------------------------
# Conv stack kernel: 16 x (residual 3x3 conv, 3->3 channels, pad=1, no bias).
#
#   w_ref : SMEM (16, 81) f32  -- w_ref[l, ((ic*3+ky)*3+kx)*3 + oc]
#   x_ref : VMEM (tb, 24, 128) f32  -- channel c occupies sublanes [8c, 8c+8)
#   o_ref : VMEM (tb, 24, 128) f32
#
# Packed plane p: (tb, 8, 128), flat pixel index i = s*128 + l = h*32 + w.
# ----------------------------------------------------------------------------
def conv_stack_kernel(w_ref, x_ref, o_ref):
    mshape = (1, SUB, LANE)
    lane = lax.broadcasted_iota(jnp.int32, mshape, 2)
    sub = lax.broadcasted_iota(jnp.int32, mshape, 1)
    lane_mod = lane & 31                       # = w coordinate within the row
    m_w_plus = lane_mod != 31                  # valid for dx = +1
    m_w_minus = lane_mod != 0                  # valid for dx = -1
    m_lane_lt96 = lane < 96
    m_lane_ge32 = lane >= 32
    m_h_plus_ok = jnp.logical_or(m_lane_lt96, sub < 7)    # ~(s==7 & l>=96)
    m_h_minus_ok = jnp.logical_or(m_lane_ge32, sub > 0)   # ~(s==0 & l<32)

    def hshift(p, dy):                         # out[h, w] = p[h+dy, w] (0 pad)
        if dy == 0:
            return p
        if dy == 1:                            # flat i -> i + 32
            a = pltpu.roll(p, shift=96, axis=2)
            c = pltpu.roll(pltpu.roll(p, shift=7, axis=1), shift=96, axis=2)
            r = jnp.where(m_lane_lt96, a, c)
            return jnp.where(m_h_plus_ok, r, 0.0)
        # dy == -1: flat i -> i - 32
        a = pltpu.roll(p, shift=32, axis=2)
        c = pltpu.roll(pltpu.roll(p, shift=1, axis=1), shift=32, axis=2)
        r = jnp.where(m_lane_ge32, a, c)
        return jnp.where(m_h_minus_ok, r, 0.0)

    def wshift(p, dx):                         # out[h, w] = p[h, w+dx] (0 pad)
        if dx == 0:
            return p
        if dx == 1:
            return jnp.where(m_w_plus, pltpu.roll(p, shift=127, axis=2), 0.0)
        return jnp.where(m_w_minus, pltpu.roll(p, shift=1, axis=2), 0.0)

    def layer_body(layer, cur):                # cur: (tb, 24, 128)
        act = _leaky(cur)
        # Per-oc accumulators initialized with the residual input.
        accs = [cur[:, oc * SUB:(oc + 1) * SUB, :] for oc in range(C)]
        for ic in range(C):
            a_ic = act[:, ic * SUB:(ic + 1) * SUB, :]      # (tb, 8, 128)
            for ky in range(3):
                hp = hshift(a_ic, ky - 1)
                for kx in range(3):
                    sp = wshift(hp, kx - 1)
                    tap = (ic * 3 + ky) * 3 + kx
                    for oc in range(C):
                        w = w_ref[layer, tap * 3 + oc]     # SMEM scalar
                        accs[oc] = accs[oc] + w * sp
        return jnp.concatenate(accs, axis=1)               # (tb, 24, 128)

    out = lax.fori_loop(0, NUM_LAYERS, layer_body, x_ref[...])
    o_ref[...] = out


# ----------------------------------------------------------------------------
# FC head kernel (row-tiled): leaky -> fc1 -> leaky -> fc2
#   x_ref : (bm, 3072) f32
#   w1_ref: (3072, 1024) bf16   (pre-transposed + zero-padded outside jit)
#   b1_ref: (1, 1024) f32
#   w2_ref: (1024, 128) bf16    (output zero-padded 10 -> 128 lanes)
#   b2_ref: (1, 128) f32
#   o_ref : (bm, 128) f32
# ----------------------------------------------------------------------------
def fc_kernel(x_ref, w1_ref, b1_ref, w2_ref, b2_ref, o_ref):
    x = _leaky(x_ref[...]).astype(jnp.bfloat16)
    h = jnp.dot(x, w1_ref[...], preferred_element_type=jnp.float32) + b1_ref[...]
    h = _leaky(h).astype(jnp.bfloat16)
    o_ref[...] = (jnp.dot(h, w2_ref[...], preferred_element_type=jnp.float32)
                  + b2_ref[...])


# ----------------------------------------------------------------------------
# One-time (outside jit) parameter preparation.
# ----------------------------------------------------------------------------
def prepare_params(conv_w, fc1_w, fc1_b, fc2_w, fc2_b):
    # Conv scalar table: w_tab[l, ((ic*3+ky)*3+kx)*3 + oc] = conv_w[l,oc,ic,ky,kx]
    w = np.asarray(conv_w, np.float32)                 # (L, oc, ic, ky, kx)
    w_tab = np.transpose(w, (0, 2, 3, 4, 1)).reshape(NUM_LAYERS, TAPS * C)

    # FC weights: transpose once on host, zero-pad (1000->1024, 10->128), bf16.
    w1 = np.zeros((IN_FEATS, HIDDEN_PAD), np.float32)
    w1[:, :HIDDEN] = np.asarray(fc1_w, np.float32).T
    b1 = np.zeros((1, HIDDEN_PAD), np.float32)
    b1[0, :HIDDEN] = np.asarray(fc1_b, np.float32)
    w2 = np.zeros((HIDDEN_PAD, OUT_PAD), np.float32)
    w2[:HIDDEN, :OUT] = np.asarray(fc2_w, np.float32).T
    b2 = np.zeros((1, OUT_PAD), np.float32)
    b2[0, :OUT] = np.asarray(fc2_b, np.float32)
    return (jnp.asarray(w_tab),
            jnp.asarray(w1, jnp.bfloat16), jnp.asarray(b1),
            jnp.asarray(w2, jnp.bfloat16), jnp.asarray(b2))


def _pick_conv_tb(n):
    # Biggest tile <= 8 that still gives >= 2 grid blocks when possible
    # (so v7x's two TensorCores both get work via the parallel batch axis).
    tb = min(8, n)
    while tb > 1 and (n + tb - 1) // tb < 2:
        tb //= 2
    return max(tb, 1)


def _pick_fc_bm(n):
    if n > 256:
        return 256                     # 256-row MXU tiles, pipelined over rows
    if n >= 16 and n % 16 == 0:
        return n // 2                  # >=2 blocks -> both v7x TCs busy
    return n                           # small batch: one full-array block


# ----------------------------------------------------------------------------
# Forward pass wrapper.
# ----------------------------------------------------------------------------
@jax.jit
def reinforce_net_forward(x, w_tab, w1p, b1p, w2p, b2p):
    n = x.shape[0]
    # Pack (N, 3, 32, 32) -> (N, 24, 128): channel c on sublanes [8c, 8c+8),
    # flat pixel i = h*32 + w at (sublane i//128, lane i%128).  Pure reshape.
    xp = x.reshape(n, C * SUB, LANE)

    tb = _pick_conv_tb(n)
    conv_out = pl.pallas_call(
        conv_stack_kernel,
        out_shape=jax.ShapeDtypeStruct((n, C * SUB, LANE), jnp.float32),
        grid=(pl.cdiv(n, tb),),
        in_specs=[
            pl.BlockSpec(memory_space=pltpu.MemorySpace.SMEM),   # conv weights
            pl.BlockSpec((tb, C * SUB, LANE), lambda i: (i, 0, 0)),
        ],
        out_specs=pl.BlockSpec((tb, C * SUB, LANE), lambda i: (i, 0, 0)),
        compiler_params=pltpu.CompilerParams(
            dimension_semantics=("parallel",),
            vmem_limit_bytes=32 << 20),
    )(w_tab, xp)

    # Flatten matches torch's out16.view(-1, 3*32*32) (row-major NCHW).
    flat = conv_out.reshape(n, IN_FEATS)

    bm = _pick_fc_bm(n)
    out_pad = pl.pallas_call(
        fc_kernel,
        out_shape=jax.ShapeDtypeStruct((n, OUT_PAD), jnp.float32),
        grid=(pl.cdiv(n, bm),),
        in_specs=[
            pl.BlockSpec((bm, IN_FEATS), lambda i: (i, 0)),
            pl.BlockSpec((IN_FEATS, HIDDEN_PAD), lambda i: (0, 0)),  # resident
            pl.BlockSpec((1, HIDDEN_PAD), lambda i: (0, 0)),
            pl.BlockSpec((HIDDEN_PAD, OUT_PAD), lambda i: (0, 0)),
            pl.BlockSpec((1, OUT_PAD), lambda i: (0, 0)),
        ],
        out_specs=pl.BlockSpec((bm, OUT_PAD), lambda i: (i, 0)),
        compiler_params=pltpu.CompilerParams(
            dimension_semantics=("parallel",),
            vmem_limit_bytes=40 << 20),   # well under v7x's 64 MiB physical
    )(flat, w1p, b1p, w2p, b2p)
    return out_pad[:, :OUT]


# ----------------------------------------------------------------------------
# Pure-JAX reference for verification.
# ----------------------------------------------------------------------------
def reference_forward(x, conv_w, fc1_w, fc1_b, fc2_w, fc2_b):
    cur = x
    for layer in range(NUM_LAYERS):
        a = _leaky(cur)
        y = lax.conv_general_dilated(
            a, conv_w[layer], window_strides=(1, 1), padding="SAME",
            dimension_numbers=("NCHW", "OIHW", "NCHW"),
            precision=lax.Precision.HIGHEST)
        cur = y + cur
    flat = cur.reshape(cur.shape[0], -1)
    h = jnp.dot(_leaky(flat), fc1_w.T, precision="highest") + fc1_b
    o = jnp.dot(_leaky(h), fc2_w.T, precision="highest") + fc2_b
    return o


if __name__ == "__main__":
    key = jax.random.PRNGKey(0)
    kx, kc, k1w, k1b, k2w, k2b = jax.random.split(key, 6)

    # Input implied by fc1 = Linear(3*32*32, 1000): N x 3 x 32 x 32.
    x = jax.random.normal(kx, (2, C, H, W), jnp.float32)

    # Synthetic parameters (PyTorch shapes: Conv2d OIHW, Linear (out, in)).
    conv_w = 0.05 * jax.random.normal(kc, (NUM_LAYERS, C, C, 3, 3), jnp.float32)
    fc1_w = 0.01 * jax.random.normal(k1w, (HIDDEN, IN_FEATS), jnp.float32)
    fc1_b = 0.01 * jax.random.normal(k1b, (HIDDEN,), jnp.float32)
    fc2_w = 0.01 * jax.random.normal(k2w, (OUT, HIDDEN), jnp.float32)
    fc2_b = 0.01 * jax.random.normal(k2b, (OUT,), jnp.float32)

    params = prepare_params(conv_w, fc1_w, fc1_b, fc2_w, fc2_b)
    out = reinforce_net_forward(x, *params)
    out = jax.block_until_ready(out)

    ref = reference_forward(x, conv_w, fc1_w, fc1_b, fc2_w, fc2_b)
    np.testing.assert_allclose(np.asarray(out), np.asarray(ref),
                               rtol=2e-2, atol=2e-2)

    print("KERNEL_OK")
</pallas_src>

<mosaic_0001>
module attributes {stable_mosaic.version = 11 : i64} {
  func.func @fc_kernel(%arg0: i32, %arg1: memref<2x3072xf32, #tpu.memory_space<vmem>>, %arg2: memref<3072x1024xbf16, #tpu.memory_space<vmem>>, %arg3: memref<1x1024xf32, #tpu.memory_space<vmem>>, %arg4: memref<1024x128xbf16, #tpu.memory_space<vmem>>, %arg5: memref<1x128xf32, #tpu.memory_space<vmem>>, %arg6: memref<2x128xf32, #tpu.memory_space<vmem>>) attributes {dimension_semantics = [#tpu.dimension_semantics<parallel>], iteration_bounds = array<i64: 1>, scalar_prefetch = 0 : i64, scratch_operands = 0 : i64, tpu.core_type = #tpu.core_type<tc>, window_params = [{transform_indices = @transform_0, window_bounds = array<i64: 2, 3072>}, {pipeline_mode = #tpu.pipeline_mode<synchronous>, transform_indices = @transform_1, window_bounds = array<i64: 3072, 1024>}, {pipeline_mode = #tpu.pipeline_mode<synchronous>, transform_indices = @transform_2, window_bounds = array<i64: 1, 1024>}, {pipeline_mode = #tpu.pipeline_mode<synchronous>, transform_indices = @transform_3, window_bounds = array<i64: 1024, 128>}, {pipeline_mode = #tpu.pipeline_mode<synchronous>, transform_indices = @transform_4, window_bounds = array<i64: 1, 128>}, {transform_indices = @transform_5, window_bounds = array<i64: 2, 128>}]} {
    %c0 = arith.constant 0 : index
    %c0_0 = arith.constant 0 : index
    %0 = vector.load %arg1[%c0, %c0_0] : memref<2x3072xf32, #tpu.memory_space<vmem>>, vector<2x3072xf32>
    %cst = arith.constant 0.00999999977 : f32
    %1 = vector.broadcast %cst : f32 to vector<2x3072xf32>
    %2 = arith.mulf %1, %0 : vector<2x3072xf32>
    %3 = arith.maximumf %0, %2 : vector<2x3072xf32>
    %4 = arith.truncf %3 : vector<2x3072xf32> to vector<2x3072xbf16>
    %c0_1 = arith.constant 0 : index
    %c0_2 = arith.constant 0 : index
    %5 = vector.load %arg2[%c0_1, %c0_2] : memref<3072x1024xbf16, #tpu.memory_space<vmem>>, vector<3072x1024xbf16>
    %cst_3 = arith.constant dense<0.000000e+00> : vector<2x1024xf32>
    %6 = tpu.matmul %4, %5, %cst_3 {dimension_numbers = #tpu.dot_dimension_numbers<[1], [0], [0], [1], [0, 0, 1, 1], [], []>} : vector<2x3072xbf16>, vector<3072x1024xbf16>, vector<2x1024xf32> -> vector<2x1024xf32>
    %c0_4 = arith.constant 0 : index
    %c0_5 = arith.constant 0 : index
    %7 = vector.load %arg3[%c0_4, %c0_5] : memref<1x1024xf32, #tpu.memory_space<vmem>>, vector<1x1024xf32>
    %8 = vector.broadcast %7 : vector<1x1024xf32> to vector<2x1024xf32>
    %9 = arith.addf %6, %8 : vector<2x1024xf32>
    %cst_6 = arith.constant 0.00999999977 : f32
    %10 = vector.broadcast %cst_6 : f32 to vector<2x1024xf32>
    %11 = arith.mulf %10, %9 : vector<2x1024xf32>
    %12 = arith.maximumf %9, %11 : vector<2x1024xf32>
    %13 = arith.truncf %12 : vector<2x1024xf32> to vector<2x1024xbf16>
    %c0_7 = arith.constant 0 : index
    %c0_8 = arith.constant 0 : index
    %14 = vector.load %arg4[%c0_7, %c0_8] : memref<1024x128xbf16, #tpu.memory_space<vmem>>, vector<1024x128xbf16>
    %cst_9 = arith.constant dense<0.000000e+00> : vector<2x128xf32>
    %15 = tpu.matmul %13, %14, %cst_9 {dimension_numbers = #tpu.dot_dimension_numbers<[1], [0], [0], [1], [0, 0, 1, 1], [], []>} : vector<2x1024xbf16>, vector<1024x128xbf16>, vector<2x128xf32> -> vector<2x128xf32>
    %c0_10 = arith.constant 0 : index
    %c0_11 = arith.constant 0 : index
    %16 = vector.load %arg5[%c0_10, %c0_11] : memref<1x128xf32, #tpu.memory_space<vmem>>, vector<1x128xf32>
    %17 = vector.broadcast %16 : vector<1x128xf32> to vector<2x128xf32>
    %18 = arith.addf %15, %17 : vector<2x128xf32>
    %c0_12 = arith.constant 0 : index
    %c0_13 = arith.constant 0 : index
    %19 = vector.load %arg6[%c0_12, %c0_13] : memref<2x128xf32, #tpu.memory_space<vmem>>, vector<2x128xf32>
    tpu.vector_store %arg6[%c0_12, %c0_13], %18 {strides = array<i32>} : memref<2x128xf32, #tpu.memory_space<vmem>>, vector<2x128xf32>,
    return
  }
  func.func @transform_0(%arg0: i32) -> (i32, i32) {
    %c0_i32 = arith.constant 0 : i32
    %c0_i32_0 = arith.constant 0 : i32
    return %arg0, %c0_i32 : i32, i32
  }
  func.func @transform_1(%arg0: i32) -> (i32, i32) {
    %c0_i32 = arith.constant 0 : i32
    %c0_i32_0 = arith.constant 0 : i32
    %c0_i32_1 = arith.constant 0 : i32
    return %c0_i32, %c0_i32_0 : i32, i32
  }
  func.func @transform_2(%arg0: i32) -> (i32, i32) {
    %c0_i32 = arith.constant 0 : i32
    %c0_i32_0 = arith.constant 0 : i32
    %c0_i32_1 = arith.constant 0 : i32
    return %c0_i32, %c0_i32_0 : i32, i32
  }
  func.func @transform_3(%arg0: i32) -> (i32, i32) {
    %c0_i32 = arith.constant 0 : i32
    %c0_i32_0 = arith.constant 0 : i32
    %c0_i32_1 = arith.constant 0 : i32
    return %c0_i32, %c0_i32_0 : i32, i32
  }
  func.func @transform_4(%arg0: i32) -> (i32, i32) {
    %c0_i32 = arith.constant 0 : i32
    %c0_i32_0 = arith.constant 0 : i32
    %c0_i32_1 = arith.constant 0 : i32
    return %c0_i32, %c0_i32_0 : i32, i32
  }
  func.func @transform_5(%arg0: i32) -> (i32, i32) {
    %c0_i32 = arith.constant 0 : i32
    %c0_i32_0 = arith.constant 0 : i32
    return %arg0, %c0_i32 : i32, i32
  }
}

module attributes {stable_mosaic.version = 11 : i64} {
  func.func @conv_stack_kernel(%arg0: i32, %arg1: memref<16x81xf32, #tpu.memory_space<smem>>, %arg2: memref<1x24x128xf32, #tpu.memory_space<vmem>>, %arg3: memref<1x24x128xf32, #tpu.memory_space<vmem>>) attributes {dimension_semantics = [#tpu.dimension_semantics<parallel>], iteration_bounds = array<i64: 2>, scalar_prefetch = 0 : i64, scratch_operands = 0 : i64, tpu.core_type = #tpu.core_type<tc>, window_params = [{transform_indices = @transform_0, window_bounds = array<i64: 16, 81>}, {transform_indices = @transform_1, window_bounds = array<i64: 1, 24, 128>}, {transform_indices = @transform_2, window_bounds = array<i64: 1, 24, 128>}]} {
    %0 = tpu.iota {dimensions = array<i32: 2>} : vector<1x8x128xi32>
    %1 = tpu.iota {dimensions = array<i32: 1>} : vector<1x8x128xi32>
    %c31_i32 = arith.constant 31 : i32
    %2 = vector.broadcast %c31_i32 : i32 to vector<1x8x128xi32>
    %3 = arith.andi %0, %2 : vector<1x8x128xi32>
    %c31_i32_0 = arith.constant 31 : i32
    %4 = vector.broadcast %c31_i32_0 : i32 to vector<1x8x128xi32>
    %5 = arith.cmpi ne, %3, %4 : vector<1x8x128xi32>
    %c0_i32 = arith.constant 0 : i32
    %6 = vector.broadcast %c0_i32 : i32 to vector<1x8x128xi32>
    %7 = arith.cmpi ne, %3, %6 : vector<1x8x128xi32>
    %c96_i32 = arith.constant 96 : i32
    %8 = vector.broadcast %c96_i32 : i32 to vector<1x8x128xi32>
    %9 = arith.cmpi slt, %0, %8 : vector<1x8x128xi32>
    %c32_i32 = arith.constant 32 : i32
    %10 = vector.broadcast %c32_i32 : i32 to vector<1x8x128xi32>
    %11 = arith.cmpi sge, %0, %10 : vector<1x8x128xi32>
    %c7_i32 = arith.constant 7 : i32
    %12 = vector.broadcast %c7_i32 : i32 to vector<1x8x128xi32>
    %13 = arith.cmpi slt, %1, %12 : vector<1x8x128xi32>
    %14 = arith.ori %9, %13 : vector<1x8x128xi1>
    %c0_i32_1 = arith.constant 0 : i32
    %15 = vector.broadcast %c0_i32_1 : i32 to vector<1x8x128xi32>
    %16 = arith.cmpi sgt, %1, %15 : vector<1x8x128xi32>
    %17 = arith.ori %11, %16 : vector<1x8x128xi1>
    %c0 = arith.constant 0 : index
    %c0_2 = arith.constant 0 : index
    %c0_3 = arith.constant 0 : index
    %18 = vector.load %arg2[%c0, %c0_2, %c0_3] : memref<1x24x128xf32, #tpu.memory_space<vmem>>, vector<1x24x128xf32>
    %c0_i32_4 = arith.constant 0 : i32
    %c16_i32 = arith.constant 16 : i32
    %19 = arith.addi %c0_i32_4, %c16_i32 : i32
    %c1_i32 = arith.constant 1 : i32
    %20 = scf.for %arg4 = %c0_i32_4 to %19 step %c1_i32 iter_args(%arg5 = %18) -> (vector<1x24x128xf32>)  : i32 {
      %cst = arith.constant 0.00999999977 : f32
      %22 = vector.broadcast %cst : f32 to vector<1x24x128xf32>
      %23 = arith.mulf %22, %arg5 : vector<1x24x128xf32>
      %24 = arith.maximumf %arg5, %23 : vector<1x24x128xf32>
      %25 = vector.extract_strided_slice %arg5 {offsets = [0, 0, 0], sizes = [1, 8, 128], strides = [1, 1, 1]} : vector<1x24x128xf32> to vector<1x8x128xf32>
      %26 = vector.extract_strided_slice %arg5 {offsets = [0, 8, 0], sizes = [1, 8, 128], strides = [1, 1, 1]} : vector<1x24x128xf32> to vector<1x8x128xf32>
      %27 = vector.extract_strided_slice %arg5 {offsets = [0, 16, 0], sizes = [1, 8, 128], strides = [1, 1, 1]} : vector<1x24x128xf32> to vector<1x8x128xf32>
      %28 = vector.extract_strided_slice %24 {offsets = [0, 0, 0], sizes = [1, 8, 128], strides = [1, 1, 1]} : vector<1x24x128xf32> to vector<1x8x128xf32>
      %c32_i32_9 = arith.constant 32 : i32
      %29 = tpu.dynamic_rotate %28 by %c32_i32_9 dim 2 : vector<1x8x128xf32>, i32 -> vector<1x8x128xf32>
      %c1_i32_10 = arith.constant 1 : i32
      %30 = tpu.dynamic_rotate %28 by %c1_i32_10 dim 1 : vector<1x8x128xf32>, i32 -> vector<1x8x128xf32>
      %c32_i32_11 = arith.constant 32 : i32
      %31 = tpu.dynamic_rotate %30 by %c32_i32_11 dim 2 : vector<1x8x128xf32>, i32 -> vector<1x8x128xf32>
      %32 = arith.select %11, %29, %31 : vector<1x8x128xi1>, vector<1x8x128xf32>
      %cst_12 = arith.constant 0.000000e+00 : f32
      %33 = vector.broadcast %cst_12 : f32 to vector<1x8x128xf32>
      %34 = arith.select %17, %32, %33 : vector<1x8x128xi1>, vector<1x8x128xf32>
      %c1_i32_13 = arith.constant 1 : i32
      %35 = tpu.dynamic_rotate %34 by %c1_i32_13 dim 2 : vector<1x8x128xf32>, i32 -> vector<1x8x128xf32>
      %cst_14 = arith.constant 0.000000e+00 : f32
      %36 = vector.broadcast %cst_14 : f32 to vector<1x8x128xf32>
      %37 = arith.select %7, %35, %36 : vector<1x8x128xi1>, vector<1x8x128xf32>
      %38 = arith.index_cast %arg4 : i32 to index
      %c0_15 = arith.constant 0 : index
      %39 = memref.load %arg1[%38, %c0_15] : memref<16x81xf32, #tpu.memory_space<smem>>
      %40 = vector.broadcast %39 : f32 to vector<1x8x128xf32>
      %41 = arith.mulf %40, %37 : vector<1x8x128xf32>
      %42 = arith.addf %25, %41 : vector<1x8x128xf32>
      %43 = arith.index_cast %arg4 : i32 to index
      %c1 = arith.constant 1 : index
      %44 = memref.load %arg1[%43, %c1] : memref<16x81xf32, #tpu.memory_space<smem>>
      %45 = vector.broadcast %44 : f32 to vector<1x8x128xf32>
      %46 = arith.mulf %45, %37 : vector<1x8x128xf32>
      %47 = arith.addf %26, %46 : vector<1x8x128xf32>
      %48 = arith.index_cast %arg4 : i32 to index
      %c2 = arith.constant 2 : index
      %49 = memref.load %arg1[%48, %c2] : memref<16x81xf32, #tpu.memory_space<smem>>
      %50 = vector.broadcast %49 : f32 to vector<1x8x128xf32>
      %51 = arith.mulf %50, %37 : vector<1x8x128xf32>
      %52 = arith.addf %27, %51 : vector<1x8x128xf32>
      %53 = arith.index_cast %arg4 : i32 to index
      %c3 = arith.constant 3 : index
      %54 = memref.load %arg1[%53, %c3] : memref<16x81xf32, #tpu.memory_space<smem>>
      %55 = vector.broadcast %54 : f32 to vector<1x8x128xf32>
      %56 = arith.mulf %55, %34 : vector<1x8x128xf32>
      %57 = arith.addf %42, %56 : vector<1x8x128xf32>
      %58 = arith.index_cast %arg4 : i32 to index
      %c4 = arith.constant 4 : index
      %59 = memref.load %arg1[%58, %c4] : memref<16x81xf32, #tpu.memory_space<smem>>
      %60 = vector.broadcast %59 : f32 to vector<1x8x128xf32>
      %61 = arith.mulf %60, %34 : vector<1x8x128xf32>
      %62 = arith.addf %47, %61 : vector<1x8x128xf32>
      %63 = arith.index_cast %arg4 : i32 to index
      %c5 = arith.constant 5 : index
      %64 = memref.load %arg1[%63, %c5] : memref<16x81xf32, #tpu.memory_space<smem>>
      %65 = vector.broadcast %64 : f32 to vector<1x8x128xf32>
      %66 = arith.mulf %65, %34 : vector<1x8x128xf32>
      %67 = arith.addf %52, %66 : vector<1x8x128xf32>
      %c127_i32 = arith.constant 127 : i32
      %68 = tpu.dynamic_rotate %34 by %c127_i32 dim 2 : vector<1x8x128xf32>, i32 -> vector<1x8x128xf32>
      %cst_16 = arith.constant 0.000000e+00 : f32
      %69 = vector.broadcast %cst_16 : f32 to vector<1x8x128xf32>
      %70 = arith.select %5, %68, %69 : vector<1x8x128xi1>, vector<1x8x128xf32>
      %71 = arith.index_cast %arg4 : i32 to index
      %c6 = arith.constant 6 : index
      %72 = memref.load %arg1[%71, %c6] : memref<16x81xf32, #tpu.memory_space<smem>>
      %73 = vector.broadcast %72 : f32 to vector<1x8x128xf32>
      %74 = arith.mulf %73, %70 : vector<1x8x128xf32>
      %75 = arith.addf %57, %74 : vector<1x8x128xf32>
      %76 = arith.index_cast %arg4 : i32 to index
      %c7 = arith.constant 7 : index
      %77 = memref.load %arg1[%76, %c7] : memref<16x81xf32, #tpu.memory_space<smem>>
      %78 = vector.broadcast %77 : f32 to vector<1x8x128xf32>
      %79 = arith.mulf %78, %70 : vector<1x8x128xf32>
      %80 = arith.addf %62, %79 : vector<1x8x128xf32>
      %81 = arith.index_cast %arg4 : i32 to index
      %c8 = arith.constant 8 : index
      %82 = memref.load %arg1[%81, %c8] : memref<16x81xf32, #tpu.memory_space<smem>>
      %83 = vector.broadcast %82 : f32 to vector<1x8x128xf32>
      %84 = arith.mulf %83, %70 : vector<1x8x128xf32>
      %85 = arith.addf %67, %84 : vector<1x8x128xf32>
      %c1_i32_17 = arith.constant 1 : i32
      %86 = tpu.dynamic_rotate %28 by %c1_i32_17 dim 2 : vector<1x8x128xf32>, i32 -> vector<1x8x128xf32>
      %cst_18 = arith.constant 0.000000e+00 : f32
      %87 = vector.broadcast %cst_18 : f32 to vector<1x8x128xf32>
      %88 = arith.select %7, %86, %87 : vector<1x8x128xi1>, vector<1x8x128xf32>
      %89 = arith.index_cast %arg4 : i32 to index
      %c9 = arith.constant 9 : index
      %90 = memref.load %arg1[%89, %c9] : memref<16x81xf32, #tpu.memory_space<smem>>
      %91 = vector.broadcast %90 : f32 to vector<1x8x128xf32>
      %92 = arith.mulf %91, %88 : vector<1x8x128xf32>
      %93 = arith.addf %75, %92 : vector<1x8x128xf32>
      %94 = arith.index_cast %arg4 : i32 to index
      %c10 = arith.constant 10 : index
      %95 = memref.load %arg1[%94, %c10] : memref<16x81xf32, #tpu.memory_space<smem>>
      %96 = vector.broadcast %95 : f32 to vector<1x8x128xf32>
      %97 = arith.mulf %96, %88 : vector<1x8x128xf32>
      %98 = arith.addf %80, %97 : vector<1x8x128xf32>
      %99 = arith.index_cast %arg4 : i32 to index
      %c11 = arith.constant 11 : index
      %100 = memref.load %arg1[%99, %c11] : memref<16x81xf32, #tpu.memory_space<smem>>
      %101 = vector.broadcast %100 : f32 to vector<1x8x128xf32>
      %102 = arith.mulf %101, %88 : vector<1x8x128xf32>
      %103 = arith.addf %85, %102 : vector<1x8x128xf32>
      %104 = arith.index_cast %arg4 : i32 to index
      %c12 = arith.constant 12 : index
      %105 = memref.load %arg1[%104, %c12] : memref<16x81xf32, #tpu.memory_space<smem>>
      %106 = vector.broadcast %105 : f32 to vector<1x8x128xf32>
      %107 = arith.mulf %106, %28 : vector<1x8x128xf32>
      %108 = arith.addf %93, %107 : vector<1x8x128xf32>
      %109 = arith.index_cast %arg4 : i32 to index
      %c13 = arith.constant 13 : index
      %110 = memref.load %arg1[%109, %c13] : memref<16x81xf32, #tpu.memory_space<smem>>
      %111 = vector.broadcast %110 : f32 to vector<1x8x128xf32>
      %112 = arith.mulf %111, %28 : vector<1x8x128xf32>
      %113 = arith.addf %98, %112 : vector<1x8x128xf32>
      %114 = arith.index_cast %arg4 : i32 to index
      %c14 = arith.constant 14 : index
      %115 = memref.load %arg1[%114, %c14] : memref<16x81xf32, #tpu.memory_space<smem>>
      %116 = vector.broadcast %115 : f32 to vector<1x8x128xf32>
      %117 = arith.mulf %116, %28 : vector<1x8x128xf32>
      %118 = arith.addf %103, %117 : vector<1x8x128xf32>
      %c127_i32_19 = arith.constant 127 : i32
      %119 = tpu.dynamic_rotate %28 by %c127_i32_19 dim 2 : vector<1x8x128xf32>, i32 -> vector<1x8x128xf32>
      %cst_20 = arith.constant 0.000000e+00 : f32
      %120 = vector.broadcast %cst_20 : f32 to vector<1x8x128xf32>
      %121 = arith.select %5, %119, %120 : vector<1x8x128xi1>, vector<1x8x128xf32>
      %122 = arith.index_cast %arg4 : i32 to index
      %c15 = arith.constant 15 : index
      %123 = memref.load %arg1[%122, %c15] : memref<16x81xf32, #tpu.memory_space<smem>>
      %124 = vector.broadcast %123 : f32 to vector<1x8x128xf32>
      %125 = arith.mulf %124, %121 : vector<1x8x128xf32>
      %126 = arith.addf %108, %125 : vector<1x8x128xf32>
      %127 = arith.index_cast %arg4 : i32 to index
      %c16 = arith.constant 16 : index
      %128 = memref.load %arg1[%127, %c16] : memref<16x81xf32, #tpu.memory_space<smem>>
      %129 = vector.broadcast %128 : f32 to vector<1x8x128xf32>
      %130 = arith.mulf %129, %121 : vector<1x8x128xf32>
      %131 = arith.addf %113, %130 : vector<1x8x128xf32>
      %132 = arith.index_cast %arg4 : i32 to index
      %c17 = arith.constant 17 : index
      %133 = memref.load %arg1[%132, %c17] : memref<16x81xf32, #tpu.memory_space<smem>>
      %134 = vector.broadcast %133 : f32 to vector<1x8x128xf32>
      %135 = arith.mulf %134, %121 : vector<1x8x128xf32>
      %136 = arith.addf %118, %135 : vector<1x8x128xf32>
      %c96_i32_21 = arith.constant 96 : i32
      %137 = tpu.dynamic_rotate %28 by %c96_i32_21 dim 2 : vector<1x8x128xf32>, i32 -> vector<1x8x128xf32>
      %c7_i32_22 = arith.constant 7 : i32
      %138 = tpu.dynamic_rotate %28 by %c7_i32_22 dim 1 : vector<1x8x128xf32>, i32 -> vector<1x8x128xf32>
      %c96_i32_23 = arith.constant 96 : i32
      %139 = tpu.dynamic_rotate %138 by %c96_i32_23 dim 2 : vector<1x8x128xf32>, i32 -> vector<1x8x128xf32>
      %140 = arith.select %9, %137, %139 : vector<1x8x128xi1>, vector<1x8x128xf32>
      %cst_24 = arith.constant 0.000000e+00 : f32
      %141 = vector.broadcast %cst_24 : f32 to vector<1x8x128xf32>
      %142 = arith.select %14, %140, %141 : vector<1x8x128xi1>, vector<1x8x128xf32>
      %c1_i32_25 = arith.constant 1 : i32
      %143 = tpu.dynamic_rotate %142 by %c1_i32_25 dim 2 : vector<1x8x128xf32>, i32 -> vector<1x8x128xf32>
      %cst_26 = arith.constant 0.000000e+00 : f32
      %144 = vector.broadcast %cst_26 : f32 to vector<1x8x128xf32>
      %145 = arith.select %7, %143, %144 : vector<1x8x128xi1>, vector<1x8x128xf32>
      %146 = arith.index_cast %arg4 : i32 to index
      %c18 = arith.constant 18 : index
      %147 = memref.load %arg1[%146, %c18] : memref<16x81xf32, #tpu.memory_space<smem>>
      %148 = vector.broadcast %147 : f32 to vector<1x8x128xf32>
      %149 = arith.mulf %148, %145 : vector<1x8x128xf32>
      %150 = arith.addf %126, %149 : vector<1x8x128xf32>
      %151 = arith.index_cast %arg4 : i32 to index
      %c19 = arith.constant 19 : index
      %152 = memref.load %arg1[%151, %c19] : memref<16x81xf32, #tpu.memory_space<smem>>
      %153 = vector.broadcast %152 : f32 to vector<1x8x128xf32>
      %154 = arith.mulf %153, %145 : vector<1x8x128xf32>
      %155 = arith.addf %131, %154 : vector<1x8x128xf32>
      %156 = arith.index_cast %arg4 : i32 to index
      %c20 = arith.constant 20 : index
      %157 = memref.load %arg1[%156, %c20] : memref<16x81xf32, #tpu.memory_space<smem>>
      %158 = vector.broadcast %157 : f32 to vector<1x8x128xf32>
      %159 = arith.mulf %158, %145 : vector<1x8x128xf32>
      %160 = arith.addf %136, %159 : vector<1x8x128xf32>
      %161 = arith.index_cast %arg4 : i32 to index
      %c21 = arith.constant 21 : index
      %162 = memref.load %arg1[%161, %c21] : memref<16x81xf32, #tpu.memory_space<smem>>
      %163 = vector.broadcast %162 : f32 to vector<1x8x128xf32>
      %164 = arith.mulf %163, %142 : vector<1x8x128xf32>
      %165 = arith.addf %150, %164 : vector<1x8x128xf32>
      %166 = arith.index_cast %arg4 : i32 to index
      %c22 = arith.constant 22 : index
      %167 = memref.load %arg1[%166, %c22] : memref<16x81xf32, #tpu.memory_space<smem>>
      %168 = vector.broadcast %167 : f32 to vector<1x8x128xf32>
      %169 = arith.mulf %168, %142 : vector<1x8x128xf32>
      %170 = arith.addf %155, %169 : vector<1x8x128xf32>
      %171 = arith.index_cast %arg4 : i32 to index
      %c23 = arith.constant 23 : index
      %172 = memref.load %arg1[%171, %c23] : memref<16x81xf32, #tpu.memory_space<smem>>
      %173 = vector.broadcast %172 : f32 to vector<1x8x128xf32>
      %174 = arith.mulf %173, %142 : vector<1x8x128xf32>
      %175 = arith.addf %160, %174 : vector<1x8x128xf32>
      %c127_i32_27 = arith.constant 127 : i32
      %176 = tpu.dynamic_rotate %142 by %c127_i32_27 dim 2 : vector<1x8x128xf32>, i32 -> vector<1x8x128xf32>
      %cst_28 = arith.constant 0.000000e+00 : f32
      %177 = vector.broadcast %cst_28 : f32 to vector<1x8x128xf32>
      %178 = arith.select %5, %176, %177 : vector<1x8x128xi1>, vector<1x8x128xf32>
      %179 = arith.index_cast %arg4 : i32 to index
      %c24 = arith.constant 24 : index
      %180 = memref.load %arg1[%179, %c24] : memref<16x81xf32, #tpu.memory_space<smem>>
      %181 = vector.broadcast %180 : f32 to vector<1x8x128xf32>
      %182 = arith.mulf %181, %178 : vector<1x8x128xf32>
      %183 = arith.addf %165, %182 : vector<1x8x128xf32>
      %184 = arith.index_cast %arg4 : i32 to index
      %c25 = arith.constant 25 : index
      %185 = memref.load %arg1[%184, %c25] : memref<16x81xf32, #tpu.memory_space<smem>>
      %186 = vector.broadcast %185 : f32 to vector<1x8x128xf32>
      %187 = arith.mulf %186, %178 : vector<1x8x128xf32>
      %188 = arith.addf %170, %187 : vector<1x8x128xf32>
      %189 = arith.index_cast %arg4 : i32 to index
      %c26 = arith.constant 26 : index
      %190 = memref.load %arg1[%189, %c26] : memref<16x81xf32, #tpu.memory_space<smem>>
      %191 = vector.broadcast %190 : f32 to vector<1x8x128xf32>
      %192 = arith.mulf %191, %178 : vector<1x8x128xf32>
      %193 = arith.addf %175, %192 : vector<1x8x128xf32>
      %194 = vector.extract_strided_slice %24 {offsets = [0, 8, 0], sizes = [1, 8, 128], strides = [1, 1, 1]} : vector<1x24x128xf32> to vector<1x8x128xf32>
      %c32_i32_29 = arith.constant 32 : i32
      %195 = tpu.dynamic_rotate %194 by %c32_i32_29 dim 2 : vector<1x8x128xf32>, i32 -> vector<1x8x128xf32>
      %c1_i32_30 = arith.constant 1 : i32
      %196 = tpu.dynamic_rotate %194 by %c1_i32_30 dim 1 : vector<1x8x128xf32>, i32 -> vector<1x8x128xf32>
      %c32_i32_31 = arith.constant 32 : i32
      %197 = tpu.dynamic_rotate %196 by %c32_i32_31 dim 2 : vector<1x8x128xf32>, i32 -> vector<1x8x128xf32>
      %198 = arith.select %11, %195, %197 : vector<1x8x128xi1>, vector<1x8x128xf32>
      %cst_32 = arith.constant 0.000000e+00 : f32
      %199 = vector.broadcast %cst_32 : f32 to vector<1x8x128xf32>
      %200 = arith.select %17, %198, %199 : vector<1x8x128xi1>, vector<1x8x128xf32>
      %c1_i32_33 = arith.constant 1 : i32
      %201 = tpu.dynamic_rotate %200 by %c1_i32_33 dim 2 : vector<1x8x128xf32>, i32 -> vector<1x8x128xf32>
      %cst_34 = arith.constant 0.000000e+00 : f32
      %202 = vector.broadcast %cst_34 : f32 to vector<1x8x128xf32>
      %203 = arith.select %7, %201, %202 : vector<1x8x128xi1>, vector<1x8x128xf32>
      %204 = arith.index_cast %arg4 : i32 to index
      %c27 = arith.constant 27 : index
      %205 = memref.load %arg1[%204, %c27] : memref<16x81xf32, #tpu.memory_space<smem>>
      %206 = vector.broadcast %205 : f32 to vector<1x8x128xf32>
      %207 = arith.mulf %206, %203 : vector<1x8x128xf32>
      %208 = arith.addf %183, %207 : vector<1x8x128xf32>
      %209 = arith.index_cast %arg4 : i32 to index
      %c28 = arith.constant 28 : index
      %210 = memref.load %arg1[%209, %c28] : memref<16x81xf32, #tpu.memory_space<smem>>
      %211 = vector.broadcast %210 : f32 to vector<1x8x128xf32>
      %212 = arith.mulf %211, %203 : vector<1x8x128xf32>
      %213 = arith.addf %188, %212 : vector<1x8x128xf32>
      %214 = arith.index_cast %arg4 : i32 to index
      %c29 = arith.constant 29 : index
      %215 = memref.load %arg1[%214, %c29] : memref<16x81xf32, #tpu.memory_space<smem>>
      %216 = vector.broadcast %215 : f32 to vector<1x8x128xf32>
      %217 = arith.mulf %216, %203 : vector<1x8x128xf32>
      %218 = arith.addf %193, %217 : vector<1x8x128xf32>
      %219 = arith.index_cast %arg4 : i32 to index
      %c30 = arith.constant 30 : index
      %220 = memref.load %arg1[%219, %c30] : memref<16x81xf32, #tpu.memory_space<smem>>
      %221 = vector.broadcast %220 : f32 to vector<1x8x128xf32>
      %222 = arith.mulf %221, %200 : vector<1x8x128xf32>
      %223 = arith.addf %208, %222 : vector<1x8x128xf32>
      %224 = arith.index_cast %arg4 : i32 to index
      %c31 = arith.constant 31 : index
      %225 = memref.load %arg1[%224, %c31] : memref<16x81xf32, #tpu.memory_space<smem>>
      %226 = vector.broadcast %225 : f32 to vector<1x8x128xf32>
      %227 = arith.mulf %226, %200 : vector<1x8x128xf32>
      %228 = arith.addf %213, %227 : vector<1x8x128xf32>
      %229 = arith.index_cast %arg4 : i32 to index
      %c32 = arith.constant 32 : index
      %230 = memref.load %arg1[%229, %c32] : memref<16x81xf32, #tpu.memory_space<smem>>
      %231 = vector.broadcast %230 : f32 to vector<1x8x128xf32>
      %232 = arith.mulf %231, %200 : vector<1x8x128xf32>
      %233 = arith.addf %218, %232 : vector<1x8x128xf32>
      %c127_i32_35 = arith.constant 127 : i32
      %234 = tpu.dynamic_rotate %200 by %c127_i32_35 dim 2 : vector<1x8x128xf32>, i32 -> vector<1x8x128xf32>
      %cst_36 = arith.constant 0.000000e+00 : f32
      %235 = vector.broadcast %cst_36 : f32 to vector<1x8x128xf32>
      %236 = arith.select %5, %234, %235 : vector<1x8x128xi1>, vector<1x8x128xf32>
      %237 = arith.index_cast %arg4 : i32 to index
      %c33 = arith.constant 33 : index
      %238 = memref.load %arg1[%237, %c33] : memref<16x81xf32, #tpu.memory_space<smem>>
      %239 = vector.broadcast %238 : f32 to vector<1x8x128xf32>
      %240 = arith.mulf %239, %236 : vector<1x8x128xf32>
      %241 = arith.addf %223, %240 : vector<1x8x128xf32>
      %242 = arith.index_cast %arg4 : i32 to index
      %c34 = arith.constant 34 : index
      %243 = memref.load %arg1[%242, %c34] : memref<16x81xf32, #tpu.memory_space<smem>>
      %244 = vector.broadcast %243 : f32 to vector<1x8x128xf32>
      %245 = arith.mulf %244, %236 : vector<1x8x128xf32>
      %246 = arith.addf %228, %245 : vector<1x8x128xf32>
      %247 = arith.index_cast %arg4 : i32 to index
      %c35 = arith.constant 35 : index
      %248 = memref.load %arg1[%247, %c35] : memref<16x81xf32, #tpu.memory_space<smem>>
      %249 = vector.broadcast %248 : f32 to vector<1x8x128xf32>
      %250 = arith.mulf %249, %236 : vector<1x8x128xf32>
      %251 = arith.addf %233, %250 : vector<1x8x128xf32>
      %c1_i32_37 = arith.constant 1 : i32
      %252 = tpu.dynamic_rotate %194 by %c1_i32_37 dim 2 : vector<1x8x128xf32>, i32 -> vector<1x8x128xf32>
      %cst_38 = arith.constant 0.000000e+00 : f32
      %253 = vector.broadcast %cst_38 : f32 to vector<1x8x128xf32>
      %254 = arith.select %7, %252, %253 : vector<1x8x128xi1>, vector<1x8x128xf32>
      %255 = arith.index_cast %arg4 : i32 to index
      %c36 = arith.constant 36 : index
      %256 = memref.load %arg1[%255, %c36] : memref<16x81xf32, #tpu.memory_space<smem>>
      %257 = vector.broadcast %256 : f32 to vector<1x8x128xf32>
      %258 = arith.mulf %257, %254 : vector<1x8x128xf32>
      %259 = arith.addf %241, %258 : vector<1x8x128xf32>
      %260 = arith.index_cast %arg4 : i32 to index
      %c37 = arith.constant 37 : index
      %261 = memref.load %arg1[%260, %c37] : memref<16x81xf32, #tpu.memory_space<smem>>
      %262 = vector.broadcast %261 : f32 to vector<1x8x128xf32>
      %263 = arith.mulf %262, %254 : vector<1x8x128xf32>
      %264 = arith.addf %246, %263 : vector<1x8x128xf32>
      %265 = arith.index_cast %arg4 : i32 to index
      %c38 = arith.constant 38 : index
      %266 = memref.load %arg1[%265, %c38] : memref<16x81xf32, #tpu.memory_space<smem>>
      %267 = vector.broadcast %266 : f32 to vector<1x8x128xf32>
      %268 = arith.mulf %267, %254 : vector<1x8x128xf32>
      %269 = arith.addf %251, %268 : vector<1x8x128xf32>
      %270 = arith.index_cast %arg4 : i32 to index
      %c39 = arith.constant 39 : index
      %271 = memref.load %arg1[%270, %c39] : memref<16x81xf32, #tpu.memory_space<smem>>
      %272 = vector.broadcast %271 : f32 to vector<1x8x128xf32>
      %273 = arith.mulf %272, %194 : vector<1x8x128xf32>
      %274 = arith.addf %259, %273 : vector<1x8x128xf32>
      %275 = arith.index_cast %arg4 : i32 to index
      %c40 = arith.constant 40 : index
      %276 = memref.load %arg1[%275, %c40] : memref<16x81xf32, #tpu.memory_space<smem>>
      %277 = vector.broadcast %276 : f32 to vector<1x8x128xf32>
      %278 = arith.mulf %277, %194 : vector<1x8x128xf32>
      %279 = arith.addf %264, %278 : vector<1x8x128xf32>
      %280 = arith.index_cast %arg4 : i32 to index
      %c41 = arith.constant 41 : index
      %281 = memref.load %arg1[%280, %c41] : memref<16x81xf32, #tpu.memory_space<smem>>
      %282 = vector.broadcast %281 : f32 to vector<1x8x128xf32>
      %283 = arith.mulf %282, %194 : vector<1x8x128xf32>
      %284 = arith.addf %269, %283 : vector<1x8x128xf32>
      %c127_i32_39 = arith.constant 127 : i32
      %285 = tpu.dynamic_rotate %194 by %c127_i32_39 dim 2 : vector<1x8x128xf32>, i32 -> vector<1x8x128xf32>
      %cst_40 = arith.constant 0.000000e+00 : f32
      %286 = vector.broadcast %cst_40 : f32 to vector<1x8x128xf32>
      %287 = arith.select %5, %285, %286 : vector<1x8x128xi1>, vector<1x8x128xf32>
      %288 = arith.index_cast %arg4 : i32 to index
      %c42 = arith.constant 42 : index
      %289 = memref.load %arg1[%288, %c42] : memref<16x81xf32, #tpu.memory_space<smem>>
      %290 = vector.broadcast %289 : f32 to vector<1x8x128xf32>
      %291 = arith.mulf %290, %287 : vector<1x8x128xf32>
      %292 = arith.addf %274, %291 : vector<1x8x128xf32>
      %293 = arith.index_cast %arg4 : i32 to index
      %c43 = arith.constant 43 : index
      %294 = memref.load %arg1[%293, %c43] : memref<16x81xf32, #tpu.memory_space<smem>>
      %295 = vector.broadcast %294 : f32 to vector<1x8x128xf32>
      %296 = arith.mulf %295, %287 : vector<1x8x128xf32>
      %297 = arith.addf %279, %296 : vector<1x8x128xf32>
      %298 = arith.index_cast %arg4 : i32 to index
      %c44 = arith.constant 44 : index
      %299 = memref.load %arg1[%298, %c44] : memref<16x81xf32, #tpu.memory_space<smem>>
      %300 = vector.broadcast %299 : f32 to vector<1x8x128xf32>
      %301 = arith.mulf %300, %287 : vector<1x8x128xf32>
      %302 = arith.addf %284, %301 : vector<1x8x128xf32>
      %c96_i32_41 = arith.constant 96 : i32
      %303 = tpu.dynamic_rotate %194 by %c96_i32_41 dim 2 : vector<1x8x128xf32>, i32 -> vector<1x8x128xf32>
      %c7_i32_42 = arith.constant 7 : i32
      %304 = tpu.dynamic_rotate %194 by %c7_i32_42 dim 1 : vector<1x8x128xf32>, i32 -> vector<1x8x128xf32>
      %c96_i32_43 = arith.constant 96 : i32
      %305 = tpu.dynamic_rotate %304 by %c96_i32_43 dim 2 : vector<1x8x128xf32>, i32 -> vector<1x8x128xf32>
      %306 = arith.select %9, %303, %305 : vector<1x8x128xi1>, vector<1x8x128xf32>
      %cst_44 = arith.constant 0.000000e+00 : f32
      %307 = vector.broadcast %cst_44 : f32 to vector<1x8x128xf32>
      %308 = arith.select %14, %306, %307 : vector<1x8x128xi1>, vector<1x8x128xf32>
      %c1_i32_45 = arith.constant 1 : i32
      %309 = tpu.dynamic_rotate %308 by %c1_i32_45 dim 2 : vector<1x8x128xf32>, i32 -> vector<1x8x128xf32>
      %cst_46 = arith.constant 0.000000e+00 : f32
      %310 = vector.broadcast %cst_46 : f32 to vector<1x8x128xf32>
      %311 = arith.select %7, %309, %310 : vector<1x8x128xi1>, vector<1x8x128xf32>
      %312 = arith.index_cast %arg4 : i32 to index
      %c45 = arith.constant 45 : index
      %313 = memref.load %arg1[%312, %c45] : memref<16x81xf32, #tpu.memory_space<smem>>
      %314 = vector.broadcast %313 : f32 to vector<1x8x128xf32>
      %315 = arith.mulf %314, %311 : vector<1x8x128xf32>
      %316 = arith.addf %292, %315 : vector<1x8x128xf32>
      %317 = arith.index_cast %arg4 : i32 to index
      %c46 = arith.constant 46 : index
      %318 = memref.load %arg1[%317, %c46] : memref<16x81xf32, #tpu.memory_space<smem>>
      %319 = vector.broadcast %318 : f32 to vector<1x8x128xf32>
      %320 = arith.mulf %319, %311 : vector<1x8x128xf32>
      %321 = arith.addf %297, %320 : vector<1x8x128xf32>
      %322 = arith.index_cast %arg4 : i32 to index
      %c47 = arith.constant 47 : index
      %323 = memref.load %arg1[%322, %c47] : memref<16x81xf32, #tpu.memory_space<smem>>
      %324 = vector.broadcast %323 : f32 to vector<1x8x128xf32>
      %325 = arith.mulf %324, %311 : vector<1x8x128xf32>
      %326 = arith.addf %302, %325 : vector<1x8x128xf32>
      %327 = arith.index_cast %arg4 : i32 to index
      %c48 = arith.constant 48 : index
      %328 = memref.load %arg1[%327, %c48] : memref<16x81xf32, #tpu.memory_space<smem>>
      %329 = vector.broadcast %328 : f32 to vector<1x8x128xf32>
      %330 = arith.mulf %329, %308 : vector<1x8x128xf32>
      %331 = arith.addf %316, %330 : vector<1x8x128xf32>
      %332 = arith.index_cast %arg4 : i32 to index
      %c49 = arith.constant 49 : index
      %333 = memref.load %arg1[%332, %c49] : memref<16x81xf32, #tpu.memory_space<smem>>
      %334 = vector.broadcast %333 : f32 to vector<1x8x128xf32>
      %335 = arith.mulf %334, %308 : vector<1x8x128xf32>
      %336 = arith.addf %321, %335 : vector<1x8x128xf32>
      %337 = arith.index_cast %arg4 : i32 to index
      %c50 = arith.constant 50 : index
      %338 = memref.load %arg1[%337, %c50] : memref<16x81xf32, #tpu.memory_space<smem>>
      %339 = vector.broadcast %338 : f32 to vector<1x8x128xf32>
      %340 = arith.mulf %339, %308 : vector<1x8x128xf32>
      %341 = arith.addf %326, %340 : vector<1x8x128xf32>
      %c127_i32_47 = arith.constant 127 : i32
      %342 = tpu.dynamic_rotate %308 by %c127_i32_47 dim 2 : vector<1x8x128xf32>, i32 -> vector<1x8x128xf32>
      %cst_48 = arith.constant 0.000000e+00 : f32
      %343 = vector.broadcast %cst_48 : f32 to vector<1x8x128xf32>
      %344 = arith.select %5, %342, %343 : vector<1x8x128xi1>, vector<1x8x128xf32>
      %345 = arith.index_cast %arg4 : i32 to index
      %c51 = arith.constant 51 : index
      %346 = memref.load %arg1[%345, %c51] : memref<16x81xf32, #tpu.memory_space<smem>>
      %347 = vector.broadcast %346 : f32 to vector<1x8x128xf32>
      %348 = arith.mulf %347, %344 : vector<1x8x128xf32>
      %349 = arith.addf %331, %348 : vector<1x8x128xf32>
      %350 = arith.index_cast %arg4 : i32 to index
      %c52 = arith.constant 52 : index
      %351 = memref.load %arg1[%350, %c52] : memref<16x81xf32, #tpu.memory_space<smem>>
      %352 = vector.broadcast %351 : f32 to vector<1x8x128xf32>
      %353 = arith.mulf %352, %344 : vector<1x8x128xf32>
      %354 = arith.addf %336, %353 : vector<1x8x128xf32>
      %355 = arith.index_cast %arg4 : i32 to index
      %c53 = arith.constant 53 : index
      %356 = memref.load %arg1[%355, %c53] : memref<16x81xf32, #tpu.memory_space<smem>>
      %357 = vector.broadcast %356 : f32 to vector<1x8x128xf32>
      %358 = arith.mulf %357, %344 : vector<1x8x128xf32>
      %359 = arith.addf %341, %358 : vector<1x8x128xf32>
      %360 = vector.extract_strided_slice %24 {offsets = [0, 16, 0], sizes = [1, 8, 128], strides = [1, 1, 1]} : vector<1x24x128xf32> to vector<1x8x128xf32>
      %c32_i32_49 = arith.constant 32 : i32
      %361 = tpu.dynamic_rotate %360 by %c32_i32_49 dim 2 : vector<1x8x128xf32>, i32 -> vector<1x8x128xf32>
      %c1_i32_50 = arith.constant 1 : i32
      %362 = tpu.dynamic_rotate %360 by %c1_i32_50 dim 1 : vector<1x8x128xf32>, i32 -> vector<1x8x128xf32>
      %c32_i32_51 = arith.constant 32 : i32
      %363 = tpu.dynamic_rotate %362 by %c32_i32_51 dim 2 : vector<1x8x128xf32>, i32 -> vector<1x8x128xf32>
      %364 = arith.select %11, %361, %363 : vector<1x8x128xi1>, vector<1x8x128xf32>
      %cst_52 = arith.constant 0.000000e+00 : f32
      %365 = vector.broadcast %cst_52 : f32 to vector<1x8x128xf32>
      %366 = arith.select %17, %364, %365 : vector<1x8x128xi1>, vector<1x8x128xf32>
      %c1_i32_53 = arith.constant 1 : i32
      %367 = tpu.dynamic_rotate %366 by %c1_i32_53 dim 2 : vector<1x8x128xf32>, i32 -> vector<1x8x128xf32>
      %cst_54 = arith.constant 0.000000e+00 : f32
      %368 = vector.broadcast %cst_54 : f32 to vector<1x8x128xf32>
      %369 = arith.select %7, %367, %368 : vector<1x8x128xi1>, vector<1x8x128xf32>
      %370 = arith.index_cast %arg4 : i32 to index
      %c54 = arith.constant 54 : index
      %371 = memref.load %arg1[%370, %c54] : memref<16x81xf32, #tpu.memory_space<smem>>
      %372 = vector.broadcast %371 : f32 to vector<1x8x128xf32>
      %373 = arith.mulf %372, %369 : vector<1x8x128xf32>
      %374 = arith.addf %349, %373 : vector<1x8x128xf32>
      %375 = arith.index_cast %arg4 : i32 to index
      %c55 = arith.constant 55 : index
      %376 = memref.load %arg1[%375, %c55] : memref<16x81xf32, #tpu.memory_space<smem>>
      %377 = vector.broadcast %376 : f32 to vector<1x8x128xf32>
      %378 = arith.mulf %377, %369 : vector<1x8x128xf32>
      %379 = arith.addf %354, %378 : vector<1x8x128xf32>
      %380 = arith.index_cast %arg4 : i32 to index
      %c56 = arith.constant 56 : index
      %381 = memref.load %arg1[%380, %c56] : memref<16x81xf32, #tpu.memory_space<smem>>
      %382 = vector.broadcast %381 : f32 to vector<1x8x128xf32>
      %383 = arith.mulf %382, %369 : vector<1x8x128xf32>
      %384 = arith.addf %359, %383 : vector<1x8x128xf32>
      %385 = arith.index_cast %arg4 : i32 to index
      %c57 = arith.constant 57 : index
      %386 = memref.load %arg1[%385, %c57] : memref<16x81xf32, #tpu.memory_space<smem>>
      %387 = vector.broadcast %386 : f32 to vector<1x8x128xf32>
      %388 = arith.mulf %387, %366 : vector<1x8x128xf32>
      %389 = arith.addf %374, %388 : vector<1x8x128xf32>
      %390 = arith.index_cast %arg4 : i32 to index
      %c58 = arith.constant 58 : index
      %391 = memref.load %arg1[%390, %c58] : memref<16x81xf32, #tpu.memory_space<smem>>
      %392 = vector.broadcast %391 : f32 to vector<1x8x128xf32>
      %393 = arith.mulf %392, %366 : vector<1x8x128xf32>
      %394 = arith.addf %379, %393 : vector<1x8x128xf32>
      %395 = arith.index_cast %arg4 : i32 to index
      %c59 = arith.constant 59 : index
      %396 = memref.load %arg1[%395, %c59] : memref<16x81xf32, #tpu.memory_space<smem>>
      %397 = vector.broadcast %396 : f32 to vector<1x8x128xf32>
      %398 = arith.mulf %397, %366 : vector<1x8x128xf32>
      %399 = arith.addf %384, %398 : vector<1x8x128xf32>
      %c127_i32_55 = arith.constant 127 : i32
      %400 = tpu.dynamic_rotate %366 by %c127_i32_55 dim 2 : vector<1x8x128xf32>, i32 -> vector<1x8x128xf32>
      %cst_56 = arith.constant 0.000000e+00 : f32
      %401 = vector.broadcast %cst_56 : f32 to vector<1x8x128xf32>
      %402 = arith.select %5, %400, %401 : vector<1x8x128xi1>, vector<1x8x128xf32>
      %403 = arith.index_cast %arg4 : i32 to index
      %c60 = arith.constant 60 : index
      %404 = memref.load %arg1[%403, %c60] : memref<16x81xf32, #tpu.memory_space<smem>>
      %405 = vector.broadcast %404 : f32 to vector<1x8x128xf32>
      %406 = arith.mulf %405, %402 : vector<1x8x128xf32>
      %407 = arith.addf %389, %406 : vector<1x8x128xf32>
      %408 = arith.index_cast %arg4 : i32 to index
      %c61 = arith.constant 61 : index
      %409 = memref.load %arg1[%408, %c61] : memref<16x81xf32, #tpu.memory_space<smem>>
      %410 = vector.broadcast %409 : f32 to vector<1x8x128xf32>
      %411 = arith.mulf %410, %402 : vector<1x8x128xf32>
      %412 = arith.addf %394, %411 : vector<1x8x128xf32>
      %413 = arith.index_cast %arg4 : i32 to index
      %c62 = arith.constant 62 : index
      %414 = memref.load %arg1[%413, %c62] : memref<16x81xf32, #tpu.memory_space<smem>>
      %415 = vector.broadcast %414 : f32 to vector<1x8x128xf32>
      %416 = arith.mulf %415, %402 : vector<1x8x128xf32>
      %417 = arith.addf %399, %416 : vector<1x8x128xf32>
      %c1_i32_57 = arith.constant 1 : i32
      %418 = tpu.dynamic_rotate %360 by %c1_i32_57 dim 2 : vector<1x8x128xf32>, i32 -> vector<1x8x128xf32>
      %cst_58 = arith.constant 0.000000e+00 : f32
      %419 = vector.broadcast %cst_58 : f32 to vector<1x8x128xf32>
      %420 = arith.select %7, %418, %419 : vector<1x8x128xi1>, vector<1x8x128xf32>
      %421 = arith.index_cast %arg4 : i32 to index
      %c63 = arith.constant 63 : index
      %422 = memref.load %arg1[%421, %c63] : memref<16x81xf32, #tpu.memory_space<smem>>
      %423 = vector.broadcast %422 : f32 to vector<1x8x128xf32>
      %424 = arith.mulf %423, %420 : vector<1x8x128xf32>
      %425 = arith.addf %407, %424 : vector<1x8x128xf32>
      %426 = arith.index_cast %arg4 : i32 to index
      %c64 = arith.constant 64 : index
      %427 = memref.load %arg1[%426, %c64] : memref<16x81xf32, #tpu.memory_space<smem>>
      %428 = vector.broadcast %427 : f32 to vector<1x8x128xf32>
      %429 = arith.mulf %428, %420 : vector<1x8x128xf32>
      %430 = arith.addf %412, %429 : vector<1x8x128xf32>
      %431 = arith.index_cast %arg4 : i32 to index
      %c65 = arith.constant 65 : index
      %432 = memref.load %arg1[%431, %c65] : memref<16x81xf32, #tpu.memory_space<smem>>
      %433 = vector.broadcast %432 : f32 to vector<1x8x128xf32>
      %434 = arith.mulf %433, %420 : vector<1x8x128xf32>
      %435 = arith.addf %417, %434 : vector<1x8x128xf32>
      %436 = arith.index_cast %arg4 : i32 to index
      %c66 = arith.constant 66 : index
      %437 = memref.load %arg1[%436, %c66] : memref<16x81xf32, #tpu.memory_space<smem>>
      %438 = vector.broadcast %437 : f32 to vector<1x8x128xf32>
      %439 = arith.mulf %438, %360 : vector<1x8x128xf32>
      %440 = arith.addf %425, %439 : vector<1x8x128xf32>
      %441 = arith.index_cast %arg4 : i32 to index
      %c67 = arith.constant 67 : index
      %442 = memref.load %arg1[%441, %c67] : memref<16x81xf32, #tpu.memory_space<smem>>
      %443 = vector.broadcast %442 : f32 to vector<1x8x128xf32>
      %444 = arith.mulf %443, %360 : vector<1x8x128xf32>
      %445 = arith.addf %430, %444 : vector<1x8x128xf32>
      %446 = arith.index_cast %arg4 : i32 to index
      %c68 = arith.constant 68 : index
      %447 = memref.load %arg1[%446, %c68] : memref<16x81xf32, #tpu.memory_space<smem>>
      %448 = vector.broadcast %447 : f32 to vector<1x8x128xf32>
      %449 = arith.mulf %448, %360 : vector<1x8x128xf32>
      %450 = arith.addf %435, %449 : vector<1x8x128xf32>
      %c127_i32_59 = arith.constant 127 : i32
      %451 = tpu.dynamic_rotate %360 by %c127_i32_59 dim 2 : vector<1x8x128xf32>, i32 -> vector<1x8x128xf32>
      %cst_60 = arith.constant 0.000000e+00 : f32
      %452 = vector.broadcast %cst_60 : f32 to vector<1x8x128xf32>
      %453 = arith.select %5, %451, %452 : vector<1x8x128xi1>, vector<1x8x128xf32>
      %454 = arith.index_cast %arg4 : i32 to index
      %c69 = arith.constant 69 : index
      %455 = memref.load %arg1[%454, %c69] : memref<16x81xf32, #tpu.memory_space<smem>>
      %456 = vector.broadcast %455 : f32 to vector<1x8x128xf32>
      %457 = arith.mulf %456, %453 : vector<1x8x128xf32>
      %458 = arith.addf %440, %457 : vector<1x8x128xf32>
      %459 = arith.index_cast %arg4 : i32 to index
      %c70 = arith.constant 70 : index
      %460 = memref.load %arg1[%459, %c70] : memref<16x81xf32, #tpu.memory_space<smem>>
      %461 = vector.broadcast %460 : f32 to vector<1x8x128xf32>
      %462 = arith.mulf %461, %453 : vector<1x8x128xf32>
      %463 = arith.addf %445, %462 : vector<1x8x128xf32>
      %464 = arith.index_cast %arg4 : i32 to index
      %c71 = arith.constant 71 : index
      %465 = memref.load %arg1[%464, %c71] : memref<16x81xf32, #tpu.memory_space<smem>>
      %466 = vector.broadcast %465 : f32 to vector<1x8x128xf32>
      %467 = arith.mulf %466, %453 : vector<1x8x128xf32>
      %468 = arith.addf %450, %467 : vector<1x8x128xf32>
      %c96_i32_61 = arith.constant 96 : i32
      %469 = tpu.dynamic_rotate %360 by %c96_i32_61 dim 2 : vector<1x8x128xf32>, i32 -> vector<1x8x128xf32>
      %c7_i32_62 = arith.constant 7 : i32
      %470 = tpu.dynamic_rotate %360 by %c7_i32_62 dim 1 : vector<1x8x128xf32>, i32 -> vector<1x8x128xf32>
      %c96_i32_63 = arith.constant 96 : i32
      %471 = tpu.dynamic_rotate %470 by %c96_i32_63 dim 2 : vector<1x8x128xf32>, i32 -> vector<1x8x128xf32>
      %472 = arith.select %9, %469, %471 : vector<1x8x128xi1>, vector<1x8x128xf32>
      %cst_64 = arith.constant 0.000000e+00 : f32
      %473 = vector.broadcast %cst_64 : f32 to vector<1x8x128xf32>
      %474 = arith.select %14, %472, %473 : vector<1x8x128xi1>, vector<1x8x128xf32>
      %c1_i32_65 = arith.constant 1 : i32
      %475 = tpu.dynamic_rotate %474 by %c1_i32_65 dim 2 : vector<1x8x128xf32>, i32 -> vector<1x8x128xf32>
      %cst_66 = arith.constant 0.000000e+00 : f32
      %476 = vector.broadcast %cst_66 : f32 to vector<1x8x128xf32>
      %477 = arith.select %7, %475, %476 : vector<1x8x128xi1>, vector<1x8x128xf32>
      %478 = arith.index_cast %arg4 : i32 to index
      %c72 = arith.constant 72 : index
      %479 = memref.load %arg1[%478, %c72] : memref<16x81xf32, #tpu.memory_space<smem>>
      %480 = vector.broadcast %479 : f32 to vector<1x8x128xf32>
      %481 = arith.mulf %480, %477 : vector<1x8x128xf32>
      %482 = arith.addf %458, %481 : vector<1x8x128xf32>
      %483 = arith.index_cast %arg4 : i32 to index
      %c73 = arith.constant 73 : index
      %484 = memref.load %arg1[%483, %c73] : memref<16x81xf32, #tpu.memory_space<smem>>
      %485 = vector.broadcast %484 : f32 to vector<1x8x128xf32>
      %486 = arith.mulf %485, %477 : vector<1x8x128xf32>
      %487 = arith.addf %463, %486 : vector<1x8x128xf32>
      %488 = arith.index_cast %arg4 : i32 to index
      %c74 = arith.constant 74 : index
      %489 = memref.load %arg1[%488, %c74] : memref<16x81xf32, #tpu.memory_space<smem>>
      %490 = vector.broadcast %489 : f32 to vector<1x8x128xf32>
      %491 = arith.mulf %490, %477 : vector<1x8x128xf32>
      %492 = arith.addf %468, %491 : vector<1x8x128xf32>
      %493 = arith.index_cast %arg4 : i32 to index
      %c75 = arith.constant 75 : index
      %494 = memref.load %arg1[%493, %c75] : memref<16x81xf32, #tpu.memory_space<smem>>
      %495 = vector.broadcast %494 : f32 to vector<1x8x128xf32>
      %496 = arith.mulf %495, %474 : vector<1x8x128xf32>
      %497 = arith.addf %482, %496 : vector<1x8x128xf32>
      %498 = arith.index_cast %arg4 : i32 to index
      %c76 = arith.constant 76 : index
      %499 = memref.load %arg1[%498, %c76] : memref<16x81xf32, #tpu.memory_space<smem>>
      %500 = vector.broadcast %499 : f32 to vector<1x8x128xf32>
      %501 = arith.mulf %500, %474 : vector<1x8x128xf32>
      %502 = arith.addf %487, %501 : vector<1x8x128xf32>
      %503 = arith.index_cast %arg4 : i32 to index
      %c77 = arith.constant 77 : index
      %504 = memref.load %arg1[%503, %c77] : memref<16x81xf32, #tpu.memory_space<smem>>
      %505 = vector.broadcast %504 : f32 to vector<1x8x128xf32>
      %506 = arith.mulf %505, %474 : vector<1x8x128xf32>
      %507 = arith.addf %492, %506 : vector<1x8x128xf32>
      %c127_i32_67 = arith.constant 127 : i32
      %508 = tpu.dynamic_rotate %474 by %c127_i32_67 dim 2 : vector<1x8x128xf32>, i32 -> vector<1x8x128xf32>
      %cst_68 = arith.constant 0.000000e+00 : f32
      %509 = vector.broadcast %cst_68 : f32 to vector<1x8x128xf32>
      %510 = arith.select %5, %508, %509 : vector<1x8x128xi1>, vector<1x8x128xf32>
      %511 = arith.index_cast %arg4 : i32 to index
      %c78 = arith.constant 78 : index
      %512 = memref.load %arg1[%511, %c78] : memref<16x81xf32, #tpu.memory_space<smem>>
      %513 = vector.broadcast %512 : f32 to vector<1x8x128xf32>
      %514 = arith.mulf %513, %510 : vector<1x8x128xf32>
      %515 = arith.addf %497, %514 : vector<1x8x128xf32>
      %516 = arith.index_cast %arg4 : i32 to index
      %c79 = arith.constant 79 : index
      %517 = memref.load %arg1[%516, %c79] : memref<16x81xf32, #tpu.memory_space<smem>>
      %518 = vector.broadcast %517 : f32 to vector<1x8x128xf32>
      %519 = arith.mulf %518, %510 : vector<1x8x128xf32>
      %520 = arith.addf %502, %519 : vector<1x8x128xf32>
      %521 = arith.index_cast %arg4 : i32 to index
      %c80 = arith.constant 80 : index
      %522 = memref.load %arg1[%521, %c80] : memref<16x81xf32, #tpu.memory_space<smem>>
      %523 = vector.broadcast %522 : f32 to vector<1x8x128xf32>
      %524 = arith.mulf %523, %510 : vector<1x8x128xf32>
      %525 = arith.addf %507, %524 : vector<1x8x128xf32>
      %526 = tpu.concatenate %515, %520, %525 in 1 : vector<1x8x128xf32>, vector<1x8x128xf32>, vector<1x8x128xf32> -> vector<1x24x128xf32>
      scf.yield %526 : vector<1x24x128xf32>
    }
    %c16_i32_5 = arith.constant 16 : i32
    %c0_6 = arith.constant 0 : index
    %c0_7 = arith.constant 0 : index
    %c0_8 = arith.constant 0 : index
    %21 = vector.load %arg3[%c0_6, %c0_7, %c0_8] : memref<1x24x128xf32, #tpu.memory_space<vmem>>, vector<1x24x128xf32>
    tpu.vector_store %arg3[%c0_6, %c0_7, %c0_8], %20 {strides = array<i32>} : memref<1x24x128xf32, #tpu.memory_space<vmem>>, vector<1x24x128xf32>,
    return
  }
  func.func @transform_0(%arg0: i32) -> (i32, i32) {
    %c0_i32 = arith.constant 0 : i32
    %c0_i32_0 = arith.constant 0 : i32
    %c0_i32_1 = arith.constant 0 : i32
    return %c0_i32, %c0_i32_0 : i32, i32
  }
  func.func @transform_1(%arg0: i32) -> (i32, i32, i32) {
    %c0_i32 = arith.constant 0 : i32
    %c0_i32_0 = arith.constant 0 : i32
    %c0_i32_1 = arith.constant 0 : i32
    return %arg0, %c0_i32, %c0_i32_0 : i32, i32, i32
  }
  func.func @transform_2(%arg0: i32) -> (i32, i32, i32) {
    %c0_i32 = arith.constant 0 : i32
    %c0_i32_0 = arith.constant 0 : i32
    %c0_i32_1 = arith.constant 0 : i32
    return %arg0, %c0_i32, %c0_i32_0 : i32, i32, i32
  }
}

</mosaic_0001>

<bundles_post_ra>
// kernel: reinforce_net_forward.2
= control target key start
LH: loop header
LB: loop body
LE: loop exit
PB: predicated region body
PF: predicated region fallthrough
CT: control target
= control target key end

     0   :  { %s1615_s0 = inlined_call_operand.hbm [shape: f32[16,81], index: 0, kind: input, shape index: {}]   ;;  %s1616_s1 = inlined_call_operand.vmem [shape: f32[2,24,128], index: 1, kind: input, shape index: {}]   ;;  %s1617_s2 = inlined_call_operand.vmem [shape: f32[2,24,128], index: 2, kind: output, shape index: {}]  }
   0x1   :  { %1627 = sst [smem:[#allocation18_spill]] %s1615_s0 }
   0x2   :  { %1628 = sst [smem:[#allocation19_spill]] %s1616_s1 }
   0x3   :  { %1629 = sst [smem:[#allocation20_spill]] %s1617_s2 }
   0x4   :  { %7 = vsyncpa [#allocation3], 0  ;;  %s923_s9 = smov 0  }
   0x5 LB: > { %1630 = sst [smem:[#allocation5_spill]] %s883_s9  ;;  %s774_s10 = sadd.s32 4294967295, %s883_s9   ;;  %s883_s9 = sphi %s923_s9, %s13_s9  }
   0x6   : > { %p776_p0 = scmp.ge.s32.totalorder %s883_s9, 1  ;;  %p91_p1 = scmp.lt.s32.totalorder %s883_s9, 3 }
   0x7   : > { %p795_p3 = scmp.eq.s32.totalorder %s774_s10, 0  ;;  %s1632_s0 = sld [smem:[#allocation18_spill]] }
   0x8   : > { %p931_p2 = pnand %p776_p0, %p91_p1 }
   0xa   : > { %p791_p4 = pneg %p931_p2 }
   0xc   : > { %p792_p5 = pnand %p795_p3, %p791_p4 }
   0xd   : > { %s844_s14 = scalar_lea.hbm %s1632_s0, 256 }
   0xe   : > { %p845_p6 = scmp.ne.s32.totalorder %s1632_s0, %s844_s14  ;;  %p846_p7 = pneg %p792_p5 }
   0xf   : > { %p851_p10 = scmp.lt.u32.totalorder %s844_s14, %s1632_s0 }
  0x10   : > { %p847_p8 = pnand %p846_p7, %p845_p6 }
  0x12   : > { %p848_p9 = pneg %p847_p8 }
  0x14   : > { %p853_p11 = pnand %p851_p10, %p848_p9 }
  0x16   : > { %856 = shalt.err (!%p853_p11)
}
  0x17   : > { %s901_s19 = smov [#allocation2]   ;;  %s902_s20 = smov 128  }
  0x18   : > { %s903_s21 = smov 8   ;;  %125 = sbr.rel (%p931_p2) target bundleno = 342 (0x156), region = 28 }
  0x19   : > { %794 = dma.hbm_to_smem (!%p792_p5), %s1632_s0, 256, %s901_s19, [#allocation3], %s902_s20, %s902_s20, %s903_s21  }
  0x1f   : > { %878 = dma.done.wait (%p795_p3), [#allocation3], 256  }
  0x20   : > { %880 = vsyncadd (%p795_p3), [#allocation3], 4294967040 }
  0x21   : > { %131 = sfence }
  0x22   : > { %p148_p12 = scmp.lt.s32.totalorder %s774_s10, 1  ;;  %v158_v0 = vlaneseq  ;;  %s1635_s1 = sld [smem:[#allocation19_spill]] }
  0x23   : > { %s1636_s2 = sld [smem:[#allocation20_spill]]  ;;  %s993_s3 = smov 0  }
  0x24   : > { %s1674_s10 = smov (!%p148_p12, %s774_s10), 1  ;;  %v954_v1 = vand.u32 127, %v158_v0  ;;  %v161_v2 = vshrl.u32 %v158_v0, 7 }
  0x25   : > { %s786_s24 = smul.u32 24, %s1674_s10 }
  0x26   : > { %v162_v3 = vand.u32 31, %v954_v1  ;;  %vm165_vm0 = vcmp.lt.s32.totalorder %v954_v1, 96  ;;  %vm166_vm1 = vcmp.ge.s32.totalorder %v954_v1, 32  ;;  %vm167_vm2 = vcmp.lt.s32.totalorder %v161_v2, 7 }
  0x27   : > { %vm961_vm3 = vmor %vm165_vm0, %vm167_vm2  ;;  %vm169_vm4 = vcmp.gt.s32.totalorder %v161_v2, 0 }
  0x28   : > { %s152_s27 = scalar_lea.vmem %s1635_s1, %s786_s24  ;;  %vm973_vm5 = vcmp.ne.s32.totalorder %v162_v3, 31  ;;  %vm977_vm6 = vcmp.ne.s32.totalorder %v162_v3, 0  ;;  %vm983_vm7 = vmor %vm166_vm1, %vm169_vm4 }
  0x29   : > { %s971_s30 = scalar_lea.vmem %s1636_s2, %s786_s24  ;;  %v171_v8 = vld [vmem:[%s152_s27] sm:$0xff]   ;;  %v172_v9 = vld [vmem:[%s152_s27 + $0x8] sm:$0xff]   ;;  %v173_v10 = vld [vmem:[%s152_s27 + $0x10] sm:$0xff]  }
  0x2a   : > { %1637 = sst [smem:[#allocation6_spill]] %s971_s30 }
  0x2b LB: >> { %1644 = sst [smem:[#allocation7_spill]] %s899_s3  ;;  %v183_v11 = vmul.f32 0.01, %v895_v8  ;;  %v184_v12 = vmul.f32 0.01, %v891_v9  ;;  %s904_s4 = smov 32   ;;  %s899_s3 = sphi %s993_s3, %s179_s3   ;;  %v895_v8 = vphi %v171_v8, %v1670_v8   ;;  %v891_v9 = vphi %v172_v9, %v1669_v9   ;;  %v887_v10 = vphi %v173_v10, %v1668_v10  }
  0x2c   : >> { %s905_s5 = smov 96   ;;  %v185_v18 = vmul.f32 0.01, %v887_v10  ;;  %s906_s6 = smov 1  }
  0x2d   : >> { %v1010_v13 = vmax.f32 %v895_v8, %v183_v11  ;;  %v1017_v16 = vmax.f32 %v891_v9, %v184_v12  ;;  %s907_s7 = smov 127   ;;  %s1104_s8 = sshll.u32 %s899_s3, 7 }
  0x2e   : >> { %v1024_v20 = vmax.f32 %v887_v10, %v185_v18  ;;  %s214_s10 = sadd.s32 3, %s1104_s8  ;;  %s219_s11 = sadd.s32 4, %s1104_s8 }
  0x2f   : >> { %189 = vrot.lane.b32.xlu0 %v1010_v13, %s904_s4  ;;  %v191_v14 = vrot.slane %v1010_v13, 7  ;;  %298 = vrot.lane.b32.xlu1 %v1010_v13, %s905_s5  ;;  %v300_v15 = vrot.slane %v1010_v13, 1  ;;  %v358_v17 = vrot.slane %v1017_v16, 7  ;;  %v467_v19 = vrot.slane %v1017_v16, 1  ;;  %s224_s12 = sadd.s32 5, %s1104_s8  ;;  %s323_s13 = sadd.s32 21, %s1104_s8 }
  0x30   : >> { %v525_v21 = vrot.slane %v1024_v20, 7  ;;  %v634_v22 = vrot.slane %v1024_v20, 1  ;;  %s1110_s14 = sld [smem:[#allocation2 + %s214_s10]]  ;;  %s328_s18 = sadd.s32 22, %s1104_s8 }
  0x31   : >> { %s1112_s15 = sld [smem:[#allocation2 + %s219_s11]]  ;;  %s333_s19 = sadd.s32 23, %s1104_s8 }
  0x32   : >> { %s1114_s16 = sld [smem:[#allocation2 + %s224_s12]]  ;;  %s381_s20 = sadd.s32 30, %s1104_s8 }
  0x33   : >> { %192 = vrot.lane.b32.xlu0 %v191_v14, %s904_s4  ;;  %301 = vrot.lane.b32.xlu1 %v300_v15, %s905_s5  ;;  %s1116_s17 = sld [smem:[#allocation2 + %s323_s13]]  ;;  %s386_s21 = sadd.s32 31, %s1104_s8 }
  0x34   : >> { %s391_s22 = sadd.s32 32, %s1104_s8  ;;  %s1123_s23 = sld [smem:[#allocation2 + %s328_s18]] }
  0x35   : >> { %s490_s24 = sadd.s32 48, %s1104_s8  ;;  %s1126_s25 = sld [smem:[#allocation2 + %s333_s19]] }
  0x36   : >> { %s1128_s26 = sld [smem:[#allocation2 + %s381_s20]]  ;;  %s558_s10 = sadd.s32 59, %s1104_s8  ;;  %v216_v47 = vstv %s1110_s14 }
  0x37   : >> { %356 = vrot.lane.b32.xlu0 %v1017_v16, %s904_s4  ;;  %359 = vrot.lane.b32.xlu1 %v358_v17, %s904_s4  ;;  %s1130_s27 = sld [smem:[#allocation2 + %s386_s21]]  ;;  %s204_s12 = sadd.s32 1, %s1104_s8  ;;  %v221_v48 = vstv %s1112_s15 }
  0x38   : >> { %s1132_s28 = sld [smem:[#allocation2 + %s391_s22]]  ;;  %s242_s0 = sadd.s32 8, %s1104_s8  ;;  %v226_v49 = vstv %s1114_s16 }
  0x39   : >> { %s1134_s29 = sld [smem:[#allocation2 + %s490_s24]]  ;;  %s209_s24 = sadd.s32 2, %s1104_s8  ;;  %v325_v50 = vstv %s1116_s17 }
  0x3a   : >> { %s1150_s20 = sld [smem:[#allocation2 + %s558_s10]]  ;;  %s255_s1 = sadd.s32 10, %s1104_s8  ;;  %v330_v51 = vstv %s1123_s23 }
  0x3b   : >> { %465 = vrot.lane.b32.xlu0 %v1017_v16, %s905_s5  ;;  %468 = vrot.lane.b32.xlu1 %v467_v19, %s905_s5  ;;  %s1153_s21 = sld [smem:[#allocation2 + %s1104_s8]]  ;;  %s260_s3 = sadd.s32 11, %s1104_s8  ;;  %v335_v52 = vstv %s1126_s25 }
  0x3c   : >> { %s1155_s22 = sld [smem:[#allocation2 + %s204_s12]]  ;;  %v383_v53 = vstv %s1128_s26  ;;  %s351_s23 = sadd.s32 26, %s1104_s8 }
  0x3d   : >> { %s1169_s9 = sld [smem:[#allocation2 + %s242_s0]]  ;;  %v388_v54 = vstv %s1130_s27 }
  0x3e   : >> { %s1173_s30 = sld [smem:[#allocation2 + %s255_s1]]  ;;  %v393_v55 = vstv %s1132_s28 }
  0x3f   : >> { %523 = vrot.lane.b32.xlu0 %v1024_v20, %s904_s4  ;;  %526 = vrot.lane.b32.xlu1 %v525_v21, %s904_s4  ;;  %s495_s4 = sadd.s32 49, %s1104_s8  ;;  %v492_v56 = vstv %s1134_s29  ;;  %s1238_s27 = sld [smem:[#allocation2 + %s351_s23]] }
  0x40   : >> { %s1141_s11 = sld [smem:[#allocation2 + %s495_s4]]  ;;  %s232_s4 = sadd.s32 6, %s1104_s8  ;;  %v560_v61 = vstv %s1150_s20 }
  0x41   : >> { %1645 = sst [smem:[#allocation8_spill]] %s1153_s21  ;;  %s313_s21 = sadd.s32 19, %s1104_s8 }
  0x42   : >> { %1646 = sst [smem:[#allocation9_spill]] %s1155_s22  ;;  %s265_s22 = sadd.s32 12, %s1104_s8 }
  0x43   : >> { %632 = vrot.lane.b32.xlu0 %v1024_v20, %s905_s5  ;;  %635 = vrot.lane.b32.xlu1 %v634_v22, %s905_s5  ;;  %s500_s5 = sadd.s32 50, %s1104_s8  ;;  %s1165_s2 = sld [smem:[#allocation2 + %s232_s4]] }
  0x44   : >> { %s1144_s13 = sld [smem:[#allocation2 + %s500_s5]]  ;;  %s237_s5 = sadd.s32 7, %s1104_s8 }
  0x45   : >> { %s1167_s10 = sld [smem:[#allocation2 + %s237_s5]]  ;;  %s283_s4 = sadd.s32 15, %s1104_s8 }
  0x46   : >> { %1650 = sst [smem:[#allocation13_spill]] %s1169_s9  ;;  %s288_s5 = sadd.s32 16, %s1104_s8  ;;  %v497_v57 = vstv %s1141_s11 }
  0x47   : >> { %1652 = sst [smem:[#allocation15_spill]] %s1173_s30  ;;  %s293_s9 = sadd.s32 17, %s1104_s8 }
  0x48   : >> { %s1183_s0 = sld [smem:[#allocation2 + %s265_s22]]  ;;  %s346_s22 = sadd.s32 25, %s1104_s8 }
  0x49   : >> { %1648 = sst [smem:[#allocation11_spill]] %s1165_s2  ;;  %s308_s2 = sadd.s32 18, %s1104_s8 }
  0x4a   : >> { %s1189_s30 = sld [smem:[#allocation2 + %s283_s4]]  ;;  %v502_v58 = vstv %s1144_s13  ;;  %s399_s13 = sadd.s32 33, %s1104_s8 }
  0x4b   : >> { %1649 = sst [smem:[#allocation12_spill]] %s1167_s10  ;;  %s1657_s15 = sld [smem:[#allocation9_spill]] }
  0x4c   : >> { %s1181_s10 = sld [smem:[#allocation2 + %s260_s3]]  ;;  %s318_s3 = sadd.s32 20, %s1104_s8 }
  0x4d   : >> { %s1206_s4 = sld [smem:[#allocation2 + %s313_s21]] }
  0x4e   : >> { %s1216_s14 = sld [smem:[#allocation2 + %s346_s22]]  ;;  %v267_v63 = vstv %s1183_s0 }
  0x4f   : >> { %s1659_s21 = sld [smem:[#allocation11_spill]]  ;;  %s1660_s17 = sld [smem:[#allocation12_spill]]  ;;  %v1252_v22 = vmul.f32 %v267_v63, %v1010_v13 }
  0x50   : >> { %s1661_s25 = sld [smem:[#allocation13_spill]] }
  0x51   : >> { %v206_v3 = vstv %s1657_s15  ;;  %s422_s15 = sadd.s32 37, %s1104_s8 }
  0x52   : >> { %1653 = sst [smem:[#allocation16_spill]] %s1181_s10  ;;  %s341_s10 = sadd.s32 24, %s1104_s8 }
  0x53   : >> { %s1664_s22 = sld [smem:[#allocation16_spill]] }
  0x54   : >> { %1656 = sst [smem:[#allocation17_spill]] %s1216_s14  ;;  %s371_s14 = sadd.s32 28, %s1104_s8 }
  0x55   : >> { %v234_v12 = vstv %s1659_s21  ;;  %v239_v14 = vstv %s1660_s17  ;;  %s1246_s29 = sld [smem:[#allocation2 + %s371_s14]] }
  0x56   : >> { %v244_v15 = vstv %s1661_s25  ;;  %s1292_s14 = sld [smem:[#allocation2 + %s399_s13]]  ;;  %s432_s13 = sadd.s32 39, %s1104_s8 }
  0x57   : >> { %s1319_s25 = sld [smem:[#allocation2 + %s422_s15]]  ;;  %s450_s15 = sadd.s32 42, %s1104_s8 }
  0x58   : >> { %s1337_s17 = sld [smem:[#allocation2 + %s432_s13]] }
  0x59   : >> { %v262_v19 = vstv %s1664_s22  ;;  %s1372_s20 = sld [smem:[#allocation2 + %s450_s15]] }
  0xa1   : >> { %v190_v23 = vpop.permute.xlu0 %189  ;;  %v299_v24 = vpop.permute.xlu1 %298 }
  0xa5   : >> { %v193_v25 = vpop.permute.xlu0 %192  ;;  %v302_v28 = vpop.permute.xlu1 %301 }
  0xa6   : >> { %v194_v26 = vsel %vm166_vm1, %v190_v23, %v193_v25  ;;  %v303_v29 = vsel %vm165_vm0, %v299_v24, %v302_v28 }
  0xa7   : >> { %v1035_v27 = vsel %vm983_vm7, %v194_v26, 0.0  ;;  %v1049_v32 = vsel %vm961_vm3, %v303_v29, 0.0  ;;  %v285_v29 = vstv %s1189_s30  ;;  %s480_s30 = sadd.s32 46, %s1104_s8 }
  0xa8   : >> { %196 = vrot.lane.b32.xlu0 %v1035_v27, %s906_s6  ;;  %229 = vrot.lane.b32.xlu1 %v1035_v27, %s907_s7  ;;  %v217_v21 = vmul.f32 %v216_v47, %v1035_v27  ;;  %v222_v25 = vmul.f32 %v221_v48, %v1035_v27  ;;  %v227_v26 = vmul.f32 %v226_v49, %v1035_v27 }
  0xa9   : >> { %v357_v30 = vpop.permute.xlu0 %356  ;;  %v360_v31 = vpop.permute.xlu1 %359  ;;  %v1263_v28 = vmul.f32 %v325_v50, %v1049_v32 }
  0xaa   : >> { %v361_v33 = vsel %vm166_vm1, %v357_v30, %v360_v31  ;;  %v1268_v30 = vmul.f32 %v330_v51, %v1049_v32 }
  0xab   : >> { %v1059_v34 = vsel %vm983_vm7, %v361_v33, 0.0 }
  0xac   : >> { %247 = vrot.lane.b32.xlu0 %v1010_v13, %s906_s6  ;;  %280 = vrot.lane.b32.xlu1 %v1010_v13, %s907_s7  ;;  %v1278_v27 = vmul.f32 %v383_v53, %v1059_v34  ;;  %v353_v53 = vstv %s1238_s27 }
  0xad   : >> { %v466_v35 = vpop.permute.xlu0 %465  ;;  %v469_v36 = vpop.permute.xlu1 %468 }
  0xae   : >> { %v470_v37 = vsel %vm165_vm0, %v466_v35, %v469_v36  ;;  %v1281_v35 = vmul.f32 %v388_v54, %v1059_v34  ;;  %v1284_v36 = vmul.f32 %v393_v55, %v1059_v34  ;;  %v373_v55 = vstv %s1246_s29 }
  0xaf   : >> { %v1073_v40 = vsel %vm961_vm3, %v470_v37, 0.0 }
  0xb0   : >> { %305 = vrot.lane.b32.xlu0 %v1049_v32, %s906_s6  ;;  %338 = vrot.lane.b32.xlu1 %v1049_v32, %s907_s7  ;;  %v1310_v49 = vmul.f32 %v502_v58, %v1073_v40 }
  0xb1   : >> { %v524_v38 = vpop.permute.xlu0 %523  ;;  %v527_v39 = vpop.permute.xlu1 %526 }
  0xb2   : >> { %v528_v41 = vsel %vm166_vm1, %v524_v38, %v527_v39 }
  0xb3   : >> { %v1083_v42 = vsel %vm983_vm7, %v528_v41, 0.0 }
  0xb4   : >> { %363 = vrot.lane.b32.xlu0 %v1059_v34, %s906_s6  ;;  %396 = vrot.lane.b32.xlu1 %v1059_v34, %s907_s7  ;;  %v1299_v34 = vmul.f32 %v497_v57, %v1073_v40 }
  0xb5   : >> { %v633_v43 = vpop.permute.xlu0 %632  ;;  %v636_v44 = vpop.permute.xlu1 %635 }
  0xb6   : >> { %v637_v45 = vsel %vm165_vm0, %v633_v43, %v636_v44 }
  0xb7   : >> { %v1097_v46 = vsel %vm961_vm3, %v637_v45, 0.0  ;;  %v1296_v45 = vmul.f32 %v492_v56, %v1073_v40 }
  0xb8   : >> { %414 = vrot.lane.b32.xlu0 %v1017_v16, %s906_s6  ;;  %447 = vrot.lane.b32.xlu1 %v1017_v16, %s907_s7 }
  0xbc   : >> { %472 = vrot.lane.b32.xlu0 %v1073_v40, %s906_s6  ;;  %505 = vrot.lane.b32.xlu1 %v1073_v40, %s907_s7 }
  0xc0   : >> { %563 = vrot.lane.b32.xlu1 %v1083_v42, %s907_s7  ;;  %530 = vrot.lane.b32.xlu0 %v1083_v42, %s906_s6 }
  0xc4   : >> { %581 = vrot.lane.b32.xlu0 %v1024_v20, %s906_s6  ;;  %614 = vrot.lane.b32.xlu1 %v1024_v20, %s907_s7 }
  0xc8   : >> { %672 = vrot.lane.b32.xlu1 %v1097_v46, %s907_s7  ;;  %639 = vrot.lane.b32.xlu0 %v1097_v46, %s906_s6  ;;  %s548_s6 = sadd.s32 57, %s1104_s8  ;;  %s553_s7 = sadd.s32 58, %s1104_s8 }
  0xc9   : >> { %s1146_s18 = sld [smem:[#allocation2 + %s548_s6]]  ;;  %s250_s6 = sadd.s32 9, %s1104_s8 }
  0xca   : >> { %s1148_s19 = sld [smem:[#allocation2 + %s553_s7]] }
  0xcb   : >> { %s1163_s7 = sld [smem:[#allocation2 + %s209_s24]]  ;;  %s270_s24 = sadd.s32 13, %s1104_s8 }
  0xcc   : >> { %s1171_s12 = sld [smem:[#allocation2 + %s250_s6]] }
  0xcd   : >> { %s1185_s6 = sld [smem:[#allocation2 + %s270_s24]] }
  0xce   : >> { %s1199_s24 = sld [smem:[#allocation2 + %s293_s9]] }
  0xcf   : >> { %s1214_s9 = sld [smem:[#allocation2 + %s341_s10]]  ;;  %v550_v59 = vstv %s1146_s18  ;;  %s455_s18 = sadd.s32 43, %s1104_s8 }
  0xd0   : >> { %v555_v60 = vstv %s1148_s19  ;;  %s1663_s10 = sld [smem:[#allocation15_spill]]  ;;  %s460_s19 = sadd.s32 44, %s1104_s8 }
  0xd1   : >> { %1647 = sst [smem:[#allocation10_spill]] %s1163_s7  ;;  %s275_s7 = sadd.s32 14, %s1104_s8 }
  0xd2   : >> { %1651 = sst [smem:[#allocation14_spill]] %s1171_s12  ;;  %s1658_s16 = sld [smem:[#allocation10_spill]] }
  0xd3   : >> { %s1187_s1 = sld [smem:[#allocation2 + %s275_s7]]  ;;  %v272_v0 = vstv %s1185_s6 }
  0xd4   : >> { %s1191_s12 = sld [smem:[#allocation2 + %s288_s5]]  ;;  %v1255_v23 = vmul.f32 %v272_v0, %v1010_v13  ;;  %v295_v33 = vstv %s1199_s24 }
  0xd5   : >> { %s1201_s7 = sld [smem:[#allocation2 + %s308_s2]] }
  0xd6   : >> { %s1208_s5 = sld [smem:[#allocation2 + %s318_s3]]  ;;  %s366_s3 = sadd.s32 27, %s1104_s8  ;;  %v257_v18 = vstv %s1663_s10 }
  0xd7   : >> { %s1654_s2 = sld [smem:[#allocation8_spill]]  ;;  %s1662_s26 = sld [smem:[#allocation14_spill]] }
  0xd8   : >> { %1655 = sst [smem:[#allocation8_spill]] %s1214_s9  ;;  %s376_s9 = sadd.s32 29, %s1104_s8  ;;  %v211_v11 = vstv %s1658_s16 }
  0xd9   : >> { %v277_v2 = vstv %s1187_s1  ;;  %s1240_s28 = sld [smem:[#allocation2 + %s366_s3]]  ;;  %s404_s1 = sadd.s32 34, %s1104_s8 }
  0xda   : >> { %s1248_s11 = sld [smem:[#allocation2 + %s376_s9]]  ;;  %v1258_v24 = vmul.f32 %v277_v2, %v1010_v13  ;;  %v1271_v13 = vmul.f32 %v335_v52, %v1049_v32  ;;  %v290_v31 = vstv %s1191_s12  ;;  %s417_s9 = sadd.s32 36, %s1104_s8  ;;  %v315_v32 = vstv %s1206_s4 }
  0xdb   : >> { %s1665_s0 = sld [smem:[#allocation8_spill]]  ;;  %s1666_s6 = sld [smem:[#allocation17_spill]]  ;;  %v310_v37 = vstv %s1201_s7 }
  0xdc   : >> { %v320_v41 = vstv %s1208_s5  ;;  %s1305_s16 = sld [smem:[#allocation2 + %s404_s1]]  ;;  %s427_s3 = sadd.s32 38, %s1104_s8 }
  0xdd   : >> { %v201_v62 = vstv %s1654_s2  ;;  %v252_v17 = vstv %s1662_s26  ;;  %s409_s2 = sadd.s32 35, %s1104_s8  ;;  %s1312_s23 = sld [smem:[#allocation2 + %s417_s9]] }
  0xde   : >> { %s1307_s21 = sld [smem:[#allocation2 + %s409_s2]]  ;;  %s437_s1 = sadd.s32 40, %s1104_s8 }
  0xdf   : >> { %v368_v54 = vstv %s1240_s28  ;;  %s442_s2 = sadd.s32 41, %s1104_s8  ;;  %s1333_s9 = sld [smem:[#allocation2 + %s427_s3]] }
  0xe0   : >> { %v378_v56 = vstv %s1248_s11  ;;  %s1354_s26 = sld [smem:[#allocation2 + %s437_s1]]  ;;  %s475_s10 = sadd.s32 45, %s1104_s8 }
  0xe1   : >> { %v343_v43 = vstv %s1665_s0  ;;  %v348_v44 = vstv %s1666_s6  ;;  %s1356_s3 = sld [smem:[#allocation2 + %s442_s2]]  ;;  %s485_s12 = sadd.s32 47, %s1104_s8 }
  0xe2   : >> { %s1383_s24 = sld [smem:[#allocation2 + %s455_s18]]  ;;  %s508_s1 = sadd.s32 51, %s1104_s8 }
  0xe3   : >> { %s1385_s22 = sld [smem:[#allocation2 + %s460_s19]]  ;;  %s513_s7 = sadd.s32 52, %s1104_s8 }
  0xe4   : >> { %s1392_s13 = sld [smem:[#allocation2 + %s475_s10]]  ;;  %s518_s4 = sadd.s32 53, %s1104_s8 }
  0xe5   : >> { %s1402_s2 = sld [smem:[#allocation2 + %s480_s30]]  ;;  %s533_s18 = sadd.s32 54, %s1104_s8 }
  0xe6   : >> { %s1404_s15 = sld [smem:[#allocation2 + %s485_s12]]  ;;  %s538_s19 = sadd.s32 55, %s1104_s8 }
  0xe7   : >> { %s1415_s5 = sld [smem:[#allocation2 + %s508_s1]]  ;;  %s543_s10 = sadd.s32 56, %s1104_s8 }
  0xe8   : >> { %s1430_s0 = sld [smem:[#allocation2 + %s513_s7]]  ;;  %s566_s28 = sadd.s32 60, %s1104_s8 }
  0xe9   : >> { %s1439_s27 = sld [smem:[#allocation2 + %s533_s18]]  ;;  %s571_s6 = sadd.s32 61, %s1104_s8 }
  0xea   : >> { %s1452_s29 = sld [smem:[#allocation2 + %s538_s19]]  ;;  %s599_s30 = sadd.s32 66, %s1104_s8 }
  0xeb   : >> { %s1454_s11 = sld [smem:[#allocation2 + %s543_s10]]  ;;  %s604_s12 = sadd.s32 67, %s1104_s8 }
  0xec   : >> { %s627_s18 = sadd.s32 71, %s1104_s8  ;;  %s642_s19 = sadd.s32 72, %s1104_s8 }
  0xed   : >> { %s647_s10 = sadd.s32 73, %s1104_s8 }
 0x11a   : >> { %v197_v38 = vpop.permute.xlu0 %196  ;;  %v230_v39 = vpop.permute.xlu1 %229 }
 0x11b   : >> { %v198_v47 = vsel %vm977_vm6, %v197_v38, 0.0  ;;  %v231_v48 = vsel %vm973_vm5, %v230_v39, 0.0 }
 0x11c   : >> { %v202_v50 = vmul.f32 %v201_v62, %v198_v47  ;;  %v207_v51 = vmul.f32 %v206_v3, %v198_v47  ;;  %v212_v52 = vmul.f32 %v211_v11, %v198_v47  ;;  %v235_v62 = vmul.f32 %v234_v12, %v231_v48 }
 0x11d   : >> { %v240_v2 = vmul.f32 %v239_v14, %v231_v48  ;;  %v245_v3 = vmul.f32 %v244_v15, %v231_v48  ;;  %v1343_v14 = vmul.f32 %v550_v59, %v1083_v42  ;;  %v1348_v15 = vmul.f32 %v555_v60, %v1083_v42 }
 0x11e   : >> { %v203_v57 = vadd.f32 %v895_v8, %v202_v50  ;;  %v208_v40 = vadd.f32 %v891_v9, %v207_v51  ;;  %v213_v58 = vadd.f32 %v887_v10, %v212_v52  ;;  %v248_v63 = vpop.permute.xlu0 %247  ;;  %v281_v0 = vpop.permute.xlu1 %280 }
 0x11f   : >> { %v249_v8 = vsel %vm977_vm6, %v248_v63, 0.0  ;;  %v282_v9 = vsel %vm973_vm5, %v281_v0, 0.0 }
 0x120   : >> { %v218_v10 = vadd.f32 %v217_v21, %v203_v57  ;;  %v223_v11 = vadd.f32 %v222_v25, %v208_v40  ;;  %v228_v12 = vadd.f32 %v227_v26, %v213_v58  ;;  %v253_v38 = vmul.f32 %v252_v17, %v249_v8 }
 0x121   : >> { %v258_v21 = vmul.f32 %v257_v18, %v249_v8  ;;  %v263_v25 = vmul.f32 %v262_v19, %v249_v8  ;;  %v1361_v17 = vmul.f32 %v560_v61, %v1083_v42  ;;  %v286_v18 = vmul.f32 %v285_v29, %v282_v9 }
 0x122   : >> { %v236_v59 = vadd.f32 %v235_v62, %v218_v10  ;;  %v241_v26 = vadd.f32 %v240_v2, %v223_v11  ;;  %v246_v39 = vadd.f32 %v245_v3, %v228_v12  ;;  %v306_v60 = vpop.permute.xlu0 %305  ;;  %v291_v19 = vmul.f32 %v290_v31, %v282_v9  ;;  %v339_v42 = vpop.permute.xlu1 %338 }
 0x123   : >> { %v296_v47 = vmul.f32 %v295_v33, %v282_v9  ;;  %v401_v61 = vstv %s1292_s14  ;;  %v307_v52 = vsel %vm977_vm6, %v306_v60, 0.0  ;;  %v406_v29 = vstv %s1305_s16  ;;  %s1480_s14 = sld [smem:[#allocation2 + %s571_s6]]  ;;  %s667_s6 = sadd.s32 77, %s1104_s8 }
 0x124   : >> { %v254_v48 = vadd.f32 %v253_v38, %v236_v59  ;;  %v259_v50 = vadd.f32 %v258_v21, %v241_v26  ;;  %v264_v51 = vadd.f32 %v263_v25, %v246_v39  ;;  %v411_v31 = vstv %s1307_s21 }
 0x125   : >> { %v419_v33 = vstv %s1312_s23  ;;  %v424_v57 = vstv %s1319_s25  ;;  %v340_v63 = vsel %vm973_vm5, %v339_v42, 0.0  ;;  %v311_v2 = vmul.f32 %v310_v37, %v307_v52  ;;  %s589_s23 = sadd.s32 64, %s1104_s8  ;;  %s1496_s25 = sld [smem:[#allocation2 + %s599_s30]] }
 0x126   : >> { %v269_v40 = vadd.f32 %v1252_v22, %v254_v48  ;;  %v274_v58 = vadd.f32 %v1255_v23, %v259_v50  ;;  %v279_v62 = vadd.f32 %v1258_v24, %v264_v51  ;;  %v364_v0 = vpop.permute.xlu0 %363  ;;  %v316_v22 = vmul.f32 %v315_v32, %v307_v52  ;;  %v397_v10 = vpop.permute.xlu1 %396  ;;  %s1507_s1 = sld [smem:[#allocation2 + %s589_s23]] }
 0x127   : >> { %v321_v23 = vmul.f32 %v320_v41, %v307_v52  ;;  %v429_v24 = vstv %s1333_s9  ;;  %v365_v37 = vsel %vm977_vm6, %v364_v0, 0.0  ;;  %v344_v32 = vmul.f32 %v343_v43, %v340_v63  ;;  %s594_s9 = sadd.s32 65, %s1104_s8 }
 0x128   : >> { %v287_v3 = vadd.f32 %v286_v18, %v269_v40  ;;  %v292_v8 = vadd.f32 %v291_v19, %v274_v58  ;;  %v297_v9 = vadd.f32 %v296_v47, %v279_v62  ;;  %v434_v41 = vstv %s1337_s17  ;;  %s1432_s17 = sld [smem:[#allocation2 + %s518_s4]] }
 0x129   : >> { %v439_v11 = vstv %s1354_s26  ;;  %v444_v12 = vstv %s1356_s3  ;;  %v349_v59 = vmul.f32 %v348_v44, %v340_v63  ;;  %v354_v26 = vmul.f32 %v353_v53, %v340_v63  ;;  %s576_s26 = sadd.s32 62, %s1104_s8  ;;  %s1465_s3 = sld [smem:[#allocation2 + %s566_s28]] }
 0x12a   : >> { %v312_v38 = vadd.f32 %v311_v2, %v287_v3  ;;  %v317_v21 = vadd.f32 %v316_v22, %v292_v8  ;;  %v322_v25 = vadd.f32 %v321_v23, %v297_v9  ;;  %v369_v43 = vmul.f32 %v368_v54, %v365_v37  ;;  %v415_v18 = vpop.permute.xlu0 %414  ;;  %v448_v50 = vpop.permute.xlu1 %447  ;;  %s1482_s16 = sld [smem:[#allocation2 + %s576_s26]] }
 0x12b   : >> { %v374_v39 = vmul.f32 %v373_v55, %v365_v37  ;;  %v398_v60 = vsel %vm973_vm5, %v397_v10, 0.0  ;;  %v379_v54 = vmul.f32 %v378_v56, %v365_v37  ;;  %v1443_v55 = vmul.f32 %v434_v41, %v1017_v16  ;;  %s1543_s28 = sld [smem:[#allocation2 + %s647_s10]] }
 0x12c   : >> { %v327_v19 = vadd.f32 %v1263_v28, %v312_v38  ;;  %v332_v44 = vadd.f32 %v1268_v30, %v317_v21  ;;  %v337_v53 = vadd.f32 %v1271_v13, %v322_v25  ;;  %v1446_v28 = vmul.f32 %v439_v11, %v1017_v16 }
 0x12d   : >> { %v1449_v30 = vmul.f32 %v444_v12, %v1017_v16  ;;  %v452_v13 = vstv %s1372_s20  ;;  %v416_v48 = vsel %vm977_vm6, %v415_v18, 0.0  ;;  %v402_v16 = vmul.f32 %v401_v61, %v398_v60  ;;  %s584_s20 = sadd.s32 63, %s1104_s8 }
 0x12e   : >> { %v345_v56 = vadd.f32 %v344_v32, %v327_v19  ;;  %v350_v47 = vadd.f32 %v349_v59, %v332_v44  ;;  %v355_v42 = vadd.f32 %v354_v26, %v337_v53  ;;  %v457_v51 = vstv %s1383_s24  ;;  %v473_v3 = vpop.permute.xlu0 %472  ;;  %s1489_s21 = sld [smem:[#allocation2 + %s584_s20]]  ;;  %v506_v32 = vpop.permute.xlu1 %505  ;;  %s680_s20 = sadd.s32 79, %s1104_s8 }
 0x12f   : >> { %v462_v52 = vstv %s1385_s22  ;;  %v477_v40 = vstv %s1392_s13  ;;  %v407_v0 = vmul.f32 %v406_v29, %v398_v60  ;;  %v412_v61 = vmul.f32 %v411_v31, %v398_v60  ;;  %s1498_s24 = sld [smem:[#allocation2 + %s604_s12]]  ;;  %s609_s22 = sadd.s32 68, %s1104_s8 }
 0x130   : >> { %v370_v58 = vadd.f32 %v369_v43, %v345_v56  ;;  %v375_v62 = vadd.f32 %v374_v39, %v350_v47  ;;  %v380_v63 = vadd.f32 %v379_v54, %v355_v42  ;;  %v420_v2 = vmul.f32 %v419_v33, %v416_v48  ;;  %s617_s13 = sadd.s32 69, %s1104_s8  ;;  %s1515_s7 = sld [smem:[#allocation2 + %s609_s22]] }
 0x131   : >> { %v425_v22 = vmul.f32 %v424_v57, %v416_v48  ;;  %v449_v23 = vsel %vm973_vm5, %v448_v50, 0.0  ;;  %v430_v33 = vmul.f32 %v429_v24, %v416_v48  ;;  %v482_v57 = vstv %s1402_s2  ;;  %s622_s2 = sadd.s32 70, %s1104_s8  ;;  %s1520_s4 = sld [smem:[#allocation2 + %s617_s13]] }
 0x132   : >> { %v385_v29 = vadd.f32 %v1278_v27, %v370_v58  ;;  %v390_v8 = vadd.f32 %v1281_v35, %v375_v62  ;;  %v395_v31 = vadd.f32 %v1284_v36, %v380_v63  ;;  %v487_v9 = vstv %s1404_s15  ;;  %v531_v19 = vpop.permute.xlu0 %530  ;;  %s1513_s15 = sld [smem:[#allocation2 + %s594_s9]] }
 0x133   : >> { %v510_v37 = vstv %s1415_s5  ;;  %v515_v10 = vstv %s1430_s0  ;;  %v474_v24 = vsel %vm977_vm6, %v473_v3, 0.0  ;;  %v453_v41 = vmul.f32 %v452_v13, %v449_v23  ;;  %s1526_s5 = sld [smem:[#allocation2 + %s622_s2]] }
 0x134   : >> { %v403_v27 = vadd.f32 %v402_v16, %v385_v29  ;;  %v408_v35 = vadd.f32 %v407_v0, %v390_v8  ;;  %v413_v36 = vadd.f32 %v412_v61, %v395_v31  ;;  %v458_v11 = vmul.f32 %v457_v51, %v449_v23  ;;  %v564_v16 = vpop.permute.xlu1 %563  ;;  %s1536_s0 = sld [smem:[#allocation2 + %s627_s18]] }
 0x135   : >> { %v520_v12 = vstv %s1432_s17  ;;  %v535_v38 = vstv %s1439_s27  ;;  %v463_v26 = vmul.f32 %v462_v52, %v449_v23  ;;  %v478_v43 = vmul.f32 %v477_v40, %v474_v24  ;;  %s652_s17 = sadd.s32 74, %s1104_s8  ;;  %s1541_s27 = sld [smem:[#allocation2 + %s642_s19]] }
 0x136   : >> { %v421_v21 = vadd.f32 %v420_v2, %v403_v27  ;;  %v426_v25 = vadd.f32 %v425_v22, %v408_v35  ;;  %v431_v59 = vadd.f32 %v430_v33, %v413_v36  ;;  %v483_v39 = vmul.f32 %v482_v57, %v474_v24  ;;  %v582_v29 = vpop.permute.xlu0 %581  ;;  %s1555_s26 = sld [smem:[#allocation2 + %s652_s17]] }
 0x137   : >> { %v507_v60 = vsel %vm973_vm5, %v506_v32, 0.0  ;;  %v540_v18 = vstv %s1452_s29  ;;  %v488_v13 = vmul.f32 %v487_v9, %v474_v24  ;;  %v545_v56 = vstv %s1454_s11  ;;  %s657_s29 = sadd.s32 75, %s1104_s8  ;;  %s662_s11 = sadd.s32 76, %s1104_s8 }
 0x138   : >> { %v436_v44 = vadd.f32 %v1443_v55, %v421_v21  ;;  %v441_v53 = vadd.f32 %v1446_v28, %v426_v25  ;;  %v446_v54 = vadd.f32 %v1449_v30, %v431_v59  ;;  %v568_v47 = vstv %s1465_s3  ;;  %s675_s3 = sadd.s32 78, %s1104_s8  ;;  %s1561_s30 = sld [smem:[#allocation2 + %s657_s29]]  ;;  %v615_v25 = vpop.permute.xlu1 %614 }
 0x139   : >> { %v573_v42 = vstv %s1480_s14  ;;  %v578_v48 = vstv %s1482_s16  ;;  %v532_v30 = vsel %vm977_vm6, %v531_v19, 0.0  ;;  %v511_v51 = vmul.f32 %v510_v37, %v507_v60  ;;  %s1563_s12 = sld [smem:[#allocation2 + %s662_s11]]  ;;  %s685_s16 = sadd.s32 80, %s1104_s8 }
 0x13a   : >> { %v454_v55 = vadd.f32 %v453_v41, %v436_v44  ;;  %v459_v50 = vadd.f32 %v458_v11, %v441_v53  ;;  %v464_v28 = vadd.f32 %v463_v26, %v446_v54  ;;  %v586_v52 = vstv %s1489_s21  ;;  %s1568_s14 = sld [smem:[#allocation2 + %s667_s6]] }
 0x13b   : >> { %v601_v40 = vstv %s1496_s25  ;;  %v606_v58 = vstv %s1498_s24  ;;  %v516_v61 = vmul.f32 %v515_v10, %v507_v60  ;;  %v521_v2 = vmul.f32 %v520_v12, %v507_v60  ;;  %v640_v60 = vpop.permute.xlu0 %639  ;;  %s1573_s21 = sld [smem:[#allocation2 + %s675_s3]] }
 0x13c   : >> { %v479_v62 = vadd.f32 %v478_v43, %v454_v55  ;;  %v484_v63 = vadd.f32 %v483_v39, %v459_v50  ;;  %v489_v0 = vadd.f32 %v488_v13, %v464_v28  ;;  %v536_v22 = vmul.f32 %v535_v38, %v532_v30  ;;  %s1575_s23 = sld [smem:[#allocation2 + %s680_s20]] }
 0x13d   : >> { %v541_v23 = vmul.f32 %v540_v18, %v532_v30  ;;  %v565_v3 = vsel %vm973_vm5, %v564_v16, 0.0  ;;  %v546_v57 = vmul.f32 %v545_v56, %v532_v30  ;;  %v591_v9 = vstv %s1507_s1  ;;  %s1584_s8 = sld [smem:[#allocation2 + %s685_s16]] }
 0x13e   : >> { %v494_v8 = vadd.f32 %v1296_v45, %v479_v62  ;;  %v499_v31 = vadd.f32 %v1299_v34, %v484_v63  ;;  %v504_v33 = vadd.f32 %v1310_v49, %v489_v0  ;;  %v596_v37 = vstv %s1513_s15  ;;  %v673_v62 = vpop.permute.xlu1 %672  ;;  %s1667_s25 = sld [smem:[#allocation7_spill]] }
 0x13f   : >> { %v602_v10 = vmul.f32 %v601_v40, %v1024_v20  ;;  %v611_v27 = vstv %s1515_s7  ;;  %v583_v45 = vsel %vm977_vm6, %v582_v29, 0.0  ;;  %v569_v34 = vmul.f32 %v568_v47, %v565_v3 }
 0x140   : >> { %v512_v35 = vadd.f32 %v511_v51, %v494_v8  ;;  %v517_v36 = vadd.f32 %v516_v61, %v499_v31  ;;  %v522_v24 = vadd.f32 %v521_v2, %v504_v33  ;;  %v607_v49 = vmul.f32 %v606_v58, %v1024_v20 }
 0x141   : >> { %v619_v32 = vstv %s1520_s4  ;;  %v624_v41 = vstv %s1526_s5  ;;  %v574_v21 = vmul.f32 %v573_v42, %v565_v3  ;;  %v579_v59 = vmul.f32 %v578_v48, %v565_v3 }
 0x142   : >> { %v537_v11 = vadd.f32 %v536_v22, %v512_v35  ;;  %v542_v12 = vadd.f32 %v541_v23, %v517_v36  ;;  %v547_v38 = vadd.f32 %v546_v57, %v522_v24  ;;  %v587_v26 = vmul.f32 %v586_v52, %v583_v45 }
 0x143   : >> { %v592_v43 = vmul.f32 %v591_v9, %v583_v45  ;;  %v616_v39 = vsel %vm973_vm5, %v615_v25, 0.0  ;;  %v597_v53 = vmul.f32 %v596_v37, %v583_v45  ;;  %v612_v54 = vmul.f32 %v611_v27, %v1024_v20 }
 0x144   : >> { %v552_v18 = vadd.f32 %v1343_v14, %v537_v11  ;;  %v557_v19 = vadd.f32 %v1348_v15, %v542_v12  ;;  %v562_v44 = vadd.f32 %v1361_v17, %v547_v38  ;;  %v629_v13 = vstv %s1536_s0  ;;  %s179_s3 = sadd.s32 1, %s1667_s25  }
 0x145   : >> { %v644_v56 = vstv %s1541_s27  ;;  %v649_v47 = vstv %s1543_s28  ;;  %v641_v14 = vsel %vm977_vm6, %v640_v60, 0.0  ;;  %v620_v50 = vmul.f32 %v619_v32, %v616_v39  ;;  %p176_p13 = scmp.ge.s32.totalorder %s179_s3, 16  }
 0x146   : >> { %v570_v42 = vadd.f32 %v569_v34, %v552_v18  ;;  %v575_v48 = vadd.f32 %v574_v21, %v557_v19  ;;  %v580_v55 = vadd.f32 %v579_v59, %v562_v44  ;;  %v625_v15 = vmul.f32 %v624_v41, %v616_v39  ;;  %s1671_s24 = sld [smem:[#allocation6_spill]] (%p176_p13) }
 0x147   : >> { %v654_v17 = vstv %s1555_s26  ;;  %v630_v16 = vmul.f32 %v629_v13, %v616_v39  ;;  %v659_v51 = vstv %s1561_s30  ;;  %v664_v52 = vstv %s1563_s12 }
 0x148   : >> { %v588_v20 = vadd.f32 %v587_v26, %v570_v42  ;;  %v593_v28 = vadd.f32 %v592_v43, %v575_v48  ;;  %v598_v30 = vadd.f32 %v597_v53, %v580_v55  ;;  %v645_v40 = vmul.f32 %v644_v56, %v641_v14 }
 0x149   : >> { %v650_v58 = vmul.f32 %v649_v47, %v641_v14  ;;  %v655_v2 = vmul.f32 %v654_v17, %v641_v14  ;;  %v669_v22 = vstv %s1568_s14  ;;  %v677_v23 = vstv %s1573_s21 }
 0x14a   : >> { %v603_v63 = vadd.f32 %v602_v10, %v588_v20  ;;  %v608_v0 = vadd.f32 %v607_v49, %v593_v28  ;;  %v613_v61 = vadd.f32 %v612_v54, %v598_v30  ;;  %v682_v3 = vstv %s1575_s23 }
 0x14b   : >> { %v674_v33 = vsel %vm973_vm5, %v673_v62, 0.0  ;;  %v660_v57 = vmul.f32 %v659_v51, %v1097_v46  ;;  %v665_v9 = vmul.f32 %v664_v52, %v1097_v46  ;;  %v687_v37 = vstv %s1584_s8 }
 0x14c   : >> { %v621_v29 = vadd.f32 %v620_v50, %v603_v63  ;;  %v626_v8 = vadd.f32 %v625_v15, %v608_v0  ;;  %v631_v31 = vadd.f32 %v630_v16, %v613_v61  ;;  %v670_v27 = vmul.f32 %v669_v22, %v1097_v46 }
 0x14d   : >> { %v678_v24 = vmul.f32 %v677_v23, %v674_v33  ;;  %v683_v45 = vmul.f32 %v682_v3, %v674_v33  ;;  %v688_v41 = vmul.f32 %v687_v37, %v674_v33 }
 0x14e   : >> { %v646_v10 = vadd.f32 %v645_v40, %v621_v29  ;;  %v651_v35 = vadd.f32 %v650_v58, %v626_v8  ;;  %v656_v36 = vadd.f32 %v655_v2, %v631_v31  ;;  %178 = sbr.rel (!%p176_p13) target bundleno = 43 (0x2b), region = 70 }
 0x150   : >> { %v661_v34 = vadd.f32 %v660_v57, %v646_v10  ;;  %v666_v49 = vadd.f32 %v665_v9, %v651_v35  ;;  %v671_v32 = vadd.f32 %v670_v27, %v656_v36 }
 0x152   : >> { %v679_v11 = vadd.f32 %v678_v24, %v661_v34   ;;  %v684_v12 = vadd.f32 %v683_v45, %v666_v49   ;;  %v689_v38 = vadd.f32 %v688_v41, %v671_v32  }
 0x154   : >> { %v1668_v10 = vmov %v689_v38  ;;  %v1669_v9 = vmov %v684_v12  ;;  %v1670_v8 = vmov %v679_v11  ;;  %690 = vst [vmem:[%s1671_s24] sm:$0xff] (%p176_p13), %v679_v11  ;;  %691 = vst [vmem:[%s1671_s24 + $0x8] sm:$0xff] (%p176_p13), %v684_v12 }
 0x155   : > { %692 = vst [vmem:[%s1671_s24 + $0x10] sm:$0xff] %v689_v38 }
 0x156 PF: > { %s1672_s9 = sld [smem:[#allocation5_spill]] }
 0x15c   : > { %s13_s9 = sadd.s32 1, %s1672_s9  }
 0x15d   : > { %p10_p0 = scmp.ge.s32.totalorder %s13_s9, 4  }
 0x15f   :  { %12 = sbr.rel (!%p10_p0) target bundleno = 5 (0x5), region = 81 }
 0x166   :  { %714 = vsyncpa [#allocation3], 1 }
 0x167   :  { %716 = vsyncpa [#allocation3 + $0x1], 1 }

// kernel: reinforce_net_forward.3
= control target key start
LH: loop header
LB: loop body
LE: loop exit
PB: predicated region body
PF: predicated region fallthrough
CT: control target
= control target key end

     0   :  { %10 = vsyncpa [#allocation3], 0  ;;  %s14677_s0 = inlined_call_operand.vmem [shape: f32[2,3072], index: 0, kind: input, shape index: {}]   ;;  %s14678_s1 = inlined_call_operand.hbm [shape: bf16[3072,1024], index: 1, kind: input, shape index: {}]   ;;  %s14679_s2 = inlined_call_operand.hbm [shape: f32[1,1024], index: 2, kind: input, shape index: {}]   ;;  %s14680_s3 = inlined_call_operand.hbm [shape: bf16[1024,128], index: 3, kind: input, shape index: {}]   ;;  %s14681_s4 = inlined_call_operand.hbm [shape: f32[1,128], index: 4, kind: input, shape index: {}]   ;;  %s14682_s5 = inlined_call_operand.hbm [shape: f32[2,128], index: 5, kind: output, shape index: {}]  }
   0x1   :  { %11 = vsyncpa [#allocation6], 0 }
   0x2   :  { %12 = vsyncpa [#allocation9], 0 }
   0x3   :  { %13 = vsyncpa [#allocation4], 0  ;;  %s14259_s18 = smov [#allocation5]   ;;  %s14260_s20 = smov [#allocation2]  }
   0x4   :  { %s34_s19 = sshll.u32 %s14259_s18, 4  ;;  %s21_s21 = sshll.u32 %s14260_s20, 4  ;;  %s35_s19 = int_to_ptr.vmem [resolvable:$true] %s34_s19  ;;  %s14299_s21 = int_to_ptr.vmem [resolvable:$true] %s21_s21 }
   0x5   :  { %s14141_s24 = scalar_lea.hbm %s14679_s2, 128 }
   0x6   :  { %p14142_p0 = scmp.ne.s32.totalorder %s14679_s2, %s14141_s24  ;;  %p14145_p1 = scmp.lt.u32.totalorder %s14141_s24, %s14679_s2 }
   0x8   :  { %p14147_p2 = pnand %p14145_p1, %p14142_p0 }
   0xa   :  { %14150 = shalt.err (!%p14147_p2)
}
   0xb   :  { %s14151_s29 = scalar_lea.vmem %s35_s19, 128  ;;  %p14156_p4 = scmp.lt.s32.totalorder %s35_s19, %s35_s19 }
   0xc   :  { %p14152_p3 = scmp.ne.s32.totalorder %s35_s19, %s14151_s29  ;;  %p14157_p5 = scmp.lt.s32.totalorder %s14151_s29, %s14151_s29 }
   0xe   :  { %p14158_p6 = por %p14157_p5, %p14156_p4 }
  0x10   :  { %p14159_p7 = pnand %p14158_p6, %p14152_p3 }
  0x12   :  { %14162 = shalt.err (!%p14159_p7)
}
  0x13   :  { %37 = dma.hbm_to_vmem [thread:$0]  %s14679_s2, 128, %s35_s19, [#allocation6]  }
  0x14   :  { %s14163_s9 = scalar_lea.hbm %s14678_s1, 196608 }
  0x15   :  { %p14164_p8 = scmp.ne.s32.totalorder %s14678_s1, %s14163_s9  ;;  %p14167_p9 = scmp.lt.u32.totalorder %s14163_s9, %s14678_s1 }
  0x17   :  { %p14169_p10 = pnand %p14167_p9, %p14164_p8 }
  0x19   :  { %14172 = shalt.err (!%p14169_p10)
}
  0x1a   :  { %s14173_s14 = scalar_lea.vmem %s14299_s21, 196608  ;;  %p14178_p12 = scmp.lt.s32.totalorder %s14299_s21, %s14299_s21 }
  0x1b   :  { %p14174_p11 = scmp.ne.s32.totalorder %s14299_s21, %s14173_s14  ;;  %p14179_p13 = scmp.lt.s32.totalorder %s14173_s14, %s14173_s14 }
  0x1d   :  { %p14180_p0 = por %p14179_p13, %p14178_p12 }
  0x1f   :  { %p14181_p1 = pnand %p14180_p0, %p14174_p11 }
  0x21   :  { %14184 = shalt.err (!%p14181_p1)
}
  0x22   :  { %s14261_s2 = smov 512   ;;  %s14262_s15 = smov 32  }
  0x23   :  { %27 = dma.hbm_to_vmem [thread:$0]  %s14678_s1, 196608, %s14299_s21, [#allocation3], %s14261_s2, %s14261_s2, %s14262_s15  }
  0x24   :  { %s14263_s18 = smov [#allocation7]   ;;  %s14185_s23 = scalar_lea.hbm %s14680_s3, 8192 }
  0x25   :  { %s43_s19 = sshll.u32 %s14263_s18, 4  ;;  %p14186_p2 = scmp.ne.s32.totalorder %s14680_s3, %s14185_s23  ;;  %s44_s19 = int_to_ptr.vmem [resolvable:$true] %s43_s19 }
  0x26   :  { %p14189_p3 = scmp.lt.u32.totalorder %s14185_s23, %s14680_s3 }
  0x28   :  { %p14191_p4 = pnand %p14189_p3, %p14186_p2 }
  0x2a   :  { %14194 = shalt.err (!%p14191_p4)
}
  0x2b   :  { %s14195_s28 = scalar_lea.vmem %s44_s19, 8192  ;;  %p14200_p6 = scmp.lt.s32.totalorder %s44_s19, %s44_s19 }
  0x2c   :  { %p14196_p5 = scmp.ne.s32.totalorder %s44_s19, %s14195_s28  ;;  %p14201_p7 = scmp.lt.s32.totalorder %s14195_s28, %s14195_s28 }
  0x2e   :  { %p14202_p8 = por %p14201_p7, %p14200_p6 }
  0x30   :  { %p14203_p9 = pnand %p14202_p8, %p14196_p5 }
  0x32   :  { %14206 = shalt.err (!%p14203_p9)
}
  0x33   :  { %s14264_s1 = smov 64   ;;  %s14265_s21 = smov 4  }
  0x34   :  { %49 = dma.hbm_to_vmem [thread:$0]  %s14680_s3, 8192, %s44_s19, [#allocation6], %s14264_s1, %s14264_s1, %s14265_s21  }
  0x35   :  { %s14266_s6 = smov [#allocation8]   ;;  %s14207_s10 = scalar_lea.hbm %s14681_s4, 16 }
  0x36   :  { %s56_s7 = sshll.u32 %s14266_s6, 4  ;;  %p14208_p10 = scmp.ne.s32.totalorder %s14681_s4, %s14207_s10  ;;  %s57_s7 = int_to_ptr.vmem [resolvable:$true] %s56_s7 }
  0x37   :  { %p14211_p11 = scmp.lt.u32.totalorder %s14207_s10, %s14681_s4 }
  0x39   :  { %p14213_p12 = pnand %p14211_p11, %p14208_p10 }
  0x3b   :  { %14216 = shalt.err (!%p14213_p12)
}
  0x3c   :  { %s14217_s2 = scalar_lea.vmem %s57_s7, 16  ;;  %s14221_s3 = scalar_lea.vmem %s57_s7, 32 }
  0x3d   :  { %p14218_p13 = scmp.ne.s32.totalorder %s57_s7, %s14217_s2  ;;  %p14222_p0 = scmp.lt.s32.totalorder %s57_s7, %s57_s7 }
  0x3e   :  { %p14223_p1 = scmp.lt.s32.totalorder %s14221_s3, %s14217_s2 }
  0x40   :  { %p14224_p2 = por %p14223_p1, %p14222_p0 }
  0x42   :  { %p14225_p3 = pnand %p14224_p2, %p14218_p13 }
  0x44   :  { %14228 = shalt.err (!%p14225_p3)
}
  0x45   :  { %59 = dma.hbm_to_vmem [thread:$0]  %s14681_s4, 16, %s57_s7, [#allocation9]  }
  0x46   :  { %14251 = dma.done.wait [#allocation3], 196608  }
  0x47   :  { %14252 = vsyncadd [#allocation3], 4294770688 }
  0x48   :  { %14253 = dma.done.wait [#allocation6], 8320  }
  0x49   :  { %14254 = vsyncadd [#allocation6], 4294958976 }
  0x4a   :  { %14255 = dma.done.wait [#allocation9], 16  }
  0x4b   :  { %14256 = vsyncadd [#allocation9], 4294967280  ;;  %v247_v0 = vld [vmem:[#allocation2] sm:$0xff]  ;;  %v248_v2 = vld [vmem:[#allocation2 + $0x8] sm:$0xff]  ;;  %v14267_v40 = vmov 1983009808   ;;  %v101_v42 = vlaneseq }
  0x4c   :  { %v251_v1 = vld [vmem:[#allocation2 + $0x20] sm:$0xff]  ;;  %v252_v4 = vld [vmem:[#allocation2 + $0x28] sm:$0xff]  ;;  %v99_v41 = vunpack.c.l.s4 %v14267_v40 }
  0x4d   :  { %v12195_v3 = vcombine.high %v247_v0, %v251_v1  ;;  %v12194_v5 = vcombine.low %v247_v0, %v251_v1  ;;  %v255_v6 = vld [vmem:[#allocation2 + $0x40] sm:$0xff]  ;;  %v12197_v8 = vcombine.high %v248_v2, %v252_v4  ;;  %v12196_v9 = vcombine.low %v248_v2, %v252_v4  ;;  %v256_v11 = vld [vmem:[#allocation2 + $0x48] sm:$0xff] }
  0x4e   :  { %v259_v7 = vld [vmem:[#allocation2 + $0x60] sm:$0xff]  ;;  %v260_v12 = vld [vmem:[#allocation2 + $0x68] sm:$0xff]  ;;  %v100_v51 = vunpack.c.0.s8 %v99_v41  ;;  %v14354_v52 = vshrl.u32 %v101_v42, 7 }
  0x4f   :  { %v12203_v10 = vcombine.high %v255_v6, %v259_v7  ;;  %v263_v13 = vld [vmem:[#allocation2 + $0x80] sm:$0xff]  ;;  %9505 = vmatprep.subr.bf16.mxu0 %v12195_v3  ;;  %v12205_v14 = vcombine.high %v256_v11, %v260_v12  ;;  %v264_v16 = vld [vmem:[#allocation2 + $0x88] sm:$0xff]  ;;  %9997 = vmatprep.subr.bf16.mxu1 %v12197_v8  ;;  %v12202_v18 = vcombine.low %v255_v6, %v259_v7 }
  0x50   :  { %v267_v15 = vld [vmem:[#allocation2 + $0xa0] sm:$0xff]  ;;  %v268_v17 = vld [vmem:[#allocation2 + $0xa8] sm:$0xff]  ;;  %9506 = vmatpush1.bf16.msra.mxu0 %v12194_v5  ;;  %9998 = vmatpush1.bf16.msra.mxu1 %v12196_v9  ;;  %v12204_v19 = vcombine.low %v256_v11, %v260_v12  ;;  %v14360_v63 = vsub.s32 %v100_v51, %v14354_v52 }
  0x51   :  { %9507 = vmatprep.subr.bf16.mxu0 %v12203_v10  ;;  %v12211_v20 = vcombine.high %v263_v13, %v267_v15  ;;  %9999 = vmatprep.subr.bf16.mxu1 %v12205_v14  ;;  %v12213_v21 = vcombine.high %v264_v16, %v268_v17  ;;  %v271_v22 = vld [vmem:[#allocation2 + $0xc0] sm:$0xff]  ;;  %v272_v24 = vld [vmem:[#allocation2 + $0xc8] sm:$0xff]  ;;  %v12210_v26 = vcombine.low %v263_v13, %v267_v15 }
  0x52   :  { %v275_v23 = vld [vmem:[#allocation2 + $0xe0] sm:$0xff]  ;;  %v276_v25 = vld [vmem:[#allocation2 + $0xe8] sm:$0xff]  ;;  %v12212_v27 = vcombine.low %v264_v16, %v268_v17 }
  0x53   :  { %v12219_v28 = vcombine.high %v271_v22, %v275_v23  ;;  %v12221_v29 = vcombine.high %v272_v24, %v276_v25  ;;  %v279_v30 = vld [vmem:[#allocation2 + $0x100] sm:$0xff]  ;;  %v280_v32 = vld [vmem:[#allocation2 + $0x108] sm:$0xff]  ;;  %v12218_v34 = vcombine.low %v271_v22, %v275_v23  ;;  %v12220_v35 = vcombine.low %v272_v24, %v276_v25 }
  0x54   :  { %9508 = vmatpush1.bf16.msra.mxu0 %v12202_v18  ;;  %10000 = vmatpush1.bf16.msra.mxu1 %v12204_v19  ;;  %v283_v31 = vld [vmem:[#allocation2 + $0x120] sm:$0xff]  ;;  %v284_v33 = vld [vmem:[#allocation2 + $0x128] sm:$0xff] }
  0x55   :  { %9509 = vmatprep.subr.bf16.mxu0 %v12211_v20  ;;  %10001 = vmatprep.subr.bf16.mxu1 %v12213_v21  ;;  %v12227_v36 = vcombine.high %v279_v30, %v283_v31  ;;  %v12229_v37 = vcombine.high %v280_v32, %v284_v33  ;;  %v287_v38 = vld [vmem:[#allocation2 + $0x140] sm:$0xff]  ;;  %v288_v43 = vld [vmem:[#allocation2 + $0x148] sm:$0xff]  ;;  %v12226_v45 = vcombine.low %v279_v30, %v283_v31 }
  0x56   :  { %v291_v39 = vld [vmem:[#allocation2 + $0x160] sm:$0xff]  ;;  %v292_v44 = vld [vmem:[#allocation2 + $0x168] sm:$0xff]  ;;  %v12228_v46 = vcombine.low %v280_v32, %v284_v33 }
  0x57   :  { %v12235_v47 = vcombine.high %v287_v38, %v291_v39  ;;  %v12237_v48 = vcombine.high %v288_v43, %v292_v44  ;;  %v295_v49 = vld [vmem:[#allocation2 + $0x180] sm:$0xff]  ;;  %v296_v53 = vld [vmem:[#allocation2 + $0x188] sm:$0xff]  ;;  %v12234_v55 = vcombine.low %v287_v38, %v291_v39  ;;  %v12236_v56 = vcombine.low %v288_v43, %v292_v44 }
  0x58   :  { %9510 = vmatpush1.bf16.msra.mxu0 %v12210_v26  ;;  %10002 = vmatpush1.bf16.msra.mxu1 %v12212_v27  ;;  %v299_v50 = vld [vmem:[#allocation2 + $0x1a0] sm:$0xff]  ;;  %v300_v54 = vld [vmem:[#allocation2 + $0x1a8] sm:$0xff] }
  0x59   :  { %9511 = vmatprep.subr.bf16.mxu0 %v12219_v28  ;;  %10003 = vmatprep.subr.bf16.mxu1 %v12221_v29  ;;  %v12243_v57 = vcombine.high %v295_v49, %v299_v50  ;;  %v73_v58 = vld [vmem:[%s14677_s0] sm:$0xff]  ;;  %v12245_v59 = vcombine.high %v296_v53, %v300_v54  ;;  %v304_v0 = vld [vmem:[#allocation2 + $0x1c8] sm:$0xff]  ;;  %v12242_v2 = vcombine.low %v295_v49, %v299_v50 }
  0x5a   :  { %v303_v60 = vld [vmem:[#allocation2 + $0x1c0] sm:$0xff]  ;;  %v79_v62 = vmul.f32 0.01, %v73_v58  ;;  %v308_v1 = vld [vmem:[#allocation2 + $0x1e8] sm:$0xff]  ;;  %v12244_v4 = vcombine.low %v296_v53, %v300_v54 }
  0x5b   :  { %v307_v61 = vld [vmem:[#allocation2 + $0x1e0] sm:$0xff]  ;;  %v12253_v6 = vcombine.high %v304_v0, %v308_v1  ;;  %v312_v10 = vld [vmem:[#allocation2 + $0x208] sm:$0xff]  ;;  %v12252_v14 = vcombine.low %v304_v0, %v308_v1 }
  0x5c   :  { %9512 = vmatpush1.bf16.msra.mxu0 %v12218_v34  ;;  %10004 = vmatpush1.bf16.msra.mxu1 %v12220_v35  ;;  %v14362_v3 = vmax.f32 %v73_v58, %v79_v62  ;;  %v12251_v5 = vcombine.high %v303_v60, %v307_v61  ;;  %v311_v7 = vld [vmem:[#allocation2 + $0x200] sm:$0xff]  ;;  %v316_v11 = vld [vmem:[#allocation2 + $0x228] sm:$0xff]  ;;  %v12250_v12 = vcombine.low %v303_v60, %v307_v61 }
  0x5d   :  { %9513 = vmatprep.subr.bf16.mxu0 %v12227_v36  ;;  %10005 = vmatprep.subr.bf16.mxu1 %v12229_v37  ;;  %v315_v8 = vld [vmem:[#allocation2 + $0x220] sm:$0xff]  ;;  %v12261_v16 = vcombine.high %v312_v10, %v316_v11  ;;  %v320_v20 = vld [vmem:[#allocation2 + $0x248] sm:$0xff]  ;;  %v12260_v23 = vcombine.low %v312_v10, %v316_v11 }
  0x5e   :  { %v14366_v9 = vrot.slane %v14362_v3, %v14360_v63  ;;  %v12259_v15 = vcombine.high %v311_v7, %v315_v8  ;;  %v319_v17 = vld [vmem:[#allocation2 + $0x240] sm:$0xff]  ;;  %v324_v21 = vld [vmem:[#allocation2 + $0x268] sm:$0xff]  ;;  %v12258_v22 = vcombine.low %v311_v7, %v315_v8  ;;  %v97_v7 = vcombine.high %v14362_v3, %v14362_v3 }
  0x5f   :  { %v323_v18 = vld [vmem:[#allocation2 + $0x260] sm:$0xff]  ;;  %v12269_v25 = vcombine.high %v320_v20, %v324_v21  ;;  %v328_v28 = vld [vmem:[#allocation2 + $0x288] sm:$0xff]  ;;  %v12268_v31 = vcombine.low %v320_v20, %v324_v21 }
  0x60   :  { %9514 = vmatpush1.bf16.msra.mxu0 %v12226_v45  ;;  %10006 = vmatpush1.bf16.msra.mxu1 %v12228_v46  ;;  %v112_v13 = vcombine.high %v14366_v9, %v14366_v9  ;;  %v12267_v24 = vcombine.high %v319_v17, %v323_v18  ;;  %v327_v26 = vld [vmem:[#allocation2 + $0x280] sm:$0xff]  ;;  %v332_v29 = vld [vmem:[#allocation2 + $0x2a8] sm:$0xff]  ;;  %v12266_v30 = vcombine.low %v319_v17, %v323_v18 }
  0x61   :  { %9515 = vmatprep.subr.bf16.mxu0 %v12235_v47  ;;  %10007 = vmatprep.subr.bf16.mxu1 %v12237_v48  ;;  %v331_v27 = vld [vmem:[#allocation2 + $0x2a0] sm:$0xff]  ;;  %v12277_v33 = vcombine.high %v328_v28, %v332_v29  ;;  %v336_v36 = vld [vmem:[#allocation2 + $0x2c8] sm:$0xff]  ;;  %v12276_v39 = vcombine.low %v328_v28, %v332_v29  ;;  %v14377_v17 = vrot.slane %v97_v7, %v14360_v63 }
  0x62   :  { %v14370_v19 = vpack.c.bf16 %v112_v13, %v112_v13  ;;  %v12275_v32 = vcombine.high %v327_v26, %v331_v27  ;;  %v335_v34 = vld [vmem:[#allocation2 + $0x2c0] sm:$0xff]  ;;  %v340_v37 = vld [vmem:[#allocation2 + $0x2e8] sm:$0xff]  ;;  %v12274_v38 = vcombine.low %v327_v26, %v331_v27  ;;  %v14383_v27 = vpack.c.bf16 %v14366_v9, %v14366_v9 }
  0x63   :  { %v339_v35 = vld [vmem:[#allocation2 + $0x2e0] sm:$0xff]  ;;  %v12285_v41 = vcombine.high %v336_v36, %v340_v37  ;;  %v344_v44 = vld [vmem:[#allocation2 + $0x308] sm:$0xff]  ;;  %v12284_v47 = vcombine.low %v336_v36, %v340_v37  ;;  %v113_v26 = vcombine.high %v14377_v17, %v14377_v17 }
  0x64   :  { %9516 = vmatpush1.bf16.msra.mxu0 %v12234_v55  ;;  %10008 = vmatpush1.bf16.msra.mxu1 %v12236_v56  ;;  %v12283_v40 = vcombine.high %v335_v34, %v339_v35  ;;  %v343_v42 = vld [vmem:[#allocation2 + $0x300] sm:$0xff]  ;;  %v348_v45 = vld [vmem:[#allocation2 + $0x328] sm:$0xff]  ;;  %v12282_v46 = vcombine.low %v335_v34, %v339_v35 }
  0x65   :  { %9517 = vmatprep.subr.bf16.mxu0 %v12243_v57  ;;  %10009 = vmatprep.subr.bf16.mxu1 %v12245_v59  ;;  %v347_v43 = vld [vmem:[#allocation2 + $0x320] sm:$0xff]  ;;  %v12293_v49 = vcombine.high %v344_v44, %v348_v45  ;;  %v352_v53 = vld [vmem:[#allocation2 + $0x348] sm:$0xff]  ;;  %v12292_v56 = vcombine.low %v344_v44, %v348_v45 }
  0x66   :  { %9537 = vmatprep.mubr.bf16.mxu0 %v14370_v19  ;;  %10029 = vmatprep.mubr.bf16.mxu1 %v14370_v19  ;;  %v12291_v48 = vcombine.high %v343_v42, %v347_v43  ;;  %v351_v50 = vld [vmem:[#allocation2 + $0x340] sm:$0xff]  ;;  %v356_v54 = vld [vmem:[#allocation2 + $0x368] sm:$0xff]  ;;  %v12290_v55 = vcombine.low %v343_v42, %v347_v43 }
  0x67   :  { %v355_v51 = vld [vmem:[#allocation2 + $0x360] sm:$0xff]  ;;  %v12301_v58 = vcombine.high %v352_v53, %v356_v54  ;;  %v360_v61 = vld [vmem:[#allocation2 + $0x388] sm:$0xff]  ;;  %v12300_v1 = vcombine.low %v352_v53, %v356_v54 }
  0x68   :  { %9518 = vmatpush1.bf16.msra.mxu0 %v12242_v2  ;;  %10010 = vmatpush1.bf16.msra.mxu1 %v12244_v4  ;;  %v12299_v57 = vcombine.high %v351_v50, %v355_v51  ;;  %v359_v59 = vld [vmem:[#allocation2 + $0x380] sm:$0xff]  ;;  %v364_v62 = vld [vmem:[#allocation2 + $0x3a8] sm:$0xff]  ;;  %v12298_v0 = vcombine.low %v351_v50, %v355_v51 }
  0x69   :  { %9519 = vmatprep.subr.bf16.mxu0 %v12251_v5  ;;  %10011 = vmatprep.subr.bf16.mxu1 %v12253_v6  ;;  %v363_v60 = vld [vmem:[#allocation2 + $0x3a0] sm:$0xff]  ;;  %v12309_v4 = vcombine.high %v360_v61, %v364_v62  ;;  %v368_v8 = vld [vmem:[#allocation2 + $0x3c8] sm:$0xff] }
  0x6a   :  { %v12307_v2 = vcombine.high %v359_v59, %v363_v60  ;;  %v367_v5 = vld [vmem:[#allocation2 + $0x3c0] sm:$0xff]  ;;  %v372_v10 = vld [vmem:[#allocation2 + $0x3e8] sm:$0xff]  ;;  %v12306_v11 = vcombine.low %v359_v59, %v363_v60 }
  0x6b   :  { %v371_v6 = vld [vmem:[#allocation2 + $0x3e0] sm:$0xff]  ;;  %v376_v18 = vld [vmem:[#allocation2 + $0x408] sm:$0xff]  ;;  %v12316_v3 = vcombine.low %v368_v8, %v372_v10 }
  0x6c   :  { %9520 = vmatpush1.bf16.msra.mxu0 %v12250_v12  ;;  %10012 = vmatpush1.bf16.msra.mxu1 %v12252_v14  ;;  %v12308_v12 = vcombine.low %v360_v61, %v364_v62  ;;  %v12315_v13 = vcombine.high %v367_v5, %v371_v6  ;;  %v12317_v14 = vcombine.high %v368_v8, %v372_v10  ;;  %v380_v20 = vld [vmem:[#allocation2 + $0x428] sm:$0xff]  ;;  %v395_v34 = vld [vmem:[#allocation2 + $0x4a0] sm:$0xff] }
  0x6d   :  { %9521 = vmatprep.subr.bf16.mxu0 %v12259_v15  ;;  %10013 = vmatprep.subr.bf16.mxu1 %v12261_v16  ;;  %v375_v15 = vld [vmem:[#allocation2 + $0x400] sm:$0xff]  ;;  %v12314_v21 = vcombine.low %v367_v5, %v371_v6  ;;  %v384_v28 = vld [vmem:[#allocation2 + $0x448] sm:$0xff] }
  0x6e   :  { %v379_v16 = vld [vmem:[#allocation2 + $0x420] sm:$0xff]  ;;  %v388_v29 = vld [vmem:[#allocation2 + $0x468] sm:$0xff] }
  0x6f   :  { %v392_v35 = vld [vmem:[#allocation2 + $0x488] sm:$0xff]  ;;  %v12333_v36 = vcombine.high %v384_v28, %v388_v29  ;;  %v403_v42 = vld [vmem:[#allocation2 + $0x4e0] sm:$0xff] }
  0x70   :  { %9522 = vmatpush1.bf16.msra.mxu0 %v12258_v22  ;;  %10014 = vmatpush1.bf16.msra.mxu1 %v12260_v23  ;;  %v12323_v22 = vcombine.high %v375_v15, %v379_v16  ;;  %v12325_v23 = vcombine.high %v376_v18, %v380_v20  ;;  %v396_v37 = vld [vmem:[#allocation2 + $0x4a8] sm:$0xff]  ;;  %v411_v50 = vld [vmem:[#allocation2 + $0x520] sm:$0xff] }
  0x71   :  { %9523 = vmatprep.subr.bf16.mxu0 %v12267_v24  ;;  %10015 = vmatprep.subr.bf16.mxu1 %v12269_v25  ;;  %v383_v24 = vld [vmem:[#allocation2 + $0x440] sm:$0xff]  ;;  %v400_v43 = vld [vmem:[#allocation2 + $0x4c8] sm:$0xff]  ;;  %v12341_v44 = vcombine.high %v392_v35, %v396_v37 }
  0x72   :  { %v387_v25 = vld [vmem:[#allocation2 + $0x460] sm:$0xff]  ;;  %v404_v45 = vld [vmem:[#allocation2 + $0x4e8] sm:$0xff] }
  0x73   :  { %v12330_v9 = vcombine.low %v383_v24, %v387_v25  ;;  %v408_v51 = vld [vmem:[#allocation2 + $0x508] sm:$0xff]  ;;  %v12349_v53 = vcombine.high %v400_v43, %v404_v45  ;;  %v419_v59 = vld [vmem:[#allocation2 + $0x560] sm:$0xff] }
  0x74   :  { %9524 = vmatpush1.bf16.msra.mxu0 %v12266_v30  ;;  %10016 = vmatpush1.bf16.msra.mxu1 %v12268_v31  ;;  %v12322_v30 = vcombine.low %v375_v15, %v379_v16  ;;  %v12324_v31 = vcombine.low %v376_v18, %v380_v20  ;;  %v412_v54 = vld [vmem:[#allocation2 + $0x528] sm:$0xff]  ;;  %v427_v5 = vld [vmem:[#allocation2 + $0x5a0] sm:$0xff] }
  0x75   :  { %9525 = vmatprep.subr.bf16.mxu0 %v12275_v32  ;;  %10017 = vmatprep.subr.bf16.mxu1 %v12277_v33  ;;  %v12331_v32 = vcombine.high %v383_v24, %v387_v25  ;;  %v391_v33 = vld [vmem:[#allocation2 + $0x480] sm:$0xff]  ;;  %v416_v60 = vld [vmem:[#allocation2 + $0x548] sm:$0xff]  ;;  %v12357_v61 = vcombine.high %v408_v51, %v412_v54 }
  0x76   :  { %v420_v62 = vld [vmem:[#allocation2 + $0x568] sm:$0xff] }
  0x77   :  { %v424_v6 = vld [vmem:[#allocation2 + $0x588] sm:$0xff]  ;;  %v12365_v7 = vcombine.high %v416_v60, %v420_v62 }
  0x78   :  { %9526 = vmatpush1.bf16.msra.mxu0 %v12274_v38  ;;  %10018 = vmatpush1.bf16.msra.mxu1 %v12276_v39  ;;  %v14385_v38 = vpack.c.bf16 %v113_v26, %v113_v26  ;;  %v12332_v39 = vcombine.low %v384_v28, %v388_v29  ;;  %v428_v8 = vld [vmem:[#allocation2 + $0x5a8] sm:$0xff] }
  0x79   :  { %9527 = vmatprep.subr.bf16.mxu0 %v12283_v40  ;;  %10019 = vmatprep.subr.bf16.mxu1 %v12285_v41  ;;  %v12339_v40 = vcombine.high %v391_v33, %v395_v34  ;;  %v399_v41 = vld [vmem:[#allocation2 + $0x4c0] sm:$0xff]  ;;  %v432_v15 = vld [vmem:[#allocation2 + $0x5c8] sm:$0xff]  ;;  %v12373_v16 = vcombine.high %v424_v6, %v428_v8 }
  0x7a   :  { %v436_v18 = vld [vmem:[#allocation2 + $0x5e8] sm:$0xff] }
  0x7b   :  { %v440_v24 = vld [vmem:[#allocation2 + $0x608] sm:$0xff]  ;;  %v12381_v25 = vcombine.high %v432_v15, %v436_v18  ;;  %v12380_v29 = vcombine.low %v432_v15, %v436_v18 }
  0x7c   :  { %9528 = vmatpush1.bf16.msra.mxu0 %v12282_v46  ;;  %10020 = vmatpush1.bf16.msra.mxu1 %v12284_v47  ;;  %v12338_v46 = vcombine.low %v391_v33, %v395_v34  ;;  %v12340_v47 = vcombine.low %v392_v35, %v396_v37  ;;  %v444_v26 = vld [vmem:[#allocation2 + $0x628] sm:$0xff] }
  0x7d   :  { %9529 = vmatprep.subr.bf16.mxu0 %v12291_v48  ;;  %10021 = vmatprep.subr.bf16.mxu1 %v12293_v49  ;;  %v12347_v48 = vcombine.high %v399_v41, %v403_v42  ;;  %v407_v49 = vld [vmem:[#allocation2 + $0x500] sm:$0xff]  ;;  %v448_v33 = vld [vmem:[#allocation2 + $0x648] sm:$0xff]  ;;  %v12389_v34 = vcombine.high %v440_v24, %v444_v26  ;;  %v12388_v37 = vcombine.low %v440_v24, %v444_v26 }
  0x7e   :  { %v452_v35 = vld [vmem:[#allocation2 + $0x668] sm:$0xff] }
  0x7f   :  { %v492_v15 = vld [vmem:[#allocation2 + $0x7a8] sm:$0xff] }
  0x80   :  { %9530 = vmatpush1.bf16.msra.mxu0 %v12290_v55  ;;  %10022 = vmatpush1.bf16.msra.mxu1 %v12292_v56  ;;  %v12346_v55 = vcombine.low %v399_v41, %v403_v42  ;;  %v12348_v56 = vcombine.low %v400_v43, %v404_v45  ;;  %v456_v41 = vld [vmem:[#allocation2 + $0x688] sm:$0xff]  ;;  %v12397_v42 = vcombine.high %v448_v33, %v452_v35 }
  0x81   :  { %9531 = vmatprep.subr.bf16.mxu0 %v12299_v57  ;;  %10023 = vmatprep.subr.bf16.mxu1 %v12301_v58  ;;  %v12355_v57 = vcombine.high %v407_v49, %v411_v50  ;;  %v415_v58 = vld [vmem:[#allocation2 + $0x540] sm:$0xff]  ;;  %v460_v43 = vld [vmem:[#allocation2 + $0x6a8] sm:$0xff]  ;;  %v12396_v45 = vcombine.low %v448_v33, %v452_v35 }
  0x82   :  { %v12362_v10 = vcombine.low %v415_v58, %v419_v59  ;;  %v496_v24 = vld [vmem:[#allocation2 + $0x7c8] sm:$0xff]  ;;  %v507_v33 = vld [vmem:[#allocation2 + $0x820] sm:$0xff] }
  0x83   :  { %v500_v26 = vld [vmem:[#allocation2 + $0x7e8] sm:$0xff] }
  0x84   :  { %9532 = vmatpush1.bf16.msra.mxu0 %v12298_v0  ;;  %10024 = vmatpush1.bf16.msra.mxu1 %v12300_v1  ;;  %v12354_v0 = vcombine.low %v407_v49, %v411_v50  ;;  %v12356_v1 = vcombine.low %v408_v51, %v412_v54  ;;  %v464_v49 = vld [vmem:[#allocation2 + $0x6c8] sm:$0xff]  ;;  %v12405_v50 = vcombine.high %v456_v41, %v460_v43 }
  0x85   :  { %9533 = vmatprep.subr.bf16.mxu0 %v12307_v2  ;;  %10025 = vmatprep.subr.bf16.mxu1 %v12309_v4  ;;  %v12363_v2 = vcombine.high %v415_v58, %v419_v59  ;;  %v423_v4 = vld [vmem:[#allocation2 + $0x580] sm:$0xff]  ;;  %v468_v51 = vld [vmem:[#allocation2 + $0x6e8] sm:$0xff]  ;;  %v12404_v54 = vcombine.low %v456_v41, %v460_v43  ;;  %v12445_v35 = vcombine.high %v496_v24, %v500_v26 }
  0x86   :  { %v12370_v20 = vcombine.low %v423_v4, %v427_v5  ;;  %v472_v58 = vld [vmem:[#allocation2 + $0x708] sm:$0xff]  ;;  %v12413_v59 = vcombine.high %v464_v49, %v468_v51  ;;  %v511_v41 = vld [vmem:[#allocation2 + $0x840] sm:$0xff] }
  0x87   :  { %v512_v43 = vld [vmem:[#allocation2 + $0x848] sm:$0xff] }
  0x88   :  { %9534 = vmatpush1.bf16.msra.mxu0 %v12306_v11  ;;  %10026 = vmatpush1.bf16.msra.mxu1 %v12308_v12  ;;  %v12364_v11 = vcombine.low %v416_v60, %v420_v62  ;;  %v12371_v12 = vcombine.high %v423_v4, %v427_v5  ;;  %v476_v60 = vld [vmem:[#allocation2 + $0x728] sm:$0xff]  ;;  %v479_v62 = vld [vmem:[#allocation2 + $0x740] sm:$0xff] }
  0x89   :  { %9535 = vmatprep.subr.bf16.mxu0 %v12315_v13  ;;  %10027 = vmatprep.subr.bf16.mxu1 %v12317_v14  ;;  %v431_v13 = vld [vmem:[#allocation2 + $0x5c0] sm:$0xff]  ;;  %v480_v4 = vld [vmem:[#allocation2 + $0x748] sm:$0xff] }
  0x8a   :  { %v435_v14 = vld [vmem:[#allocation2 + $0x5e0] sm:$0xff]  ;;  %v484_v5 = vld [vmem:[#allocation2 + $0x768] sm:$0xff] }
  0x8b   :  { %v12378_v28 = vcombine.low %v431_v13, %v435_v14 }
  0x8c   :  { %9536 = vmatpush1.bf16.msra.mxu0 %v12314_v21  ;;  %10028 = vmatpush1.bf16.msra.mxu1 %v12316_v3  ;;  %v12372_v21 = vcombine.low %v424_v6, %v428_v8  ;;  %v12379_v3 = vcombine.high %v431_v13, %v435_v14  ;;  %v12421_v6 = vcombine.high %v472_v58, %v476_v60  ;;  %v491_v13 = vld [vmem:[#allocation2 + $0x7a0] sm:$0xff]  ;;  %v488_v14 = vld [vmem:[#allocation2 + $0x788] sm:$0xff] }
  0x8d   :  { %9546 = vmatprep.subr.bf16.mxu0 %v12323_v22  ;;  %10038 = vmatprep.subr.bf16.mxu1 %v12325_v23  ;;  %v439_v22 = vld [vmem:[#allocation2 + $0x600] sm:$0xff] }
  0x8e   :  { %v443_v23 = vld [vmem:[#allocation2 + $0x620] sm:$0xff] }
  0x8f   :  { %9538 = vmatmul.mubr.bf16.vlgmr.msra.gmra.mrb[0].mxu0 %v14383_v27  ;;  %10030 = vmatmul.mubr.bf16.vlgmr.msra.gmra.mrb[0].mxu1 %v14383_v27 }
  0x90   :  { %9547 = vmatpush1.bf16.msra.mxu0 %v12322_v30  ;;  %10039 = vmatpush1.bf16.msra.mxu1 %v12324_v31  ;;  %v12387_v30 = vcombine.high %v439_v22, %v443_v23  ;;  %v447_v31 = vld [vmem:[#allocation2 + $0x640] sm:$0xff] }
  0x91   :  { %9548 = vmatprep.subr.bf16.mxu0 %v12331_v32  ;;  %10040 = vmatprep.subr.bf16.mxu1 %v12333_v36  ;;  %v451_v32 = vld [vmem:[#allocation2 + $0x660] sm:$0xff]  ;;  %v12386_v36 = vcombine.low %v439_v22, %v443_v23 }
  0x92   :  { %9578 = vmatprep.mubr.bf16.mxu0 %v14385_v38  ;;  %10070 = vmatprep.mubr.bf16.mxu1 %v14385_v38  ;;  %v495_v22 = vld [vmem:[#allocation2 + $0x7c0] sm:$0xff] }
  0x93   :  { %v499_v23 = vld [vmem:[#allocation2 + $0x7e0] sm:$0xff] }
  0x94   :  { %9549 = vmatpush1.bf16.msra.mxu0 %v12330_v9  ;;  %10041 = vmatpush1.bf16.msra.mxu1 %v12332_v39  ;;  %v12395_v9 = vcombine.high %v447_v31, %v451_v32  ;;  %v455_v39 = vld [vmem:[#allocation2 + $0x680] sm:$0xff] }
  0x95   :  { %9550 = vmatprep.subr.bf16.mxu0 %v12339_v40  ;;  %10042 = vmatprep.subr.bf16.mxu1 %v12341_v44  ;;  %v459_v40 = vld [vmem:[#allocation2 + $0x6a0] sm:$0xff]  ;;  %v12394_v44 = vcombine.low %v447_v31, %v451_v32  ;;  %v12443_v31 = vcombine.high %v495_v22, %v499_v23 }
  0x96   :  { %v503_v32 = vld [vmem:[#allocation2 + $0x800] sm:$0xff] }
  0x98   :  { %9551 = vmatpush1.bf16.msra.mxu0 %v12338_v46  ;;  %10043 = vmatpush1.bf16.msra.mxu1 %v12340_v47  ;;  %v12403_v46 = vcombine.high %v455_v39, %v459_v40  ;;  %v463_v47 = vld [vmem:[#allocation2 + $0x6c0] sm:$0xff] }
  0x99   :  { %9552 = vmatprep.subr.bf16.mxu0 %v12347_v48  ;;  %10044 = vmatprep.subr.bf16.mxu1 %v12349_v53  ;;  %v467_v48 = vld [vmem:[#allocation2 + $0x6e0] sm:$0xff]  ;;  %v12402_v53 = vcombine.low %v455_v39, %v459_v40  ;;  %v12444_v39 = vcombine.low %v496_v24, %v500_v26  ;;  %v12451_v40 = vcombine.high %v503_v32, %v507_v33 }
  0x9a   :  { %v555_v26 = vld [vmem:[#allocation2 + $0x9a0] sm:$0xff] }
  0x9c   :  { %9553 = vmatpush1.bf16.msra.mxu0 %v12346_v55  ;;  %10045 = vmatpush1.bf16.msra.mxu1 %v12348_v56  ;;  %v12411_v55 = vcombine.high %v463_v47, %v467_v48  ;;  %v471_v56 = vld [vmem:[#allocation2 + $0x700] sm:$0xff] }
  0x9d   :  { %9554 = vmatprep.subr.bf16.mxu0 %v12355_v57  ;;  %10046 = vmatprep.subr.bf16.mxu1 %v12357_v61  ;;  %v475_v57 = vld [vmem:[#allocation2 + $0x720] sm:$0xff]  ;;  %v12410_v61 = vcombine.low %v463_v47, %v467_v48  ;;  %v14404_v47 = vpack.c.bf16 %v14377_v17, %v14377_v17  ;;  %v12450_v48 = vcombine.low %v503_v32, %v507_v33 }
  0x9e   :  { %v12418_v8 = vcombine.low %v471_v56, %v475_v57 }
  0xa0   :  { %9555 = vmatpush1.bf16.msra.mxu0 %v12354_v0  ;;  %10047 = vmatpush1.bf16.msra.mxu1 %v12356_v1  ;;  %v12412_v0 = vcombine.low %v464_v49, %v468_v51  ;;  %v12419_v1 = vcombine.high %v471_v56, %v475_v57  ;;  %v520_v56 = vld [vmem:[#allocation2 + $0x888] sm:$0xff] }
  0xa1   :  { %9556 = vmatprep.subr.bf16.mxu0 %v12363_v2  ;;  %10048 = vmatprep.subr.bf16.mxu1 %v12365_v7  ;;  %v483_v2 = vld [vmem:[#allocation2 + $0x760] sm:$0xff]  ;;  %v74_v7 = vld [vmem:[%s14677_s0 + $0x8] sm:$0xff] }
  0xa2   :  { %v80_v18 = vmul.f32 0.01, %v74_v7  ;;  %v524_v57 = vld [vmem:[#allocation2 + $0x8a8] sm:$0xff] }
  0xa4   :  { %9557 = vmatpush1.bf16.msra.mxu0 %v12362_v10  ;;  %10049 = vmatpush1.bf16.msra.mxu1 %v12364_v11  ;;  %v487_v10 = vld [vmem:[#allocation2 + $0x780] sm:$0xff]  ;;  %v12420_v11 = vcombine.low %v472_v58, %v476_v60  ;;  %v12469_v60 = vcombine.high %v520_v56, %v524_v57 }
  0xa5   :  { %9558 = vmatprep.subr.bf16.mxu0 %v12371_v12  ;;  %10050 = vmatprep.subr.bf16.mxu1 %v12373_v16  ;;  %v12427_v12 = vcombine.high %v479_v62, %v483_v2  ;;  %v12429_v16 = vcombine.high %v480_v4, %v484_v5 }
  0xa8   :  { %9559 = vmatpush1.bf16.msra.mxu0 %v12370_v20  ;;  %10051 = vmatpush1.bf16.msra.mxu1 %v12372_v21  ;;  %v12426_v20 = vcombine.low %v479_v62, %v483_v2  ;;  %v12428_v21 = vcombine.low %v480_v4, %v484_v5  ;;  %v531_v62 = vld [vmem:[#allocation2 + $0x8e0] sm:$0xff]  ;;  %v12468_v4 = vcombine.low %v520_v56, %v524_v57  ;;  %v576_v57 = vld [vmem:[#allocation2 + $0xa48] sm:$0xff] }
  0xa9   :  { %9560 = vmatprep.subr.bf16.mxu0 %v12379_v3  ;;  %10052 = vmatprep.subr.bf16.mxu1 %v12381_v25  ;;  %v12435_v3 = vcombine.high %v487_v10, %v491_v13  ;;  %v12437_v25 = vcombine.high %v488_v14, %v492_v15  ;;  %v579_v56 = vld [vmem:[#allocation2 + $0xa60] sm:$0xff] }
  0xac   :  { %9561 = vmatpush1.bf16.msra.mxu0 %v12378_v28  ;;  %10053 = vmatpush1.bf16.msra.mxu1 %v12380_v29  ;;  %v14394_v28 = vmax.f32 %v74_v7, %v80_v18  ;;  %v12434_v29 = vcombine.low %v487_v10, %v491_v13  ;;  %v535_v7 = vld [vmem:[#allocation2 + $0x900] sm:$0xff]  ;;  %v536_v10 = vld [vmem:[#allocation2 + $0x908] sm:$0xff] }
  0xad   :  { %9562 = vmatprep.subr.bf16.mxu0 %v12387_v30  ;;  %10054 = vmatprep.subr.bf16.mxu1 %v12389_v34  ;;  %v12436_v30 = vcombine.low %v488_v14, %v492_v15  ;;  %v504_v34 = vld [vmem:[#allocation2 + $0x808] sm:$0xff]  ;;  %v547_v18 = vld [vmem:[#allocation2 + $0x960] sm:$0xff] }
  0xb0   :  { %9563 = vmatpush1.bf16.msra.mxu0 %v12386_v36  ;;  %10055 = vmatpush1.bf16.msra.mxu1 %v12388_v37  ;;  %v508_v36 = vld [vmem:[#allocation2 + $0x828] sm:$0xff]  ;;  %v14398_v37 = vrot.slane %v14394_v28, %v14360_v63 }
  0xb1   :  { %9564 = vmatprep.subr.bf16.mxu0 %v12395_v9  ;;  %10056 = vmatprep.subr.bf16.mxu1 %v12397_v42  ;;  %v12442_v9 = vcombine.low %v495_v22, %v499_v23  ;;  %v515_v42 = vld [vmem:[#allocation2 + $0x860] sm:$0xff]  ;;  %v12452_v49 = vcombine.low %v504_v34, %v508_v36 }
  0xb2   :  { %v12458_v17 = vcombine.low %v511_v41, %v515_v42 }
  0xb4   :  { %9565 = vmatpush1.bf16.msra.mxu0 %v12394_v44  ;;  %10057 = vmatpush1.bf16.msra.mxu1 %v12396_v45  ;;  %v12453_v44 = vcombine.high %v504_v34, %v508_v36  ;;  %v516_v45 = vld [vmem:[#allocation2 + $0x868] sm:$0xff]  ;;  %v563_v36 = vld [vmem:[#allocation2 + $0x9e0] sm:$0xff] }
  0xb5   :  { %9566 = vmatprep.subr.bf16.mxu0 %v12403_v46  ;;  %10058 = vmatprep.subr.bf16.mxu1 %v12405_v50  ;;  %v129_v46 = vcombine.high %v14398_v37, %v14398_v37  ;;  %v12459_v50 = vcombine.high %v511_v41, %v515_v42  ;;  %v12461_v51 = vcombine.high %v512_v43, %v516_v45 }
  0xb6   :  { %v12460_v58 = vcombine.low %v512_v43, %v516_v45  ;;  %v571_v45 = vld [vmem:[#allocation2 + $0xa20] sm:$0xff] }
  0xb8   :  { %9567 = vmatpush1.bf16.msra.mxu0 %v12402_v53  ;;  %10059 = vmatpush1.bf16.msra.mxu1 %v12404_v54  ;;  %v519_v53 = vld [vmem:[#allocation2 + $0x880] sm:$0xff] }
  0xb9   :  { %9568 = vmatprep.subr.bf16.mxu0 %v12411_v55  ;;  %10060 = vmatprep.subr.bf16.mxu1 %v12413_v59  ;;  %v523_v54 = vld [vmem:[#allocation2 + $0x8a0] sm:$0xff]  ;;  %v14406_v55 = vpack.c.bf16 %v129_v46, %v129_v46  ;;  %v568_v46 = vld [vmem:[#allocation2 + $0xa08] sm:$0xff] }
  0xba   :  { %v12467_v59 = vcombine.high %v519_v53, %v523_v54  ;;  %v12466_v2 = vcombine.low %v519_v53, %v523_v54  ;;  %v575_v54 = vld [vmem:[#allocation2 + $0xa40] sm:$0xff] }
  0xbc   :  { %9569 = vmatpush1.bf16.msra.mxu0 %v12410_v61  ;;  %10061 = vmatpush1.bf16.msra.mxu1 %v12412_v0  ;;  %v527_v61 = vld [vmem:[#allocation2 + $0x8c0] sm:$0xff]  ;;  %v528_v0 = vld [vmem:[#allocation2 + $0x8c8] sm:$0xff] }
  0xbd   :  { %9570 = vmatprep.subr.bf16.mxu0 %v12419_v1  ;;  %10062 = vmatprep.subr.bf16.mxu1 %v12421_v6  ;;  %v532_v1 = vld [vmem:[#allocation2 + $0x8e8] sm:$0xff]  ;;  %v12475_v5 = vcombine.high %v527_v61, %v531_v62 }
  0xbe   :  { %v12477_v6 = vcombine.high %v528_v0, %v532_v1  ;;  %v12476_v13 = vcombine.low %v528_v0, %v532_v1  ;;  %v587_v0 = vld [vmem:[#allocation2 + $0xaa0] sm:$0xff]  ;;  %v584_v1 = vld [vmem:[#allocation2 + $0xa88] sm:$0xff] }
  0xc0   :  { %9571 = vmatpush1.bf16.msra.mxu0 %v12418_v8  ;;  %10063 = vmatpush1.bf16.msra.mxu1 %v12420_v11  ;;  %v539_v8 = vld [vmem:[#allocation2 + $0x920] sm:$0xff]  ;;  %v540_v11 = vld [vmem:[#allocation2 + $0x928] sm:$0xff] }
  0xc1   :  { %9572 = vmatprep.subr.bf16.mxu0 %v12427_v12  ;;  %10064 = vmatprep.subr.bf16.mxu1 %v12429_v16  ;;  %v12474_v12 = vcombine.low %v527_v61, %v531_v62  ;;  %v12483_v14 = vcombine.high %v535_v7, %v539_v8  ;;  %v12485_v15 = vcombine.high %v536_v10, %v540_v11  ;;  %v543_v16 = vld [vmem:[#allocation2 + $0x940] sm:$0xff] }
  0xc2   :  { %v12484_v22 = vcombine.low %v536_v10, %v540_v11  ;;  %v12491_v23 = vcombine.high %v543_v16, %v547_v18  ;;  %v583_v62 = vld [vmem:[#allocation2 + $0xa80] sm:$0xff]  ;;  %v592_v11 = vld [vmem:[#allocation2 + $0xac8] sm:$0xff] }
  0xc3   :  { %v595_v10 = vld [vmem:[#allocation2 + $0xae0] sm:$0xff] }
  0xc4   :  { %9573 = vmatpush1.bf16.msra.mxu0 %v12426_v20  ;;  %10065 = vmatpush1.bf16.msra.mxu1 %v12428_v21  ;;  %v544_v20 = vld [vmem:[#allocation2 + $0x948] sm:$0xff] }
  0xc5   :  { %9574 = vmatprep.subr.bf16.mxu0 %v12435_v3  ;;  %10066 = vmatprep.subr.bf16.mxu1 %v12437_v25  ;;  %v548_v21 = vld [vmem:[#allocation2 + $0x968] sm:$0xff]  ;;  %v12482_v3 = vcombine.low %v535_v7, %v539_v8  ;;  %v551_v25 = vld [vmem:[#allocation2 + $0x980] sm:$0xff] }
  0xc6   :  { %v12493_v24 = vcombine.high %v544_v20, %v548_v21  ;;  %v12492_v32 = vcombine.low %v544_v20, %v548_v21  ;;  %v12499_v33 = vcombine.high %v551_v25, %v555_v26  ;;  %v591_v8 = vld [vmem:[#allocation2 + $0xac0] sm:$0xff]  ;;  %v600_v21 = vld [vmem:[#allocation2 + $0xb08] sm:$0xff] }
  0xc7   :  { %v603_v20 = vld [vmem:[#allocation2 + $0xb20] sm:$0xff] }
  0xc8   :  { %9575 = vmatpush1.bf16.msra.mxu0 %v12434_v29  ;;  %10067 = vmatpush1.bf16.msra.mxu1 %v12436_v30  ;;  %v552_v29 = vld [vmem:[#allocation2 + $0x988] sm:$0xff] }
  0xc9   :  { %9576 = vmatprep.subr.bf16.mxu0 %v12443_v31  ;;  %10068 = vmatprep.subr.bf16.mxu1 %v12445_v35  ;;  %v556_v30 = vld [vmem:[#allocation2 + $0x9a8] sm:$0xff]  ;;  %v12490_v31 = vcombine.low %v543_v16, %v547_v18  ;;  %v559_v35 = vld [vmem:[#allocation2 + $0x9c0] sm:$0xff] }
  0xca   :  { %v12501_v34 = vcombine.high %v552_v29, %v556_v30  ;;  %v12500_v41 = vcombine.low %v552_v29, %v556_v30  ;;  %v12507_v42 = vcombine.high %v559_v35, %v563_v36  ;;  %v599_v18 = vld [vmem:[#allocation2 + $0xb00] sm:$0xff]  ;;  %v608_v30 = vld [vmem:[#allocation2 + $0xb48] sm:$0xff] }
  0xcb   :  { %v611_v29 = vld [vmem:[#allocation2 + $0xb60] sm:$0xff] }
  0xcc   :  { %9577 = vmatpush1.bf16.msra.mxu0 %v12442_v9  ;;  %10069 = vmatpush1.bf16.msra.mxu1 %v12444_v39  ;;  %v560_v9 = vld [vmem:[#allocation2 + $0x9c8] sm:$0xff] }
  0xcd   :  { %9587 = vmatprep.subr.bf16.mxu0 %v12451_v40  ;;  %10079 = vmatprep.subr.bf16.mxu1 %v12453_v44  ;;  %v564_v39 = vld [vmem:[#allocation2 + $0x9e8] sm:$0xff]  ;;  %v12498_v40 = vcombine.low %v551_v25, %v555_v26  ;;  %v567_v44 = vld [vmem:[#allocation2 + $0xa00] sm:$0xff] }
  0xce   :  { %v12509_v43 = vcombine.high %v560_v9, %v564_v39  ;;  %v607_v26 = vld [vmem:[#allocation2 + $0xb40] sm:$0xff] }
  0xcf   :  { %9579 = vmatmul.mubr.bf16.vlgmr.msra.gmra.mrb[0].mxu0 %v14404_v47  ;;  %10071 = vmatmul.mubr.bf16.vlgmr.msra.gmra.mrb[0].mxu1 %v14404_v47 }
  0xd0   :  { %9588 = vmatpush1.bf16.msra.mxu0 %v12450_v48  ;;  %10080 = vmatpush1.bf16.msra.mxu1 %v12452_v49  ;;  %v572_v48 = vld [vmem:[#allocation2 + $0xa28] sm:$0xff]  ;;  %v12506_v49 = vcombine.low %v559_v35, %v563_v36  ;;  %v615_v36 = vld [vmem:[#allocation2 + $0xb80] sm:$0xff] }
  0xd1   :  { %9589 = vmatprep.subr.bf16.mxu0 %v12459_v50  ;;  %10081 = vmatprep.subr.bf16.mxu1 %v12461_v51  ;;  %v12508_v50 = vcombine.low %v560_v9, %v564_v39  ;;  %v12515_v51 = vcombine.high %v567_v44, %v571_v45  ;;  %v12517_v53 = vcombine.high %v568_v46, %v572_v48  ;;  %v619_v9 = vld [vmem:[#allocation2 + $0xba0] sm:$0xff]  ;;  %v616_v39 = vld [vmem:[#allocation2 + $0xb88] sm:$0xff] }
  0xd2   :  { %9619 = vmatprep.mubr.bf16.mxu0 %v14406_v55  ;;  %10111 = vmatprep.mubr.bf16.mxu1 %v14406_v55 }
  0xd4   :  { %9590 = vmatpush1.bf16.msra.mxu0 %v12458_v17  ;;  %10082 = vmatpush1.bf16.msra.mxu1 %v12460_v58  ;;  %v580_v17 = vld [vmem:[#allocation2 + $0xa68] sm:$0xff]  ;;  %v12514_v58 = vcombine.low %v567_v44, %v571_v45  ;;  %v623_v45 = vld [vmem:[#allocation2 + $0xbc0] sm:$0xff] }
  0xd5   :  { %9591 = vmatprep.subr.bf16.mxu0 %v12467_v59  ;;  %10083 = vmatprep.subr.bf16.mxu1 %v12469_v60  ;;  %v12516_v59 = vcombine.low %v568_v46, %v572_v48  ;;  %v12523_v60 = vcombine.high %v575_v54, %v579_v56  ;;  %v12525_v61 = vcombine.high %v576_v57, %v580_v17  ;;  %v627_v46 = vld [vmem:[#allocation2 + $0xbe0] sm:$0xff] }
  0xd6   :  { %v114_v48 = vcombine.high %v14394_v28, %v14394_v28 }
  0xd8   :  { %9592 = vmatpush1.bf16.msra.mxu0 %v12466_v2  ;;  %10084 = vmatpush1.bf16.msra.mxu1 %v12468_v4  ;;  %v588_v2 = vld [vmem:[#allocation2 + $0xaa8] sm:$0xff]  ;;  %v12522_v4 = vcombine.low %v575_v54, %v579_v56  ;;  %v12571_v54 = vcombine.high %v623_v45, %v627_v46 }
  0xd9   :  { %9593 = vmatprep.subr.bf16.mxu0 %v12475_v5  ;;  %10085 = vmatprep.subr.bf16.mxu1 %v12477_v6  ;;  %v12524_v5 = vcombine.low %v576_v57, %v580_v17  ;;  %v12531_v6 = vcombine.high %v583_v62, %v587_v0  ;;  %v12533_v7 = vcombine.high %v584_v1, %v588_v2  ;;  %v631_v57 = vld [vmem:[#allocation2 + $0xc00] sm:$0xff] }
  0xda   :  { %v635_v17 = vld [vmem:[#allocation2 + $0xc20] sm:$0xff] }
  0xdc   :  { %9594 = vmatpush1.bf16.msra.mxu0 %v12474_v12  ;;  %10086 = vmatpush1.bf16.msra.mxu1 %v12476_v13  ;;  %v596_v12 = vld [vmem:[#allocation2 + $0xae8] sm:$0xff]  ;;  %v12530_v13 = vcombine.low %v583_v62, %v587_v0  ;;  %v12579_v62 = vcombine.high %v631_v57, %v635_v17 }
  0xdd   :  { %9595 = vmatprep.subr.bf16.mxu0 %v12483_v14  ;;  %10087 = vmatprep.subr.bf16.mxu1 %v12485_v15  ;;  %v12532_v14 = vcombine.low %v584_v1, %v588_v2  ;;  %v12539_v15 = vcombine.high %v591_v8, %v595_v10  ;;  %v12541_v16 = vcombine.high %v592_v11, %v596_v12  ;;  %v639_v1 = vld [vmem:[#allocation2 + $0xc40] sm:$0xff] }
  0xde   :  { %v643_v2 = vld [vmem:[#allocation2 + $0xc60] sm:$0xff] }
  0xe0   :  { %9596 = vmatpush1.bf16.msra.mxu0 %v12482_v3  ;;  %10088 = vmatpush1.bf16.msra.mxu1 %v12484_v22  ;;  %v604_v3 = vld [vmem:[#allocation2 + $0xb28] sm:$0xff]  ;;  %v12538_v22 = vcombine.low %v591_v8, %v595_v10  ;;  %v12578_v8 = vcombine.low %v631_v57, %v635_v17 }
  0xe1   :  { %9597 = vmatprep.subr.bf16.mxu0 %v12491_v23  ;;  %10089 = vmatprep.subr.bf16.mxu1 %v12493_v24  ;;  %v12540_v23 = vcombine.low %v592_v11, %v596_v12  ;;  %v12547_v24 = vcombine.high %v599_v18, %v603_v20  ;;  %v12549_v25 = vcombine.high %v600_v21, %v604_v3 }
  0xe2   :  { %v12587_v11 = vcombine.high %v639_v1, %v643_v2 }
  0xe4   :  { %9598 = vmatpush1.bf16.msra.mxu0 %v12490_v31  ;;  %10090 = vmatpush1.bf16.msra.mxu1 %v12492_v32  ;;  %v612_v31 = vld [vmem:[#allocation2 + $0xb68] sm:$0xff]  ;;  %v12546_v32 = vcombine.low %v599_v18, %v603_v20 }
  0xe5   :  { %9599 = vmatprep.subr.bf16.mxu0 %v12499_v33  ;;  %10091 = vmatprep.subr.bf16.mxu1 %v12501_v34  ;;  %v12548_v33 = vcombine.low %v600_v21, %v604_v3  ;;  %v12555_v34 = vcombine.high %v607_v26, %v611_v29  ;;  %v12557_v35 = vcombine.high %v608_v30, %v612_v31  ;;  %v652_v18 = vld [vmem:[#allocation2 + $0xca8] sm:$0xff] }
  0xe8   :  { %9600 = vmatpush1.bf16.msra.mxu0 %v12498_v40  ;;  %10092 = vmatpush1.bf16.msra.mxu1 %v12500_v41  ;;  %v620_v40 = vld [vmem:[#allocation2 + $0xba8] sm:$0xff]  ;;  %v12554_v41 = vcombine.low %v607_v26, %v611_v29 }
  0xe9   :  { %9601 = vmatprep.subr.bf16.mxu0 %v12507_v42  ;;  %10093 = vmatprep.subr.bf16.mxu1 %v12509_v43  ;;  %v12556_v42 = vcombine.low %v608_v30, %v612_v31  ;;  %v12563_v43 = vcombine.high %v615_v36, %v619_v9  ;;  %v12565_v44 = vcombine.high %v616_v39, %v620_v40 }
  0xec   :  { %9602 = vmatpush1.bf16.msra.mxu0 %v12506_v49  ;;  %10094 = vmatpush1.bf16.msra.mxu1 %v12508_v50  ;;  %v624_v49 = vld [vmem:[#allocation2 + $0xbc8] sm:$0xff] }
  0xed   :  { %9603 = vmatprep.subr.bf16.mxu0 %v12515_v51  ;;  %10095 = vmatprep.subr.bf16.mxu1 %v12517_v53  ;;  %v628_v50 = vld [vmem:[#allocation2 + $0xbe8] sm:$0xff]  ;;  %v12562_v51 = vcombine.low %v615_v36, %v619_v9  ;;  %v12564_v53 = vcombine.low %v616_v39, %v620_v40 }
  0xee   :  { %v12573_v56 = vcombine.high %v624_v49, %v628_v50  ;;  %v12572_v28 = vcombine.low %v624_v49, %v628_v50  ;;  %v679_v50 = vld [vmem:[#allocation2 + $0xd80] sm:$0xff] }
  0xf0   :  { %9604 = vmatpush1.bf16.msra.mxu0 %v12514_v58  ;;  %10096 = vmatpush1.bf16.msra.mxu1 %v12516_v59  ;;  %v14415_v58 = vrot.slane %v114_v48, %v14360_v63  ;;  %v632_v59 = vld [vmem:[#allocation2 + $0xc08] sm:$0xff] }
  0xf1   :  { %9605 = vmatprep.subr.bf16.mxu0 %v12523_v60  ;;  %10097 = vmatprep.subr.bf16.mxu1 %v12525_v61  ;;  %v636_v60 = vld [vmem:[#allocation2 + $0xc28] sm:$0xff]  ;;  %v12570_v61 = vcombine.low %v623_v45, %v627_v46 }
  0xf2   :  { %v12581_v0 = vcombine.high %v632_v59, %v636_v60  ;;  %v12580_v10 = vcombine.low %v632_v59, %v636_v60  ;;  %v687_v60 = vld [vmem:[#allocation2 + $0xdc0] sm:$0xff] }
  0xf4   :  { %9606 = vmatpush1.bf16.msra.mxu0 %v12522_v4  ;;  %10098 = vmatpush1.bf16.msra.mxu1 %v12524_v5  ;;  %v130_v4 = vcombine.high %v14415_v58, %v14415_v58  ;;  %v14421_v5 = vpack.c.bf16 %v14398_v37, %v14398_v37  ;;  %v12586_v37 = vcombine.low %v639_v1, %v643_v2 }
  0xf5   :  { %9607 = vmatprep.subr.bf16.mxu0 %v12531_v6  ;;  %10099 = vmatprep.subr.bf16.mxu1 %v12533_v7  ;;  %v640_v6 = vld [vmem:[#allocation2 + $0xc48] sm:$0xff] }
  0xf6   :  { %v644_v7 = vld [vmem:[#allocation2 + $0xc68] sm:$0xff] }
  0xf7   :  { %v12589_v12 = vcombine.high %v640_v6, %v644_v7  ;;  %v12588_v20 = vcombine.low %v640_v6, %v644_v7  ;;  %v695_v6 = vld [vmem:[#allocation2 + $0xe00] sm:$0xff] }
  0xf8   :  { %9608 = vmatpush1.bf16.msra.mxu0 %v12530_v13  ;;  %10100 = vmatpush1.bf16.msra.mxu1 %v12532_v14  ;;  %v647_v13 = vld [vmem:[#allocation2 + $0xc80] sm:$0xff] }
  0xf9   :  { %9609 = vmatprep.subr.bf16.mxu0 %v12539_v15  ;;  %10101 = vmatprep.subr.bf16.mxu1 %v12541_v16  ;;  %v651_v14 = vld [vmem:[#allocation2 + $0xca0] sm:$0xff]  ;;  %v14423_v15 = vpack.c.bf16 %v130_v4, %v130_v4  ;;  %v648_v16 = vld [vmem:[#allocation2 + $0xc88] sm:$0xff] }
  0xfa   :  { %v12595_v21 = vcombine.high %v647_v13, %v651_v14  ;;  %v12597_v3 = vcombine.high %v648_v16, %v652_v18  ;;  %v12594_v26 = vcombine.low %v647_v13, %v651_v14  ;;  %v12596_v29 = vcombine.low %v648_v16, %v652_v18  ;;  %v699_v7 = vld [vmem:[#allocation2 + $0xe20] sm:$0xff] }
  0xfb   :  { %v12643_v13 = vcombine.high %v695_v6, %v699_v7  ;;  %v703_v16 = vld [vmem:[#allocation2 + $0xe40] sm:$0xff] }
  0xfc   :  { %9610 = vmatpush1.bf16.msra.mxu0 %v12538_v22  ;;  %10102 = vmatpush1.bf16.msra.mxu1 %v12540_v23  ;;  %v655_v22 = vld [vmem:[#allocation2 + $0xcc0] sm:$0xff] }
  0xfd   :  { %9611 = vmatprep.subr.bf16.mxu0 %v12547_v24  ;;  %10103 = vmatprep.subr.bf16.mxu1 %v12549_v25  ;;  %v659_v23 = vld [vmem:[#allocation2 + $0xce0] sm:$0xff]  ;;  %v656_v24 = vld [vmem:[#allocation2 + $0xcc8] sm:$0xff] }
  0xfe   :  { %v660_v25 = vld [vmem:[#allocation2 + $0xce8] sm:$0xff]  ;;  %v12603_v30 = vcombine.high %v655_v22, %v659_v23  ;;  %v12602_v36 = vcombine.low %v655_v22, %v659_v23  ;;  %v707_v18 = vld [vmem:[#allocation2 + $0xe60] sm:$0xff] }
  0xff   :  { %v12605_v31 = vcombine.high %v656_v24, %v660_v25  ;;  %v12604_v9 = vcombine.low %v656_v24, %v660_v25  ;;  %v12651_v22 = vcombine.high %v703_v16, %v707_v18  ;;  %v711_v24 = vld [vmem:[#allocation2 + $0xe80] sm:$0xff] }
 0x100   :  { %9612 = vmatpush1.bf16.msra.mxu0 %v12546_v32  ;;  %10104 = vmatpush1.bf16.msra.mxu1 %v12548_v33  ;;  %v663_v32 = vld [vmem:[#allocation2 + $0xd00] sm:$0xff] }
 0x101   :  { %9613 = vmatprep.subr.bf16.mxu0 %v12555_v34  ;;  %10105 = vmatprep.subr.bf16.mxu1 %v12557_v35  ;;  %v667_v33 = vld [vmem:[#allocation2 + $0xd20] sm:$0xff]  ;;  %v664_v34 = vld [vmem:[#allocation2 + $0xd08] sm:$0xff] }
 0x102   :  { %v668_v35 = vld [vmem:[#allocation2 + $0xd28] sm:$0xff]  ;;  %v12611_v39 = vcombine.high %v663_v32, %v667_v33  ;;  %v12610_v45 = vcombine.low %v663_v32, %v667_v33  ;;  %v715_v25 = vld [vmem:[#allocation2 + $0xea0] sm:$0xff] }
 0x103   :  { %v12613_v40 = vcombine.high %v664_v34, %v668_v35  ;;  %v12612_v46 = vcombine.low %v664_v34, %v668_v35  ;;  %v12659_v32 = vcombine.high %v711_v24, %v715_v25  ;;  %v719_v34 = vld [vmem:[#allocation2 + $0xec0] sm:$0xff] }
 0x104   :  { %9614 = vmatpush1.bf16.msra.mxu0 %v12554_v41  ;;  %10106 = vmatpush1.bf16.msra.mxu1 %v12556_v42  ;;  %v671_v41 = vld [vmem:[#allocation2 + $0xd40] sm:$0xff] }
 0x105   :  { %9615 = vmatprep.subr.bf16.mxu0 %v12563_v43  ;;  %10107 = vmatprep.subr.bf16.mxu1 %v12565_v44  ;;  %v675_v42 = vld [vmem:[#allocation2 + $0xd60] sm:$0xff]  ;;  %v672_v43 = vld [vmem:[#allocation2 + $0xd48] sm:$0xff] }
 0x106   :  { %v676_v44 = vld [vmem:[#allocation2 + $0xd68] sm:$0xff]  ;;  %v12619_v48 = vcombine.high %v671_v41, %v675_v42  ;;  %v723_v35 = vld [vmem:[#allocation2 + $0xee0] sm:$0xff] }
 0x107   :  { %v12621_v49 = vcombine.high %v672_v43, %v676_v44  ;;  %v12620_v57 = vcombine.low %v672_v43, %v676_v44  ;;  %v727_v43 = vld [vmem:[#allocation2 + $0xf00] sm:$0xff] }
 0x108   :  { %9616 = vmatpush1.bf16.msra.mxu0 %v12562_v51  ;;  %10108 = vmatpush1.bf16.msra.mxu1 %v12564_v53  ;;  %v683_v51 = vld [vmem:[#allocation2 + $0xda0] sm:$0xff]  ;;  %v680_v53 = vld [vmem:[#allocation2 + $0xd88] sm:$0xff] }
 0x109   :  { %9617 = vmatprep.subr.bf16.mxu0 %v12571_v54  ;;  %10109 = vmatprep.subr.bf16.mxu1 %v12573_v56  ;;  %v684_v54 = vld [vmem:[#allocation2 + $0xda8] sm:$0xff]  ;;  %v12618_v56 = vcombine.low %v671_v41, %v675_v42  ;;  %v12627_v17 = vcombine.high %v679_v50, %v683_v51  ;;  %v12667_v41 = vcombine.high %v719_v34, %v723_v35  ;;  %v731_v44 = vld [vmem:[#allocation2 + $0xf20] sm:$0xff] }
 0x10a   :  { %v12629_v59 = vcombine.high %v680_v53, %v684_v54  ;;  %v12628_v1 = vcombine.low %v680_v53, %v684_v54  ;;  %v735_v53 = vld [vmem:[#allocation2 + $0xf40] sm:$0xff] }
 0x10b   :  { %v739_v54 = vld [vmem:[#allocation2 + $0xf60] sm:$0xff] }
 0x10c   :  { %9618 = vmatpush1.bf16.msra.mxu0 %v12570_v61  ;;  %10110 = vmatpush1.bf16.msra.mxu1 %v12572_v28  ;;  %v691_v61 = vld [vmem:[#allocation2 + $0xde0] sm:$0xff]  ;;  %v688_v28 = vld [vmem:[#allocation2 + $0xdc8] sm:$0xff] }
 0x10d   :  { %9628 = vmatprep.subr.bf16.mxu0 %v12579_v62  ;;  %10120 = vmatprep.subr.bf16.mxu1 %v12581_v0  ;;  %v692_v62 = vld [vmem:[#allocation2 + $0xde8] sm:$0xff]  ;;  %v12626_v0 = vcombine.low %v679_v50, %v683_v51  ;;  %v12635_v2 = vcombine.high %v687_v60, %v691_v61  ;;  %v12675_v50 = vcombine.high %v727_v43, %v731_v44 }
 0x10e   :  { %v12637_v4 = vcombine.high %v688_v28, %v692_v62 }
 0x10f   :  { %9620 = vmatmul.mubr.bf16.vlgmr.msra.gmra.mrb[0].mxu0 %v14421_v5  ;;  %10112 = vmatmul.mubr.bf16.vlgmr.msra.gmra.mrb[0].mxu1 %v14421_v5 }
 0x110   :  { %9629 = vmatpush1.bf16.msra.mxu0 %v12578_v8  ;;  %10121 = vmatpush1.bf16.msra.mxu1 %v12580_v10  ;;  %v696_v8 = vld [vmem:[#allocation2 + $0xe08] sm:$0xff] }
 0x111   :  { %9630 = vmatprep.subr.bf16.mxu0 %v12587_v11  ;;  %10122 = vmatprep.subr.bf16.mxu1 %v12589_v12  ;;  %v700_v10 = vld [vmem:[#allocation2 + $0xe28] sm:$0xff]  ;;  %v12634_v11 = vcombine.low %v687_v60, %v691_v61  ;;  %v12636_v12 = vcombine.low %v688_v28, %v692_v62  ;;  %v12683_v61 = vcombine.high %v735_v53, %v739_v54  ;;  %v743_v62 = vld [vmem:[#allocation2 + $0xf80] sm:$0xff] }
 0x112   :  { %9660 = vmatprep.mubr.bf16.mxu0 %v14423_v15  ;;  %10152 = vmatprep.mubr.bf16.mxu1 %v14423_v15  ;;  %v12645_v14 = vcombine.high %v696_v8, %v700_v10 }
 0x114   :  { %9631 = vmatpush1.bf16.msra.mxu0 %v12586_v37  ;;  %10123 = vmatpush1.bf16.msra.mxu1 %v12588_v20  ;;  %v704_v37 = vld [vmem:[#allocation2 + $0xe48] sm:$0xff] }
 0x115   :  { %9632 = vmatprep.subr.bf16.mxu0 %v12595_v21  ;;  %10124 = vmatprep.subr.bf16.mxu1 %v12597_v3  ;;  %v708_v20 = vld [vmem:[#allocation2 + $0xe68] sm:$0xff]  ;;  %v12642_v21 = vcombine.low %v695_v6, %v699_v7  ;;  %v12644_v3 = vcombine.low %v696_v8, %v700_v10  ;;  %v12682_v6 = vcombine.low %v735_v53, %v739_v54  ;;  %v783_v53 = vld [vmem:[#allocation2 + $0x10c0] sm:$0xff] }
 0x116   :  { %v12653_v23 = vcombine.high %v704_v37, %v708_v20  ;;  %v787_v54 = vld [vmem:[#allocation2 + $0x10e0] sm:$0xff] }
 0x118   :  { %9633 = vmatpush1.bf16.msra.mxu0 %v12594_v26  ;;  %10125 = vmatpush1.bf16.msra.mxu1 %v12596_v29  ;;  %v712_v26 = vld [vmem:[#allocation2 + $0xe88] sm:$0xff] }
 0x119   :  { %9634 = vmatprep.subr.bf16.mxu0 %v12603_v30  ;;  %10126 = vmatprep.subr.bf16.mxu1 %v12605_v31  ;;  %v716_v29 = vld [vmem:[#allocation2 + $0xea8] sm:$0xff]  ;;  %v12650_v30 = vcombine.low %v703_v16, %v707_v18  ;;  %v12652_v31 = vcombine.low %v704_v37, %v708_v20 }
 0x11a   :  { %v12661_v33 = vcombine.high %v712_v26, %v716_v29  ;;  %v756_v16 = vld [vmem:[#allocation2 + $0xfe8] sm:$0xff] }
 0x11c   :  { %9635 = vmatpush1.bf16.msra.mxu0 %v12602_v36  ;;  %10127 = vmatpush1.bf16.msra.mxu1 %v12604_v9  ;;  %v720_v36 = vld [vmem:[#allocation2 + $0xec8] sm:$0xff] }
 0x11d   :  { %9636 = vmatprep.subr.bf16.mxu0 %v12611_v39  ;;  %10128 = vmatprep.subr.bf16.mxu1 %v12613_v40  ;;  %v724_v9 = vld [vmem:[#allocation2 + $0xee8] sm:$0xff]  ;;  %v12658_v39 = vcombine.low %v711_v24, %v715_v25  ;;  %v12660_v40 = vcombine.low %v712_v26, %v716_v29 }
 0x11e   :  { %v12669_v42 = vcombine.high %v720_v36, %v724_v9  ;;  %v760_v24 = vld [vmem:[#allocation2 + $0x1008] sm:$0xff] }
 0x11f   :  { %v764_v25 = vld [vmem:[#allocation2 + $0x1028] sm:$0xff] }
 0x120   :  { %9637 = vmatpush1.bf16.msra.mxu0 %v12610_v45  ;;  %10129 = vmatpush1.bf16.msra.mxu1 %v12612_v46  ;;  %v728_v45 = vld [vmem:[#allocation2 + $0xf08] sm:$0xff] }
 0x121   :  { %9638 = vmatprep.subr.bf16.mxu0 %v12619_v48  ;;  %10130 = vmatprep.subr.bf16.mxu1 %v12621_v49  ;;  %v732_v46 = vld [vmem:[#allocation2 + $0xf28] sm:$0xff]  ;;  %v12666_v48 = vcombine.low %v719_v34, %v723_v35  ;;  %v12668_v49 = vcombine.low %v720_v36, %v724_v9  ;;  %v14442_v35 = vpack.c.bf16 %v14415_v58, %v14415_v58 }
 0x122   :  { %v12677_v51 = vcombine.high %v728_v45, %v732_v46  ;;  %v12676_v60 = vcombine.low %v728_v45, %v732_v46  ;;  %v768_v36 = vld [vmem:[#allocation2 + $0x1048] sm:$0xff] }
 0x123   :  { %v772_v9 = vld [vmem:[#allocation2 + $0x1068] sm:$0xff] }
 0x124   :  { %9639 = vmatpush1.bf16.msra.mxu0 %v12618_v56  ;;  %10131 = vmatpush1.bf16.msra.mxu1 %v12620_v57  ;;  %v736_v56 = vld [vmem:[#allocation2 + $0xf48] sm:$0xff] }
 0x125   :  { %9640 = vmatprep.subr.bf16.mxu0 %v12627_v17  ;;  %10132 = vmatprep.subr.bf16.mxu1 %v12629_v59  ;;  %v740_v57 = vld [vmem:[#allocation2 + $0xf68] sm:$0xff]  ;;  %v75_v17 = vld [vmem:[%s14677_s0 + $0x10] sm:$0xff]  ;;  %v12674_v59 = vcombine.low %v727_v43, %v731_v44  ;;  %v775_v43 = vld [vmem:[#allocation2 + $0x1080] sm:$0xff] }
 0x126   :  { %v12685_v28 = vcombine.high %v736_v56, %v740_v57  ;;  %v12684_v7 = vcombine.low %v736_v56, %v740_v57  ;;  %v779_v44 = vld [vmem:[#allocation2 + $0x10a0] sm:$0xff]  ;;  %v776_v46 = vld [vmem:[#allocation2 + $0x1088] sm:$0xff] }
 0x127   :  { %v784_v56 = vld [vmem:[#allocation2 + $0x10c8] sm:$0xff] }
 0x128   :  { %9641 = vmatpush1.bf16.msra.mxu0 %v12626_v0  ;;  %10133 = vmatpush1.bf16.msra.mxu1 %v12628_v1  ;;  %v747_v0 = vld [vmem:[#allocation2 + $0xfa0] sm:$0xff]  ;;  %v81_v1 = vmul.f32 0.01, %v75_v17  ;;  %v788_v57 = vld [vmem:[#allocation2 + $0x10e8] sm:$0xff] }
 0x129   :  { %9642 = vmatprep.subr.bf16.mxu0 %v12635_v2  ;;  %10134 = vmatprep.subr.bf16.mxu1 %v12637_v4  ;;  %v744_v2 = vld [vmem:[#allocation2 + $0xf88] sm:$0xff]  ;;  %v12691_v8 = vcombine.high %v743_v62, %v747_v0  ;;  %v12690_v18 = vcombine.low %v743_v62, %v747_v0  ;;  %v795_v62 = vld [vmem:[#allocation2 + $0x1120] sm:$0xff] }
 0x12a   :  { %v748_v4 = vld [vmem:[#allocation2 + $0xfa8] sm:$0xff] }
 0x12b   :  { %v12693_v10 = vcombine.high %v744_v2, %v748_v4  ;;  %v12692_v37 = vcombine.low %v744_v2, %v748_v4  ;;  %v792_v0 = vld [vmem:[#allocation2 + $0x1108] sm:$0xff]  ;;  %v12730_v2 = vcombine.low %v783_v53, %v787_v54  ;;  %v12732_v4 = vcombine.low %v784_v56, %v788_v57 }
 0x12c   :  { %9643 = vmatpush1.bf16.msra.mxu0 %v12634_v11  ;;  %10135 = vmatpush1.bf16.msra.mxu1 %v12636_v12  ;;  %v751_v11 = vld [vmem:[#allocation2 + $0xfc0] sm:$0xff] }
 0x12d   :  { %9644 = vmatprep.subr.bf16.mxu0 %v12643_v13  ;;  %10136 = vmatprep.subr.bf16.mxu1 %v12645_v14  ;;  %v755_v12 = vld [vmem:[#allocation2 + $0xfe0] sm:$0xff]  ;;  %v14432_v13 = vmax.f32 %v75_v17, %v81_v1  ;;  %v752_v14 = vld [vmem:[#allocation2 + $0xfc8] sm:$0xff]  ;;  %v12722_v17 = vcombine.low %v775_v43, %v779_v44 }
 0x12e   :  { %v12699_v20 = vcombine.high %v751_v11, %v755_v12  ;;  %v12698_v26 = vcombine.low %v751_v11, %v755_v12  ;;  %v12700_v29 = vcombine.low %v752_v14, %v756_v16  ;;  %v796_v1 = vld [vmem:[#allocation2 + $0x1128] sm:$0xff] }
 0x12f   :  { %v800_v11 = vld [vmem:[#allocation2 + $0x1148] sm:$0xff] }
 0x130   :  { %9645 = vmatpush1.bf16.msra.mxu0 %v12642_v21  ;;  %10137 = vmatpush1.bf16.msra.mxu1 %v12644_v3  ;;  %v12701_v21 = vcombine.high %v752_v14, %v756_v16  ;;  %v759_v3 = vld [vmem:[#allocation2 + $0x1000] sm:$0xff]  ;;  %v804_v12 = vld [vmem:[#allocation2 + $0x1168] sm:$0xff]  ;;  %v12740_v16 = vcombine.low %v792_v0, %v796_v1 }
 0x131   :  { %9646 = vmatprep.subr.bf16.mxu0 %v12651_v22  ;;  %10138 = vmatprep.subr.bf16.mxu1 %v12653_v23  ;;  %v763_v22 = vld [vmem:[#allocation2 + $0x1020] sm:$0xff]  ;;  %v14436_v23 = vrot.slane %v14432_v13, %v14360_v63 }
 0x133   :  { %v146_v34 = vcombine.high %v14436_v23, %v14436_v23 }
 0x134   :  { %9647 = vmatpush1.bf16.msra.mxu0 %v12650_v30  ;;  %10139 = vmatpush1.bf16.msra.mxu1 %v12652_v31  ;;  %v12707_v30 = vcombine.high %v759_v3, %v763_v22  ;;  %v12709_v31 = vcombine.high %v760_v24, %v764_v25 }
 0x135   :  { %9648 = vmatprep.subr.bf16.mxu0 %v12659_v32  ;;  %10140 = vmatprep.subr.bf16.mxu1 %v12661_v33  ;;  %v767_v32 = vld [vmem:[#allocation2 + $0x1040] sm:$0xff]  ;;  %v14444_v45 = vpack.c.bf16 %v146_v34, %v146_v34 }
 0x136   :  { %v771_v33 = vld [vmem:[#allocation2 + $0x1060] sm:$0xff] }
 0x137   :  { %v12714_v58 = vcombine.low %v767_v32, %v771_v33 }
 0x138   :  { %9649 = vmatpush1.bf16.msra.mxu0 %v12658_v39  ;;  %10141 = vmatpush1.bf16.msra.mxu1 %v12660_v40  ;;  %v12706_v39 = vcombine.low %v759_v3, %v763_v22  ;;  %v12708_v40 = vcombine.low %v760_v24, %v764_v25  ;;  %v808_v3 = vld [vmem:[#allocation2 + $0x1188] sm:$0xff]  ;;  %v12748_v25 = vcombine.low %v800_v11, %v804_v12 }
 0x139   :  { %9650 = vmatprep.subr.bf16.mxu0 %v12667_v41  ;;  %10142 = vmatprep.subr.bf16.mxu1 %v12669_v42  ;;  %v12715_v41 = vcombine.high %v767_v32, %v771_v33  ;;  %v12717_v42 = vcombine.high %v768_v36, %v772_v9  ;;  %v812_v22 = vld [vmem:[#allocation2 + $0x11a8] sm:$0xff] }
 0x13a   :  { %v816_v32 = vld [vmem:[#allocation2 + $0x11c8] sm:$0xff] }
 0x13b   :  { %v820_v33 = vld [vmem:[#allocation2 + $0x11e8] sm:$0xff] }
 0x13c   :  { %9651 = vmatpush1.bf16.msra.mxu0 %v12666_v48  ;;  %10143 = vmatpush1.bf16.msra.mxu1 %v12668_v49  ;;  %v780_v48 = vld [vmem:[#allocation2 + $0x10a8] sm:$0xff]  ;;  %v12716_v49 = vcombine.low %v768_v36, %v772_v9  ;;  %v12756_v36 = vcombine.low %v808_v3, %v812_v22 }
 0x13d   :  { %9652 = vmatprep.subr.bf16.mxu0 %v12675_v50  ;;  %10144 = vmatprep.subr.bf16.mxu1 %v12677_v51  ;;  %v12723_v50 = vcombine.high %v775_v43, %v779_v44  ;;  %v12725_v51 = vcombine.high %v776_v46, %v780_v48  ;;  %v828_v43 = vld [vmem:[#allocation2 + $0x1228] sm:$0xff] }
 0x140   :  { %9653 = vmatpush1.bf16.msra.mxu0 %v12674_v59  ;;  %10145 = vmatpush1.bf16.msra.mxu1 %v12676_v60  ;;  %v12724_v59 = vcombine.low %v776_v46, %v780_v48  ;;  %v12731_v60 = vcombine.high %v783_v53, %v787_v54  ;;  %v12764_v46 = vcombine.low %v816_v32, %v820_v33  ;;  %v836_v53 = vld [vmem:[#allocation2 + $0x1268] sm:$0xff] }
 0x141   :  { %9654 = vmatprep.subr.bf16.mxu0 %v12683_v61  ;;  %10146 = vmatprep.subr.bf16.mxu1 %v12685_v28  ;;  %v12733_v61 = vcombine.high %v784_v56, %v788_v57  ;;  %v791_v28 = vld [vmem:[#allocation2 + $0x1100] sm:$0xff] }
 0x142   :  { %v12738_v14 = vcombine.low %v791_v28, %v795_v62 }
 0x144   :  { %9655 = vmatpush1.bf16.msra.mxu0 %v12682_v6  ;;  %10147 = vmatpush1.bf16.msra.mxu1 %v12684_v7  ;;  %v12739_v6 = vcombine.high %v791_v28, %v795_v62  ;;  %v12741_v7 = vcombine.high %v792_v0, %v796_v1  ;;  %v844_v28 = vld [vmem:[#allocation2 + $0x12a8] sm:$0xff] }
 0x145   :  { %9656 = vmatprep.subr.bf16.mxu0 %v12691_v8  ;;  %10148 = vmatprep.subr.bf16.mxu1 %v12693_v10  ;;  %v799_v8 = vld [vmem:[#allocation2 + $0x1140] sm:$0xff] }
 0x146   :  { %v803_v10 = vld [vmem:[#allocation2 + $0x1160] sm:$0xff] }
 0x147   :  { %v12746_v24 = vcombine.low %v799_v8, %v803_v10 }
 0x148   :  { %9657 = vmatpush1.bf16.msra.mxu0 %v12690_v18  ;;  %10149 = vmatpush1.bf16.msra.mxu1 %v12692_v37  ;;  %v12747_v18 = vcombine.high %v799_v8, %v803_v10  ;;  %v12749_v37 = vcombine.high %v800_v11, %v804_v12  ;;  %v852_v8 = vld [vmem:[#allocation2 + $0x12e8] sm:$0xff] }
 0x149   :  { %9658 = vmatprep.subr.bf16.mxu0 %v12699_v20  ;;  %10150 = vmatprep.subr.bf16.mxu1 %v12701_v21  ;;  %v807_v20 = vld [vmem:[#allocation2 + $0x1180] sm:$0xff] }
 0x14a   :  { %v811_v21 = vld [vmem:[#allocation2 + $0x11a0] sm:$0xff] }
 0x14b   :  { %v12754_v34 = vcombine.low %v807_v20, %v811_v21 }
 0x14c   :  { %9659 = vmatpush1.bf16.msra.mxu0 %v12698_v26  ;;  %10151 = vmatpush1.bf16.msra.mxu1 %v12700_v29  ;;  %v12755_v26 = vcombine.high %v807_v20, %v811_v21  ;;  %v12757_v29 = vcombine.high %v808_v3, %v812_v22  ;;  %v860_v20 = vld [vmem:[#allocation2 + $0x1328] sm:$0xff] }
 0x14d   :  { %9669 = vmatprep.subr.bf16.mxu0 %v12707_v30  ;;  %10161 = vmatprep.subr.bf16.mxu1 %v12709_v31  ;;  %v815_v30 = vld [vmem:[#allocation2 + $0x11c0] sm:$0xff] }
 0x14e   :  { %v819_v31 = vld [vmem:[#allocation2 + $0x11e0] sm:$0xff] }
 0x14f   :  { %9661 = vmatmul.mubr.bf16.vlgmr.msra.gmra.mrb[0].mxu0 %v14442_v35  ;;  %10153 = vmatmul.mubr.bf16.vlgmr.msra.gmra.mrb[0].mxu1 %v14442_v35  ;;  %v12763_v9 = vcombine.high %v815_v30, %v819_v31  ;;  %v12762_v44 = vcombine.low %v815_v30, %v819_v31  ;;  %v868_v30 = vld [vmem:[#allocation2 + $0x1368] sm:$0xff] }
 0x150   :  { %9670 = vmatpush1.bf16.msra.mxu0 %v12706_v39  ;;  %10162 = vmatpush1.bf16.msra.mxu1 %v12708_v40  ;;  %v12765_v39 = vcombine.high %v816_v32, %v820_v33  ;;  %v823_v40 = vld [vmem:[#allocation2 + $0x1200] sm:$0xff] }
 0x151   :  { %9671 = vmatprep.subr.bf16.mxu0 %v12715_v41  ;;  %10163 = vmatprep.subr.bf16.mxu1 %v12717_v42  ;;  %v827_v41 = vld [vmem:[#allocation2 + $0x1220] sm:$0xff]  ;;  %v824_v42 = vld [vmem:[#allocation2 + $0x1208] sm:$0xff] }
 0x152   :  { %9701 = vmatprep.mubr.bf16.mxu0 %v14444_v45  ;;  %10193 = vmatprep.mubr.bf16.mxu1 %v14444_v45  ;;  %v12771_v48 = vcombine.high %v823_v40, %v827_v41  ;;  %v12770_v54 = vcombine.low %v823_v40, %v827_v41  ;;  %v12772_v56 = vcombine.low %v824_v42, %v828_v43  ;;  %v876_v40 = vld [vmem:[#allocation2 + $0x13a8] sm:$0xff] }
 0x154   :  { %9672 = vmatpush1.bf16.msra.mxu0 %v12714_v58  ;;  %10164 = vmatpush1.bf16.msra.mxu1 %v12716_v49  ;;  %v12773_v58 = vcombine.high %v824_v42, %v828_v43  ;;  %v831_v49 = vld [vmem:[#allocation2 + $0x1240] sm:$0xff] }
 0x155   :  { %9673 = vmatprep.subr.bf16.mxu0 %v12723_v50  ;;  %10165 = vmatprep.subr.bf16.mxu1 %v12725_v51  ;;  %v835_v50 = vld [vmem:[#allocation2 + $0x1260] sm:$0xff]  ;;  %v832_v51 = vld [vmem:[#allocation2 + $0x1248] sm:$0xff] }
 0x156   :  { %v12779_v57 = vcombine.high %v831_v49, %v835_v50  ;;  %v12778_v62 = vcombine.low %v831_v49, %v835_v50  ;;  %v12780_v0 = vcombine.low %v832_v51, %v836_v53  ;;  %v880_v49 = vld [vmem:[#allocation2 + $0x13c8] sm:$0xff] }
 0x157   :  { %v884_v50 = vld [vmem:[#allocation2 + $0x13e8] sm:$0xff] }
 0x158   :  { %9674 = vmatpush1.bf16.msra.mxu0 %v12722_v17  ;;  %10166 = vmatpush1.bf16.msra.mxu1 %v12724_v59  ;;  %v12781_v17 = vcombine.high %v832_v51, %v836_v53  ;;  %v839_v59 = vld [vmem:[#allocation2 + $0x1280] sm:$0xff] }
 0x159   :  { %9675 = vmatprep.subr.bf16.mxu0 %v12731_v60  ;;  %10167 = vmatprep.subr.bf16.mxu1 %v12733_v61  ;;  %v843_v60 = vld [vmem:[#allocation2 + $0x12a0] sm:$0xff]  ;;  %v840_v61 = vld [vmem:[#allocation2 + $0x1288] sm:$0xff] }
 0x15a   :  { %v12787_v1 = vcombine.high %v839_v59, %v843_v60  ;;  %v12786_v10 = vcombine.low %v839_v59, %v843_v60  ;;  %v12788_v11 = vcombine.low %v840_v61, %v844_v28  ;;  %v888_v60 = vld [vmem:[#allocation2 + $0x1408] sm:$0xff] }
 0x15c   :  { %9676 = vmatpush1.bf16.msra.mxu0 %v12730_v2  ;;  %10168 = vmatpush1.bf16.msra.mxu1 %v12732_v4  ;;  %v12789_v2 = vcombine.high %v840_v61, %v844_v28  ;;  %v847_v4 = vld [vmem:[#allocation2 + $0x12c0] sm:$0xff]  ;;  %v892_v61 = vld [vmem:[#allocation2 + $0x1428] sm:$0xff] }
 0x15d   :  { %9677 = vmatprep.subr.bf16.mxu0 %v12739_v6  ;;  %10169 = vmatprep.subr.bf16.mxu1 %v12741_v7  ;;  %v851_v6 = vld [vmem:[#allocation2 + $0x12e0] sm:$0xff]  ;;  %v848_v7 = vld [vmem:[#allocation2 + $0x12c8] sm:$0xff] }
 0x15e   :  { %v12795_v12 = vcombine.high %v847_v4, %v851_v6  ;;  %v12794_v21 = vcombine.low %v847_v4, %v851_v6  ;;  %v12796_v3 = vcombine.low %v848_v7, %v852_v8  ;;  %v14459_v6 = vpack.c.bf16 %v14436_v23, %v14436_v23 }
 0x160   :  { %9678 = vmatpush1.bf16.msra.mxu0 %v12738_v14  ;;  %10170 = vmatpush1.bf16.msra.mxu1 %v12740_v16  ;;  %v12797_v14 = vcombine.high %v848_v7, %v852_v8  ;;  %v855_v16 = vld [vmem:[#allocation2 + $0x1300] sm:$0xff]  ;;  %v896_v7 = vld [vmem:[#allocation2 + $0x1448] sm:$0xff] }
 0x161   :  { %9679 = vmatprep.subr.bf16.mxu0 %v12747_v18  ;;  %10171 = vmatprep.subr.bf16.mxu1 %v12749_v37  ;;  %v859_v18 = vld [vmem:[#allocation2 + $0x1320] sm:$0xff]  ;;  %v856_v37 = vld [vmem:[#allocation2 + $0x1308] sm:$0xff] }
 0x162   :  { %v12803_v22 = vcombine.high %v855_v16, %v859_v18  ;;  %v12802_v31 = vcombine.low %v855_v16, %v859_v18  ;;  %v12804_v32 = vcombine.low %v856_v37, %v860_v20  ;;  %v900_v8 = vld [vmem:[#allocation2 + $0x1468] sm:$0xff]  ;;  %v903_v16 = vld [vmem:[#allocation2 + $0x1480] sm:$0xff] }
 0x163   :  { %v907_v18 = vld [vmem:[#allocation2 + $0x14a0] sm:$0xff] }
 0x164   :  { %9680 = vmatpush1.bf16.msra.mxu0 %v12746_v24  ;;  %10172 = vmatpush1.bf16.msra.mxu1 %v12748_v25  ;;  %v12805_v24 = vcombine.high %v856_v37, %v860_v20  ;;  %v863_v25 = vld [vmem:[#allocation2 + $0x1340] sm:$0xff]  ;;  %v904_v20 = vld [vmem:[#allocation2 + $0x1488] sm:$0xff] }
 0x165   :  { %9681 = vmatprep.subr.bf16.mxu0 %v12755_v26  ;;  %10173 = vmatprep.subr.bf16.mxu1 %v12757_v29  ;;  %v867_v26 = vld [vmem:[#allocation2 + $0x1360] sm:$0xff]  ;;  %v864_v29 = vld [vmem:[#allocation2 + $0x1348] sm:$0xff] }
 0x166   :  { %v12811_v33 = vcombine.high %v863_v25, %v867_v26  ;;  %v12810_v41 = vcombine.low %v863_v25, %v867_v26  ;;  %v12812_v42 = vcombine.low %v864_v29, %v868_v30  ;;  %v911_v25 = vld [vmem:[#allocation2 + $0x14c0] sm:$0xff] }
 0x167   :  { %v915_v26 = vld [vmem:[#allocation2 + $0x14e0] sm:$0xff] }
 0x168   :  { %9682 = vmatpush1.bf16.msra.mxu0 %v12754_v34  ;;  %10174 = vmatpush1.bf16.msra.mxu1 %v12756_v36  ;;  %v12813_v34 = vcombine.high %v864_v29, %v868_v30  ;;  %v871_v36 = vld [vmem:[#allocation2 + $0x1380] sm:$0xff]  ;;  %v912_v29 = vld [vmem:[#allocation2 + $0x14c8] sm:$0xff] }
 0x169   :  { %9683 = vmatprep.subr.bf16.mxu0 %v12763_v9  ;;  %10175 = vmatprep.subr.bf16.mxu1 %v12765_v39  ;;  %v875_v9 = vld [vmem:[#allocation2 + $0x13a0] sm:$0xff]  ;;  %v872_v39 = vld [vmem:[#allocation2 + $0x1388] sm:$0xff] }
 0x16a   :  { %v12819_v43 = vcombine.high %v871_v36, %v875_v9  ;;  %v12818_v51 = vcombine.low %v871_v36, %v875_v9  ;;  %v12820_v53 = vcombine.low %v872_v39, %v876_v40  ;;  %v916_v30 = vld [vmem:[#allocation2 + $0x14e8] sm:$0xff]  ;;  %v919_v36 = vld [vmem:[#allocation2 + $0x1500] sm:$0xff] }
 0x16b   :  { %v923_v9 = vld [vmem:[#allocation2 + $0x1520] sm:$0xff] }
 0x16c   :  { %9684 = vmatpush1.bf16.msra.mxu0 %v12762_v44  ;;  %10176 = vmatpush1.bf16.msra.mxu1 %v12764_v46  ;;  %v12821_v44 = vcombine.high %v872_v39, %v876_v40  ;;  %v879_v46 = vld [vmem:[#allocation2 + $0x13c0] sm:$0xff]  ;;  %v920_v39 = vld [vmem:[#allocation2 + $0x1508] sm:$0xff] }
 0x16d   :  { %9685 = vmatprep.subr.bf16.mxu0 %v12771_v48  ;;  %10177 = vmatprep.subr.bf16.mxu1 %v12773_v58  ;;  %v883_v48 = vld [vmem:[#allocation2 + $0x13e0] sm:$0xff]  ;;  %v131_v58 = vcombine.high %v14432_v13, %v14432_v13  ;;  %v12828_v13 = vcombine.low %v880_v49, %v884_v50  ;;  %v924_v40 = vld [vmem:[#allocation2 + $0x1528] sm:$0xff] }
 0x16e   :  { %v12826_v28 = vcombine.low %v879_v46, %v883_v48 }
 0x16f   :  { %v14453_v59 = vrot.slane %v131_v58, %v14360_v63  ;;  %v928_v58 = vld [vmem:[#allocation2 + $0x1548] sm:$0xff] }
 0x170   :  { %9686 = vmatpush1.bf16.msra.mxu0 %v12770_v54  ;;  %10178 = vmatpush1.bf16.msra.mxu1 %v12772_v56  ;;  %v12827_v54 = vcombine.high %v879_v46, %v883_v48  ;;  %v12829_v56 = vcombine.high %v880_v49, %v884_v50  ;;  %v927_v46 = vld [vmem:[#allocation2 + $0x1540] sm:$0xff]  ;;  %v932_v49 = vld [vmem:[#allocation2 + $0x1568] sm:$0xff]  ;;  %v12866_v50 = vcombine.low %v919_v36, %v923_v9 }
 0x171   :  { %9687 = vmatprep.subr.bf16.mxu0 %v12779_v57  ;;  %10179 = vmatprep.subr.bf16.mxu1 %v12781_v17  ;;  %v887_v57 = vld [vmem:[#allocation2 + $0x1400] sm:$0xff]  ;;  %v147_v4 = vcombine.high %v14453_v59, %v14453_v59 }
 0x172   :  { %v891_v17 = vld [vmem:[#allocation2 + $0x1420] sm:$0xff] }
 0x173   :  { %v14461_v37 = vpack.c.bf16 %v147_v4, %v147_v4  ;;  %v931_v48 = vld [vmem:[#allocation2 + $0x1560] sm:$0xff]  ;;  %v948_v4 = vld [vmem:[#allocation2 + $0x15e8] sm:$0xff] }
 0x174   :  { %9688 = vmatpush1.bf16.msra.mxu0 %v12778_v62  ;;  %10180 = vmatpush1.bf16.msra.mxu1 %v12780_v0  ;;  %v12835_v62 = vcombine.high %v887_v57, %v891_v17  ;;  %v12837_v0 = vcombine.high %v888_v60, %v892_v61 }
 0x175   :  { %9689 = vmatprep.subr.bf16.mxu0 %v12787_v1  ;;  %10181 = vmatprep.subr.bf16.mxu1 %v12789_v2  ;;  %v895_v1 = vld [vmem:[#allocation2 + $0x1440] sm:$0xff] }
 0x176   :  { %v899_v2 = vld [vmem:[#allocation2 + $0x1460] sm:$0xff] }
 0x177   :  { %v12842_v23 = vcombine.low %v895_v1, %v899_v2 }
 0x178   :  { %9690 = vmatpush1.bf16.msra.mxu0 %v12786_v10  ;;  %10182 = vmatpush1.bf16.msra.mxu1 %v12788_v11  ;;  %v12834_v10 = vcombine.low %v887_v57, %v891_v17  ;;  %v12836_v11 = vcombine.low %v888_v60, %v892_v61  ;;  %v939_v57 = vld [vmem:[#allocation2 + $0x15a0] sm:$0xff]  ;;  %v936_v17 = vld [vmem:[#allocation2 + $0x1588] sm:$0xff]  ;;  %v12874_v61 = vcombine.low %v927_v46, %v931_v48 }
 0x179   :  { %9691 = vmatprep.subr.bf16.mxu0 %v12795_v12  ;;  %10183 = vmatprep.subr.bf16.mxu1 %v12797_v14  ;;  %v12843_v12 = vcombine.high %v895_v1, %v899_v2  ;;  %v12845_v14 = vcombine.high %v896_v7, %v900_v8  ;;  %v940_v60 = vld [vmem:[#allocation2 + $0x15a8] sm:$0xff]  ;;  %v947_v1 = vld [vmem:[#allocation2 + $0x15e0] sm:$0xff] }
 0x17a   :  { %v944_v2 = vld [vmem:[#allocation2 + $0x15c8] sm:$0xff] }
 0x17c   :  { %9692 = vmatpush1.bf16.msra.mxu0 %v12794_v21  ;;  %10184 = vmatpush1.bf16.msra.mxu1 %v12796_v3  ;;  %v908_v21 = vld [vmem:[#allocation2 + $0x14a8] sm:$0xff]  ;;  %v12844_v3 = vcombine.low %v896_v7, %v900_v8  ;;  %v12884_v8 = vcombine.low %v936_v17, %v940_v60 }
 0x17d   :  { %9693 = vmatprep.subr.bf16.mxu0 %v12803_v22  ;;  %10185 = vmatprep.subr.bf16.mxu1 %v12805_v24  ;;  %v12851_v22 = vcombine.high %v903_v16, %v907_v18  ;;  %v12853_v24 = vcombine.high %v904_v20, %v908_v21 }
 0x180   :  { %9694 = vmatpush1.bf16.msra.mxu0 %v12802_v31  ;;  %10186 = vmatpush1.bf16.msra.mxu1 %v12804_v32  ;;  %v12850_v31 = vcombine.low %v903_v16, %v907_v18  ;;  %v12852_v32 = vcombine.low %v904_v20, %v908_v21  ;;  %v952_v16 = vld [vmem:[#allocation2 + $0x1608] sm:$0xff]  ;;  %v12892_v21 = vcombine.low %v944_v2, %v948_v4 }
 0x181   :  { %9695 = vmatprep.subr.bf16.mxu0 %v12811_v33  ;;  %10187 = vmatprep.subr.bf16.mxu1 %v12813_v34  ;;  %v12859_v33 = vcombine.high %v911_v25, %v915_v26  ;;  %v12861_v34 = vcombine.high %v912_v29, %v916_v30  ;;  %v956_v18 = vld [vmem:[#allocation2 + $0x1628] sm:$0xff] }
 0x184   :  { %9696 = vmatpush1.bf16.msra.mxu0 %v12810_v41  ;;  %10188 = vmatpush1.bf16.msra.mxu1 %v12812_v42  ;;  %v12858_v41 = vcombine.low %v911_v25, %v915_v26  ;;  %v12860_v42 = vcombine.low %v912_v29, %v916_v30  ;;  %v960_v25 = vld [vmem:[#allocation2 + $0x1648] sm:$0xff]  ;;  %v12900_v30 = vcombine.low %v952_v16, %v956_v18 }
 0x185   :  { %9697 = vmatprep.subr.bf16.mxu0 %v12819_v43  ;;  %10189 = vmatprep.subr.bf16.mxu1 %v12821_v44  ;;  %v12867_v43 = vcombine.high %v919_v36, %v923_v9  ;;  %v12869_v44 = vcombine.high %v920_v39, %v924_v40  ;;  %v964_v26 = vld [vmem:[#allocation2 + $0x1668] sm:$0xff] }
 0x186   :  { %v968_v36 = vld [vmem:[#allocation2 + $0x1688] sm:$0xff] }
 0x187   :  { %v972_v9 = vld [vmem:[#allocation2 + $0x16a8] sm:$0xff] }
 0x188   :  { %9698 = vmatpush1.bf16.msra.mxu0 %v12818_v51  ;;  %10190 = vmatpush1.bf16.msra.mxu1 %v12820_v53  ;;  %v12868_v51 = vcombine.low %v920_v39, %v924_v40  ;;  %v12875_v53 = vcombine.high %v927_v46, %v931_v48  ;;  %v12908_v40 = vcombine.low %v960_v25, %v964_v26  ;;  %v976_v46 = vld [vmem:[#allocation2 + $0x16c8] sm:$0xff] }
 0x189   :  { %9699 = vmatprep.subr.bf16.mxu0 %v12827_v54  ;;  %10191 = vmatprep.subr.bf16.mxu1 %v12829_v56  ;;  %v12877_v54 = vcombine.high %v928_v58, %v932_v49  ;;  %v935_v56 = vld [vmem:[#allocation2 + $0x1580] sm:$0xff]  ;;  %v980_v48 = vld [vmem:[#allocation2 + $0x16e8] sm:$0xff] }
 0x18a   :  { %v12882_v7 = vcombine.low %v935_v56, %v939_v57 }
 0x18c   :  { %9700 = vmatpush1.bf16.msra.mxu0 %v12826_v28  ;;  %10192 = vmatpush1.bf16.msra.mxu1 %v12828_v13  ;;  %v12876_v28 = vcombine.low %v928_v58, %v932_v49  ;;  %v12883_v13 = vcombine.high %v935_v56, %v939_v57  ;;  %v12916_v49 = vcombine.low %v968_v36, %v972_v9  ;;  %v984_v56 = vld [vmem:[#allocation2 + $0x1708] sm:$0xff] }
 0x18d   :  { %9710 = vmatprep.subr.bf16.mxu0 %v12835_v62  ;;  %10202 = vmatprep.subr.bf16.mxu1 %v12837_v0  ;;  %v12885_v62 = vcombine.high %v936_v17, %v940_v60  ;;  %v943_v0 = vld [vmem:[#allocation2 + $0x15c0] sm:$0xff]  ;;  %v988_v57 = vld [vmem:[#allocation2 + $0x1728] sm:$0xff]  ;;  %v12924_v60 = vcombine.low %v976_v46, %v980_v48 }
 0x18e   :  { %v12890_v20 = vcombine.low %v943_v0, %v947_v1 }
 0x18f   :  { %9702 = vmatmul.mubr.bf16.vlgmr.msra.gmra.mrb[0].mxu0 %v14459_v6  ;;  %10194 = vmatmul.mubr.bf16.vlgmr.msra.gmra.mrb[0].mxu1 %v14459_v6 }
 0x190   :  { %9711 = vmatpush1.bf16.msra.mxu0 %v12834_v10  ;;  %10203 = vmatpush1.bf16.msra.mxu1 %v12836_v11  ;;  %v12891_v10 = vcombine.high %v943_v0, %v947_v1  ;;  %v12893_v11 = vcombine.high %v944_v2, %v948_v4  ;;  %v992_v0 = vld [vmem:[#allocation2 + $0x1748] sm:$0xff]  ;;  %v76_v2 = vld [vmem:[%s14677_s0 + $0x18] sm:$0xff] }
 0x191   :  { %9712 = vmatprep.subr.bf16.mxu0 %v12843_v12  ;;  %10204 = vmatprep.subr.bf16.mxu1 %v12845_v14  ;;  %v951_v12 = vld [vmem:[#allocation2 + $0x1600] sm:$0xff]  ;;  %v996_v1 = vld [vmem:[#allocation2 + $0x1768] sm:$0xff] }
 0x192   :  { %9742 = vmatprep.mubr.bf16.mxu0 %v14461_v37  ;;  %10234 = vmatprep.mubr.bf16.mxu1 %v14461_v37  ;;  %v955_v14 = vld [vmem:[#allocation2 + $0x1620] sm:$0xff] }
 0x193   :  { %v12898_v29 = vcombine.low %v951_v12, %v955_v14 }
 0x194   :  { %9713 = vmatpush1.bf16.msra.mxu0 %v12842_v23  ;;  %10205 = vmatpush1.bf16.msra.mxu1 %v12844_v3  ;;  %v12899_v23 = vcombine.high %v951_v12, %v955_v14  ;;  %v12901_v3 = vcombine.high %v952_v16, %v956_v18  ;;  %v1003_v12 = vld [vmem:[#allocation2 + $0x17a0] sm:$0xff]  ;;  %v82_v14 = vmul.f32 0.01, %v76_v2  ;;  %v1000_v16 = vld [vmem:[#allocation2 + $0x1788] sm:$0xff] }
 0x195   :  { %9714 = vmatprep.subr.bf16.mxu0 %v12851_v22  ;;  %10206 = vmatprep.subr.bf16.mxu1 %v12853_v24  ;;  %v959_v22 = vld [vmem:[#allocation2 + $0x1640] sm:$0xff]  ;;  %v1004_v18 = vld [vmem:[#allocation2 + $0x17a8] sm:$0xff] }
 0x196   :  { %v963_v24 = vld [vmem:[#allocation2 + $0x1660] sm:$0xff] }
 0x197   :  { %v12906_v39 = vcombine.low %v959_v22, %v963_v24 }
 0x198   :  { %9715 = vmatpush1.bf16.msra.mxu0 %v12850_v31  ;;  %10207 = vmatpush1.bf16.msra.mxu1 %v12852_v32  ;;  %v12907_v31 = vcombine.high %v959_v22, %v963_v24  ;;  %v12909_v32 = vcombine.high %v960_v25, %v964_v26  ;;  %v1007_v22 = vld [vmem:[#allocation2 + $0x17c0] sm:$0xff]  ;;  %v14470_v25 = vmax.f32 %v76_v2, %v82_v14  ;;  %v1008_v26 = vld [vmem:[#allocation2 + $0x17c8] sm:$0xff] }
 0x199   :  { %9716 = vmatprep.subr.bf16.mxu0 %v12859_v33  ;;  %10208 = vmatprep.subr.bf16.mxu1 %v12861_v34  ;;  %v967_v33 = vld [vmem:[#allocation2 + $0x1680] sm:$0xff] }
 0x19a   :  { %v971_v34 = vld [vmem:[#allocation2 + $0x16a0] sm:$0xff] }
 0x19b   :  { %v12914_v58 = vcombine.low %v967_v33, %v971_v34  ;;  %v1011_v24 = vld [vmem:[#allocation2 + $0x17e0] sm:$0xff] }
 0x19c   :  { %9717 = vmatpush1.bf16.msra.mxu0 %v12858_v41  ;;  %10209 = vmatpush1.bf16.msra.mxu1 %v12860_v42  ;;  %v12915_v41 = vcombine.high %v967_v33, %v971_v34  ;;  %v12917_v42 = vcombine.high %v968_v36, %v972_v9  ;;  %v1015_v34 = vld [vmem:[#allocation2 + $0x1800] sm:$0xff]  ;;  %v14474_v9 = vrot.slane %v14470_v25, %v14360_v63 }
 0x19d   :  { %9718 = vmatprep.subr.bf16.mxu0 %v12867_v43  ;;  %10210 = vmatprep.subr.bf16.mxu1 %v12869_v44  ;;  %v975_v43 = vld [vmem:[#allocation2 + $0x16c0] sm:$0xff] }
 0x19e   :  { %v979_v44 = vld [vmem:[#allocation2 + $0x16e0] sm:$0xff] }
 0x19f   :  { %v12922_v17 = vcombine.low %v975_v43, %v979_v44  ;;  %v1019_v36 = vld [vmem:[#allocation2 + $0x1820] sm:$0xff] }
 0x1a0   :  { %9719 = vmatpush1.bf16.msra.mxu0 %v12866_v50  ;;  %10211 = vmatpush1.bf16.msra.mxu1 %v12868_v51  ;;  %v12923_v50 = vcombine.high %v975_v43, %v979_v44  ;;  %v12925_v51 = vcombine.high %v976_v46, %v980_v48  ;;  %v12963_v43 = vcombine.high %v1015_v34, %v1019_v36  ;;  %v1023_v46 = vld [vmem:[#allocation2 + $0x1840] sm:$0xff] }
 0x1a1   :  { %9720 = vmatprep.subr.bf16.mxu0 %v12875_v53  ;;  %10212 = vmatprep.subr.bf16.mxu1 %v12877_v54  ;;  %v983_v53 = vld [vmem:[#allocation2 + $0x1700] sm:$0xff] }
 0x1a2   :  { %v987_v54 = vld [vmem:[#allocation2 + $0x1720] sm:$0xff] }
 0x1a3   :  { %v12930_v4 = vcombine.low %v983_v53, %v987_v54  ;;  %v1027_v48 = vld [vmem:[#allocation2 + $0x1860] sm:$0xff] }
 0x1a4   :  { %9721 = vmatpush1.bf16.msra.mxu0 %v12874_v61  ;;  %10213 = vmatpush1.bf16.msra.mxu1 %v12876_v28  ;;  %v12931_v61 = vcombine.high %v983_v53, %v987_v54  ;;  %v12933_v28 = vcombine.high %v984_v56, %v988_v57  ;;  %v12962_v53 = vcombine.low %v1015_v34, %v1019_v36  ;;  %v1039_v2 = vld [vmem:[#allocation2 + $0x18c0] sm:$0xff] }
 0x1a5   :  { %9722 = vmatprep.subr.bf16.mxu0 %v12883_v13  ;;  %10214 = vmatprep.subr.bf16.mxu1 %v12885_v62  ;;  %v991_v13 = vld [vmem:[#allocation2 + $0x1740] sm:$0xff] }
 0x1a6   :  { %v995_v62 = vld [vmem:[#allocation2 + $0x1760] sm:$0xff] }
 0x1a8   :  { %9723 = vmatpush1.bf16.msra.mxu0 %v12882_v7  ;;  %10215 = vmatpush1.bf16.msra.mxu1 %v12884_v8  ;;  %v12932_v7 = vcombine.low %v984_v56, %v988_v57  ;;  %v12939_v8 = vcombine.high %v991_v13, %v995_v62  ;;  %v12971_v56 = vcombine.high %v1023_v46, %v1027_v48 }
 0x1a9   :  { %9724 = vmatprep.subr.bf16.mxu0 %v12891_v10  ;;  %10216 = vmatprep.subr.bf16.mxu1 %v12893_v11  ;;  %v12941_v10 = vcombine.high %v992_v0, %v996_v1  ;;  %v999_v11 = vld [vmem:[#allocation2 + $0x1780] sm:$0xff] }
 0x1ac   :  { %9725 = vmatpush1.bf16.msra.mxu0 %v12890_v20  ;;  %10217 = vmatpush1.bf16.msra.mxu1 %v12892_v21  ;;  %v12938_v20 = vcombine.low %v991_v13, %v995_v62  ;;  %v12940_v21 = vcombine.low %v992_v0, %v996_v1  ;;  %v1036_v13 = vld [vmem:[#allocation2 + $0x18a8] sm:$0xff] }
 0x1ad   :  { %9726 = vmatprep.subr.bf16.mxu0 %v12899_v23  ;;  %10218 = vmatprep.subr.bf16.mxu1 %v12901_v3  ;;  %v12947_v23 = vcombine.high %v999_v11, %v1003_v12  ;;  %v12949_v3 = vcombine.high %v1000_v16, %v1004_v18 }
 0x1b0   :  { %9727 = vmatpush1.bf16.msra.mxu0 %v12898_v29  ;;  %10219 = vmatpush1.bf16.msra.mxu1 %v12900_v30  ;;  %v1012_v29 = vld [vmem:[#allocation2 + $0x17e8] sm:$0xff]  ;;  %v12946_v30 = vcombine.low %v999_v11, %v1003_v12 }
 0x1b1   :  { %9728 = vmatprep.subr.bf16.mxu0 %v12907_v31  ;;  %10220 = vmatprep.subr.bf16.mxu1 %v12909_v32  ;;  %v12948_v31 = vcombine.low %v1000_v16, %v1004_v18  ;;  %v12955_v32 = vcombine.high %v1007_v22, %v1011_v24  ;;  %v12957_v33 = vcombine.high %v1008_v26, %v1012_v29  ;;  %v1047_v16 = vld [vmem:[#allocation2 + $0x1900] sm:$0xff] }
 0x1b2   :  { %v1051_v18 = vld [vmem:[#allocation2 + $0x1920] sm:$0xff] }
 0x1b4   :  { %9729 = vmatpush1.bf16.msra.mxu0 %v12906_v39  ;;  %10221 = vmatpush1.bf16.msra.mxu1 %v12908_v40  ;;  %v1016_v39 = vld [vmem:[#allocation2 + $0x1808] sm:$0xff] }
 0x1b5   :  { %9730 = vmatprep.subr.bf16.mxu0 %v12915_v41  ;;  %10222 = vmatprep.subr.bf16.mxu1 %v12917_v42  ;;  %v1020_v40 = vld [vmem:[#allocation2 + $0x1828] sm:$0xff]  ;;  %v12954_v41 = vcombine.low %v1007_v22, %v1011_v24  ;;  %v12956_v42 = vcombine.low %v1008_v26, %v1012_v29  ;;  %v12995_v22 = vcombine.high %v1047_v16, %v1051_v18  ;;  %v1055_v26 = vld [vmem:[#allocation2 + $0x1940] sm:$0xff] }
 0x1b6   :  { %v12965_v44 = vcombine.high %v1016_v39, %v1020_v40  ;;  %v12964_v54 = vcombine.low %v1016_v39, %v1020_v40  ;;  %v1059_v29 = vld [vmem:[#allocation2 + $0x1960] sm:$0xff] }
 0x1b7   :  { %v13003_v34 = vcombine.high %v1055_v26, %v1059_v29  ;;  %v1063_v39 = vld [vmem:[#allocation2 + $0x1980] sm:$0xff] }
 0x1b8   :  { %9731 = vmatpush1.bf16.msra.mxu0 %v12914_v58  ;;  %10223 = vmatpush1.bf16.msra.mxu1 %v12916_v49  ;;  %v163_v58 = vcombine.high %v14474_v9, %v14474_v9  ;;  %v14480_v49 = vpack.c.bf16 %v14453_v59, %v14453_v59  ;;  %v12970_v59 = vcombine.low %v1023_v46, %v1027_v48  ;;  %v1067_v40 = vld [vmem:[#allocation2 + $0x19a0] sm:$0xff] }
 0x1b9   :  { %9732 = vmatprep.subr.bf16.mxu0 %v12923_v50  ;;  %10224 = vmatprep.subr.bf16.mxu1 %v12925_v51  ;;  %v1024_v50 = vld [vmem:[#allocation2 + $0x1848] sm:$0xff]  ;;  %v13011_v46 = vcombine.high %v1063_v39, %v1067_v40 }
 0x1ba   :  { %v1028_v51 = vld [vmem:[#allocation2 + $0x1868] sm:$0xff] }
 0x1bb   :  { %v12973_v57 = vcombine.high %v1024_v50, %v1028_v51  ;;  %v12972_v62 = vcombine.low %v1024_v50, %v1028_v51  ;;  %v1075_v50 = vld [vmem:[#allocation2 + $0x19e0] sm:$0xff]  ;;  %v1072_v51 = vld [vmem:[#allocation2 + $0x19c8] sm:$0xff] }
 0x1bc   :  { %9733 = vmatpush1.bf16.msra.mxu0 %v12922_v17  ;;  %10225 = vmatpush1.bf16.msra.mxu1 %v12924_v60  ;;  %v1031_v17 = vld [vmem:[#allocation2 + $0x1880] sm:$0xff] }
 0x1bd   :  { %9734 = vmatprep.subr.bf16.mxu0 %v12931_v61  ;;  %10226 = vmatprep.subr.bf16.mxu1 %v12933_v28  ;;  %v1035_v60 = vld [vmem:[#allocation2 + $0x18a0] sm:$0xff]  ;;  %v14482_v61 = vpack.c.bf16 %v163_v58, %v163_v58  ;;  %v1032_v28 = vld [vmem:[#allocation2 + $0x1888] sm:$0xff] }
 0x1be   :  { %v12979_v0 = vcombine.high %v1031_v17, %v1035_v60  ;;  %v12981_v1 = vcombine.high %v1032_v28, %v1036_v13  ;;  %v12980_v11 = vcombine.low %v1032_v28, %v1036_v13  ;;  %v1071_v58 = vld [vmem:[#allocation2 + $0x19c0] sm:$0xff]  ;;  %v1080_v13 = vld [vmem:[#allocation2 + $0x1a08] sm:$0xff] }
 0x1bf   :  { %v1083_v28 = vld [vmem:[#allocation2 + $0x1a20] sm:$0xff] }
 0x1c0   :  { %9735 = vmatpush1.bf16.msra.mxu0 %v12930_v4  ;;  %10227 = vmatpush1.bf16.msra.mxu1 %v12932_v7  ;;  %v1043_v4 = vld [vmem:[#allocation2 + $0x18e0] sm:$0xff]  ;;  %v1040_v7 = vld [vmem:[#allocation2 + $0x18c8] sm:$0xff] }
 0x1c1   :  { %9736 = vmatprep.subr.bf16.mxu0 %v12939_v8  ;;  %10228 = vmatprep.subr.bf16.mxu1 %v12941_v10  ;;  %v1044_v8 = vld [vmem:[#allocation2 + $0x18e8] sm:$0xff]  ;;  %v12978_v10 = vcombine.low %v1031_v17, %v1035_v60  ;;  %v12987_v12 = vcombine.high %v1039_v2, %v1043_v4  ;;  %v1079_v60 = vld [vmem:[#allocation2 + $0x1a00] sm:$0xff] }
 0x1c2   :  { %v12989_v14 = vcombine.high %v1040_v7, %v1044_v8 }
 0x1c4   :  { %9737 = vmatpush1.bf16.msra.mxu0 %v12938_v20  ;;  %10229 = vmatpush1.bf16.msra.mxu1 %v12940_v21  ;;  %v1048_v20 = vld [vmem:[#allocation2 + $0x1908] sm:$0xff] }
 0x1c5   :  { %9738 = vmatprep.subr.bf16.mxu0 %v12947_v23  ;;  %10230 = vmatprep.subr.bf16.mxu1 %v12949_v3  ;;  %v1052_v21 = vld [vmem:[#allocation2 + $0x1928] sm:$0xff]  ;;  %v12986_v23 = vcombine.low %v1039_v2, %v1043_v4  ;;  %v12988_v3 = vcombine.low %v1040_v7, %v1044_v8  ;;  %v1087_v4 = vld [vmem:[#allocation2 + $0x1a40] sm:$0xff] }
 0x1c6   :  { %v12997_v24 = vcombine.high %v1048_v20, %v1052_v21  ;;  %v1091_v7 = vld [vmem:[#allocation2 + $0x1a60] sm:$0xff]  ;;  %v1088_v8 = vld [vmem:[#allocation2 + $0x1a48] sm:$0xff] }
 0x1c8   :  { %9739 = vmatpush1.bf16.msra.mxu0 %v12946_v30  ;;  %10231 = vmatpush1.bf16.msra.mxu1 %v12948_v31  ;;  %v1056_v30 = vld [vmem:[#allocation2 + $0x1948] sm:$0xff] }
 0x1c9   :  { %9740 = vmatprep.subr.bf16.mxu0 %v12955_v32  ;;  %10232 = vmatprep.subr.bf16.mxu1 %v12957_v33  ;;  %v1060_v31 = vld [vmem:[#allocation2 + $0x1968] sm:$0xff]  ;;  %v12994_v32 = vcombine.low %v1047_v16, %v1051_v18  ;;  %v12996_v33 = vcombine.low %v1048_v20, %v1052_v21  ;;  %v1095_v18 = vld [vmem:[#allocation2 + $0x1a80] sm:$0xff] }
 0x1ca   :  { %v13005_v36 = vcombine.high %v1056_v30, %v1060_v31  ;;  %v1099_v20 = vld [vmem:[#allocation2 + $0x1aa0] sm:$0xff]  ;;  %v1096_v21 = vld [vmem:[#allocation2 + $0x1a88] sm:$0xff] }
 0x1cc   :  { %9741 = vmatpush1.bf16.msra.mxu0 %v12954_v41  ;;  %10233 = vmatpush1.bf16.msra.mxu1 %v12956_v42  ;;  %v1064_v41 = vld [vmem:[#allocation2 + $0x1988] sm:$0xff] }
 0x1cd   :  { %9751 = vmatprep.subr.bf16.mxu0 %v12963_v43  ;;  %10243 = vmatprep.subr.bf16.mxu1 %v12965_v44  ;;  %v1068_v42 = vld [vmem:[#allocation2 + $0x19a8] sm:$0xff]  ;;  %v13002_v43 = vcombine.low %v1055_v26, %v1059_v29  ;;  %v13004_v44 = vcombine.low %v1056_v30, %v1060_v31  ;;  %v1103_v29 = vld [vmem:[#allocation2 + $0x1ac0] sm:$0xff] }
 0x1ce   :  { %v13013_v48 = vcombine.high %v1064_v41, %v1068_v42  ;;  %v1107_v30 = vld [vmem:[#allocation2 + $0x1ae0] sm:$0xff]  ;;  %v1104_v31 = vld [vmem:[#allocation2 + $0x1ac8] sm:$0xff] }
 0x1cf   :  { %9743 = vmatmul.mubr.bf16.vlgmr.msra.gmra.mrb[0].mxu0 %v14480_v49  ;;  %10235 = vmatmul.mubr.bf16.vlgmr.msra.gmra.mrb[0].mxu1 %v14480_v49 }
 0x1d0   :  { %9752 = vmatpush1.bf16.msra.mxu0 %v12962_v53  ;;  %10244 = vmatpush1.bf16.msra.mxu1 %v12964_v54  ;;  %v1076_v53 = vld [vmem:[#allocation2 + $0x19e8] sm:$0xff]  ;;  %v13010_v54 = vcombine.low %v1063_v39, %v1067_v40  ;;  %v1111_v40 = vld [vmem:[#allocation2 + $0x1b00] sm:$0xff] }
 0x1d1   :  { %9753 = vmatprep.subr.bf16.mxu0 %v12971_v56  ;;  %10245 = vmatprep.subr.bf16.mxu1 %v12973_v57  ;;  %v13012_v56 = vcombine.low %v1064_v41, %v1068_v42  ;;  %v13019_v57 = vcombine.high %v1071_v58, %v1075_v50  ;;  %v13021_v17 = vcombine.high %v1072_v51, %v1076_v53  ;;  %v1115_v41 = vld [vmem:[#allocation2 + $0x1b20] sm:$0xff]  ;;  %v1112_v42 = vld [vmem:[#allocation2 + $0x1b08] sm:$0xff] }
 0x1d2   :  { %9783 = vmatprep.mubr.bf16.mxu0 %v14482_v61  ;;  %10275 = vmatprep.mubr.bf16.mxu1 %v14482_v61 }
 0x1d4   :  { %9754 = vmatpush1.bf16.msra.mxu0 %v12970_v59  ;;  %10246 = vmatpush1.bf16.msra.mxu1 %v12972_v62  ;;  %v1084_v59 = vld [vmem:[#allocation2 + $0x1a28] sm:$0xff]  ;;  %v13018_v62 = vcombine.low %v1071_v58, %v1075_v50  ;;  %v1119_v50 = vld [vmem:[#allocation2 + $0x1b40] sm:$0xff] }
 0x1d5   :  { %9755 = vmatprep.subr.bf16.mxu0 %v12979_v0  ;;  %10247 = vmatprep.subr.bf16.mxu1 %v12981_v1  ;;  %v13020_v0 = vcombine.low %v1072_v51, %v1076_v53  ;;  %v13027_v1 = vcombine.high %v1079_v60, %v1083_v28  ;;  %v13029_v2 = vcombine.high %v1080_v13, %v1084_v59  ;;  %v1123_v51 = vld [vmem:[#allocation2 + $0x1b60] sm:$0xff]  ;;  %v1120_v53 = vld [vmem:[#allocation2 + $0x1b48] sm:$0xff] }
 0x1d8   :  { %9756 = vmatpush1.bf16.msra.mxu0 %v12978_v10  ;;  %10248 = vmatpush1.bf16.msra.mxu1 %v12980_v11  ;;  %v1092_v10 = vld [vmem:[#allocation2 + $0x1a68] sm:$0xff]  ;;  %v13026_v11 = vcombine.low %v1079_v60, %v1083_v28  ;;  %v1127_v28 = vld [vmem:[#allocation2 + $0x1b80] sm:$0xff] }
 0x1d9   :  { %9757 = vmatprep.subr.bf16.mxu0 %v12987_v12  ;;  %10249 = vmatprep.subr.bf16.mxu1 %v12989_v14  ;;  %v13028_v12 = vcombine.low %v1080_v13, %v1084_v59  ;;  %v13035_v14 = vcombine.high %v1087_v4, %v1091_v7  ;;  %v13037_v16 = vcombine.high %v1088_v8, %v1092_v10  ;;  %v1131_v13 = vld [vmem:[#allocation2 + $0x1ba0] sm:$0xff]  ;;  %v1128_v59 = vld [vmem:[#allocation2 + $0x1b88] sm:$0xff] }
 0x1dc   :  { %9758 = vmatpush1.bf16.msra.mxu0 %v12986_v23  ;;  %10250 = vmatpush1.bf16.msra.mxu1 %v12988_v3  ;;  %v1100_v23 = vld [vmem:[#allocation2 + $0x1aa8] sm:$0xff]  ;;  %v13034_v3 = vcombine.low %v1087_v4, %v1091_v7  ;;  %v1135_v7 = vld [vmem:[#allocation2 + $0x1bc0] sm:$0xff] }
 0x1dd   :  { %9759 = vmatprep.subr.bf16.mxu0 %v12995_v22  ;;  %10251 = vmatprep.subr.bf16.mxu1 %v12997_v24  ;;  %v13036_v22 = vcombine.low %v1088_v8, %v1092_v10  ;;  %v13043_v24 = vcombine.high %v1095_v18, %v1099_v20  ;;  %v13045_v26 = vcombine.high %v1096_v21, %v1100_v23  ;;  %v1139_v8 = vld [vmem:[#allocation2 + $0x1be0] sm:$0xff] }
 0x1de   :  { %v148_v10 = vcombine.high %v14470_v25, %v14470_v25 }
 0x1e0   :  { %9760 = vmatpush1.bf16.msra.mxu0 %v12994_v32  ;;  %10252 = vmatpush1.bf16.msra.mxu1 %v12996_v33  ;;  %v1108_v32 = vld [vmem:[#allocation2 + $0x1ae8] sm:$0xff]  ;;  %v13042_v33 = vcombine.low %v1095_v18, %v1099_v20  ;;  %v13083_v18 = vcombine.high %v1135_v7, %v1139_v8 }
 0x1e1   :  { %9761 = vmatprep.subr.bf16.mxu0 %v13003_v34  ;;  %10253 = vmatprep.subr.bf16.mxu1 %v13005_v36  ;;  %v13044_v34 = vcombine.low %v1096_v21, %v1100_v23  ;;  %v13051_v36 = vcombine.high %v1103_v29, %v1107_v30  ;;  %v13053_v39 = vcombine.high %v1104_v31, %v1108_v32  ;;  %v1143_v21 = vld [vmem:[#allocation2 + $0x1c00] sm:$0xff] }
 0x1e2   :  { %v1147_v23 = vld [vmem:[#allocation2 + $0x1c20] sm:$0xff] }
 0x1e4   :  { %9762 = vmatpush1.bf16.msra.mxu0 %v13002_v43  ;;  %10254 = vmatpush1.bf16.msra.mxu1 %v13004_v44  ;;  %v1116_v43 = vld [vmem:[#allocation2 + $0x1b28] sm:$0xff]  ;;  %v13050_v44 = vcombine.low %v1103_v29, %v1107_v30  ;;  %v13091_v29 = vcombine.high %v1143_v21, %v1147_v23 }
 0x1e5   :  { %9763 = vmatprep.subr.bf16.mxu0 %v13011_v46  ;;  %10255 = vmatprep.subr.bf16.mxu1 %v13013_v48  ;;  %v13052_v46 = vcombine.low %v1104_v31, %v1108_v32  ;;  %v13059_v48 = vcombine.high %v1111_v40, %v1115_v41  ;;  %v13061_v58 = vcombine.high %v1112_v42, %v1116_v43  ;;  %v1151_v31 = vld [vmem:[#allocation2 + $0x1c40] sm:$0xff] }
 0x1e6   :  { %v1155_v32 = vld [vmem:[#allocation2 + $0x1c60] sm:$0xff] }
 0x1e8   :  { %9764 = vmatpush1.bf16.msra.mxu0 %v13010_v54  ;;  %10256 = vmatpush1.bf16.msra.mxu1 %v13012_v56  ;;  %v1124_v54 = vld [vmem:[#allocation2 + $0x1b68] sm:$0xff]  ;;  %v13058_v56 = vcombine.low %v1111_v40, %v1115_v41  ;;  %v13090_v40 = vcombine.low %v1143_v21, %v1147_v23 }
 0x1e9   :  { %9765 = vmatprep.subr.bf16.mxu0 %v13019_v57  ;;  %10257 = vmatprep.subr.bf16.mxu1 %v13021_v17  ;;  %v13060_v57 = vcombine.low %v1112_v42, %v1116_v43  ;;  %v13067_v17 = vcombine.high %v1119_v50, %v1123_v51  ;;  %v13069_v60 = vcombine.high %v1120_v53, %v1124_v54 }
 0x1ea   :  { %v13099_v42 = vcombine.high %v1151_v31, %v1155_v32 }
 0x1ec   :  { %9766 = vmatpush1.bf16.msra.mxu0 %v13018_v62  ;;  %10258 = vmatpush1.bf16.msra.mxu1 %v13020_v0  ;;  %v1132_v62 = vld [vmem:[#allocation2 + $0x1ba8] sm:$0xff]  ;;  %v13066_v0 = vcombine.low %v1119_v50, %v1123_v51 }
 0x1ed   :  { %9767 = vmatprep.subr.bf16.mxu0 %v13027_v1  ;;  %10259 = vmatprep.subr.bf16.mxu1 %v13029_v2  ;;  %v13068_v1 = vcombine.low %v1120_v53, %v1124_v54  ;;  %v13075_v2 = vcombine.high %v1127_v28, %v1131_v13  ;;  %v13077_v4 = vcombine.high %v1128_v59, %v1132_v62  ;;  %v1164_v50 = vld [vmem:[#allocation2 + $0x1ca8] sm:$0xff] }
 0x1f0   :  { %9768 = vmatpush1.bf16.msra.mxu0 %v13026_v11  ;;  %10260 = vmatpush1.bf16.msra.mxu1 %v13028_v12  ;;  %v1136_v11 = vld [vmem:[#allocation2 + $0x1bc8] sm:$0xff] }
 0x1f1   :  { %9769 = vmatprep.subr.bf16.mxu0 %v13035_v14  ;;  %10261 = vmatprep.subr.bf16.mxu1 %v13037_v16  ;;  %v1140_v12 = vld [vmem:[#allocation2 + $0x1be8] sm:$0xff]  ;;  %v13074_v14 = vcombine.low %v1127_v28, %v1131_v13  ;;  %v13076_v16 = vcombine.low %v1128_v59, %v1132_v62 }
 0x1f2   :  { %v13085_v20 = vcombine.high %v1136_v11, %v1140_v12  ;;  %v13084_v25 = vcombine.low %v1136_v11, %v1140_v12  ;;  %v1183_v12 = vld [vmem:[#allocation2 + $0x1d40] sm:$0xff] }
 0x1f4   :  { %9770 = vmatpush1.bf16.msra.mxu0 %v13034_v3  ;;  %10262 = vmatpush1.bf16.msra.mxu1 %v13036_v22  ;;  %v14491_v3 = vrot.slane %v148_v10, %v14360_v63  ;;  %v1144_v22 = vld [vmem:[#allocation2 + $0x1c08] sm:$0xff] }
 0x1f5   :  { %9771 = vmatprep.subr.bf16.mxu0 %v13043_v24  ;;  %10263 = vmatprep.subr.bf16.mxu1 %v13045_v26  ;;  %v1148_v24 = vld [vmem:[#allocation2 + $0x1c28] sm:$0xff]  ;;  %v13082_v26 = vcombine.low %v1135_v7, %v1139_v8 }
 0x1f6   :  { %v13093_v30 = vcombine.high %v1144_v22, %v1148_v24  ;;  %v13092_v41 = vcombine.low %v1144_v22, %v1148_v24  ;;  %v1191_v24 = vld [vmem:[#allocation2 + $0x1d80] sm:$0xff] }
 0x1f8   :  { %9772 = vmatpush1.bf16.msra.mxu0 %v13042_v33  ;;  %10264 = vmatpush1.bf16.msra.mxu1 %v13044_v34  ;;  %v164_v33 = vcombine.high %v14491_v3, %v14491_v3  ;;  %v14497_v34 = vpack.c.bf16 %v14474_v9, %v14474_v9  ;;  %v13098_v9 = vcombine.low %v1151_v31, %v1155_v32 }
 0x1f9   :  { %9773 = vmatprep.subr.bf16.mxu0 %v13051_v36  ;;  %10265 = vmatprep.subr.bf16.mxu1 %v13053_v39  ;;  %v1152_v36 = vld [vmem:[#allocation2 + $0x1c48] sm:$0xff] }
 0x1fa   :  { %v1156_v39 = vld [vmem:[#allocation2 + $0x1c68] sm:$0xff] }
 0x1fb   :  { %v13101_v43 = vcombine.high %v1152_v36, %v1156_v39  ;;  %v13100_v51 = vcombine.low %v1152_v36, %v1156_v39  ;;  %v1199_v36 = vld [vmem:[#allocation2 + $0x1dc0] sm:$0xff] }
 0x1fc   :  { %9774 = vmatpush1.bf16.msra.mxu0 %v13050_v44  ;;  %10266 = vmatpush1.bf16.msra.mxu1 %v13052_v46  ;;  %v1159_v44 = vld [vmem:[#allocation2 + $0x1c80] sm:$0xff] }
 0x1fd   :  { %9775 = vmatprep.subr.bf16.mxu0 %v13059_v48  ;;  %10267 = vmatprep.subr.bf16.mxu1 %v13061_v58  ;;  %v1163_v46 = vld [vmem:[#allocation2 + $0x1ca0] sm:$0xff]  ;;  %v14499_v48 = vpack.c.bf16 %v164_v33, %v164_v33  ;;  %v1160_v58 = vld [vmem:[#allocation2 + $0x1c88] sm:$0xff] }
 0x1fe   :  { %v13107_v53 = vcombine.high %v1159_v44, %v1163_v46  ;;  %v13109_v54 = vcombine.high %v1160_v58, %v1164_v50  ;;  %v13106_v28 = vcombine.low %v1159_v44, %v1163_v46  ;;  %v13108_v13 = vcombine.low %v1160_v58, %v1164_v50  ;;  %v1203_v39 = vld [vmem:[#allocation2 + $0x1de0] sm:$0xff] }
 0x1ff   :  { %v13147_v44 = vcombine.high %v1199_v36, %v1203_v39  ;;  %v1207_v58 = vld [vmem:[#allocation2 + $0x1e00] sm:$0xff] }
 0x200   :  { %9776 = vmatpush1.bf16.msra.mxu0 %v13058_v56  ;;  %10268 = vmatpush1.bf16.msra.mxu1 %v13060_v57  ;;  %v1167_v56 = vld [vmem:[#allocation2 + $0x1cc0] sm:$0xff] }
 0x201   :  { %9777 = vmatprep.subr.bf16.mxu0 %v13067_v17  ;;  %10269 = vmatprep.subr.bf16.mxu1 %v13069_v60  ;;  %v1171_v57 = vld [vmem:[#allocation2 + $0x1ce0] sm:$0xff]  ;;  %v1168_v17 = vld [vmem:[#allocation2 + $0x1cc8] sm:$0xff] }
 0x202   :  { %v1172_v60 = vld [vmem:[#allocation2 + $0x1ce8] sm:$0xff]  ;;  %v13115_v59 = vcombine.high %v1167_v56, %v1171_v57  ;;  %v13114_v7 = vcombine.low %v1167_v56, %v1171_v57  ;;  %v1211_v50 = vld [vmem:[#allocation2 + $0x1e20] sm:$0xff] }
 0x203   :  { %v13117_v62 = vcombine.high %v1168_v17, %v1172_v60  ;;  %v13116_v8 = vcombine.low %v1168_v17, %v1172_v60  ;;  %v13155_v56 = vcombine.high %v1207_v58, %v1211_v50  ;;  %v1215_v17 = vld [vmem:[#allocation2 + $0x1e40] sm:$0xff] }
 0x204   :  { %9778 = vmatpush1.bf16.msra.mxu0 %v13066_v0  ;;  %10270 = vmatpush1.bf16.msra.mxu1 %v13068_v1  ;;  %v1175_v0 = vld [vmem:[#allocation2 + $0x1d00] sm:$0xff] }
 0x205   :  { %9779 = vmatprep.subr.bf16.mxu0 %v13075_v2  ;;  %10271 = vmatprep.subr.bf16.mxu1 %v13077_v4  ;;  %v1179_v1 = vld [vmem:[#allocation2 + $0x1d20] sm:$0xff]  ;;  %v1176_v2 = vld [vmem:[#allocation2 + $0x1d08] sm:$0xff] }
 0x206   :  { %v1180_v4 = vld [vmem:[#allocation2 + $0x1d28] sm:$0xff]  ;;  %v13123_v10 = vcombine.high %v1175_v0, %v1179_v1  ;;  %v1219_v60 = vld [vmem:[#allocation2 + $0x1e60] sm:$0xff] }
 0x207   :  { %v13125_v11 = vcombine.high %v1176_v2, %v1180_v4  ;;  %v13124_v21 = vcombine.low %v1176_v2, %v1180_v4  ;;  %v1223_v2 = vld [vmem:[#allocation2 + $0x1e80] sm:$0xff] }
 0x208   :  { %9780 = vmatpush1.bf16.msra.mxu0 %v13074_v14  ;;  %10272 = vmatpush1.bf16.msra.mxu1 %v13076_v16  ;;  %v1187_v14 = vld [vmem:[#allocation2 + $0x1d60] sm:$0xff]  ;;  %v1184_v16 = vld [vmem:[#allocation2 + $0x1d48] sm:$0xff] }
 0x209   :  { %9781 = vmatprep.subr.bf16.mxu0 %v13083_v18  ;;  %10273 = vmatprep.subr.bf16.mxu1 %v13085_v20  ;;  %v1188_v18 = vld [vmem:[#allocation2 + $0x1d68] sm:$0xff]  ;;  %v13122_v20 = vcombine.low %v1175_v0, %v1179_v1  ;;  %v13131_v23 = vcombine.high %v1183_v12, %v1187_v14  ;;  %v13163_v0 = vcombine.high %v1215_v17, %v1219_v60  ;;  %v1227_v4 = vld [vmem:[#allocation2 + $0x1ea0] sm:$0xff] }
 0x20a   :  { %v13133_v22 = vcombine.high %v1184_v16, %v1188_v18  ;;  %v13132_v31 = vcombine.low %v1184_v16, %v1188_v18  ;;  %v1231_v16 = vld [vmem:[#allocation2 + $0x1ec0] sm:$0xff] }
 0x20b   :  { %v1235_v18 = vld [vmem:[#allocation2 + $0x1ee0] sm:$0xff] }
 0x20c   :  { %9782 = vmatpush1.bf16.msra.mxu0 %v13082_v26  ;;  %10274 = vmatpush1.bf16.msra.mxu1 %v13084_v25  ;;  %v1195_v26 = vld [vmem:[#allocation2 + $0x1da0] sm:$0xff]  ;;  %v1192_v25 = vld [vmem:[#allocation2 + $0x1d88] sm:$0xff] }
 0x20d   :  { %9792 = vmatprep.subr.bf16.mxu0 %v13091_v29  ;;  %10284 = vmatprep.subr.bf16.mxu1 %v13093_v30  ;;  %v1196_v29 = vld [vmem:[#allocation2 + $0x1da8] sm:$0xff]  ;;  %v13130_v30 = vcombine.low %v1183_v12, %v1187_v14  ;;  %v13139_v32 = vcombine.high %v1191_v24, %v1195_v26  ;;  %v13171_v12 = vcombine.high %v1223_v2, %v1227_v4 }
 0x20e   :  { %v13141_v33 = vcombine.high %v1192_v25, %v1196_v29 }
 0x20f   :  { %9784 = vmatmul.mubr.bf16.vlgmr.msra.gmra.mrb[0].mxu0 %v14497_v34  ;;  %10276 = vmatmul.mubr.bf16.vlgmr.msra.gmra.mrb[0].mxu1 %v14497_v34 }
 0x210   :  { %9793 = vmatpush1.bf16.msra.mxu0 %v13090_v40  ;;  %10285 = vmatpush1.bf16.msra.mxu1 %v13092_v41  ;;  %v1200_v40 = vld [vmem:[#allocation2 + $0x1dc8] sm:$0xff] }
 0x211   :  { %9794 = vmatprep.subr.bf16.mxu0 %v13099_v42  ;;  %10286 = vmatprep.subr.bf16.mxu1 %v13101_v43  ;;  %v1204_v41 = vld [vmem:[#allocation2 + $0x1de8] sm:$0xff]  ;;  %v13138_v42 = vcombine.low %v1191_v24, %v1195_v26  ;;  %v13140_v43 = vcombine.low %v1192_v25, %v1196_v29  ;;  %v13179_v24 = vcombine.high %v1231_v16, %v1235_v18  ;;  %v1239_v25 = vld [vmem:[#allocation2 + $0x1f00] sm:$0xff] }
 0x212   :  { %9824 = vmatprep.mubr.bf16.mxu0 %v14499_v48  ;;  %10316 = vmatprep.mubr.bf16.mxu1 %v14499_v48  ;;  %v13149_v46 = vcombine.high %v1200_v40, %v1204_v41  ;;  %v1243_v29 = vld [vmem:[#allocation2 + $0x1f20] sm:$0xff] }
 0x214   :  { %9795 = vmatpush1.bf16.msra.mxu0 %v13098_v9  ;;  %10287 = vmatpush1.bf16.msra.mxu1 %v13100_v51  ;;  %v1208_v9 = vld [vmem:[#allocation2 + $0x1e08] sm:$0xff] }
 0x215   :  { %9796 = vmatprep.subr.bf16.mxu0 %v13107_v53  ;;  %10288 = vmatprep.subr.bf16.mxu1 %v13109_v54  ;;  %v1212_v51 = vld [vmem:[#allocation2 + $0x1e28] sm:$0xff]  ;;  %v13146_v53 = vcombine.low %v1199_v36, %v1203_v39  ;;  %v13148_v54 = vcombine.low %v1200_v40, %v1204_v41  ;;  %v13187_v36 = vcombine.high %v1239_v25, %v1243_v29  ;;  %v1247_v40 = vld [vmem:[#allocation2 + $0x1f40] sm:$0xff] }
 0x216   :  { %v13157_v57 = vcombine.high %v1208_v9, %v1212_v51  ;;  %v1251_v41 = vld [vmem:[#allocation2 + $0x1f60] sm:$0xff] }
 0x218   :  { %9797 = vmatpush1.bf16.msra.mxu0 %v13106_v28  ;;  %10289 = vmatpush1.bf16.msra.mxu1 %v13108_v13  ;;  %v1216_v28 = vld [vmem:[#allocation2 + $0x1e48] sm:$0xff] }
 0x219   :  { %9798 = vmatprep.subr.bf16.mxu0 %v13115_v59  ;;  %10290 = vmatprep.subr.bf16.mxu1 %v13117_v62  ;;  %v1220_v13 = vld [vmem:[#allocation2 + $0x1e68] sm:$0xff]  ;;  %v13154_v59 = vcombine.low %v1207_v58, %v1211_v50  ;;  %v13156_v62 = vcombine.low %v1208_v9, %v1212_v51  ;;  %v13195_v50 = vcombine.high %v1247_v40, %v1251_v41  ;;  %v1255_v51 = vld [vmem:[#allocation2 + $0x1f80] sm:$0xff] }
 0x21a   :  { %v13165_v1 = vcombine.high %v1216_v28, %v1220_v13 }
 0x21c   :  { %9799 = vmatpush1.bf16.msra.mxu0 %v13114_v7  ;;  %10291 = vmatpush1.bf16.msra.mxu1 %v13116_v8  ;;  %v1224_v7 = vld [vmem:[#allocation2 + $0x1e88] sm:$0xff] }
 0x21d   :  { %9800 = vmatprep.subr.bf16.mxu0 %v13123_v10  ;;  %10292 = vmatprep.subr.bf16.mxu1 %v13125_v11  ;;  %v1228_v8 = vld [vmem:[#allocation2 + $0x1ea8] sm:$0xff]  ;;  %v13162_v10 = vcombine.low %v1215_v17, %v1219_v60  ;;  %v13164_v11 = vcombine.low %v1216_v28, %v1220_v13  ;;  %v13194_v17 = vcombine.low %v1247_v40, %v1251_v41  ;;  %v1287_v40 = vld [vmem:[#allocation2 + $0x2080] sm:$0xff] }
 0x21e   :  { %v13173_v14 = vcombine.high %v1224_v7, %v1228_v8  ;;  %v1291_v41 = vld [vmem:[#allocation2 + $0x20a0] sm:$0xff] }
 0x220   :  { %9801 = vmatpush1.bf16.msra.mxu0 %v13122_v20  ;;  %10293 = vmatpush1.bf16.msra.mxu1 %v13124_v21  ;;  %v1232_v20 = vld [vmem:[#allocation2 + $0x1ec8] sm:$0xff] }
 0x221   :  { %9802 = vmatprep.subr.bf16.mxu0 %v13131_v23  ;;  %10294 = vmatprep.subr.bf16.mxu1 %v13133_v22  ;;  %v1236_v21 = vld [vmem:[#allocation2 + $0x1ee8] sm:$0xff]  ;;  %v13170_v23 = vcombine.low %v1223_v2, %v1227_v4  ;;  %v13172_v22 = vcombine.low %v1224_v7, %v1228_v8 }
 0x222   :  { %v13181_v26 = vcombine.high %v1232_v20, %v1236_v21  ;;  %v1268_v2 = vld [vmem:[#allocation2 + $0x1fe8] sm:$0xff] }
 0x224   :  { %9803 = vmatpush1.bf16.msra.mxu0 %v13130_v30  ;;  %10295 = vmatpush1.bf16.msra.mxu1 %v13132_v31  ;;  %v1240_v30 = vld [vmem:[#allocation2 + $0x1f08] sm:$0xff] }
 0x225   :  { %9804 = vmatprep.subr.bf16.mxu0 %v13139_v32  ;;  %10296 = vmatprep.subr.bf16.mxu1 %v13141_v33  ;;  %v1244_v31 = vld [vmem:[#allocation2 + $0x1f28] sm:$0xff]  ;;  %v13178_v32 = vcombine.low %v1231_v16, %v1235_v18  ;;  %v13180_v33 = vcombine.low %v1232_v20, %v1236_v21 }
 0x226   :  { %v13189_v39 = vcombine.high %v1240_v30, %v1244_v31  ;;  %v13188_v58 = vcombine.low %v1240_v30, %v1244_v31  ;;  %v1272_v16 = vld [vmem:[#allocation2 + $0x2008] sm:$0xff] }
 0x227   :  { %v1276_v18 = vld [vmem:[#allocation2 + $0x2028] sm:$0xff] }
 0x228   :  { %9805 = vmatpush1.bf16.msra.mxu0 %v13138_v42  ;;  %10297 = vmatpush1.bf16.msra.mxu1 %v13140_v43  ;;  %v1248_v42 = vld [vmem:[#allocation2 + $0x1f48] sm:$0xff] }
 0x229   :  { %9806 = vmatprep.subr.bf16.mxu0 %v13147_v44  ;;  %10298 = vmatprep.subr.bf16.mxu1 %v13149_v46  ;;  %v1252_v43 = vld [vmem:[#allocation2 + $0x1f68] sm:$0xff]  ;;  %v77_v44 = vld [vmem:[%s14677_s0 + $0x20] sm:$0xff]  ;;  %v13186_v46 = vcombine.low %v1239_v25, %v1243_v29  ;;  %v14518_v29 = vpack.c.bf16 %v14491_v3, %v14491_v3 }
 0x22a   :  { %v13197_v9 = vcombine.high %v1248_v42, %v1252_v43  ;;  %v13196_v60 = vcombine.low %v1248_v42, %v1252_v43  ;;  %v1280_v30 = vld [vmem:[#allocation2 + $0x2048] sm:$0xff] }
 0x22b   :  { %v1284_v31 = vld [vmem:[#allocation2 + $0x2068] sm:$0xff] }
 0x22c   :  { %9807 = vmatpush1.bf16.msra.mxu0 %v13146_v53  ;;  %10299 = vmatpush1.bf16.msra.mxu1 %v13148_v54  ;;  %v1259_v53 = vld [vmem:[#allocation2 + $0x1fa0] sm:$0xff]  ;;  %v83_v54 = vmul.f32 0.01, %v77_v44  ;;  %v1288_v43 = vld [vmem:[#allocation2 + $0x2088] sm:$0xff] }
 0x22d   :  { %9808 = vmatprep.subr.bf16.mxu0 %v13155_v56  ;;  %10300 = vmatprep.subr.bf16.mxu1 %v13157_v57  ;;  %v1256_v56 = vld [vmem:[#allocation2 + $0x1f88] sm:$0xff]  ;;  %v13203_v28 = vcombine.high %v1255_v51, %v1259_v53  ;;  %v13202_v4 = vcombine.low %v1255_v51, %v1259_v53  ;;  %v1299_v51 = vld [vmem:[#allocation2 + $0x20e0] sm:$0xff] }
 0x22e   :  { %v1260_v57 = vld [vmem:[#allocation2 + $0x1fa8] sm:$0xff] }
 0x22f   :  { %v13205_v13 = vcombine.high %v1256_v56, %v1260_v57  ;;  %v13204_v7 = vcombine.low %v1256_v56, %v1260_v57  ;;  %v1296_v53 = vld [vmem:[#allocation2 + $0x20c8] sm:$0xff]  ;;  %v13234_v56 = vcombine.low %v1287_v40, %v1291_v41 }
 0x230   :  { %9809 = vmatpush1.bf16.msra.mxu0 %v13154_v59  ;;  %10301 = vmatpush1.bf16.msra.mxu1 %v13156_v62  ;;  %v1263_v59 = vld [vmem:[#allocation2 + $0x1fc0] sm:$0xff] }
 0x231   :  { %9810 = vmatprep.subr.bf16.mxu0 %v13163_v0  ;;  %10302 = vmatprep.subr.bf16.mxu1 %v13165_v1  ;;  %v1267_v62 = vld [vmem:[#allocation2 + $0x1fe0] sm:$0xff]  ;;  %v14508_v0 = vmax.f32 %v77_v44, %v83_v54  ;;  %v1264_v1 = vld [vmem:[#allocation2 + $0x1fc8] sm:$0xff] }
 0x232   :  { %v13211_v8 = vcombine.high %v1263_v59, %v1267_v62  ;;  %v13210_v20 = vcombine.low %v1263_v59, %v1267_v62  ;;  %v13212_v21 = vcombine.low %v1264_v1, %v1268_v2  ;;  %v1292_v44 = vld [vmem:[#allocation2 + $0x20a8] sm:$0xff] }
 0x233   :  { %v1300_v54 = vld [vmem:[#allocation2 + $0x20e8] sm:$0xff]  ;;  %v13236_v57 = vcombine.low %v1288_v43, %v1292_v44 }
 0x234   :  { %9811 = vmatpush1.bf16.msra.mxu0 %v13162_v10  ;;  %10303 = vmatpush1.bf16.msra.mxu1 %v13164_v11  ;;  %v13213_v10 = vcombine.high %v1264_v1, %v1268_v2  ;;  %v1271_v11 = vld [vmem:[#allocation2 + $0x2000] sm:$0xff]  ;;  %v1304_v59 = vld [vmem:[#allocation2 + $0x2108] sm:$0xff]  ;;  %v13244_v2 = vcombine.low %v1296_v53, %v1300_v54 }
 0x235   :  { %9812 = vmatprep.subr.bf16.mxu0 %v13171_v12  ;;  %10304 = vmatprep.subr.bf16.mxu1 %v13173_v14  ;;  %v1275_v12 = vld [vmem:[#allocation2 + $0x2020] sm:$0xff]  ;;  %v14512_v14 = vrot.slane %v14508_v0, %v14360_v63  ;;  %v1308_v62 = vld [vmem:[#allocation2 + $0x2128] sm:$0xff] }
 0x237   :  { %v180_v25 = vcombine.high %v14512_v14, %v14512_v14 }
 0x238   :  { %9813 = vmatpush1.bf16.msra.mxu0 %v13170_v23  ;;  %10305 = vmatpush1.bf16.msra.mxu1 %v13172_v22  ;;  %v13219_v23 = vcombine.high %v1271_v11, %v1275_v12  ;;  %v13221_v22 = vcombine.high %v1272_v16, %v1276_v18 }
 0x239   :  { %9814 = vmatprep.subr.bf16.mxu0 %v13179_v24  ;;  %10306 = vmatprep.subr.bf16.mxu1 %v13181_v26  ;;  %v1279_v24 = vld [vmem:[#allocation2 + $0x2040] sm:$0xff]  ;;  %v14520_v42 = vpack.c.bf16 %v180_v25, %v180_v25 }
 0x23a   :  { %v1283_v26 = vld [vmem:[#allocation2 + $0x2060] sm:$0xff] }
 0x23b   :  { %v13226_v3 = vcombine.low %v1279_v24, %v1283_v26 }
 0x23c   :  { %9815 = vmatpush1.bf16.msra.mxu0 %v13178_v32  ;;  %10307 = vmatpush1.bf16.msra.mxu1 %v13180_v33  ;;  %v13218_v32 = vcombine.low %v1271_v11, %v1275_v12  ;;  %v13220_v33 = vcombine.low %v1272_v16, %v1276_v18  ;;  %v1312_v11 = vld [vmem:[#allocation2 + $0x2148] sm:$0xff]  ;;  %v13252_v18 = vcombine.low %v1304_v59, %v1308_v62 }
 0x23d   :  { %9816 = vmatprep.subr.bf16.mxu0 %v13187_v36  ;;  %10308 = vmatprep.subr.bf16.mxu1 %v13189_v39  ;;  %v13227_v36 = vcombine.high %v1279_v24, %v1283_v26  ;;  %v13229_v39 = vcombine.high %v1280_v30, %v1284_v31  ;;  %v1316_v12 = vld [vmem:[#allocation2 + $0x2168] sm:$0xff] }
 0x23e   :  { %v1320_v24 = vld [vmem:[#allocation2 + $0x2188] sm:$0xff] }
 0x23f   :  { %v1324_v26 = vld [vmem:[#allocation2 + $0x21a8] sm:$0xff] }
 0x240   :  { %9817 = vmatpush1.bf16.msra.mxu0 %v13186_v46  ;;  %10309 = vmatpush1.bf16.msra.mxu1 %v13188_v58  ;;  %v13228_v46 = vcombine.low %v1280_v30, %v1284_v31  ;;  %v13235_v58 = vcombine.high %v1287_v40, %v1291_v41  ;;  %v13260_v30 = vcombine.low %v1312_v11, %v1316_v12  ;;  %v1332_v40 = vld [vmem:[#allocation2 + $0x21e8] sm:$0xff] }
 0x241   :  { %9818 = vmatprep.subr.bf16.mxu0 %v13195_v50  ;;  %10310 = vmatprep.subr.bf16.mxu1 %v13197_v9  ;;  %v13237_v50 = vcombine.high %v1288_v43, %v1292_v44  ;;  %v1295_v9 = vld [vmem:[#allocation2 + $0x20c0] sm:$0xff]  ;;  %v13268_v43 = vcombine.low %v1320_v24, %v1324_v26 }
 0x242   :  { %v13242_v1 = vcombine.low %v1295_v9, %v1299_v51 }
 0x244   :  { %9819 = vmatpush1.bf16.msra.mxu0 %v13194_v17  ;;  %10311 = vmatpush1.bf16.msra.mxu1 %v13196_v60  ;;  %v13243_v17 = vcombine.high %v1295_v9, %v1299_v51  ;;  %v13245_v60 = vcombine.high %v1296_v53, %v1300_v54  ;;  %v1340_v9 = vld [vmem:[#allocation2 + $0x2228] sm:$0xff] }
 0x245   :  { %9820 = vmatprep.subr.bf16.mxu0 %v13203_v28  ;;  %10312 = vmatprep.subr.bf16.mxu1 %v13205_v13  ;;  %v1303_v28 = vld [vmem:[#allocation2 + $0x2100] sm:$0xff] }
 0x246   :  { %v1307_v13 = vld [vmem:[#allocation2 + $0x2120] sm:$0xff] }
 0x247   :  { %v13250_v16 = vcombine.low %v1303_v28, %v1307_v13 }
 0x248   :  { %9821 = vmatpush1.bf16.msra.mxu0 %v13202_v4  ;;  %10313 = vmatpush1.bf16.msra.mxu1 %v13204_v7  ;;  %v13251_v4 = vcombine.high %v1303_v28, %v1307_v13  ;;  %v13253_v7 = vcombine.high %v1304_v59, %v1308_v62  ;;  %v1348_v28 = vld [vmem:[#allocation2 + $0x2268] sm:$0xff] }
 0x249   :  { %9822 = vmatprep.subr.bf16.mxu0 %v13211_v8  ;;  %10314 = vmatprep.subr.bf16.mxu1 %v13213_v10  ;;  %v1311_v8 = vld [vmem:[#allocation2 + $0x2140] sm:$0xff] }
 0x24a   :  { %v1315_v10 = vld [vmem:[#allocation2 + $0x2160] sm:$0xff] }
 0x24b   :  { %v13258_v25 = vcombine.low %v1311_v8, %v1315_v10 }
 0x24c   :  { %9823 = vmatpush1.bf16.msra.mxu0 %v13210_v20  ;;  %10315 = vmatpush1.bf16.msra.mxu1 %v13212_v21  ;;  %v13259_v20 = vcombine.high %v1311_v8, %v1315_v10  ;;  %v13261_v21 = vcombine.high %v1312_v11, %v1316_v12  ;;  %v1356_v8 = vld [vmem:[#allocation2 + $0x22a8] sm:$0xff] }
 0x24d   :  { %9833 = vmatprep.subr.bf16.mxu0 %v13219_v23  ;;  %10325 = vmatprep.subr.bf16.mxu1 %v13221_v22  ;;  %v1319_v23 = vld [vmem:[#allocation2 + $0x2180] sm:$0xff] }
 0x24e   :  { %v1323_v22 = vld [vmem:[#allocation2 + $0x21a0] sm:$0xff] }
 0x24f   :  { %9825 = vmatmul.mubr.bf16.vlgmr.msra.gmra.mrb[0].mxu0 %v14518_v29  ;;  %10317 = vmatmul.mubr.bf16.vlgmr.msra.gmra.mrb[0].mxu1 %v14518_v29  ;;  %v13267_v31 = vcombine.high %v1319_v23, %v1323_v22  ;;  %v13266_v41 = vcombine.low %v1319_v23, %v1323_v22  ;;  %v1364_v23 = vld [vmem:[#allocation2 + $0x22e8] sm:$0xff] }
 0x250   :  { %9834 = vmatpush1.bf16.msra.mxu0 %v13218_v32  ;;  %10326 = vmatpush1.bf16.msra.mxu1 %v13220_v33  ;;  %v13269_v32 = vcombine.high %v1320_v24, %v1324_v26  ;;  %v1327_v33 = vld [vmem:[#allocation2 + $0x21c0] sm:$0xff] }
 0x251   :  { %9835 = vmatprep.subr.bf16.mxu0 %v13227_v36  ;;  %10327 = vmatprep.subr.bf16.mxu1 %v13229_v39  ;;  %v1331_v36 = vld [vmem:[#allocation2 + $0x21e0] sm:$0xff]  ;;  %v1328_v39 = vld [vmem:[#allocation2 + $0x21c8] sm:$0xff] }
 0x252   :  { %9865 = vmatprep.mubr.bf16.mxu0 %v14520_v42  ;;  %10357 = vmatprep.mubr.bf16.mxu1 %v14520_v42  ;;  %v13275_v44 = vcombine.high %v1327_v33, %v1331_v36  ;;  %v13274_v51 = vcombine.low %v1327_v33, %v1331_v36  ;;  %v13276_v53 = vcombine.low %v1328_v39, %v1332_v40  ;;  %v1372_v33 = vld [vmem:[#allocation2 + $0x2328] sm:$0xff] }
 0x254   :  { %9836 = vmatpush1.bf16.msra.mxu0 %v13226_v3  ;;  %10328 = vmatpush1.bf16.msra.mxu1 %v13228_v46  ;;  %v13277_v3 = vcombine.high %v1328_v39, %v1332_v40  ;;  %v1335_v46 = vld [vmem:[#allocation2 + $0x2200] sm:$0xff] }
 0x255   :  { %9837 = vmatprep.subr.bf16.mxu0 %v13235_v58  ;;  %10329 = vmatprep.subr.bf16.mxu1 %v13237_v50  ;;  %v1339_v58 = vld [vmem:[#allocation2 + $0x2220] sm:$0xff]  ;;  %v1336_v50 = vld [vmem:[#allocation2 + $0x2208] sm:$0xff] }
 0x256   :  { %v13283_v54 = vcombine.high %v1335_v46, %v1339_v58  ;;  %v13282_v13 = vcombine.low %v1335_v46, %v1339_v58  ;;  %v13284_v59 = vcombine.low %v1336_v50, %v1340_v9  ;;  %v1380_v46 = vld [vmem:[#allocation2 + $0x2368] sm:$0xff] }
 0x258   :  { %9838 = vmatpush1.bf16.msra.mxu0 %v13234_v56  ;;  %10330 = vmatpush1.bf16.msra.mxu1 %v13236_v57  ;;  %v13285_v56 = vcombine.high %v1336_v50, %v1340_v9  ;;  %v1343_v57 = vld [vmem:[#allocation2 + $0x2240] sm:$0xff] }
 0x259   :  { %9839 = vmatprep.subr.bf16.mxu0 %v13243_v17  ;;  %10331 = vmatprep.subr.bf16.mxu1 %v13245_v60  ;;  %v1347_v17 = vld [vmem:[#allocation2 + $0x2260] sm:$0xff]  ;;  %v1344_v60 = vld [vmem:[#allocation2 + $0x2248] sm:$0xff] }
 0x25a   :  { %v13291_v62 = vcombine.high %v1343_v57, %v1347_v17  ;;  %v13290_v10 = vcombine.low %v1343_v57, %v1347_v17  ;;  %v13292_v11 = vcombine.low %v1344_v60, %v1348_v28  ;;  %v1388_v57 = vld [vmem:[#allocation2 + $0x23a8] sm:$0xff] }
 0x25c   :  { %9840 = vmatpush1.bf16.msra.mxu0 %v13242_v1  ;;  %10332 = vmatpush1.bf16.msra.mxu1 %v13244_v2  ;;  %v13293_v1 = vcombine.high %v1344_v60, %v1348_v28  ;;  %v1351_v2 = vld [vmem:[#allocation2 + $0x2280] sm:$0xff] }
 0x25d   :  { %9841 = vmatprep.subr.bf16.mxu0 %v13251_v4  ;;  %10333 = vmatprep.subr.bf16.mxu1 %v13253_v7  ;;  %v1355_v4 = vld [vmem:[#allocation2 + $0x22a0] sm:$0xff]  ;;  %v1352_v7 = vld [vmem:[#allocation2 + $0x2288] sm:$0xff] }
 0x25e   :  { %v13299_v12 = vcombine.high %v1351_v2, %v1355_v4  ;;  %v13298_v22 = vcombine.low %v1351_v2, %v1355_v4  ;;  %v13300_v24 = vcombine.low %v1352_v7, %v1356_v8  ;;  %v1392_v2 = vld [vmem:[#allocation2 + $0x23c8] sm:$0xff] }
 0x25f   :  { %v1396_v4 = vld [vmem:[#allocation2 + $0x23e8] sm:$0xff] }
 0x260   :  { %9842 = vmatpush1.bf16.msra.mxu0 %v13250_v16  ;;  %10334 = vmatpush1.bf16.msra.mxu1 %v13252_v18  ;;  %v13301_v16 = vcombine.high %v1352_v7, %v1356_v8  ;;  %v1359_v18 = vld [vmem:[#allocation2 + $0x22c0] sm:$0xff] }
 0x261   :  { %9843 = vmatprep.subr.bf16.mxu0 %v13259_v20  ;;  %10335 = vmatprep.subr.bf16.mxu1 %v13261_v21  ;;  %v1363_v20 = vld [vmem:[#allocation2 + $0x22e0] sm:$0xff]  ;;  %v1360_v21 = vld [vmem:[#allocation2 + $0x22c8] sm:$0xff] }
 0x262   :  { %v13307_v26 = vcombine.high %v1359_v18, %v1363_v20  ;;  %v13306_v36 = vcombine.low %v1359_v18, %v1363_v20  ;;  %v13308_v39 = vcombine.low %v1360_v21, %v1364_v23  ;;  %v1400_v20 = vld [vmem:[#allocation2 + $0x2408] sm:$0xff] }
 0x264   :  { %9844 = vmatpush1.bf16.msra.mxu0 %v13258_v25  ;;  %10336 = vmatpush1.bf16.msra.mxu1 %v13260_v30  ;;  %v13309_v25 = vcombine.high %v1360_v21, %v1364_v23  ;;  %v1367_v30 = vld [vmem:[#allocation2 + $0x2300] sm:$0xff]  ;;  %v1404_v21 = vld [vmem:[#allocation2 + $0x2428] sm:$0xff] }
 0x265   :  { %9845 = vmatprep.subr.bf16.mxu0 %v13267_v31  ;;  %10337 = vmatprep.subr.bf16.mxu1 %v13269_v32  ;;  %v1371_v31 = vld [vmem:[#allocation2 + $0x2320] sm:$0xff]  ;;  %v1368_v32 = vld [vmem:[#allocation2 + $0x2308] sm:$0xff] }
 0x266   :  { %v13315_v40 = vcombine.high %v1367_v30, %v1371_v31  ;;  %v13314_v58 = vcombine.low %v1367_v30, %v1371_v31  ;;  %v13316_v50 = vcombine.low %v1368_v32, %v1372_v33  ;;  %v14535_v31 = vpack.c.bf16 %v14512_v14, %v14512_v14 }
 0x268   :  { %9846 = vmatpush1.bf16.msra.mxu0 %v13266_v41  ;;  %10338 = vmatpush1.bf16.msra.mxu1 %v13268_v43  ;;  %v13317_v41 = vcombine.high %v1368_v32, %v1372_v33  ;;  %v1375_v43 = vld [vmem:[#allocation2 + $0x2340] sm:$0xff]  ;;  %v1408_v32 = vld [vmem:[#allocation2 + $0x2448] sm:$0xff] }
 0x269   :  { %9847 = vmatprep.subr.bf16.mxu0 %v13275_v44  ;;  %10339 = vmatprep.subr.bf16.mxu1 %v13277_v3  ;;  %v1379_v44 = vld [vmem:[#allocation2 + $0x2360] sm:$0xff]  ;;  %v1376_v3 = vld [vmem:[#allocation2 + $0x2348] sm:$0xff] }
 0x26a   :  { %v13323_v9 = vcombine.high %v1375_v43, %v1379_v44  ;;  %v13322_v17 = vcombine.low %v1375_v43, %v1379_v44  ;;  %v13324_v60 = vcombine.low %v1376_v3, %v1380_v46  ;;  %v1412_v33 = vld [vmem:[#allocation2 + $0x2468] sm:$0xff]  ;;  %v1415_v43 = vld [vmem:[#allocation2 + $0x2480] sm:$0xff] }
 0x26b   :  { %v1419_v44 = vld [vmem:[#allocation2 + $0x24a0] sm:$0xff] }
 0x26c   :  { %9848 = vmatpush1.bf16.msra.mxu0 %v13274_v51  ;;  %10340 = vmatpush1.bf16.msra.mxu1 %v13276_v53  ;;  %v13325_v51 = vcombine.high %v1376_v3, %v1380_v46  ;;  %v1383_v53 = vld [vmem:[#allocation2 + $0x2380] sm:$0xff]  ;;  %v1416_v46 = vld [vmem:[#allocation2 + $0x2488] sm:$0xff] }
 0x26d   :  { %9849 = vmatprep.subr.bf16.mxu0 %v13283_v54  ;;  %10341 = vmatprep.subr.bf16.mxu1 %v13285_v56  ;;  %v1387_v54 = vld [vmem:[#allocation2 + $0x23a0] sm:$0xff]  ;;  %v1384_v56 = vld [vmem:[#allocation2 + $0x2388] sm:$0xff] }
 0x26e   :  { %v13331_v28 = vcombine.high %v1383_v53, %v1387_v54  ;;  %v13330_v7 = vcombine.low %v1383_v53, %v1387_v54  ;;  %v13332_v8 = vcombine.low %v1384_v56, %v1388_v57  ;;  %v1423_v53 = vld [vmem:[#allocation2 + $0x24c0] sm:$0xff] }
 0x26f   :  { %v1427_v54 = vld [vmem:[#allocation2 + $0x24e0] sm:$0xff] }
 0x270   :  { %9850 = vmatpush1.bf16.msra.mxu0 %v13282_v13  ;;  %10342 = vmatpush1.bf16.msra.mxu1 %v13284_v59  ;;  %v13333_v13 = vcombine.high %v1384_v56, %v1388_v57  ;;  %v1391_v59 = vld [vmem:[#allocation2 + $0x23c0] sm:$0xff]  ;;  %v1424_v56 = vld [vmem:[#allocation2 + $0x24c8] sm:$0xff] }
 0x271   :  { %9851 = vmatprep.subr.bf16.mxu0 %v13291_v62  ;;  %10343 = vmatprep.subr.bf16.mxu1 %v13293_v1  ;;  %v1395_v62 = vld [vmem:[#allocation2 + $0x23e0] sm:$0xff]  ;;  %v165_v1 = vcombine.high %v14508_v0, %v14508_v0  ;;  %v13340_v0 = vcombine.low %v1392_v2, %v1396_v4  ;;  %v1428_v57 = vld [vmem:[#allocation2 + $0x24e8] sm:$0xff] }
 0x272   :  { %v13338_v23 = vcombine.low %v1391_v59, %v1395_v62 }
 0x273   :  { %v14529_v18 = vrot.slane %v165_v1, %v14360_v63  ;;  %v1432_v1 = vld [vmem:[#allocation2 + $0x2508] sm:$0xff] }
 0x274   :  { %9852 = vmatpush1.bf16.msra.mxu0 %v13290_v10  ;;  %10344 = vmatpush1.bf16.msra.mxu1 %v13292_v11  ;;  %v13339_v10 = vcombine.high %v1391_v59, %v1395_v62  ;;  %v13341_v11 = vcombine.high %v1392_v2, %v1396_v4  ;;  %v1431_v59 = vld [vmem:[#allocation2 + $0x2500] sm:$0xff]  ;;  %v1436_v2 = vld [vmem:[#allocation2 + $0x2528] sm:$0xff]  ;;  %v13370_v4 = vcombine.low %v1423_v53, %v1427_v54 }
 0x275   :  { %9853 = vmatprep.subr.bf16.mxu0 %v13299_v12  ;;  %10345 = vmatprep.subr.bf16.mxu1 %v13301_v16  ;;  %v1399_v12 = vld [vmem:[#allocation2 + $0x2400] sm:$0xff]  ;;  %v181_v30 = vcombine.high %v14529_v18, %v14529_v18 }
 0x276   :  { %v1403_v16 = vld [vmem:[#allocation2 + $0x2420] sm:$0xff] }
 0x277   :  { %v14537_v3 = vpack.c.bf16 %v181_v30, %v181_v30  ;;  %v1435_v62 = vld [vmem:[#allocation2 + $0x2520] sm:$0xff]  ;;  %v1452_v30 = vld [vmem:[#allocation2 + $0x25a8] sm:$0xff] }
 0x278   :  { %9854 = vmatpush1.bf16.msra.mxu0 %v13298_v22  ;;  %10346 = vmatpush1.bf16.msra.mxu1 %v13300_v24  ;;  %v13347_v22 = vcombine.high %v1399_v12, %v1403_v16  ;;  %v13349_v24 = vcombine.high %v1400_v20, %v1404_v21 }
 0x279   :  { %9855 = vmatprep.subr.bf16.mxu0 %v13307_v26  ;;  %10347 = vmatprep.subr.bf16.mxu1 %v13309_v25  ;;  %v1407_v26 = vld [vmem:[#allocation2 + $0x2440] sm:$0xff] }
 0x27a   :  { %v1411_v25 = vld [vmem:[#allocation2 + $0x2460] sm:$0xff] }
 0x27b   :  { %v13354_v14 = vcombine.low %v1407_v26, %v1411_v25 }
 0x27c   :  { %9856 = vmatpush1.bf16.msra.mxu0 %v13306_v36  ;;  %10348 = vmatpush1.bf16.msra.mxu1 %v13308_v39  ;;  %v13346_v36 = vcombine.low %v1399_v12, %v1403_v16  ;;  %v13348_v39 = vcombine.low %v1400_v20, %v1404_v21  ;;  %v1443_v12 = vld [vmem:[#allocation2 + $0x2560] sm:$0xff]  ;;  %v1440_v16 = vld [vmem:[#allocation2 + $0x2548] sm:$0xff]  ;;  %v13378_v21 = vcombine.low %v1431_v59, %v1435_v62 }
 0x27d   :  { %9857 = vmatprep.subr.bf16.mxu0 %v13315_v40  ;;  %10349 = vmatprep.subr.bf16.mxu1 %v13317_v41  ;;  %v13355_v40 = vcombine.high %v1407_v26, %v1411_v25  ;;  %v13357_v41 = vcombine.high %v1408_v32, %v1412_v33  ;;  %v1444_v20 = vld [vmem:[#allocation2 + $0x2568] sm:$0xff]  ;;  %v1451_v26 = vld [vmem:[#allocation2 + $0x25a0] sm:$0xff] }
 0x27e   :  { %v1448_v25 = vld [vmem:[#allocation2 + $0x2588] sm:$0xff] }
 0x280   :  { %9858 = vmatpush1.bf16.msra.mxu0 %v13314_v58  ;;  %10350 = vmatpush1.bf16.msra.mxu1 %v13316_v50  ;;  %v1420_v58 = vld [vmem:[#allocation2 + $0x24a8] sm:$0xff]  ;;  %v13356_v50 = vcombine.low %v1408_v32, %v1412_v33  ;;  %v13388_v33 = vcombine.low %v1440_v16, %v1444_v20 }
 0x281   :  { %9859 = vmatprep.subr.bf16.mxu0 %v13323_v9  ;;  %10351 = vmatprep.subr.bf16.mxu1 %v13325_v51  ;;  %v13363_v9 = vcombine.high %v1415_v43, %v1419_v44  ;;  %v13365_v51 = vcombine.high %v1416_v46, %v1420_v58 }
 0x284   :  { %9860 = vmatpush1.bf16.msra.mxu0 %v13322_v17  ;;  %10352 = vmatpush1.bf16.msra.mxu1 %v13324_v60  ;;  %v13362_v17 = vcombine.low %v1415_v43, %v1419_v44  ;;  %v13364_v60 = vcombine.low %v1416_v46, %v1420_v58  ;;  %v1456_v43 = vld [vmem:[#allocation2 + $0x25c8] sm:$0xff]  ;;  %v13396_v58 = vcombine.low %v1448_v25, %v1452_v30 }
 0x285   :  { %9861 = vmatprep.subr.bf16.mxu0 %v13331_v28  ;;  %10353 = vmatprep.subr.bf16.mxu1 %v13333_v13  ;;  %v13371_v28 = vcombine.high %v1423_v53, %v1427_v54  ;;  %v13373_v13 = vcombine.high %v1424_v56, %v1428_v57  ;;  %v1460_v44 = vld [vmem:[#allocation2 + $0x25e8] sm:$0xff] }
 0x286   :  { %v1464_v53 = vld [vmem:[#allocation2 + $0x2608] sm:$0xff] }
 0x287   :  { %v1468_v54 = vld [vmem:[#allocation2 + $0x2628] sm:$0xff] }
 0x288   :  { %9862 = vmatpush1.bf16.msra.mxu0 %v13330_v7  ;;  %10354 = vmatpush1.bf16.msra.mxu1 %v13332_v8  ;;  %v13372_v7 = vcombine.low %v1424_v56, %v1428_v57  ;;  %v13379_v8 = vcombine.high %v1431_v59, %v1435_v62  ;;  %v13404_v57 = vcombine.low %v1456_v43, %v1460_v44  ;;  %v1472_v59 = vld [vmem:[#allocation2 + $0x2648] sm:$0xff] }
 0x289   :  { %9863 = vmatprep.subr.bf16.mxu0 %v13339_v10  ;;  %10355 = vmatprep.subr.bf16.mxu1 %v13341_v11  ;;  %v13381_v10 = vcombine.high %v1432_v1, %v1436_v2  ;;  %v1439_v11 = vld [vmem:[#allocation2 + $0x2540] sm:$0xff]  ;;  %v1476_v62 = vld [vmem:[#allocation2 + $0x2668] sm:$0xff] }
 0x28a   :  { %v13386_v32 = vcombine.low %v1439_v11, %v1443_v12 }
 0x28c   :  { %9864 = vmatpush1.bf16.msra.mxu0 %v13338_v23  ;;  %10356 = vmatpush1.bf16.msra.mxu1 %v13340_v0  ;;  %v13380_v23 = vcombine.low %v1432_v1, %v1436_v2  ;;  %v13387_v0 = vcombine.high %v1439_v11, %v1443_v12  ;;  %v13412_v2 = vcombine.low %v1464_v53, %v1468_v54  ;;  %v1480_v11 = vld [vmem:[#allocation2 + $0x2688] sm:$0xff] }
 0x28d   :  { %9874 = vmatprep.subr.bf16.mxu0 %v13347_v22  ;;  %10366 = vmatprep.subr.bf16.mxu1 %v13349_v24  ;;  %v13389_v22 = vcombine.high %v1440_v16, %v1444_v20  ;;  %v1447_v24 = vld [vmem:[#allocation2 + $0x2580] sm:$0xff]  ;;  %v1484_v12 = vld [vmem:[#allocation2 + $0x26a8] sm:$0xff]  ;;  %v13420_v20 = vcombine.low %v1472_v59, %v1476_v62 }
 0x28e   :  { %v13394_v46 = vcombine.low %v1447_v24, %v1451_v26 }
 0x28f   :  { %9866 = vmatmul.mubr.bf16.vlgmr.msra.gmra.mrb[0].mxu0 %v14535_v31  ;;  %10358 = vmatmul.mubr.bf16.vlgmr.msra.gmra.mrb[0].mxu1 %v14535_v31 }
 0x290   :  { %9875 = vmatpush1.bf16.msra.mxu0 %v13346_v36  ;;  %10367 = vmatpush1.bf16.msra.mxu1 %v13348_v39  ;;  %v13395_v36 = vcombine.high %v1447_v24, %v1451_v26  ;;  %v13397_v39 = vcombine.high %v1448_v25, %v1452_v30  ;;  %v1488_v24 = vld [vmem:[#allocation2 + $0x26c8] sm:$0xff]  ;;  %v13428_v30 = vcombine.low %v1480_v11, %v1484_v12 }
 0x291   :  { %9876 = vmatprep.subr.bf16.mxu0 %v13355_v40  ;;  %10368 = vmatprep.subr.bf16.mxu1 %v13357_v41  ;;  %v1455_v40 = vld [vmem:[#allocation2 + $0x25c0] sm:$0xff]  ;;  %v1492_v26 = vld [vmem:[#allocation2 + $0x26e8] sm:$0xff] }
 0x292   :  { %9906 = vmatprep.mubr.bf16.mxu0 %v14537_v3  ;;  %10398 = vmatprep.mubr.bf16.mxu1 %v14537_v3  ;;  %v1459_v41 = vld [vmem:[#allocation2 + $0x25e0] sm:$0xff] }
 0x293   :  { %v13402_v56 = vcombine.low %v1455_v40, %v1459_v41 }
 0x294   :  { %9877 = vmatpush1.bf16.msra.mxu0 %v13354_v14  ;;  %10369 = vmatpush1.bf16.msra.mxu1 %v13356_v50  ;;  %v13403_v14 = vcombine.high %v1455_v40, %v1459_v41  ;;  %v13405_v50 = vcombine.high %v1456_v43, %v1460_v44  ;;  %v1496_v40 = vld [vmem:[#allocation2 + $0x2708] sm:$0xff]  ;;  %v13436_v44 = vcombine.low %v1488_v24, %v1492_v26 }
 0x295   :  { %9878 = vmatprep.subr.bf16.mxu0 %v13363_v9  ;;  %10370 = vmatprep.subr.bf16.mxu1 %v13365_v51  ;;  %v1463_v9 = vld [vmem:[#allocation2 + $0x2600] sm:$0xff]  ;;  %v1500_v41 = vld [vmem:[#allocation2 + $0x2728] sm:$0xff] }
 0x296   :  { %v1467_v51 = vld [vmem:[#allocation2 + $0x2620] sm:$0xff] }
 0x297   :  { %v13410_v1 = vcombine.low %v1463_v9, %v1467_v51 }
 0x298   :  { %9879 = vmatpush1.bf16.msra.mxu0 %v13362_v17  ;;  %10371 = vmatpush1.bf16.msra.mxu1 %v13364_v60  ;;  %v13411_v17 = vcombine.high %v1463_v9, %v1467_v51  ;;  %v13413_v60 = vcombine.high %v1464_v53, %v1468_v54  ;;  %v1504_v9 = vld [vmem:[#allocation2 + $0x2748] sm:$0xff] }
 0x299   :  { %9880 = vmatprep.subr.bf16.mxu0 %v13371_v28  ;;  %10372 = vmatprep.subr.bf16.mxu1 %v13373_v13  ;;  %v1471_v28 = vld [vmem:[#allocation2 + $0x2640] sm:$0xff]  ;;  %v1508_v51 = vld [vmem:[#allocation2 + $0x2768] sm:$0xff] }
 0x29a   :  { %v1475_v13 = vld [vmem:[#allocation2 + $0x2660] sm:$0xff]  ;;  %v78_v53 = vld [vmem:[%s14677_s0 + $0x28] sm:$0xff]  ;;  %s14268_s0 = smov [#allocation10]  }
 0x29b   :  { %v13418_v16 = vcombine.low %v1471_v28, %v1475_v13  ;;  %s12183_s1 = sshll.u32 %s14268_s0, 4  ;;  %s12184_s1 = int_to_ptr.vmem [resolvable:$true] %s12183_s1 }
 0x29c   :  { %9881 = vmatpush1.bf16.msra.mxu0 %v13370_v4  ;;  %10373 = vmatpush1.bf16.msra.mxu1 %v13372_v7  ;;  %v13419_v4 = vcombine.high %v1471_v28, %v1475_v13  ;;  %v13421_v7 = vcombine.high %v1472_v59, %v1476_v62  ;;  %v1515_v28 = vld [vmem:[#allocation2 + $0x27a0] sm:$0xff]  ;;  %v84_v13 = vmul.f32 0.01, %v78_v53  ;;  %v1512_v59 = vld [vmem:[#allocation2 + $0x2788] sm:$0xff]  ;;  %s14229_s21 = scalar_lea.vmem %s12184_s1, 32  ;;  %p14234_p5 = scmp.lt.s32.totalorder %s12184_s1, %s12184_s1 }
 0x29d   :  { %9882 = vmatprep.subr.bf16.mxu0 %v13379_v8  ;;  %10374 = vmatprep.subr.bf16.mxu1 %v13381_v10  ;;  %v1479_v8 = vld [vmem:[#allocation2 + $0x2680] sm:$0xff]  ;;  %v1516_v62 = vld [vmem:[#allocation2 + $0x27a8] sm:$0xff]  ;;  %p14230_p4 = scmp.ne.s32.totalorder %s12184_s1, %s14229_s21  ;;  %p14235_p6 = scmp.lt.s32.totalorder %s14229_s21, %s14229_s21 }
 0x29e   :  { %v1483_v10 = vld [vmem:[#allocation2 + $0x26a0] sm:$0xff] }
 0x29f   :  { %v13426_v25 = vcombine.low %v1479_v8, %v1483_v10  ;;  %p14236_p7 = por %p14235_p6, %p14234_p5 }
 0x2a0   :  { %9883 = vmatpush1.bf16.msra.mxu0 %v13378_v21  ;;  %10375 = vmatpush1.bf16.msra.mxu1 %v13380_v23  ;;  %v13427_v21 = vcombine.high %v1479_v8, %v1483_v10  ;;  %v13429_v23 = vcombine.high %v1480_v11, %v1484_v12  ;;  %v1519_v8 = vld [vmem:[#allocation2 + $0x27c0] sm:$0xff]  ;;  %v14546_v11 = vmax.f32 %v78_v53, %v84_v13  ;;  %v1520_v12 = vld [vmem:[#allocation2 + $0x27c8] sm:$0xff] }
 0x2a1   :  { %9884 = vmatprep.subr.bf16.mxu0 %v13387_v0  ;;  %10376 = vmatprep.subr.bf16.mxu1 %v13389_v22  ;;  %v1487_v0 = vld [vmem:[#allocation2 + $0x26c0] sm:$0xff]  ;;  %p14237_p8 = pnand %p14236_p7, %p14230_p4 }
 0x2a2   :  { %v1491_v22 = vld [vmem:[#allocation2 + $0x26e0] sm:$0xff] }
 0x2a3   :  { %v13434_v43 = vcombine.low %v1487_v0, %v1491_v22  ;;  %v1523_v10 = vld [vmem:[#allocation2 + $0x27e0] sm:$0xff] }
 0x2a4   :  { %9885 = vmatpush1.bf16.msra.mxu0 %v13386_v32  ;;  %10377 = vmatpush1.bf16.msra.mxu1 %v13388_v33  ;;  %v13435_v32 = vcombine.high %v1487_v0, %v1491_v22  ;;  %v13437_v33 = vcombine.high %v1488_v24, %v1492_v26  ;;  %v1527_v22 = vld [vmem:[#allocation2 + $0x2800] sm:$0xff]  ;;  %v14550_v26 = vrot.slane %v14546_v11, %v14360_v63 }
 0x2a5   :  { %9886 = vmatprep.subr.bf16.mxu0 %v13395_v36  ;;  %10378 = vmatprep.subr.bf16.mxu1 %v13397_v39  ;;  %v1495_v36 = vld [vmem:[#allocation2 + $0x2700] sm:$0xff] }
 0x2a6   :  { %v1499_v39 = vld [vmem:[#allocation2 + $0x2720] sm:$0xff] }
 0x2a7   :  { %v13442_v54 = vcombine.low %v1495_v36, %v1499_v39  ;;  %v1531_v24 = vld [vmem:[#allocation2 + $0x2820] sm:$0xff] }
 0x2a8   :  { %9887 = vmatpush1.bf16.msra.mxu0 %v13394_v46  ;;  %10379 = vmatpush1.bf16.msra.mxu1 %v13396_v58  ;;  %v13443_v46 = vcombine.high %v1495_v36, %v1499_v39  ;;  %v13445_v58 = vcombine.high %v1496_v40, %v1500_v41  ;;  %v13475_v36 = vcombine.high %v1527_v22, %v1531_v24  ;;  %v1543_v53 = vld [vmem:[#allocation2 + $0x2880] sm:$0xff] }
 0x2a9   :  { %9888 = vmatprep.subr.bf16.mxu0 %v13403_v14  ;;  %10380 = vmatprep.subr.bf16.mxu1 %v13405_v50  ;;  %v1503_v14 = vld [vmem:[#allocation2 + $0x2740] sm:$0xff] }
 0x2aa   :  { %v1507_v50 = vld [vmem:[#allocation2 + $0x2760] sm:$0xff] }
 0x2ac   :  { %9889 = vmatpush1.bf16.msra.mxu0 %v13402_v56  ;;  %10381 = vmatpush1.bf16.msra.mxu1 %v13404_v57  ;;  %v13444_v56 = vcombine.low %v1496_v40, %v1500_v41  ;;  %v13451_v57 = vcombine.high %v1503_v14, %v1507_v50  ;;  %v1535_v40 = vld [vmem:[#allocation2 + $0x2840] sm:$0xff] }
 0x2ad   :  { %9890 = vmatprep.subr.bf16.mxu0 %v13411_v17  ;;  %10382 = vmatprep.subr.bf16.mxu1 %v13413_v60  ;;  %v13453_v17 = vcombine.high %v1504_v9, %v1508_v51  ;;  %v1511_v60 = vld [vmem:[#allocation2 + $0x2780] sm:$0xff] }
 0x2ae   :  { %v1539_v41 = vld [vmem:[#allocation2 + $0x2860] sm:$0xff] }
 0x2b0   :  { %9891 = vmatpush1.bf16.msra.mxu0 %v13410_v1  ;;  %10383 = vmatpush1.bf16.msra.mxu1 %v13412_v2  ;;  %v13450_v1 = vcombine.low %v1503_v14, %v1507_v50  ;;  %v13452_v2 = vcombine.low %v1504_v9, %v1508_v51  ;;  %v13474_v14 = vcombine.low %v1527_v22, %v1531_v24 }
 0x2b1   :  { %9892 = vmatprep.subr.bf16.mxu0 %v13419_v4  ;;  %10384 = vmatprep.subr.bf16.mxu1 %v13421_v7  ;;  %v13459_v4 = vcombine.high %v1511_v60, %v1515_v28  ;;  %v13461_v7 = vcombine.high %v1512_v59, %v1516_v62  ;;  %v13483_v9 = vcombine.high %v1535_v40, %v1539_v41 }
 0x2b4   :  { %9893 = vmatpush1.bf16.msra.mxu0 %v13418_v16  ;;  %10385 = vmatpush1.bf16.msra.mxu1 %v13420_v20  ;;  %v1524_v16 = vld [vmem:[#allocation2 + $0x27e8] sm:$0xff]  ;;  %v13458_v20 = vcombine.low %v1511_v60, %v1515_v28 }
 0x2b5   :  { %9894 = vmatprep.subr.bf16.mxu0 %v13427_v21  ;;  %10386 = vmatprep.subr.bf16.mxu1 %v13429_v23  ;;  %v13460_v21 = vcombine.low %v1512_v59, %v1516_v62  ;;  %v13467_v23 = vcombine.high %v1519_v8, %v1523_v10  ;;  %v13469_v0 = vcombine.high %v1520_v12, %v1524_v16  ;;  %v1551_v59 = vld [vmem:[#allocation2 + $0x28c0] sm:$0xff] }
 0x2b6   :  { %v1555_v62 = vld [vmem:[#allocation2 + $0x28e0] sm:$0xff] }
 0x2b8   :  { %9895 = vmatpush1.bf16.msra.mxu0 %v13426_v25  ;;  %10387 = vmatpush1.bf16.msra.mxu1 %v13428_v30  ;;  %v1528_v25 = vld [vmem:[#allocation2 + $0x2808] sm:$0xff] }
 0x2b9   :  { %9896 = vmatprep.subr.bf16.mxu0 %v13435_v32  ;;  %10388 = vmatprep.subr.bf16.mxu1 %v13437_v33  ;;  %v1532_v30 = vld [vmem:[#allocation2 + $0x2828] sm:$0xff]  ;;  %v13466_v32 = vcombine.low %v1519_v8, %v1523_v10  ;;  %v13468_v33 = vcombine.low %v1520_v12, %v1524_v16  ;;  %v13499_v8 = vcombine.high %v1551_v59, %v1555_v62  ;;  %v1559_v12 = vld [vmem:[#allocation2 + $0x2900] sm:$0xff] }
 0x2ba   :  { %v13477_v39 = vcombine.high %v1528_v25, %v1532_v30  ;;  %v13476_v50 = vcombine.low %v1528_v25, %v1532_v30  ;;  %v1563_v16 = vld [vmem:[#allocation2 + $0x2920] sm:$0xff] }
 0x2bb   :  { %v13507_v22 = vcombine.high %v1559_v12, %v1563_v16  ;;  %v1567_v25 = vld [vmem:[#allocation2 + $0x2940] sm:$0xff] }
 0x2bc   :  { %9897 = vmatpush1.bf16.msra.mxu0 %v13434_v43  ;;  %10389 = vmatpush1.bf16.msra.mxu1 %v13436_v44  ;;  %v197_v43 = vcombine.high %v14550_v26, %v14550_v26  ;;  %v14556_v44 = vpack.c.bf16 %v14529_v18, %v14529_v18  ;;  %v13482_v18 = vcombine.low %v1535_v40, %v1539_v41  ;;  %v1571_v30 = vld [vmem:[#allocation2 + $0x2960] sm:$0xff] }
 0x2bd   :  { %9898 = vmatprep.subr.bf16.mxu0 %v13443_v46  ;;  %10390 = vmatprep.subr.bf16.mxu1 %v13445_v58  ;;  %v1536_v46 = vld [vmem:[#allocation2 + $0x2848] sm:$0xff]  ;;  %v13515_v40 = vcombine.high %v1567_v25, %v1571_v30 }
 0x2be   :  { %v1540_v58 = vld [vmem:[#allocation2 + $0x2868] sm:$0xff] }
 0x2bf   :  { %v13485_v51 = vcombine.high %v1536_v46, %v1540_v58  ;;  %v13484_v60 = vcombine.low %v1536_v46, %v1540_v58  ;;  %v1579_v46 = vld [vmem:[#allocation2 + $0x29a0] sm:$0xff]  ;;  %v1576_v58 = vld [vmem:[#allocation2 + $0x2988] sm:$0xff] }
 0x2c0   :  { %9899 = vmatpush1.bf16.msra.mxu0 %v13442_v54  ;;  %10391 = vmatpush1.bf16.msra.mxu1 %v13444_v56  ;;  %v1547_v54 = vld [vmem:[#allocation2 + $0x28a0] sm:$0xff]  ;;  %v14558_v56 = vpack.c.bf16 %v197_v43, %v197_v43 }
 0x2c1   :  { %9900 = vmatprep.subr.bf16.mxu0 %v13451_v57  ;;  %10392 = vmatprep.subr.bf16.mxu1 %v13453_v17  ;;  %v1544_v57 = vld [vmem:[#allocation2 + $0x2888] sm:$0xff]  ;;  %v13491_v28 = vcombine.high %v1543_v53, %v1547_v54  ;;  %v1575_v43 = vld [vmem:[#allocation2 + $0x2980] sm:$0xff] }
 0x2c2   :  { %v1548_v17 = vld [vmem:[#allocation2 + $0x28a8] sm:$0xff] }
 0x2c3   :  { %v13493_v13 = vcombine.high %v1544_v57, %v1548_v17 }
 0x2c4   :  { %9901 = vmatpush1.bf16.msra.mxu0 %v13450_v1  ;;  %10393 = vmatpush1.bf16.msra.mxu1 %v13452_v2  ;;  %v1552_v1 = vld [vmem:[#allocation2 + $0x28c8] sm:$0xff] }
 0x2c5   :  { %9902 = vmatprep.subr.bf16.mxu0 %v13459_v4  ;;  %10394 = vmatprep.subr.bf16.mxu1 %v13461_v7  ;;  %v1556_v2 = vld [vmem:[#allocation2 + $0x28e8] sm:$0xff]  ;;  %v13490_v4 = vcombine.low %v1543_v53, %v1547_v54  ;;  %v13492_v7 = vcombine.low %v1544_v57, %v1548_v17  ;;  %v1583_v54 = vld [vmem:[#allocation2 + $0x29c0] sm:$0xff] }
 0x2c6   :  { %v13501_v10 = vcombine.high %v1552_v1, %v1556_v2  ;;  %v1587_v57 = vld [vmem:[#allocation2 + $0x29e0] sm:$0xff]  ;;  %v1584_v17 = vld [vmem:[#allocation2 + $0x29c8] sm:$0xff] }
 0x2c8   :  { %9903 = vmatpush1.bf16.msra.mxu0 %v13458_v20  ;;  %10395 = vmatpush1.bf16.msra.mxu1 %v13460_v21  ;;  %v1560_v20 = vld [vmem:[#allocation2 + $0x2908] sm:$0xff] }
 0x2c9   :  { %9904 = vmatprep.subr.bf16.mxu0 %v13467_v23  ;;  %10396 = vmatprep.subr.bf16.mxu1 %v13469_v0  ;;  %v1564_v21 = vld [vmem:[#allocation2 + $0x2928] sm:$0xff]  ;;  %v13498_v23 = vcombine.low %v1551_v59, %v1555_v62  ;;  %v13500_v0 = vcombine.low %v1552_v1, %v1556_v2  ;;  %v1591_v62 = vld [vmem:[#allocation2 + $0x2a00] sm:$0xff] }
 0x2ca   :  { %v13509_v24 = vcombine.high %v1560_v20, %v1564_v21  ;;  %v1595_v1 = vld [vmem:[#allocation2 + $0x2a20] sm:$0xff]  ;;  %v1592_v2 = vld [vmem:[#allocation2 + $0x2a08] sm:$0xff] }
 0x2cc   :  { %9905 = vmatpush1.bf16.msra.mxu0 %v13466_v32  ;;  %10397 = vmatpush1.bf16.msra.mxu1 %v13468_v33  ;;  %v1568_v32 = vld [vmem:[#allocation2 + $0x2948] sm:$0xff] }
 0x2cd   :  { %9915 = vmatprep.subr.bf16.mxu0 %v13475_v36  ;;  %10407 = vmatprep.subr.bf16.mxu1 %v13477_v39  ;;  %v1572_v33 = vld [vmem:[#allocation2 + $0x2968] sm:$0xff]  ;;  %v13506_v36 = vcombine.low %v1559_v12, %v1563_v16  ;;  %v13508_v39 = vcombine.low %v1560_v20, %v1564_v21  ;;  %v1599_v16 = vld [vmem:[#allocation2 + $0x2a40] sm:$0xff] }
 0x2ce   :  { %v13517_v41 = vcombine.high %v1568_v32, %v1572_v33  ;;  %v1603_v20 = vld [vmem:[#allocation2 + $0x2a60] sm:$0xff]  ;;  %v1600_v21 = vld [vmem:[#allocation2 + $0x2a48] sm:$0xff] }
 0x2cf   :  { %9907 = vmatmul.mubr.bf16.vlgmr.msra.gmra.mrb[0].mxu0 %v14556_v44  ;;  %10399 = vmatmul.mubr.bf16.vlgmr.msra.gmra.mrb[0].mxu1 %v14556_v44 }
 0x2d0   :  { %9916 = vmatpush1.bf16.msra.mxu0 %v13474_v14  ;;  %10408 = vmatpush1.bf16.msra.mxu1 %v13476_v50  ;;  %v1580_v14 = vld [vmem:[#allocation2 + $0x29a8] sm:$0xff]  ;;  %v13514_v50 = vcombine.low %v1567_v25, %v1571_v30  ;;  %v1607_v30 = vld [vmem:[#allocation2 + $0x2a80] sm:$0xff] }
 0x2d1   :  { %9917 = vmatprep.subr.bf16.mxu0 %v13483_v9  ;;  %10409 = vmatprep.subr.bf16.mxu1 %v13485_v51  ;;  %v13516_v9 = vcombine.low %v1568_v32, %v1572_v33  ;;  %v13523_v51 = vcombine.high %v1575_v43, %v1579_v46  ;;  %v13525_v53 = vcombine.high %v1576_v58, %v1580_v14  ;;  %v1611_v32 = vld [vmem:[#allocation2 + $0x2aa0] sm:$0xff]  ;;  %v1608_v33 = vld [vmem:[#allocation2 + $0x2a88] sm:$0xff] }
 0x2d2   :  { %9947 = vmatprep.mubr.bf16.mxu0 %v14558_v56  ;;  %10439 = vmatprep.mubr.bf16.mxu1 %v14558_v56 }
 0x2d4   :  { %9918 = vmatpush1.bf16.msra.mxu0 %v13482_v18  ;;  %10410 = vmatpush1.bf16.msra.mxu1 %v13484_v60  ;;  %v1588_v18 = vld [vmem:[#allocation2 + $0x29e8] sm:$0xff]  ;;  %v13522_v60 = vcombine.low %v1575_v43, %v1579_v46  ;;  %v1615_v46 = vld [vmem:[#allocation2 + $0x2ac0] sm:$0xff] }
 0x2d5   :  { %9919 = vmatprep.subr.bf16.mxu0 %v13491_v28  ;;  %10411 = vmatprep.subr.bf16.mxu1 %v13493_v13  ;;  %v13524_v28 = vcombine.low %v1576_v58, %v1580_v14  ;;  %v13531_v13 = vcombine.high %v1583_v54, %v1587_v57  ;;  %v13533_v59 = vcombine.high %v1584_v17, %v1588_v18  ;;  %v1619_v58 = vld [vmem:[#allocation2 + $0x2ae0] sm:$0xff]  ;;  %v1616_v14 = vld [vmem:[#allocation2 + $0x2ac8] sm:$0xff] }
 0x2d8   :  { %9920 = vmatpush1.bf16.msra.mxu0 %v13490_v4  ;;  %10412 = vmatpush1.bf16.msra.mxu1 %v13492_v7  ;;  %v1596_v4 = vld [vmem:[#allocation2 + $0x2a28] sm:$0xff]  ;;  %v13530_v7 = vcombine.low %v1583_v54, %v1587_v57  ;;  %v1623_v57 = vld [vmem:[#allocation2 + $0x2b00] sm:$0xff] }
 0x2d9   :  { %9921 = vmatprep.subr.bf16.mxu0 %v13499_v8  ;;  %10413 = vmatprep.subr.bf16.mxu1 %v13501_v10  ;;  %v13532_v8 = vcombine.low %v1584_v17, %v1588_v18  ;;  %v13539_v10 = vcombine.high %v1591_v62, %v1595_v1  ;;  %v13541_v12 = vcombine.high %v1592_v2, %v1596_v4  ;;  %v1627_v17 = vld [vmem:[#allocation2 + $0x2b20] sm:$0xff]  ;;  %v1624_v18 = vld [vmem:[#allocation2 + $0x2b08] sm:$0xff] }
 0x2dc   :  { %9922 = vmatpush1.bf16.msra.mxu0 %v13498_v23  ;;  %10414 = vmatpush1.bf16.msra.mxu1 %v13500_v0  ;;  %v1604_v23 = vld [vmem:[#allocation2 + $0x2a68] sm:$0xff]  ;;  %v13538_v0 = vcombine.low %v1591_v62, %v1595_v1  ;;  %v1631_v1 = vld [vmem:[#allocation2 + $0x2b40] sm:$0xff] }
 0x2dd   :  { %9923 = vmatprep.subr.bf16.mxu0 %v13507_v22  ;;  %10415 = vmatprep.subr.bf16.mxu1 %v13509_v24  ;;  %v13540_v22 = vcombine.low %v1592_v2, %v1596_v4  ;;  %v13547_v24 = vcombine.high %v1599_v16, %v1603_v20  ;;  %v13549_v25 = vcombine.high %v1600_v21, %v1604_v23  ;;  %v1635_v2 = vld [vmem:[#allocation2 + $0x2b60] sm:$0xff]  ;;  %v1632_v4 = vld [vmem:[#allocation2 + $0x2b48] sm:$0xff] }
 0x2e0   :  { %9924 = vmatpush1.bf16.msra.mxu0 %v13506_v36  ;;  %10416 = vmatpush1.bf16.msra.mxu1 %v13508_v39  ;;  %v1612_v36 = vld [vmem:[#allocation2 + $0x2aa8] sm:$0xff]  ;;  %v13546_v39 = vcombine.low %v1599_v16, %v1603_v20  ;;  %v1639_v20 = vld [vmem:[#allocation2 + $0x2b80] sm:$0xff] }
 0x2e1   :  { %9925 = vmatprep.subr.bf16.mxu0 %v13515_v40  ;;  %10417 = vmatprep.subr.bf16.mxu1 %v13517_v41  ;;  %v13548_v40 = vcombine.low %v1600_v21, %v1604_v23  ;;  %v13555_v41 = vcombine.high %v1607_v30, %v1611_v32  ;;  %v13557_v43 = vcombine.high %v1608_v33, %v1612_v36  ;;  %v1643_v21 = vld [vmem:[#allocation2 + $0x2ba0] sm:$0xff]  ;;  %v1640_v23 = vld [vmem:[#allocation2 + $0x2b88] sm:$0xff] }
 0x2e4   :  { %9926 = vmatpush1.bf16.msra.mxu0 %v13514_v50  ;;  %10418 = vmatpush1.bf16.msra.mxu1 %v13516_v9  ;;  %v1620_v50 = vld [vmem:[#allocation2 + $0x2ae8] sm:$0xff]  ;;  %v13554_v9 = vcombine.low %v1607_v30, %v1611_v32  ;;  %v1647_v32 = vld [vmem:[#allocation2 + $0x2bc0] sm:$0xff] }
 0x2e5   :  { %9927 = vmatprep.subr.bf16.mxu0 %v13523_v51  ;;  %10419 = vmatprep.subr.bf16.mxu1 %v13525_v53  ;;  %v13556_v51 = vcombine.low %v1608_v33, %v1612_v36  ;;  %v13563_v53 = vcombine.high %v1615_v46, %v1619_v58  ;;  %v13565_v54 = vcombine.high %v1616_v14, %v1620_v50  ;;  %v1651_v33 = vld [vmem:[#allocation2 + $0x2be0] sm:$0xff] }
 0x2e6   :  { %v182_v36 = vcombine.high %v14546_v11, %v14546_v11 }
 0x2e8   :  { %9928 = vmatpush1.bf16.msra.mxu0 %v13522_v60  ;;  %10420 = vmatpush1.bf16.msra.mxu1 %v13524_v28  ;;  %v1628_v60 = vld [vmem:[#allocation2 + $0x2b28] sm:$0xff]  ;;  %v13562_v28 = vcombine.low %v1615_v46, %v1619_v58  ;;  %v13595_v46 = vcombine.high %v1647_v32, %v1651_v33 }
 0x2e9   :  { %9929 = vmatprep.subr.bf16.mxu0 %v13531_v13  ;;  %10421 = vmatprep.subr.bf16.mxu1 %v13533_v59  ;;  %v13564_v13 = vcombine.low %v1616_v14, %v1620_v50  ;;  %v13571_v59 = vcombine.high %v1623_v57, %v1627_v17  ;;  %v13573_v62 = vcombine.high %v1624_v18, %v1628_v60  ;;  %v1655_v14 = vld [vmem:[#allocation2 + $0x2c00] sm:$0xff] }
 0x2ea   :  { %v1659_v50 = vld [vmem:[#allocation2 + $0x2c20] sm:$0xff] }
 0x2ec   :  { %9930 = vmatpush1.bf16.msra.mxu0 %v13530_v7  ;;  %10422 = vmatpush1.bf16.msra.mxu1 %v13532_v8  ;;  %v1636_v7 = vld [vmem:[#allocation2 + $0x2b68] sm:$0xff]  ;;  %v13570_v8 = vcombine.low %v1623_v57, %v1627_v17  ;;  %v13603_v57 = vcombine.high %v1655_v14, %v1659_v50 }
 0x2ed   :  { %9931 = vmatprep.subr.bf16.mxu0 %v13539_v10  ;;  %10423 = vmatprep.subr.bf16.mxu1 %v13541_v12  ;;  %v13572_v10 = vcombine.low %v1624_v18, %v1628_v60  ;;  %v13579_v12 = vcombine.high %v1631_v1, %v1635_v2  ;;  %v13581_v16 = vcombine.high %v1632_v4, %v1636_v7  ;;  %v1663_v18 = vld [vmem:[#allocation2 + $0x2c40] sm:$0xff] }
 0x2ee   :  { %v1667_v60 = vld [vmem:[#allocation2 + $0x2c60] sm:$0xff] }
 0x2f0   :  { %9932 = vmatpush1.bf16.msra.mxu0 %v13538_v0  ;;  %10424 = vmatpush1.bf16.msra.mxu1 %v13540_v22  ;;  %v1644_v0 = vld [vmem:[#allocation2 + $0x2ba8] sm:$0xff]  ;;  %v13578_v22 = vcombine.low %v1631_v1, %v1635_v2  ;;  %v13611_v2 = vcombine.high %v1663_v18, %v1667_v60 }
 0x2f1   :  { %9933 = vmatprep.subr.bf16.mxu0 %v13547_v24  ;;  %10425 = vmatprep.subr.bf16.mxu1 %v13549_v25  ;;  %v13580_v24 = vcombine.low %v1632_v4, %v1636_v7  ;;  %v13587_v25 = vcombine.high %v1639_v20, %v1643_v21  ;;  %v13589_v30 = vcombine.high %v1640_v23, %v1644_v0  ;;  %v1671_v7 = vld [vmem:[#allocation2 + $0x2c80] sm:$0xff] }
 0x2f4   :  { %9934 = vmatpush1.bf16.msra.mxu0 %v13546_v39  ;;  %10426 = vmatpush1.bf16.msra.mxu1 %v13548_v40  ;;  %v1648_v39 = vld [vmem:[#allocation2 + $0x2bc8] sm:$0xff] }
 0x2f5   :  { %9935 = vmatprep.subr.bf16.mxu0 %v13555_v41  ;;  %10427 = vmatprep.subr.bf16.mxu1 %v13557_v43  ;;  %v1652_v40 = vld [vmem:[#allocation2 + $0x2be8] sm:$0xff]  ;;  %v13586_v41 = vcombine.low %v1639_v20, %v1643_v21  ;;  %v13588_v43 = vcombine.low %v1640_v23, %v1644_v0  ;;  %v1679_v0 = vld [vmem:[#allocation2 + $0x2cc0] sm:$0xff] }
 0x2f6   :  { %v13597_v58 = vcombine.high %v1648_v39, %v1652_v40  ;;  %v13596_v11 = vcombine.low %v1648_v39, %v1652_v40  ;;  %v1687_v39 = vld [vmem:[#allocation2 + $0x2d00] sm:$0xff] }
 0x2f7   :  { %v1691_v40 = vld [vmem:[#allocation2 + $0x2d20] sm:$0xff] }
 0x2f8   :  { %9936 = vmatpush1.bf16.msra.mxu0 %v13554_v9  ;;  %10428 = vmatpush1.bf16.msra.mxu1 %v13556_v51  ;;  %v14567_v9 = vrot.slane %v182_v36, %v14360_v63  ;;  %v1656_v51 = vld [vmem:[#allocation2 + $0x2c08] sm:$0xff] }
 0x2f9   :  { %9937 = vmatprep.subr.bf16.mxu0 %v13563_v53  ;;  %10429 = vmatprep.subr.bf16.mxu1 %v13565_v54  ;;  %v1660_v53 = vld [vmem:[#allocation2 + $0x2c28] sm:$0xff]  ;;  %v13594_v54 = vcombine.low %v1647_v32, %v1651_v33 }
 0x2fa   :  { %v13605_v17 = vcombine.high %v1656_v51, %v1660_v53  ;;  %v1664_v63 = vld [vmem:[#allocation2 + $0x2c48] sm:$0xff]  ;;  %v13604_v1 = vcombine.low %v1656_v51, %v1660_v53  ;;  %v1695_v51 = vld [vmem:[#allocation2 + $0x2d40] sm:$0xff] }
 0x2fb   :  { %v1699_v53 = vld [vmem:[#allocation2 + $0x2d60] sm:$0xff] }
 0x2fc   :  { %9938 = vmatpush1.bf16.msra.mxu0 %v13562_v28  ;;  %10430 = vmatpush1.bf16.msra.mxu1 %v13564_v13  ;;  %v198_v28 = vcombine.high %v14567_v9, %v14567_v9  ;;  %v14573_v13 = vpack.c.bf16 %v14550_v26, %v14550_v26  ;;  %v13610_v26 = vcombine.low %v1663_v18, %v1667_v60 }
 0x2fd   :  { %9939 = vmatprep.subr.bf16.mxu0 %v13571_v59  ;;  %10431 = vmatprep.subr.bf16.mxu1 %v13573_v62  ;;  %v1668_v59 = vld [vmem:[#allocation2 + $0x2c68] sm:$0xff]  ;;  %v13602_v62 = vcombine.low %v1655_v14, %v1659_v50  ;;  %v13635_v14 = vcombine.high %v1687_v39, %v1691_v40  ;;  %v13643_v18 = vcombine.high %v1695_v51, %v1699_v53 }
 0x2fe   :  { %v13613_v4 = vcombine.high %v1664_v63, %v1668_v59  ;;  %v13612_v20 = vcombine.low %v1664_v63, %v1668_v59  ;;  %v1707_v63 = vld [vmem:[#allocation2 + $0x2da0] sm:$0xff]  ;;  %v1704_v59 = vld [vmem:[#allocation2 + $0x2d88] sm:$0xff] }
 0x300   :  { %9940 = vmatpush1.bf16.msra.mxu0 %v13570_v8  ;;  %10432 = vmatpush1.bf16.msra.mxu1 %v13572_v10  ;;  %v1675_v8 = vld [vmem:[#allocation2 + $0x2ca0] sm:$0xff]  ;;  %v14575_v10 = vpack.c.bf16 %v198_v28, %v198_v28 }
 0x301   :  { %9941 = vmatprep.subr.bf16.mxu0 %v13579_v12  ;;  %10433 = vmatprep.subr.bf16.mxu1 %v13581_v16  ;;  %v1672_v12 = vld [vmem:[#allocation2 + $0x2c88] sm:$0xff]  ;;  %v13619_v21 = vcombine.high %v1671_v7, %v1675_v8  ;;  %v1703_v28 = vld [vmem:[#allocation2 + $0x2d80] sm:$0xff] }
 0x302   :  { %v1676_v16 = vld [vmem:[#allocation2 + $0x2ca8] sm:$0xff] }
 0x303   :  { %v13621_v23 = vcombine.high %v1672_v12, %v1676_v16  ;;  %v13620_v32 = vcombine.low %v1672_v12, %v1676_v16  ;;  %v1715_v12 = vld [vmem:[#allocation2 + $0x2de0] sm:$0xff]  ;;  %v1712_v16 = vld [vmem:[#allocation2 + $0x2dc8] sm:$0xff] }
 0x304   :  { %9942 = vmatpush1.bf16.msra.mxu0 %v13578_v22  ;;  %10434 = vmatpush1.bf16.msra.mxu1 %v13580_v24  ;;  %v1683_v22 = vld [vmem:[#allocation2 + $0x2ce0] sm:$0xff]  ;;  %v1680_v24 = vld [vmem:[#allocation2 + $0x2cc8] sm:$0xff] }
 0x305   :  { %9943 = vmatprep.subr.bf16.mxu0 %v13587_v25  ;;  %10435 = vmatprep.subr.bf16.mxu1 %v13589_v30  ;;  %v1684_v25 = vld [vmem:[#allocation2 + $0x2ce8] sm:$0xff]  ;;  %v13618_v30 = vcombine.low %v1671_v7, %v1675_v8  ;;  %v13627_v33 = vcombine.high %v1679_v0, %v1683_v22  ;;  %v1711_v8 = vld [vmem:[#allocation2 + $0x2dc0] sm:$0xff] }
 0x306   :  { %v13629_v36 = vcombine.high %v1680_v24, %v1684_v25 }
 0x308   :  { %9944 = vmatpush1.bf16.msra.mxu0 %v13586_v41  ;;  %10436 = vmatpush1.bf16.msra.mxu1 %v13588_v43  ;;  %v1688_v41 = vld [vmem:[#allocation2 + $0x2d08] sm:$0xff] }
 0x309   :  { %9945 = vmatprep.subr.bf16.mxu0 %v13595_v46  ;;  %10437 = vmatprep.subr.bf16.mxu1 %v13597_v58  ;;  %v1692_v43 = vld [vmem:[#allocation2 + $0x2d28] sm:$0xff]  ;;  %v13626_v46 = vcombine.low %v1679_v0, %v1683_v22  ;;  %v13628_v58 = vcombine.low %v1680_v24, %v1684_v25  ;;  %v1719_v22 = vld [vmem:[#allocation2 + $0x2e00] sm:$0xff] }
 0x30a   :  { %v13637_v50 = vcombine.high %v1688_v41, %v1692_v43  ;;  %v1723_v24 = vld [vmem:[#allocation2 + $0x2e20] sm:$0xff]  ;;  %v1720_v25 = vld [vmem:[#allocation2 + $0x2e08] sm:$0xff] }
 0x30c   :  { %9946 = vmatpush1.bf16.msra.mxu0 %v13594_v54  ;;  %10438 = vmatpush1.bf16.msra.mxu1 %v13596_v11  ;;  %v1696_v54 = vld [vmem:[#allocation2 + $0x2d48] sm:$0xff] }
 0x30d   :  { %9956 = vmatprep.subr.bf16.mxu0 %v13603_v57  ;;  %10448 = vmatprep.subr.bf16.mxu1 %v13605_v17  ;;  %v1700_v11 = vld [vmem:[#allocation2 + $0x2d68] sm:$0xff]  ;;  %v13634_v57 = vcombine.low %v1687_v39, %v1691_v40  ;;  %v13636_v17 = vcombine.low %v1688_v41, %v1692_v43  ;;  %v1727_v40 = vld [vmem:[#allocation2 + $0x2e40] sm:$0xff] }
 0x30e   :  { %v13645_v60 = vcombine.high %v1696_v54, %v1700_v11  ;;  %v1731_v41 = vld [vmem:[#allocation2 + $0x2e60] sm:$0xff]  ;;  %v1728_v43 = vld [vmem:[#allocation2 + $0x2e48] sm:$0xff] }
 0x30f   :  { %9948 = vmatmul.mubr.bf16.vlgmr.msra.gmra.mrb[0].mxu0 %v14573_v13  ;;  %10440 = vmatmul.mubr.bf16.vlgmr.msra.gmra.mrb[0].mxu1 %v14573_v13 }
 0x310   :  { %9957 = vmatpush1.bf16.msra.mxu0 %v13602_v62  ;;  %10449 = vmatpush1.bf16.msra.mxu1 %v13604_v1  ;;  %v1708_v62 = vld [vmem:[#allocation2 + $0x2da8] sm:$0xff]  ;;  %v13642_v1 = vcombine.low %v1695_v51, %v1699_v53  ;;  %v1735_v53 = vld [vmem:[#allocation2 + $0x2e80] sm:$0xff] }
 0x311   :  { %9958 = vmatprep.subr.bf16.mxu0 %v13611_v2  ;;  %10450 = vmatprep.subr.bf16.mxu1 %v13613_v4  ;;  %v13644_v2 = vcombine.low %v1696_v54, %v1700_v11  ;;  %v13651_v4 = vcombine.high %v1703_v28, %v1707_v63  ;;  %v13653_v7 = vcombine.high %v1704_v59, %v1708_v62  ;;  %v1739_v54 = vld [vmem:[#allocation2 + $0x2ea0] sm:$0xff]  ;;  %v1736_v11 = vld [vmem:[#allocation2 + $0x2e88] sm:$0xff] }
 0x312   :  { %9988 = vmatprep.mubr.bf16.mxu0 %v14575_v10  ;;  %10480 = vmatprep.mubr.bf16.mxu1 %v14575_v10 }
 0x314   :  { %9959 = vmatpush1.bf16.msra.mxu0 %v13610_v26  ;;  %10451 = vmatpush1.bf16.msra.mxu1 %v13612_v20  ;;  %v1716_v26 = vld [vmem:[#allocation2 + $0x2de8] sm:$0xff]  ;;  %v13650_v20 = vcombine.low %v1703_v28, %v1707_v63  ;;  %v1743_v63 = vld [vmem:[#allocation2 + $0x2ec0] sm:$0xff] }
 0x315   :  { %9960 = vmatprep.subr.bf16.mxu0 %v13619_v21  ;;  %10452 = vmatprep.subr.bf16.mxu1 %v13621_v23  ;;  %v13652_v21 = vcombine.low %v1704_v59, %v1708_v62  ;;  %v13659_v23 = vcombine.high %v1711_v8, %v1715_v12  ;;  %v13661_v0 = vcombine.high %v1712_v16, %v1716_v26  ;;  %v1747_v59 = vld [vmem:[#allocation2 + $0x2ee0] sm:$0xff]  ;;  %v1744_v62 = vld [vmem:[#allocation2 + $0x2ec8] sm:$0xff] }
 0x318   :  { %9961 = vmatpush1.bf16.msra.mxu0 %v13618_v30  ;;  %10453 = vmatpush1.bf16.msra.mxu1 %v13620_v32  ;;  %v1724_v30 = vld [vmem:[#allocation2 + $0x2e28] sm:$0xff]  ;;  %v13658_v32 = vcombine.low %v1711_v8, %v1715_v12  ;;  %v1751_v12 = vld [vmem:[#allocation2 + $0x2f00] sm:$0xff] }
 0x319   :  { %9962 = vmatprep.subr.bf16.mxu0 %v13627_v33  ;;  %10454 = vmatprep.subr.bf16.mxu1 %v13629_v36  ;;  %v13660_v33 = vcombine.low %v1712_v16, %v1716_v26  ;;  %v13667_v36 = vcombine.high %v1719_v22, %v1723_v24  ;;  %v13669_v39 = vcombine.high %v1720_v25, %v1724_v30  ;;  %v1755_v16 = vld [vmem:[#allocation2 + $0x2f20] sm:$0xff]  ;;  %v1752_v26 = vld [vmem:[#allocation2 + $0x2f08] sm:$0xff] }
 0x31c   :  { %9963 = vmatpush1.bf16.msra.mxu0 %v13626_v46  ;;  %10455 = vmatpush1.bf16.msra.mxu1 %v13628_v58  ;;  %v1732_v46 = vld [vmem:[#allocation2 + $0x2e68] sm:$0xff]  ;;  %v13666_v58 = vcombine.low %v1719_v22, %v1723_v24  ;;  %v1759_v24 = vld [vmem:[#allocation2 + $0x2f40] sm:$0xff] }
 0x31d   :  { %9964 = vmatprep.subr.bf16.mxu0 %v13635_v14  ;;  %10456 = vmatprep.subr.bf16.mxu1 %v13637_v50  ;;  %v13668_v14 = vcombine.low %v1720_v25, %v1724_v30  ;;  %v13675_v50 = vcombine.high %v1727_v40, %v1731_v41  ;;  %v13677_v51 = vcombine.high %v1728_v43, %v1732_v46  ;;  %v1763_v25 = vld [vmem:[#allocation2 + $0x2f60] sm:$0xff]  ;;  %v1760_v30 = vld [vmem:[#allocation2 + $0x2f48] sm:$0xff] }
 0x320   :  { %9965 = vmatpush1.bf16.msra.mxu0 %v13634_v57  ;;  %10457 = vmatpush1.bf16.msra.mxu1 %v13636_v17  ;;  %v1740_v57 = vld [vmem:[#allocation2 + $0x2ea8] sm:$0xff]  ;;  %v13674_v17 = vcombine.low %v1727_v40, %v1731_v41  ;;  %v1767_v41 = vld [vmem:[#allocation2 + $0x2f80] sm:$0xff] }
 0x321   :  { %9966 = vmatprep.subr.bf16.mxu0 %v13643_v18  ;;  %10458 = vmatprep.subr.bf16.mxu1 %v13645_v60  ;;  %v13676_v18 = vcombine.low %v1728_v43, %v1732_v46  ;;  %v13683_v60 = vcombine.high %v1735_v53, %v1739_v54  ;;  %v13685_v28 = vcombine.high %v1736_v11, %v1740_v57  ;;  %v1771_v43 = vld [vmem:[#allocation2 + $0x2fa0] sm:$0xff]  ;;  %v1768_v46 = vld [vmem:[#allocation2 + $0x2f88] sm:$0xff] }
 0x324   :  { %9967 = vmatpush1.bf16.msra.mxu0 %v13642_v1  ;;  %10459 = vmatpush1.bf16.msra.mxu1 %v13644_v2  ;;  %v1748_v1 = vld [vmem:[#allocation2 + $0x2ee8] sm:$0xff]  ;;  %v13682_v2 = vcombine.low %v1735_v53, %v1739_v54  ;;  %v1775_v54 = vld [vmem:[#allocation2 + $0x2fc0] sm:$0xff] }
 0x325   :  { %9968 = vmatprep.subr.bf16.mxu0 %v13651_v4  ;;  %10460 = vmatprep.subr.bf16.mxu1 %v13653_v7  ;;  %v13684_v4 = vcombine.low %v1736_v11, %v1740_v57  ;;  %v13691_v7 = vcombine.high %v1743_v63, %v1747_v59  ;;  %v13693_v8 = vcombine.high %v1744_v62, %v1748_v1  ;;  %v1779_v11 = vld [vmem:[#allocation2 + $0x2fe0] sm:$0xff]  ;;  %v1776_v57 = vld [vmem:[#allocation2 + $0x2fc8] sm:$0xff] }
 0x328   :  { %9969 = vmatpush1.bf16.msra.mxu0 %v13650_v20  ;;  %10461 = vmatpush1.bf16.msra.mxu1 %v13652_v21  ;;  %v1756_v20 = vld [vmem:[#allocation2 + $0x2f28] sm:$0xff]  ;;  %v13690_v21 = vcombine.low %v1743_v63, %v1747_v59  ;;  %v249_v59 = vld [vmem:[#allocation2 + $0x10] sm:$0xff] }
 0x329   :  { %9970 = vmatprep.subr.bf16.mxu0 %v13659_v23  ;;  %10462 = vmatprep.subr.bf16.mxu1 %v13661_v0  ;;  %v13692_v23 = vcombine.low %v1744_v62, %v1748_v1  ;;  %v13699_v0 = vcombine.high %v1751_v12, %v1755_v16  ;;  %v13701_v22 = vcombine.high %v1752_v26, %v1756_v20  ;;  %v253_v62 = vld [vmem:[#allocation2 + $0x30] sm:$0xff]  ;;  %v250_v1 = vld [vmem:[#allocation2 + $0x18] sm:$0xff] }
 0x32c   :  { %9971 = vmatpush1.bf16.msra.mxu0 %v13658_v32  ;;  %10463 = vmatpush1.bf16.msra.mxu1 %v13660_v33  ;;  %v1764_v32 = vld [vmem:[#allocation2 + $0x2f68] sm:$0xff]  ;;  %v13698_v33 = vcombine.low %v1751_v12, %v1755_v16  ;;  %v257_v16 = vld [vmem:[#allocation2 + $0x50] sm:$0xff] }
 0x32d   :  { %9972 = vmatprep.subr.bf16.mxu0 %v13667_v36  ;;  %10464 = vmatprep.subr.bf16.mxu1 %v13669_v39  ;;  %v13700_v36 = vcombine.low %v1752_v26, %v1756_v20  ;;  %v13707_v39 = vcombine.high %v1759_v24, %v1763_v25  ;;  %v13709_v40 = vcombine.high %v1760_v30, %v1764_v32  ;;  %v261_v26 = vld [vmem:[#allocation2 + $0x70] sm:$0xff] }
 0x32e   :  { %v14583_v20 = vpack.c.bf16 %v14567_v9, %v14567_v9  ;;  %v12206_v9 = vcombine.low %v257_v16, %v261_v26 }
 0x330   :  { %9973 = vmatpush1.bf16.msra.mxu0 %v13666_v58  ;;  %10465 = vmatpush1.bf16.msra.mxu1 %v13668_v14  ;;  %v1772_v58 = vld [vmem:[#allocation2 + $0x2fa8] sm:$0xff]  ;;  %v13706_v14 = vcombine.low %v1759_v24, %v1763_v25  ;;  %v12207_v24 = vcombine.high %v257_v16, %v261_v26  ;;  %v297_v16 = vld [vmem:[#allocation2 + $0x190] sm:$0xff] }
 0x331   :  { %9974 = vmatprep.subr.bf16.mxu0 %v13675_v50  ;;  %10466 = vmatprep.subr.bf16.mxu1 %v13677_v51  ;;  %v13708_v50 = vcombine.low %v1760_v30, %v1764_v32  ;;  %v13715_v51 = vcombine.high %v1767_v41, %v1771_v43  ;;  %v13717_v53 = vcombine.high %v1768_v46, %v1772_v58  ;;  %v265_v30 = vld [vmem:[#allocation2 + $0x90] sm:$0xff] }
 0x332   :  { %v269_v32 = vld [vmem:[#allocation2 + $0xb0] sm:$0xff] }
 0x333   :  { %v301_v26 = vld [vmem:[#allocation2 + $0x1b0] sm:$0xff] }
 0x334   :  { %9975 = vmatpush1.bf16.msra.mxu0 %v13674_v17  ;;  %10467 = vmatpush1.bf16.msra.mxu1 %v13676_v18  ;;  %v1780_v17 = vld [vmem:[#allocation2 + $0x2fe8] sm:$0xff]  ;;  %v13714_v18 = vcombine.low %v1767_v41, %v1771_v43  ;;  %v273_v43 = vld [vmem:[#allocation2 + $0xd0] sm:$0xff] }
 0x335   :  { %9976 = vmatprep.subr.bf16.mxu0 %v13683_v60  ;;  %10468 = vmatprep.subr.bf16.mxu1 %v13685_v28  ;;  %v13716_v60 = vcombine.low %v1768_v46, %v1772_v58  ;;  %v13723_v28 = vcombine.high %v1775_v54, %v1779_v11  ;;  %v13725_v63 = vcombine.high %v1776_v57, %v1780_v17  ;;  %v277_v46 = vld [vmem:[#allocation2 + $0xf0] sm:$0xff]  ;;  %v274_v58 = vld [vmem:[#allocation2 + $0xd8] sm:$0xff] }
 0x338   :  { %9977 = vmatpush1.bf16.msra.mxu0 %v13682_v2  ;;  %10469 = vmatpush1.bf16.msra.mxu1 %v13684_v4  ;;  %v254_v2 = vld [vmem:[#allocation2 + $0x38] sm:$0xff]  ;;  %v13722_v4 = vcombine.low %v1775_v54, %v1779_v11  ;;  %v281_v11 = vld [vmem:[#allocation2 + $0x110] sm:$0xff] }
 0x339   :  { %9978 = vmatprep.subr.bf16.mxu0 %v13691_v7  ;;  %10470 = vmatprep.subr.bf16.mxu1 %v13693_v8  ;;  %v13724_v7 = vcombine.low %v1776_v57, %v1780_v17  ;;  %v12199_v8 = vcombine.high %v249_v59, %v253_v62  ;;  %v12201_v12 = vcombine.high %v250_v1, %v254_v2  ;;  %v285_v57 = vld [vmem:[#allocation2 + $0x130] sm:$0xff]  ;;  %v282_v17 = vld [vmem:[#allocation2 + $0x118] sm:$0xff] }
 0x33c   :  { %9979 = vmatpush1.bf16.msra.mxu0 %v13690_v21  ;;  %10471 = vmatpush1.bf16.msra.mxu1 %v13692_v23  ;;  %v258_v21 = vld [vmem:[#allocation2 + $0x58] sm:$0xff] }
 0x33d   :  { %9980 = vmatprep.subr.bf16.mxu0 %v13699_v0  ;;  %10472 = vmatprep.subr.bf16.mxu1 %v13701_v22  ;;  %v262_v23 = vld [vmem:[#allocation2 + $0x78] sm:$0xff]  ;;  %v12198_v0 = vcombine.low %v249_v59, %v253_v62  ;;  %v12200_v22 = vcombine.low %v250_v1, %v254_v2  ;;  %v289_v59 = vld [vmem:[#allocation2 + $0x150] sm:$0xff] }
 0x33e   :  { %v12209_v25 = vcombine.high %v258_v21, %v262_v23  ;;  %v293_v62 = vld [vmem:[#allocation2 + $0x170] sm:$0xff]  ;;  %v290_v1 = vld [vmem:[#allocation2 + $0x158] sm:$0xff] }
 0x33f   :  { %v294_v2 = vld [vmem:[#allocation2 + $0x178] sm:$0xff] }
 0x340   :  { %9981 = vmatpush1.bf16.msra.mxu0 %v13698_v33  ;;  %10473 = vmatpush1.bf16.msra.mxu1 %v13700_v36  ;;  %v266_v33 = vld [vmem:[#allocation2 + $0x98] sm:$0xff] }
 0x341   :  { %9982 = vmatprep.subr.bf16.mxu0 %v13707_v39  ;;  %10474 = vmatprep.subr.bf16.mxu1 %v13709_v40  ;;  %v270_v36 = vld [vmem:[#allocation2 + $0xb8] sm:$0xff]  ;;  %v12208_v39 = vcombine.low %v258_v21, %v262_v23  ;;  %v12215_v40 = vcombine.high %v265_v30, %v269_v32 }
 0x342   :  { %v12217_v41 = vcombine.high %v266_v33, %v270_v36  ;;  %v298_v21 = vld [vmem:[#allocation2 + $0x198] sm:$0xff] }
 0x343   :  { %v302_v23 = vld [vmem:[#allocation2 + $0x1b8] sm:$0xff] }
 0x344   :  { %9983 = vmatpush1.bf16.msra.mxu0 %v13706_v14  ;;  %10475 = vmatpush1.bf16.msra.mxu1 %v13708_v50  ;;  %v278_v14 = vld [vmem:[#allocation2 + $0xf8] sm:$0xff]  ;;  %v12214_v50 = vcombine.low %v265_v30, %v269_v32  ;;  %v305_v30 = vld [vmem:[#allocation2 + $0x1d0] sm:$0xff] }
 0x345   :  { %9984 = vmatprep.subr.bf16.mxu0 %v13715_v51  ;;  %10476 = vmatprep.subr.bf16.mxu1 %v13717_v53  ;;  %v12216_v51 = vcombine.low %v266_v33, %v270_v36  ;;  %v12223_v53 = vcombine.high %v273_v43, %v277_v46  ;;  %v12225_v54 = vcombine.high %v274_v58, %v278_v14  ;;  %v309_v32 = vld [vmem:[#allocation2 + $0x1f0] sm:$0xff]  ;;  %v306_v33 = vld [vmem:[#allocation2 + $0x1d8] sm:$0xff] }
 0x346   :  { %v310_v36 = vld [vmem:[#allocation2 + $0x1f8] sm:$0xff] }
 0x348   :  { %9985 = vmatpush1.bf16.msra.mxu0 %v13714_v18  ;;  %10477 = vmatpush1.bf16.msra.mxu1 %v13716_v60  ;;  %v286_v18 = vld [vmem:[#allocation2 + $0x138] sm:$0xff]  ;;  %v12222_v60 = vcombine.low %v273_v43, %v277_v46  ;;  %v313_v43 = vld [vmem:[#allocation2 + $0x210] sm:$0xff] }
 0x349   :  { %9986 = vmatprep.subr.bf16.mxu0 %v13723_v28  ;;  %10478 = vmatprep.subr.bf16.mxu1 %v13725_v63  ;;  %v12224_v28 = vcombine.low %v274_v58, %v278_v14  ;;  %v12231_v63 = vcombine.high %v281_v11, %v285_v57  ;;  %v317_v46 = vld [vmem:[#allocation2 + $0x230] sm:$0xff]  ;;  %v314_v58 = vld [vmem:[#allocation2 + $0x218] sm:$0xff] }
 0x34a   :  { %v318_v14 = vld [vmem:[#allocation2 + $0x238] sm:$0xff] }
 0x34c   :  { %9987 = vmatpush1.bf16.msra.mxu0 %v13722_v4  ;;  %10479 = vmatpush1.bf16.msra.mxu1 %v13724_v7  ;;  %v12230_v4 = vcombine.low %v281_v11, %v285_v57  ;;  %v12232_v7 = vcombine.low %v282_v17, %v286_v18  ;;  %v321_v11 = vld [vmem:[#allocation2 + $0x250] sm:$0xff] }
 0x34d   :  { %10489 = vmatprep.subr.bf16.mxu0 %v12199_v8  ;;  %10981 = vmatprep.subr.bf16.mxu1 %v12201_v12  ;;  %v12239_v8 = vcombine.high %v289_v59, %v293_v62  ;;  %v12241_v12 = vcombine.high %v290_v1, %v294_v2  ;;  %v325_v57 = vld [vmem:[#allocation2 + $0x270] sm:$0xff] }
 0x34f   :  { %9989 = vmatmul.mubr.bf16.vlgmr.msra.gmra.mrb[0].mxu0 %v14583_v20  ;;  %10481 = vmatmul.mubr.bf16.vlgmr.msra.gmra.mrb[0].mxu1 %v14583_v20 }
 0x350   :  { %10490 = vmatpush1.bf16.msra.mxu0 %v12198_v0  ;;  %10982 = vmatpush1.bf16.msra.mxu1 %v12200_v22  ;;  %v12238_v0 = vcombine.low %v289_v59, %v293_v62  ;;  %v12240_v22 = vcombine.low %v290_v1, %v294_v2  ;;  %v329_v59 = vld [vmem:[#allocation2 + $0x290] sm:$0xff]  ;;  %v330_v1 = vld [vmem:[#allocation2 + $0x298] sm:$0xff] }
 0x351   :  { %10491 = vmatprep.subr.bf16.mxu0 %v12207_v24  ;;  %10983 = vmatprep.subr.bf16.mxu1 %v12209_v25  ;;  %v12247_v24 = vcombine.high %v297_v16, %v301_v26  ;;  %v12249_v25 = vcombine.high %v298_v21, %v302_v23  ;;  %v333_v62 = vld [vmem:[#allocation2 + $0x2b0] sm:$0xff]  ;;  %v334_v2 = vld [vmem:[#allocation2 + $0x2b8] sm:$0xff] }
 0x352   :  { %10521 = vmatprep.mubr.bf16.mxu0 %v14370_v19  ;;  %11013 = vmatprep.mubr.bf16.mxu1 %v14370_v19  ;;  %v12233_v19 = vcombine.high %v282_v17, %v286_v18  ;;  %v322_v17 = vld [vmem:[#allocation2 + $0x258] sm:$0xff] }
 0x353   :  { %v326_v18 = vld [vmem:[#allocation2 + $0x278] sm:$0xff] }
 0x354   :  { %10492 = vmatpush1.bf16.msra.mxu0 %v12206_v9  ;;  %10984 = vmatpush1.bf16.msra.mxu1 %v12208_v39  ;;  %v12246_v9 = vcombine.low %v297_v16, %v301_v26  ;;  %v12248_v39 = vcombine.low %v298_v21, %v302_v23  ;;  %v337_v16 = vld [vmem:[#allocation2 + $0x2d0] sm:$0xff]  ;;  %v338_v21 = vld [vmem:[#allocation2 + $0x2d8] sm:$0xff] }
 0x355   :  { %10493 = vmatprep.subr.bf16.mxu0 %v12215_v40  ;;  %10985 = vmatprep.subr.bf16.mxu1 %v12217_v41  ;;  %v12255_v40 = vcombine.high %v305_v30, %v309_v32  ;;  %v12257_v41 = vcombine.high %v306_v33, %v310_v36  ;;  %v341_v26 = vld [vmem:[#allocation2 + $0x2f0] sm:$0xff]  ;;  %v342_v23 = vld [vmem:[#allocation2 + $0x2f8] sm:$0xff] }
 0x358   :  { %10494 = vmatpush1.bf16.msra.mxu0 %v12214_v50  ;;  %10986 = vmatpush1.bf16.msra.mxu1 %v12216_v51  ;;  %v12254_v50 = vcombine.low %v305_v30, %v309_v32  ;;  %v12256_v51 = vcombine.low %v306_v33, %v310_v36  ;;  %v345_v30 = vld [vmem:[#allocation2 + $0x310] sm:$0xff]  ;;  %v346_v33 = vld [vmem:[#allocation2 + $0x318] sm:$0xff] }
 0x359   :  { %10495 = vmatprep.subr.bf16.mxu0 %v12223_v53  ;;  %10987 = vmatprep.subr.bf16.mxu1 %v12225_v54  ;;  %v12263_v53 = vcombine.high %v313_v43, %v317_v46  ;;  %v12265_v54 = vcombine.high %v314_v58, %v318_v14  ;;  %v349_v32 = vld [vmem:[#allocation2 + $0x330] sm:$0xff]  ;;  %v350_v36 = vld [vmem:[#allocation2 + $0x338] sm:$0xff] }
 0x35c   :  { %10496 = vmatpush1.bf16.msra.mxu0 %v12222_v60  ;;  %10988 = vmatpush1.bf16.msra.mxu1 %v12224_v28  ;;  %v12262_v60 = vcombine.low %v313_v43, %v317_v46  ;;  %v12264_v28 = vcombine.low %v314_v58, %v318_v14  ;;  %v353_v43 = vld [vmem:[#allocation2 + $0x350] sm:$0xff]  ;;  %v354_v58 = vld [vmem:[#allocation2 + $0x358] sm:$0xff] }
 0x35d   :  { %10497 = vmatprep.subr.bf16.mxu0 %v12231_v63  ;;  %10989 = vmatprep.subr.bf16.mxu1 %v12233_v19  ;;  %v12271_v63 = vcombine.high %v321_v11, %v325_v57  ;;  %v12273_v19 = vcombine.high %v322_v17, %v326_v18  ;;  %v357_v46 = vld [vmem:[#allocation2 + $0x370] sm:$0xff]  ;;  %v358_v14 = vld [vmem:[#allocation2 + $0x378] sm:$0xff] }
 0x360   :  { %10498 = vmatpush1.bf16.msra.mxu0 %v12230_v4  ;;  %10990 = vmatpush1.bf16.msra.mxu1 %v12232_v7  ;;  %v12270_v4 = vcombine.low %v321_v11, %v325_v57  ;;  %v12272_v7 = vcombine.low %v322_v17, %v326_v18  ;;  %v361_v11 = vld [vmem:[#allocation2 + $0x390] sm:$0xff]  ;;  %v362_v17 = vld [vmem:[#allocation2 + $0x398] sm:$0xff] }
 0x361   :  { %10499 = vmatprep.subr.bf16.mxu0 %v12239_v8  ;;  %10991 = vmatprep.subr.bf16.mxu1 %v12241_v12  ;;  %v12279_v8 = vcombine.high %v329_v59, %v333_v62  ;;  %v12281_v12 = vcombine.high %v330_v1, %v334_v2  ;;  %v365_v57 = vld [vmem:[#allocation2 + $0x3b0] sm:$0xff]  ;;  %v366_v18 = vld [vmem:[#allocation2 + $0x3b8] sm:$0xff] }
 0x364   :  { %10500 = vmatpush1.bf16.msra.mxu0 %v12238_v0  ;;  %10992 = vmatpush1.bf16.msra.mxu1 %v12240_v22  ;;  %v12278_v0 = vcombine.low %v329_v59, %v333_v62  ;;  %v12280_v22 = vcombine.low %v330_v1, %v334_v2  ;;  %v369_v59 = vld [vmem:[#allocation2 + $0x3d0] sm:$0xff]  ;;  %v370_v1 = vld [vmem:[#allocation2 + $0x3d8] sm:$0xff] }
 0x365   :  { %10501 = vmatprep.subr.bf16.mxu0 %v12247_v24  ;;  %10993 = vmatprep.subr.bf16.mxu1 %v12249_v25  ;;  %v12287_v24 = vcombine.high %v337_v16, %v341_v26  ;;  %v12289_v25 = vcombine.high %v338_v21, %v342_v23  ;;  %v373_v62 = vld [vmem:[#allocation2 + $0x3f0] sm:$0xff]  ;;  %v374_v2 = vld [vmem:[#allocation2 + $0x3f8] sm:$0xff] }
 0x368   :  { %10502 = vmatpush1.bf16.msra.mxu0 %v12246_v9  ;;  %10994 = vmatpush1.bf16.msra.mxu1 %v12248_v39  ;;  %v12286_v9 = vcombine.low %v337_v16, %v341_v26  ;;  %v12288_v39 = vcombine.low %v338_v21, %v342_v23  ;;  %v377_v16 = vld [vmem:[#allocation2 + $0x410] sm:$0xff]  ;;  %v378_v21 = vld [vmem:[#allocation2 + $0x418] sm:$0xff] }
 0x369   :  { %10503 = vmatprep.subr.bf16.mxu0 %v12255_v40  ;;  %10995 = vmatprep.subr.bf16.mxu1 %v12257_v41  ;;  %v12295_v40 = vcombine.high %v345_v30, %v349_v32  ;;  %v12297_v41 = vcombine.high %v346_v33, %v350_v36  ;;  %v381_v26 = vld [vmem:[#allocation2 + $0x430] sm:$0xff]  ;;  %v382_v23 = vld [vmem:[#allocation2 + $0x438] sm:$0xff] }
 0x36c   :  { %10504 = vmatpush1.bf16.msra.mxu0 %v12254_v50  ;;  %10996 = vmatpush1.bf16.msra.mxu1 %v12256_v51  ;;  %v12294_v50 = vcombine.low %v345_v30, %v349_v32  ;;  %v12296_v51 = vcombine.low %v346_v33, %v350_v36  ;;  %v385_v30 = vld [vmem:[#allocation2 + $0x450] sm:$0xff]  ;;  %v386_v33 = vld [vmem:[#allocation2 + $0x458] sm:$0xff] }
 0x36d   :  { %10505 = vmatprep.subr.bf16.mxu0 %v12263_v53  ;;  %10997 = vmatprep.subr.bf16.mxu1 %v12265_v54  ;;  %v12303_v53 = vcombine.high %v353_v43, %v357_v46  ;;  %v12305_v54 = vcombine.high %v354_v58, %v358_v14  ;;  %v389_v32 = vld [vmem:[#allocation2 + $0x470] sm:$0xff]  ;;  %v390_v36 = vld [vmem:[#allocation2 + $0x478] sm:$0xff] }
 0x370   :  { %10506 = vmatpush1.bf16.msra.mxu0 %v12262_v60  ;;  %10998 = vmatpush1.bf16.msra.mxu1 %v12264_v28  ;;  %v12302_v60 = vcombine.low %v353_v43, %v357_v46  ;;  %v12304_v28 = vcombine.low %v354_v58, %v358_v14  ;;  %v393_v43 = vld [vmem:[#allocation2 + $0x490] sm:$0xff]  ;;  %v394_v58 = vld [vmem:[#allocation2 + $0x498] sm:$0xff] }
 0x371   :  { %10507 = vmatprep.subr.bf16.mxu0 %v12271_v63  ;;  %10999 = vmatprep.subr.bf16.mxu1 %v12273_v19  ;;  %v12311_v63 = vcombine.high %v361_v11, %v365_v57  ;;  %v12313_v19 = vcombine.high %v362_v17, %v366_v18  ;;  %v397_v46 = vld [vmem:[#allocation2 + $0x4b0] sm:$0xff]  ;;  %v398_v14 = vld [vmem:[#allocation2 + $0x4b8] sm:$0xff] }
 0x374   :  { %10508 = vmatpush1.bf16.msra.mxu0 %v12270_v4  ;;  %11000 = vmatpush1.bf16.msra.mxu1 %v12272_v7  ;;  %v12310_v4 = vcombine.low %v361_v11, %v365_v57  ;;  %v12312_v7 = vcombine.low %v362_v17, %v366_v18  ;;  %v401_v11 = vld [vmem:[#allocation2 + $0x4d0] sm:$0xff]  ;;  %v402_v17 = vld [vmem:[#allocation2 + $0x4d8] sm:$0xff] }
 0x375   :  { %10509 = vmatprep.subr.bf16.mxu0 %v12279_v8  ;;  %11001 = vmatprep.subr.bf16.mxu1 %v12281_v12  ;;  %v12319_v8 = vcombine.high %v369_v59, %v373_v62  ;;  %v12321_v12 = vcombine.high %v370_v1, %v374_v2  ;;  %v405_v57 = vld [vmem:[#allocation2 + $0x4f0] sm:$0xff]  ;;  %v406_v18 = vld [vmem:[#allocation2 + $0x4f8] sm:$0xff] }
 0x378   :  { %10510 = vmatpush1.bf16.msra.mxu0 %v12278_v0  ;;  %11002 = vmatpush1.bf16.msra.mxu1 %v12280_v22  ;;  %v12318_v0 = vcombine.low %v369_v59, %v373_v62  ;;  %v12320_v22 = vcombine.low %v370_v1, %v374_v2  ;;  %v413_v59 = vld [vmem:[#allocation2 + $0x530] sm:$0xff]  ;;  %v410_v62 = vld [vmem:[#allocation2 + $0x518] sm:$0xff]  ;;  %v12350_v2 = vcombine.low %v401_v11, %v405_v57 }
 0x379   :  { %10511 = vmatprep.subr.bf16.mxu0 %v12287_v24  ;;  %11003 = vmatprep.subr.bf16.mxu1 %v12289_v25  ;;  %v12327_v24 = vcombine.high %v377_v16, %v381_v26  ;;  %v12329_v25 = vcombine.high %v378_v21, %v382_v23  ;;  %v414_v1 = vld [vmem:[#allocation2 + $0x538] sm:$0xff] }
 0x37c   :  { %10512 = vmatpush1.bf16.msra.mxu0 %v12286_v9  ;;  %11004 = vmatpush1.bf16.msra.mxu1 %v12288_v39  ;;  %v12326_v9 = vcombine.low %v377_v16, %v381_v26  ;;  %v12328_v39 = vcombine.low %v378_v21, %v382_v23  ;;  %v418_v16 = vld [vmem:[#allocation2 + $0x558] sm:$0xff]  ;;  %v12360_v23 = vcombine.low %v410_v62, %v414_v1 }
 0x37d   :  { %10513 = vmatprep.subr.bf16.mxu0 %v12295_v40  ;;  %11005 = vmatprep.subr.bf16.mxu1 %v12297_v41  ;;  %v12335_v40 = vcombine.high %v385_v30, %v389_v32  ;;  %v12337_v41 = vcombine.high %v386_v33, %v390_v36  ;;  %v422_v26 = vld [vmem:[#allocation2 + $0x578] sm:$0xff] }
 0x380   :  { %10514 = vmatpush1.bf16.msra.mxu0 %v12294_v50  ;;  %11006 = vmatpush1.bf16.msra.mxu1 %v12296_v51  ;;  %v12334_v50 = vcombine.low %v385_v30, %v389_v32  ;;  %v12336_v51 = vcombine.low %v386_v33, %v390_v36  ;;  %v426_v30 = vld [vmem:[#allocation2 + $0x598] sm:$0xff]  ;;  %v12368_v36 = vcombine.low %v418_v16, %v422_v26 }
 0x381   :  { %10515 = vmatprep.subr.bf16.mxu0 %v12303_v53  ;;  %11007 = vmatprep.subr.bf16.mxu1 %v12305_v54  ;;  %v12343_v53 = vcombine.high %v393_v43, %v397_v46  ;;  %v12345_v54 = vcombine.high %v394_v58, %v398_v14  ;;  %v430_v32 = vld [vmem:[#allocation2 + $0x5b8] sm:$0xff] }
 0x384   :  { %10516 = vmatpush1.bf16.msra.mxu0 %v12302_v60  ;;  %11008 = vmatpush1.bf16.msra.mxu1 %v12304_v28  ;;  %v12342_v60 = vcombine.low %v393_v43, %v397_v46  ;;  %v12351_v28 = vcombine.high %v401_v11, %v405_v57  ;;  %v434_v43 = vld [vmem:[#allocation2 + $0x5d8] sm:$0xff] }
 0x385   :  { %10517 = vmatprep.subr.bf16.mxu0 %v12311_v63  ;;  %11009 = vmatprep.subr.bf16.mxu1 %v12313_v19  ;;  %v12353_v63 = vcombine.high %v402_v17, %v406_v18  ;;  %v409_v19 = vld [vmem:[#allocation2 + $0x510] sm:$0xff]  ;;  %v438_v46 = vld [vmem:[#allocation2 + $0x5f8] sm:$0xff] }
 0x386   :  { %v12358_v21 = vcombine.low %v409_v19, %v413_v59  ;;  %v442_v11 = vld [vmem:[#allocation2 + $0x618] sm:$0xff] }
 0x387   :  { %v446_v57 = vld [vmem:[#allocation2 + $0x638] sm:$0xff] }
 0x388   :  { %10518 = vmatpush1.bf16.msra.mxu0 %v12310_v4  ;;  %11010 = vmatpush1.bf16.msra.mxu1 %v12312_v7  ;;  %v12352_v4 = vcombine.low %v402_v17, %v406_v18  ;;  %v12359_v7 = vcombine.high %v409_v19, %v413_v59  ;;  %v12384_v18 = vcombine.low %v434_v43, %v438_v46  ;;  %v450_v19 = vld [vmem:[#allocation2 + $0x658] sm:$0xff] }
 0x389   :  { %10519 = vmatprep.subr.bf16.mxu0 %v12319_v8  ;;  %11011 = vmatprep.subr.bf16.mxu1 %v12321_v12  ;;  %v417_v8 = vld [vmem:[#allocation2 + $0x550] sm:$0xff]  ;;  %v454_v59 = vld [vmem:[#allocation2 + $0x678] sm:$0xff] }
 0x38a   :  { %v421_v12 = vld [vmem:[#allocation2 + $0x570] sm:$0xff] }
 0x38b   :  { %v12366_v33 = vcombine.low %v417_v8, %v421_v12 }
 0x38c   :  { %10520 = vmatpush1.bf16.msra.mxu0 %v12318_v0  ;;  %11012 = vmatpush1.bf16.msra.mxu1 %v12320_v22  ;;  %v12367_v0 = vcombine.high %v417_v8, %v421_v12  ;;  %v12369_v22 = vcombine.high %v418_v16, %v422_v26  ;;  %v458_v8 = vld [vmem:[#allocation2 + $0x698] sm:$0xff]  ;;  %v12400_v26 = vcombine.low %v450_v19, %v454_v59 }
 0x38d   :  { %10530 = vmatprep.subr.bf16.mxu0 %v12327_v24  ;;  %11022 = vmatprep.subr.bf16.mxu1 %v12329_v25  ;;  %v425_v24 = vld [vmem:[#allocation2 + $0x590] sm:$0xff]  ;;  %v462_v12 = vld [vmem:[#allocation2 + $0x6b8] sm:$0xff] }
 0x38e   :  { %v429_v25 = vld [vmem:[#allocation2 + $0x5b0] sm:$0xff] }
 0x38f   :  { %10522 = vmatmul.mubr.bf16.vlgmr.msra.gmra.mrb[4].mxu0 %v14383_v27  ;;  %11014 = vmatmul.mubr.bf16.vlgmr.msra.gmra.mrb[4].mxu1 %v14383_v27  ;;  %v12344_v27 = vcombine.low %v394_v58, %v398_v14  ;;  %v12374_v58 = vcombine.low %v425_v24, %v429_v25  ;;  %v12376_v14 = vcombine.low %v426_v30, %v430_v32 }
 0x390   :  { %10531 = vmatpush1.bf16.msra.mxu0 %v12326_v9  ;;  %11023 = vmatpush1.bf16.msra.mxu1 %v12328_v39  ;;  %v12375_v9 = vcombine.high %v425_v24, %v429_v25  ;;  %v12377_v39 = vcombine.high %v426_v30, %v430_v32  ;;  %v466_v24 = vld [vmem:[#allocation2 + $0x6d8] sm:$0xff]  ;;  %v12408_v32 = vcombine.low %v458_v8, %v462_v12 }
 0x391   :  { %10532 = vmatprep.subr.bf16.mxu0 %v12335_v40  ;;  %11024 = vmatprep.subr.bf16.mxu1 %v12337_v41  ;;  %v433_v40 = vld [vmem:[#allocation2 + $0x5d0] sm:$0xff]  ;;  %v470_v25 = vld [vmem:[#allocation2 + $0x6f8] sm:$0xff] }
 0x392   :  { %10562 = vmatprep.mubr.bf16.mxu0 %v14385_v38  ;;  %11054 = vmatprep.mubr.bf16.mxu1 %v14385_v38  ;;  %v12361_v38 = vcombine.high %v410_v62, %v414_v1  ;;  %v437_v41 = vld [vmem:[#allocation2 + $0x5f0] sm:$0xff]  ;;  %v12392_v1 = vcombine.low %v442_v11, %v446_v57 }
 0x393   :  { %v12382_v17 = vcombine.low %v433_v40, %v437_v41 }
 0x394   :  { %10533 = vmatpush1.bf16.msra.mxu0 %v12334_v50  ;;  %11025 = vmatpush1.bf16.msra.mxu1 %v12336_v51  ;;  %v12383_v50 = vcombine.high %v433_v40, %v437_v41  ;;  %v12385_v51 = vcombine.high %v434_v43, %v438_v46  ;;  %v474_v40 = vld [vmem:[#allocation2 + $0x718] sm:$0xff]  ;;  %v12416_v46 = vcombine.low %v466_v24, %v470_v25 }
 0x395   :  { %10534 = vmatprep.subr.bf16.mxu0 %v12343_v53  ;;  %11026 = vmatprep.subr.bf16.mxu1 %v12345_v54  ;;  %v441_v53 = vld [vmem:[#allocation2 + $0x610] sm:$0xff]  ;;  %v478_v41 = vld [vmem:[#allocation2 + $0x738] sm:$0xff] }
 0x396   :  { %v445_v54 = vld [vmem:[#allocation2 + $0x630] sm:$0xff] }
 0x397   :  { %v12390_v62 = vcombine.low %v441_v53, %v445_v54 }
 0x398   :  { %10535 = vmatpush1.bf16.msra.mxu0 %v12342_v60  ;;  %11027 = vmatpush1.bf16.msra.mxu1 %v12344_v27  ;;  %v12391_v60 = vcombine.high %v441_v53, %v445_v54  ;;  %v12393_v27 = vcombine.high %v442_v11, %v446_v57  ;;  %v482_v53 = vld [vmem:[#allocation2 + $0x758] sm:$0xff]  ;;  %v12424_v57 = vcombine.low %v474_v40, %v478_v41 }
 0x399   :  { %10536 = vmatprep.subr.bf16.mxu0 %v12351_v28  ;;  %11028 = vmatprep.subr.bf16.mxu1 %v12353_v63  ;;  %v449_v28 = vld [vmem:[#allocation2 + $0x650] sm:$0xff]  ;;  %v486_v54 = vld [vmem:[#allocation2 + $0x778] sm:$0xff] }
 0x39a   :  { %v453_v63 = vld [vmem:[#allocation2 + $0x670] sm:$0xff] }
 0x39b   :  { %v12398_v16 = vcombine.low %v449_v28, %v453_v63 }
 0x39c   :  { %10537 = vmatpush1.bf16.msra.mxu0 %v12350_v2  ;;  %11029 = vmatpush1.bf16.msra.mxu1 %v12352_v4  ;;  %v12399_v2 = vcombine.high %v449_v28, %v453_v63  ;;  %v12401_v4 = vcombine.high %v450_v19, %v454_v59  ;;  %v490_v28 = vld [vmem:[#allocation2 + $0x798] sm:$0xff]  ;;  %v12432_v59 = vcombine.low %v482_v53, %v486_v54 }
 0x39d   :  { %10538 = vmatprep.subr.bf16.mxu0 %v12359_v7  ;;  %11030 = vmatprep.subr.bf16.mxu1 %v12361_v38  ;;  %v457_v7 = vld [vmem:[#allocation2 + $0x690] sm:$0xff]  ;;  %v494_v63 = vld [vmem:[#allocation2 + $0x7b8] sm:$0xff] }
 0x39e   :  { %v461_v38 = vld [vmem:[#allocation2 + $0x6b0] sm:$0xff] }
 0x39f   :  { %v12406_v30 = vcombine.low %v457_v7, %v461_v38 }
 0x3a0   :  { %10539 = vmatpush1.bf16.msra.mxu0 %v12358_v21  ;;  %11031 = vmatpush1.bf16.msra.mxu1 %v12360_v23  ;;  %v12407_v21 = vcombine.high %v457_v7, %v461_v38  ;;  %v12409_v23 = vcombine.high %v458_v8, %v462_v12  ;;  %v498_v7 = vld [vmem:[#allocation2 + $0x7d8] sm:$0xff]  ;;  %v12440_v12 = vcombine.low %v490_v28, %v494_v63 }
 0x3a1   :  { %10540 = vmatprep.subr.bf16.mxu0 %v12367_v0  ;;  %11032 = vmatprep.subr.bf16.mxu1 %v12369_v22  ;;  %v465_v0 = vld [vmem:[#allocation2 + $0x6d0] sm:$0xff]  ;;  %v502_v38 = vld [vmem:[#allocation2 + $0x7f8] sm:$0xff] }
 0x3a2   :  { %v469_v22 = vld [vmem:[#allocation2 + $0x6f0] sm:$0xff] }
 0x3a3   :  { %v12414_v43 = vcombine.low %v465_v0, %v469_v22 }
 0x3a4   :  { %10541 = vmatpush1.bf16.msra.mxu0 %v12366_v33  ;;  %11033 = vmatpush1.bf16.msra.mxu1 %v12368_v36  ;;  %v12415_v33 = vcombine.high %v465_v0, %v469_v22  ;;  %v12417_v36 = vcombine.high %v466_v24, %v470_v25  ;;  %v506_v0 = vld [vmem:[#allocation2 + $0x818] sm:$0xff]  ;;  %v12448_v25 = vcombine.low %v498_v7, %v502_v38 }
 0x3a5   :  { %10542 = vmatprep.subr.bf16.mxu0 %v12375_v9  ;;  %11034 = vmatprep.subr.bf16.mxu1 %v12377_v39  ;;  %v473_v9 = vld [vmem:[#allocation2 + $0x710] sm:$0xff]  ;;  %v510_v22 = vld [vmem:[#allocation2 + $0x838] sm:$0xff] }
 0x3a6   :  { %v477_v39 = vld [vmem:[#allocation2 + $0x730] sm:$0xff] }
 0x3a7   :  { %v12422_v11 = vcombine.low %v473_v9, %v477_v39 }
 0x3a8   :  { %10543 = vmatpush1.bf16.msra.mxu0 %v12374_v58  ;;  %11035 = vmatpush1.bf16.msra.mxu1 %v12376_v14  ;;  %v12423_v58 = vcombine.high %v473_v9, %v477_v39  ;;  %v12425_v14 = vcombine.high %v474_v40, %v478_v41  ;;  %v514_v9 = vld [vmem:[#allocation2 + $0x858] sm:$0xff]  ;;  %v12456_v41 = vcombine.low %v506_v0, %v510_v22 }
 0x3a9   :  { %10544 = vmatprep.subr.bf16.mxu0 %v12383_v50  ;;  %11036 = vmatprep.subr.bf16.mxu1 %v12385_v51  ;;  %v481_v50 = vld [vmem:[#allocation2 + $0x750] sm:$0xff]  ;;  %v518_v39 = vld [vmem:[#allocation2 + $0x878] sm:$0xff] }
 0x3aa   :  { %v485_v51 = vld [vmem:[#allocation2 + $0x770] sm:$0xff] }
 0x3ab   :  { %v12430_v19 = vcombine.low %v481_v50, %v485_v51 }
 0x3ac   :  { %10545 = vmatpush1.bf16.msra.mxu0 %v12382_v17  ;;  %11037 = vmatpush1.bf16.msra.mxu1 %v12384_v18  ;;  %v12431_v17 = vcombine.high %v481_v50, %v485_v51  ;;  %v12433_v18 = vcombine.high %v482_v53, %v486_v54  ;;  %v522_v50 = vld [vmem:[#allocation2 + $0x898] sm:$0xff]  ;;  %v12464_v54 = vcombine.low %v514_v9, %v518_v39 }
 0x3ad   :  { %10546 = vmatprep.subr.bf16.mxu0 %v12391_v60  ;;  %11038 = vmatprep.subr.bf16.mxu1 %v12393_v27  ;;  %v489_v60 = vld [vmem:[#allocation2 + $0x790] sm:$0xff]  ;;  %v526_v51 = vld [vmem:[#allocation2 + $0x8b8] sm:$0xff] }
 0x3ae   :  { %v493_v27 = vld [vmem:[#allocation2 + $0x7b0] sm:$0xff] }
 0x3af   :  { %v12438_v8 = vcombine.low %v489_v60, %v493_v27 }
 0x3b0   :  { %10547 = vmatpush1.bf16.msra.mxu0 %v12390_v62  ;;  %11039 = vmatpush1.bf16.msra.mxu1 %v12392_v1  ;;  %v12439_v62 = vcombine.high %v489_v60, %v493_v27  ;;  %v12441_v1 = vcombine.high %v490_v28, %v494_v63  ;;  %v530_v60 = vld [vmem:[#allocation2 + $0x8d8] sm:$0xff] }
 0x3b1   :  { %10548 = vmatprep.subr.bf16.mxu0 %v12399_v2  ;;  %11040 = vmatprep.subr.bf16.mxu1 %v12401_v4  ;;  %v497_v2 = vld [vmem:[#allocation2 + $0x7d0] sm:$0xff]  ;;  %v534_v27 = vld [vmem:[#allocation2 + $0x8f8] sm:$0xff] }
 0x3b2   :  { %v501_v4 = vld [vmem:[#allocation2 + $0x7f0] sm:$0xff] }
 0x3b3   :  { %v12446_v24 = vcombine.low %v497_v2, %v501_v4 }
 0x3b4   :  { %10549 = vmatpush1.bf16.msra.mxu0 %v12398_v16  ;;  %11041 = vmatpush1.bf16.msra.mxu1 %v12400_v26  ;;  %v12447_v16 = vcombine.high %v497_v2, %v501_v4  ;;  %v12449_v26 = vcombine.high %v498_v7, %v502_v38  ;;  %v542_v2 = vld [vmem:[#allocation2 + $0x938] sm:$0xff]  ;;  %v12480_v7 = vcombine.low %v530_v60, %v534_v27 }
 0x3b5   :  { %10550 = vmatprep.subr.bf16.mxu0 %v12407_v21  ;;  %11042 = vmatprep.subr.bf16.mxu1 %v12409_v23  ;;  %v505_v21 = vld [vmem:[#allocation2 + $0x810] sm:$0xff] }
 0x3b6   :  { %v509_v23 = vld [vmem:[#allocation2 + $0x830] sm:$0xff] }
 0x3b7   :  { %v12454_v40 = vcombine.low %v505_v21, %v509_v23 }
 0x3b8   :  { %10551 = vmatpush1.bf16.msra.mxu0 %v12406_v30  ;;  %11043 = vmatpush1.bf16.msra.mxu1 %v12408_v32  ;;  %v12455_v30 = vcombine.high %v505_v21, %v509_v23  ;;  %v12457_v32 = vcombine.high %v506_v0, %v510_v22 }
 0x3b9   :  { %10552 = vmatprep.subr.bf16.mxu0 %v12415_v33  ;;  %11044 = vmatprep.subr.bf16.mxu1 %v12417_v36  ;;  %v513_v33 = vld [vmem:[#allocation2 + $0x850] sm:$0xff] }
 0x3ba   :  { %v517_v36 = vld [vmem:[#allocation2 + $0x870] sm:$0xff] }
 0x3bb   :  { %v12462_v53 = vcombine.low %v513_v33, %v517_v36 }
 0x3bc   :  { %10553 = vmatpush1.bf16.msra.mxu0 %v12414_v43  ;;  %11045 = vmatpush1.bf16.msra.mxu1 %v12416_v46  ;;  %v12463_v43 = vcombine.high %v513_v33, %v517_v36  ;;  %v12465_v46 = vcombine.high %v514_v9, %v518_v39 }
 0x3bd   :  { %10554 = vmatprep.subr.bf16.mxu0 %v12423_v58  ;;  %11046 = vmatprep.subr.bf16.mxu1 %v12425_v14  ;;  %v521_v58 = vld [vmem:[#allocation2 + $0x890] sm:$0xff] }
 0x3be   :  { %v525_v14 = vld [vmem:[#allocation2 + $0x8b0] sm:$0xff] }
 0x3bf   :  { %v12470_v28 = vcombine.low %v521_v58, %v525_v14 }
 0x3c0   :  { %10555 = vmatpush1.bf16.msra.mxu0 %v12422_v11  ;;  %11047 = vmatpush1.bf16.msra.mxu1 %v12424_v57  ;;  %v12471_v11 = vcombine.high %v521_v58, %v525_v14  ;;  %v12473_v57 = vcombine.high %v522_v50, %v526_v51 }
 0x3c1   :  { %10556 = vmatprep.subr.bf16.mxu0 %v12431_v17  ;;  %11048 = vmatprep.subr.bf16.mxu1 %v12433_v18  ;;  %v529_v17 = vld [vmem:[#allocation2 + $0x8d0] sm:$0xff] }
 0x3c2   :  { %v533_v18 = vld [vmem:[#allocation2 + $0x8f0] sm:$0xff] }
 0x3c3   :  { %v12479_v63 = vcombine.high %v529_v17, %v533_v18  ;;  %v12478_v4 = vcombine.low %v529_v17, %v533_v18 }
 0x3c4   :  { %10557 = vmatpush1.bf16.msra.mxu0 %v12430_v19  ;;  %11049 = vmatpush1.bf16.msra.mxu1 %v12432_v59  ;;  %v12481_v19 = vcombine.high %v530_v60, %v534_v27  ;;  %v537_v59 = vld [vmem:[#allocation2 + $0x910] sm:$0xff] }
 0x3c5   :  { %10558 = vmatprep.subr.bf16.mxu0 %v12439_v62  ;;  %11050 = vmatprep.subr.bf16.mxu1 %v12441_v1  ;;  %v541_v62 = vld [vmem:[#allocation2 + $0x930] sm:$0xff]  ;;  %v538_v1 = vld [vmem:[#allocation2 + $0x918] sm:$0xff] }
 0x3c6   :  { %v12487_v38 = vcombine.high %v537_v59, %v541_v62  ;;  %v12486_v21 = vcombine.low %v537_v59, %v541_v62  ;;  %v12488_v23 = vcombine.low %v538_v1, %v542_v2 }
 0x3c8   :  { %10559 = vmatpush1.bf16.msra.mxu0 %v12438_v8  ;;  %11051 = vmatpush1.bf16.msra.mxu1 %v12440_v12  ;;  %v545_v8 = vld [vmem:[#allocation2 + $0x950] sm:$0xff] }
 0x3c9   :  { %10560 = vmatprep.subr.bf16.mxu0 %v12447_v16  ;;  %11052 = vmatprep.subr.bf16.mxu1 %v12449_v26  ;;  %v549_v12 = vld [vmem:[#allocation2 + $0x970] sm:$0xff]  ;;  %v546_v16 = vld [vmem:[#allocation2 + $0x958] sm:$0xff] }
 0x3ca   :  { %v550_v26 = vld [vmem:[#allocation2 + $0x978] sm:$0xff]  ;;  %v12495_v0 = vcombine.high %v545_v8, %v549_v12  ;;  %v12494_v33 = vcombine.low %v545_v8, %v549_v12 }
 0x3cb   :  { %v12497_v22 = vcombine.high %v546_v16, %v550_v26  ;;  %v12496_v36 = vcombine.low %v546_v16, %v550_v26 }
 0x3cc   :  { %10561 = vmatpush1.bf16.msra.mxu0 %v12446_v24  ;;  %11053 = vmatpush1.bf16.msra.mxu1 %v12448_v25  ;;  %v553_v24 = vld [vmem:[#allocation2 + $0x990] sm:$0xff] }
 0x3cd   :  { %10571 = vmatprep.subr.bf16.mxu0 %v12455_v30  ;;  %11063 = vmatprep.subr.bf16.mxu1 %v12457_v32  ;;  %v557_v25 = vld [vmem:[#allocation2 + $0x9b0] sm:$0xff]  ;;  %v554_v30 = vld [vmem:[#allocation2 + $0x998] sm:$0xff] }
 0x3ce   :  { %v558_v32 = vld [vmem:[#allocation2 + $0x9b8] sm:$0xff]  ;;  %v12503_v9 = vcombine.high %v553_v24, %v557_v25  ;;  %v12502_v58 = vcombine.low %v553_v24, %v557_v25 }
 0x3cf   :  { %10563 = vmatmul.mubr.bf16.vlgmr.msra.gmra.mrb[4].mxu0 %v14404_v47  ;;  %11055 = vmatmul.mubr.bf16.vlgmr.msra.gmra.mrb[4].mxu1 %v14404_v47  ;;  %v12472_v47 = vcombine.low %v522_v50, %v526_v51  ;;  %v12505_v39 = vcombine.high %v554_v30, %v558_v32  ;;  %v12504_v14 = vcombine.low %v554_v30, %v558_v32 }
 0x3d0   :  { %10572 = vmatpush1.bf16.msra.mxu0 %v12454_v40  ;;  %11064 = vmatpush1.bf16.msra.mxu1 %v12456_v41  ;;  %v561_v40 = vld [vmem:[#allocation2 + $0x9d0] sm:$0xff] }
 0x3d1   :  { %10573 = vmatprep.subr.bf16.mxu0 %v12463_v43  ;;  %11065 = vmatprep.subr.bf16.mxu1 %v12465_v46  ;;  %v565_v41 = vld [vmem:[#allocation2 + $0x9f0] sm:$0xff]  ;;  %v562_v43 = vld [vmem:[#allocation2 + $0x9d8] sm:$0xff] }
 0x3d2   :  { %10603 = vmatprep.mubr.bf16.mxu0 %v14406_v55  ;;  %11095 = vmatprep.mubr.bf16.mxu1 %v14406_v55  ;;  %v12489_v55 = vcombine.high %v538_v1, %v542_v2  ;;  %v566_v46 = vld [vmem:[#allocation2 + $0x9f8] sm:$0xff]  ;;  %v12511_v50 = vcombine.high %v561_v40, %v565_v41  ;;  %v12510_v17 = vcombine.low %v561_v40, %v565_v41 }
 0x3d3   :  { %v12513_v51 = vcombine.high %v562_v43, %v566_v46  ;;  %v12512_v18 = vcombine.low %v562_v43, %v566_v46 }
 0x3d4   :  { %10574 = vmatpush1.bf16.msra.mxu0 %v12462_v53  ;;  %11066 = vmatpush1.bf16.msra.mxu1 %v12464_v54  ;;  %v569_v53 = vld [vmem:[#allocation2 + $0xa10] sm:$0xff] }
 0x3d5   :  { %10575 = vmatprep.subr.bf16.mxu0 %v12471_v11  ;;  %11067 = vmatprep.subr.bf16.mxu1 %v12473_v57  ;;  %v573_v54 = vld [vmem:[#allocation2 + $0xa30] sm:$0xff]  ;;  %v570_v11 = vld [vmem:[#allocation2 + $0xa18] sm:$0xff] }
 0x3d6   :  { %v574_v57 = vld [vmem:[#allocation2 + $0xa38] sm:$0xff]  ;;  %v12519_v60 = vcombine.high %v569_v53, %v573_v54  ;;  %v12518_v59 = vcombine.low %v569_v53, %v573_v54 }
 0x3d7   :  { %v12521_v27 = vcombine.high %v570_v11, %v574_v57  ;;  %v12520_v62 = vcombine.low %v570_v11, %v574_v57 }
 0x3d8   :  { %10576 = vmatpush1.bf16.msra.mxu0 %v12470_v28  ;;  %11068 = vmatpush1.bf16.msra.mxu1 %v12472_v47  ;;  %v577_v28 = vld [vmem:[#allocation2 + $0xa50] sm:$0xff] }
 0x3d9   :  { %10577 = vmatprep.subr.bf16.mxu0 %v12479_v63  ;;  %11069 = vmatprep.subr.bf16.mxu1 %v12481_v19  ;;  %v581_v47 = vld [vmem:[#allocation2 + $0xa70] sm:$0xff]  ;;  %v578_v63 = vld [vmem:[#allocation2 + $0xa58] sm:$0xff] }
 0x3da   :  { %v582_v19 = vld [vmem:[#allocation2 + $0xa78] sm:$0xff]  ;;  %v12527_v1 = vcombine.high %v577_v28, %v581_v47  ;;  %v12526_v8 = vcombine.low %v577_v28, %v581_v47 }
 0x3db   :  { %v12529_v2 = vcombine.high %v578_v63, %v582_v19  ;;  %v12528_v12 = vcombine.low %v578_v63, %v582_v19 }
 0x3dc   :  { %10578 = vmatpush1.bf16.msra.mxu0 %v12478_v4  ;;  %11070 = vmatpush1.bf16.msra.mxu1 %v12480_v7  ;;  %v585_v4 = vld [vmem:[#allocation2 + $0xa90] sm:$0xff] }
 0x3dd   :  { %10579 = vmatprep.subr.bf16.mxu0 %v12487_v38  ;;  %11071 = vmatprep.subr.bf16.mxu1 %v12489_v55  ;;  %v589_v7 = vld [vmem:[#allocation2 + $0xab0] sm:$0xff]  ;;  %v586_v38 = vld [vmem:[#allocation2 + $0xa98] sm:$0xff] }
 0x3de   :  { %v590_v55 = vld [vmem:[#allocation2 + $0xab8] sm:$0xff]  ;;  %v12535_v16 = vcombine.high %v585_v4, %v589_v7  ;;  %v12534_v24 = vcombine.low %v585_v4, %v589_v7 }
 0x3df   :  { %v12537_v26 = vcombine.high %v586_v38, %v590_v55  ;;  %v12536_v25 = vcombine.low %v586_v38, %v590_v55 }
 0x3e0   :  { %10580 = vmatpush1.bf16.msra.mxu0 %v12486_v21  ;;  %11072 = vmatpush1.bf16.msra.mxu1 %v12488_v23  ;;  %v593_v21 = vld [vmem:[#allocation2 + $0xad0] sm:$0xff] }
 0x3e1   :  { %10581 = vmatprep.subr.bf16.mxu0 %v12495_v0  ;;  %11073 = vmatprep.subr.bf16.mxu1 %v12497_v22  ;;  %v597_v23 = vld [vmem:[#allocation2 + $0xaf0] sm:$0xff]  ;;  %v594_v0 = vld [vmem:[#allocation2 + $0xad8] sm:$0xff] }
 0x3e2   :  { %v598_v22 = vld [vmem:[#allocation2 + $0xaf8] sm:$0xff]  ;;  %v12543_v30 = vcombine.high %v593_v21, %v597_v23  ;;  %v12542_v40 = vcombine.low %v593_v21, %v597_v23 }
 0x3e3   :  { %v12545_v32 = vcombine.high %v594_v0, %v598_v22  ;;  %v12544_v41 = vcombine.low %v594_v0, %v598_v22 }
 0x3e4   :  { %10582 = vmatpush1.bf16.msra.mxu0 %v12494_v33  ;;  %11074 = vmatpush1.bf16.msra.mxu1 %v12496_v36  ;;  %v601_v33 = vld [vmem:[#allocation2 + $0xb10] sm:$0xff] }
 0x3e5   :  { %10583 = vmatprep.subr.bf16.mxu0 %v12503_v9  ;;  %11075 = vmatprep.subr.bf16.mxu1 %v12505_v39  ;;  %v605_v36 = vld [vmem:[#allocation2 + $0xb30] sm:$0xff]  ;;  %v602_v9 = vld [vmem:[#allocation2 + $0xb18] sm:$0xff] }
 0x3e6   :  { %v606_v39 = vld [vmem:[#allocation2 + $0xb38] sm:$0xff]  ;;  %v12551_v43 = vcombine.high %v601_v33, %v605_v36  ;;  %v12550_v53 = vcombine.low %v601_v33, %v605_v36 }
 0x3e7   :  { %v12553_v46 = vcombine.high %v602_v9, %v606_v39  ;;  %v12552_v54 = vcombine.low %v602_v9, %v606_v39 }
 0x3e8   :  { %10584 = vmatpush1.bf16.msra.mxu0 %v12502_v58  ;;  %11076 = vmatpush1.bf16.msra.mxu1 %v12504_v14  ;;  %v609_v58 = vld [vmem:[#allocation2 + $0xb50] sm:$0xff] }
 0x3e9   :  { %10585 = vmatprep.subr.bf16.mxu0 %v12511_v50  ;;  %11077 = vmatprep.subr.bf16.mxu1 %v12513_v51  ;;  %v613_v14 = vld [vmem:[#allocation2 + $0xb70] sm:$0xff]  ;;  %v610_v50 = vld [vmem:[#allocation2 + $0xb58] sm:$0xff] }
 0x3ea   :  { %v614_v51 = vld [vmem:[#allocation2 + $0xb78] sm:$0xff]  ;;  %v12559_v11 = vcombine.high %v609_v58, %v613_v14  ;;  %v12558_v28 = vcombine.low %v609_v58, %v613_v14 }
 0x3eb   :  { %v12561_v57 = vcombine.high %v610_v50, %v614_v51  ;;  %v12560_v47 = vcombine.low %v610_v50, %v614_v51 }
 0x3ec   :  { %10586 = vmatpush1.bf16.msra.mxu0 %v12510_v17  ;;  %11078 = vmatpush1.bf16.msra.mxu1 %v12512_v18  ;;  %v617_v17 = vld [vmem:[#allocation2 + $0xb90] sm:$0xff] }
 0x3ed   :  { %10587 = vmatprep.subr.bf16.mxu0 %v12519_v60  ;;  %11079 = vmatprep.subr.bf16.mxu1 %v12521_v27  ;;  %v621_v18 = vld [vmem:[#allocation2 + $0xbb0] sm:$0xff]  ;;  %v618_v60 = vld [vmem:[#allocation2 + $0xb98] sm:$0xff] }
 0x3ee   :  { %v622_v27 = vld [vmem:[#allocation2 + $0xbb8] sm:$0xff]  ;;  %v12567_v63 = vcombine.high %v617_v17, %v621_v18  ;;  %v12566_v4 = vcombine.low %v617_v17, %v621_v18 }
 0x3ef   :  { %v12569_v19 = vcombine.high %v618_v60, %v622_v27  ;;  %v12568_v7 = vcombine.low %v618_v60, %v622_v27  ;;  %v665_v27 = vld [vmem:[#allocation2 + $0xd10] sm:$0xff] }
 0x3f0   :  { %10588 = vmatpush1.bf16.msra.mxu0 %v12518_v59  ;;  %11080 = vmatpush1.bf16.msra.mxu1 %v12520_v62  ;;  %v625_v59 = vld [vmem:[#allocation2 + $0xbd0] sm:$0xff] }
 0x3f1   :  { %10589 = vmatprep.subr.bf16.mxu0 %v12527_v1  ;;  %11081 = vmatprep.subr.bf16.mxu1 %v12529_v2  ;;  %v629_v62 = vld [vmem:[#allocation2 + $0xbf0] sm:$0xff]  ;;  %v626_v1 = vld [vmem:[#allocation2 + $0xbd8] sm:$0xff] }
 0x3f2   :  { %v630_v2 = vld [vmem:[#allocation2 + $0xbf8] sm:$0xff]  ;;  %v12575_v38 = vcombine.high %v625_v59, %v629_v62  ;;  %v12574_v21 = vcombine.low %v625_v59, %v629_v62 }
 0x3f3   :  { %v12577_v55 = vcombine.high %v626_v1, %v630_v2  ;;  %v12576_v23 = vcombine.low %v626_v1, %v630_v2  ;;  %v673_v1 = vld [vmem:[#allocation2 + $0xd50] sm:$0xff] }
 0x3f4   :  { %10590 = vmatpush1.bf16.msra.mxu0 %v12526_v8  ;;  %11082 = vmatpush1.bf16.msra.mxu1 %v12528_v12  ;;  %v633_v8 = vld [vmem:[#allocation2 + $0xc10] sm:$0xff] }
 0x3f5   :  { %10591 = vmatprep.subr.bf16.mxu0 %v12535_v16  ;;  %11083 = vmatprep.subr.bf16.mxu1 %v12537_v26  ;;  %v637_v12 = vld [vmem:[#allocation2 + $0xc30] sm:$0xff]  ;;  %v634_v16 = vld [vmem:[#allocation2 + $0xc18] sm:$0xff] }
 0x3f6   :  { %v638_v26 = vld [vmem:[#allocation2 + $0xc38] sm:$0xff]  ;;  %v12583_v0 = vcombine.high %v633_v8, %v637_v12  ;;  %v12582_v33 = vcombine.low %v633_v8, %v637_v12  ;;  %v677_v2 = vld [vmem:[#allocation2 + $0xd70] sm:$0xff] }
 0x3f7   :  { %v12585_v22 = vcombine.high %v634_v16, %v638_v26  ;;  %v12584_v36 = vcombine.low %v634_v16, %v638_v26  ;;  %v12623_v8 = vcombine.high %v673_v1, %v677_v2  ;;  %v681_v16 = vld [vmem:[#allocation2 + $0xd90] sm:$0xff] }
 0x3f8   :  { %10592 = vmatpush1.bf16.msra.mxu0 %v12534_v24  ;;  %11084 = vmatpush1.bf16.msra.mxu1 %v12536_v25  ;;  %v641_v24 = vld [vmem:[#allocation2 + $0xc50] sm:$0xff] }
 0x3f9   :  { %10593 = vmatprep.subr.bf16.mxu0 %v12543_v30  ;;  %11085 = vmatprep.subr.bf16.mxu1 %v12545_v32  ;;  %v645_v25 = vld [vmem:[#allocation2 + $0xc70] sm:$0xff]  ;;  %v642_v30 = vld [vmem:[#allocation2 + $0xc58] sm:$0xff] }
 0x3fa   :  { %v646_v32 = vld [vmem:[#allocation2 + $0xc78] sm:$0xff]  ;;  %v12591_v9 = vcombine.high %v641_v24, %v645_v25  ;;  %v12590_v58 = vcombine.low %v641_v24, %v645_v25  ;;  %v685_v26 = vld [vmem:[#allocation2 + $0xdb0] sm:$0xff] }
 0x3fb   :  { %v12593_v39 = vcombine.high %v642_v30, %v646_v32  ;;  %v12592_v14 = vcombine.low %v642_v30, %v646_v32  ;;  %v12631_v24 = vcombine.high %v681_v16, %v685_v26  ;;  %v689_v32 = vld [vmem:[#allocation2 + $0xdd0] sm:$0xff] }
 0x3fc   :  { %10594 = vmatpush1.bf16.msra.mxu0 %v12542_v40  ;;  %11086 = vmatpush1.bf16.msra.mxu1 %v12544_v41  ;;  %v649_v40 = vld [vmem:[#allocation2 + $0xc90] sm:$0xff] }
 0x3fd   :  { %10595 = vmatprep.subr.bf16.mxu0 %v12551_v43  ;;  %11087 = vmatprep.subr.bf16.mxu1 %v12553_v46  ;;  %v653_v41 = vld [vmem:[#allocation2 + $0xcb0] sm:$0xff]  ;;  %v650_v43 = vld [vmem:[#allocation2 + $0xc98] sm:$0xff] }
 0x3fe   :  { %v654_v46 = vld [vmem:[#allocation2 + $0xcb8] sm:$0xff]  ;;  %v12599_v50 = vcombine.high %v649_v40, %v653_v41  ;;  %v12598_v17 = vcombine.low %v649_v40, %v653_v41 }
 0x3ff   :  { %v12601_v51 = vcombine.high %v650_v43, %v654_v46  ;;  %v694_v40 = vld [vmem:[#allocation2 + $0xdf8] sm:$0xff] }
 0x400   :  { %10596 = vmatpush1.bf16.msra.mxu0 %v12550_v53  ;;  %11088 = vmatpush1.bf16.msra.mxu1 %v12552_v54  ;;  %v657_v53 = vld [vmem:[#allocation2 + $0xcd0] sm:$0xff] }
 0x401   :  { %10597 = vmatprep.subr.bf16.mxu0 %v12559_v11  ;;  %11089 = vmatprep.subr.bf16.mxu1 %v12561_v57  ;;  %v661_v54 = vld [vmem:[#allocation2 + $0xcf0] sm:$0xff]  ;;  %v658_v11 = vld [vmem:[#allocation2 + $0xcd8] sm:$0xff] }
 0x402   :  { %v662_v57 = vld [vmem:[#allocation2 + $0xcf8] sm:$0xff]  ;;  %v12607_v18 = vcombine.high %v657_v53, %v661_v54 }
 0x403   :  { %v12609_v60 = vcombine.high %v658_v11, %v662_v57  ;;  %v12608_v59 = vcombine.low %v658_v11, %v662_v57  ;;  %v697_v11 = vld [vmem:[#allocation2 + $0xe10] sm:$0xff] }
 0x404   :  { %10598 = vmatpush1.bf16.msra.mxu0 %v12558_v28  ;;  %11090 = vmatpush1.bf16.msra.mxu1 %v12560_v47  ;;  %v669_v28 = vld [vmem:[#allocation2 + $0xd30] sm:$0xff]  ;;  %v666_v47 = vld [vmem:[#allocation2 + $0xd18] sm:$0xff] }
 0x405   :  { %10599 = vmatprep.subr.bf16.mxu0 %v12567_v63  ;;  %11091 = vmatprep.subr.bf16.mxu1 %v12569_v19  ;;  %v670_v63 = vld [vmem:[#allocation2 + $0xd38] sm:$0xff]  ;;  %v12606_v19 = vcombine.low %v657_v53, %v661_v54  ;;  %v12615_v62 = vcombine.high %v665_v27, %v669_v28  ;;  %v701_v57 = vld [vmem:[#allocation2 + $0xe30] sm:$0xff] }
 0x408   :  { %10600 = vmatpush1.bf16.msra.mxu0 %v12566_v4  ;;  %11092 = vmatpush1.bf16.msra.mxu1 %v12568_v7  ;;  %v674_v4 = vld [vmem:[#allocation2 + $0xd58] sm:$0xff] }
 0x409   :  { %10601 = vmatprep.subr.bf16.mxu0 %v12575_v38  ;;  %11093 = vmatprep.subr.bf16.mxu1 %v12577_v55  ;;  %v678_v7 = vld [vmem:[#allocation2 + $0xd78] sm:$0xff]  ;;  %v12614_v38 = vcombine.low %v665_v27, %v669_v28  ;;  %v12616_v55 = vcombine.low %v666_v47, %v670_v63  ;;  %v12647_v27 = vcombine.high %v697_v11, %v701_v57 }
 0x40a   :  { %v12625_v12 = vcombine.high %v674_v4, %v678_v7 }
 0x40c   :  { %10602 = vmatpush1.bf16.msra.mxu0 %v12574_v21  ;;  %11094 = vmatpush1.bf16.msra.mxu1 %v12576_v23  ;;  %v682_v21 = vld [vmem:[#allocation2 + $0xd98] sm:$0xff] }
 0x40d   :  { %10612 = vmatprep.subr.bf16.mxu0 %v12583_v0  ;;  %11104 = vmatprep.subr.bf16.mxu1 %v12585_v22  ;;  %v686_v23 = vld [vmem:[#allocation2 + $0xdb8] sm:$0xff]  ;;  %v12622_v0 = vcombine.low %v673_v1, %v677_v2  ;;  %v12624_v22 = vcombine.low %v674_v4, %v678_v7  ;;  %v713_v4 = vld [vmem:[#allocation2 + $0xe90] sm:$0xff] }
 0x40e   :  { %v12633_v30 = vcombine.high %v682_v21, %v686_v23  ;;  %v717_v7 = vld [vmem:[#allocation2 + $0xeb0] sm:$0xff] }
 0x40f   :  { %10604 = vmatmul.mubr.bf16.vlgmr.msra.gmra.mrb[4].mxu0 %v14421_v5  ;;  %11096 = vmatmul.mubr.bf16.vlgmr.msra.gmra.mrb[4].mxu1 %v14421_v5  ;;  %v12600_v5 = vcombine.low %v650_v43, %v654_v46  ;;  %v12630_v46 = vcombine.low %v681_v16, %v685_v26  ;;  %v12663_v16 = vcombine.high %v713_v4, %v717_v7 }
 0x410   :  { %10613 = vmatpush1.bf16.msra.mxu0 %v12582_v33  ;;  %11105 = vmatpush1.bf16.msra.mxu1 %v12584_v36  ;;  %v693_v33 = vld [vmem:[#allocation2 + $0xdf0] sm:$0xff] }
 0x411   :  { %10614 = vmatprep.subr.bf16.mxu0 %v12591_v9  ;;  %11106 = vmatprep.subr.bf16.mxu1 %v12593_v39  ;;  %v690_v39 = vld [vmem:[#allocation2 + $0xdd8] sm:$0xff] }
 0x412   :  { %10644 = vmatprep.mubr.bf16.mxu0 %v14423_v15  ;;  %11136 = vmatprep.mubr.bf16.mxu1 %v14423_v15  ;;  %v12617_v15 = vcombine.high %v666_v47, %v670_v63  ;;  %v12641_v54 = vcombine.high %v690_v39, %v694_v40  ;;  %v705_v47 = vld [vmem:[#allocation2 + $0xe50] sm:$0xff] }
 0x413   :  { %v709_v63 = vld [vmem:[#allocation2 + $0xe70] sm:$0xff] }
 0x414   :  { %10615 = vmatpush1.bf16.msra.mxu0 %v12590_v58  ;;  %11107 = vmatpush1.bf16.msra.mxu1 %v12592_v14  ;;  %v12655_v1 = vcombine.high %v705_v47, %v709_v63 }
 0x415   :  { %10616 = vmatprep.subr.bf16.mxu0 %v12599_v50  ;;  %11108 = vmatprep.subr.bf16.mxu1 %v12601_v51  ;;  %v12632_v50 = vcombine.low %v682_v21, %v686_v23  ;;  %v12639_v51 = vcombine.high %v689_v32, %v693_v33  ;;  %v721_v21 = vld [vmem:[#allocation2 + $0xed0] sm:$0xff] }
 0x416   :  { %v725_v23 = vld [vmem:[#allocation2 + $0xef0] sm:$0xff] }
 0x418   :  { %10617 = vmatpush1.bf16.msra.mxu0 %v12598_v17  ;;  %11109 = vmatpush1.bf16.msra.mxu1 %v12600_v5  ;;  %v698_v17 = vld [vmem:[#allocation2 + $0xe18] sm:$0xff] }
 0x419   :  { %10618 = vmatprep.subr.bf16.mxu0 %v12607_v18  ;;  %11110 = vmatprep.subr.bf16.mxu1 %v12609_v60  ;;  %v702_v5 = vld [vmem:[#allocation2 + $0xe38] sm:$0xff]  ;;  %v12638_v18 = vcombine.low %v689_v32, %v693_v33  ;;  %v12640_v60 = vcombine.low %v690_v39, %v694_v40  ;;  %v12671_v32 = vcombine.high %v721_v21, %v725_v23  ;;  %v729_v39 = vld [vmem:[#allocation2 + $0xf10] sm:$0xff] }
 0x41a   :  { %v12649_v28 = vcombine.high %v698_v17, %v702_v5  ;;  %v733_v40 = vld [vmem:[#allocation2 + $0xf30] sm:$0xff] }
 0x41c   :  { %10619 = vmatpush1.bf16.msra.mxu0 %v12606_v19  ;;  %11111 = vmatpush1.bf16.msra.mxu1 %v12608_v59  ;;  %v706_v19 = vld [vmem:[#allocation2 + $0xe58] sm:$0xff] }
 0x41d   :  { %10620 = vmatprep.subr.bf16.mxu0 %v12615_v62  ;;  %11112 = vmatprep.subr.bf16.mxu1 %v12617_v15  ;;  %v710_v59 = vld [vmem:[#allocation2 + $0xe78] sm:$0xff]  ;;  %v12646_v62 = vcombine.low %v697_v11, %v701_v57  ;;  %v12648_v15 = vcombine.low %v698_v17, %v702_v5  ;;  %v12678_v17 = vcombine.low %v729_v39, %v733_v40 }
 0x41e   :  { %v12657_v2 = vcombine.high %v706_v19, %v710_v59  ;;  %v738_v11 = vld [vmem:[#allocation2 + $0xf58] sm:$0xff] }
 0x41f   :  { %v742_v57 = vld [vmem:[#allocation2 + $0xf78] sm:$0xff] }
 0x420   :  { %10621 = vmatpush1.bf16.msra.mxu0 %v12614_v38  ;;  %11113 = vmatpush1.bf16.msra.mxu1 %v12616_v55  ;;  %v714_v38 = vld [vmem:[#allocation2 + $0xe98] sm:$0xff] }
 0x421   :  { %10622 = vmatprep.subr.bf16.mxu0 %v12623_v8  ;;  %11114 = vmatprep.subr.bf16.mxu1 %v12625_v12  ;;  %v718_v55 = vld [vmem:[#allocation2 + $0xeb8] sm:$0xff]  ;;  %v12654_v8 = vcombine.low %v705_v47, %v709_v63  ;;  %v12656_v12 = vcombine.low %v706_v19, %v710_v59  ;;  %v12688_v59 = vcombine.low %v738_v11, %v742_v57 }
 0x422   :  { %v14601_v25 = vpop.f32.mrb[0].mxu0  ;;  %v14603_v36 = vpop.f32.mrb[0].mxu1  ;;  %v12665_v26 = vcombine.high %v714_v38, %v718_v55  ;;  %v746_v47 = vld [vmem:[#allocation2 + $0xf98] sm:$0xff] }
 0x423   :  { %v14605_v9 = vpop.f32.mrb[1].mxu0  ;;  %v14607_v41 = vpop.f32.mrb[1].mxu1  ;;  %v750_v63 = vld [vmem:[#allocation2 + $0xfb8] sm:$0xff] }
 0x424   :  { %v9994_v43 = vpop.f32.mrb[2].mxu0  ;;  %10623 = vmatpush1.bf16.msra.mxu0 %v12622_v0  ;;  %v10486_v58 = vpop.f32.mrb[2].mxu1  ;;  %11115 = vmatpush1.bf16.msra.mxu1 %v12624_v22  ;;  %v722_v0 = vld [vmem:[#allocation2 + $0xed8] sm:$0xff] }
 0x425   :  { %v9995_v14 = vpop.f32.mrb[3].mxu0  ;;  %10624 = vmatprep.subr.bf16.mxu0 %v12631_v24  ;;  %v10487_v53 = vpop.f32.mrb[3].mxu1  ;;  %11116 = vmatprep.subr.bf16.mxu1 %v12633_v30  ;;  %v726_v22 = vld [vmem:[#allocation2 + $0xef8] sm:$0xff]  ;;  %v12662_v24 = vcombine.low %v713_v4, %v717_v7  ;;  %v12664_v30 = vcombine.low %v714_v38, %v718_v55  ;;  %v12670_v58 = vcombine.low %v721_v21, %v725_v23 }
 0x426   :  { %v12673_v33 = vcombine.high %v722_v0, %v726_v22  ;;  %v730_v43 = vld [vmem:[#allocation2 + $0xf18] sm:$0xff]  ;;  %v12672_v14 = vcombine.low %v722_v0, %v726_v22  ;;  %v737_v53 = vld [vmem:[#allocation2 + $0xf50] sm:$0xff]  ;;  %v12696_v55 = vcombine.low %v746_v47, %v750_v63 }
 0x427   :  { %v754_v4 = vld [vmem:[#allocation2 + $0xfd8] sm:$0xff] }
 0x428   :  { %10625 = vmatpush1.bf16.msra.mxu0 %v12630_v46  ;;  %11117 = vmatpush1.bf16.msra.mxu1 %v12632_v50  ;;  %v734_v46 = vld [vmem:[#allocation2 + $0xf38] sm:$0xff]  ;;  %v12679_v50 = vcombine.high %v729_v39, %v733_v40 }
 0x429   :  { %10626 = vmatprep.subr.bf16.mxu0 %v12639_v51  ;;  %11118 = vmatprep.subr.bf16.mxu1 %v12641_v54  ;;  %v12681_v51 = vcombine.high %v730_v43, %v734_v46  ;;  %v741_v54 = vld [vmem:[#allocation2 + $0xf70] sm:$0xff]  ;;  %v12680_v5 = vcombine.low %v730_v43, %v734_v46  ;;  %v758_v7 = vld [vmem:[#allocation2 + $0xff8] sm:$0xff] }
 0x42a   :  { %v12686_v19 = vcombine.low %v737_v53, %v741_v54  ;;  %v762_v21 = vld [vmem:[#allocation2 + $0x1018] sm:$0xff]  ;;  %v12704_v22 = vcombine.low %v754_v4, %v758_v7 }
 0x42b   :  { %v766_v23 = vld [vmem:[#allocation2 + $0x1038] sm:$0xff] }
 0x42c   :  { %10627 = vmatpush1.bf16.msra.mxu0 %v12638_v18  ;;  %11119 = vmatpush1.bf16.msra.mxu1 %v12640_v60  ;;  %v12687_v18 = vcombine.high %v737_v53, %v741_v54  ;;  %v12689_v60 = vcombine.high %v738_v11, %v742_v57  ;;  %v770_v39 = vld [vmem:[#allocation2 + $0x1058] sm:$0xff]  ;;  %v12712_v46 = vcombine.low %v762_v21, %v766_v23 }
 0x42d   :  { %10628 = vmatprep.subr.bf16.mxu0 %v12647_v27  ;;  %11120 = vmatprep.subr.bf16.mxu1 %v12649_v28  ;;  %v745_v27 = vld [vmem:[#allocation2 + $0xf90] sm:$0xff]  ;;  %v774_v40 = vld [vmem:[#allocation2 + $0x1078] sm:$0xff] }
 0x42e   :  { %v749_v28 = vld [vmem:[#allocation2 + $0xfb0] sm:$0xff]  ;;  %v778_v53 = vld [vmem:[#allocation2 + $0x1098] sm:$0xff]  ;;  %v12720_v57 = vcombine.low %v770_v39, %v774_v40 }
 0x42f   :  { %v12694_v38 = vcombine.low %v745_v27, %v749_v28  ;;  %v782_v54 = vld [vmem:[#allocation2 + $0x10b8] sm:$0xff] }
 0x430   :  { %10629 = vmatpush1.bf16.msra.mxu0 %v12646_v62  ;;  %11121 = vmatpush1.bf16.msra.mxu1 %v12648_v15  ;;  %v12695_v62 = vcombine.high %v745_v27, %v749_v28  ;;  %v12697_v15 = vcombine.high %v746_v47, %v750_v63  ;;  %v786_v27 = vld [vmem:[#allocation2 + $0x10d8] sm:$0xff] }
 0x431   :  { %10630 = vmatprep.subr.bf16.mxu0 %v12655_v1  ;;  %11122 = vmatprep.subr.bf16.mxu1 %v12657_v2  ;;  %v753_v1 = vld [vmem:[#allocation2 + $0xfd0] sm:$0xff]  ;;  %v790_v28 = vld [vmem:[#allocation2 + $0x10f8] sm:$0xff] }
 0x432   :  { %v757_v2 = vld [vmem:[#allocation2 + $0xff0] sm:$0xff] }
 0x433   :  { %v12702_v0 = vcombine.low %v753_v1, %v757_v2 }
 0x434   :  { %10631 = vmatpush1.bf16.msra.mxu0 %v12654_v8  ;;  %11123 = vmatpush1.bf16.msra.mxu1 %v12656_v12  ;;  %v12703_v8 = vcombine.high %v753_v1, %v757_v2  ;;  %v12705_v12 = vcombine.high %v754_v4, %v758_v7  ;;  %v798_v1 = vld [vmem:[#allocation2 + $0x1138] sm:$0xff]  ;;  %v12736_v4 = vcombine.low %v786_v27, %v790_v28 }
 0x435   :  { %10632 = vmatprep.subr.bf16.mxu0 %v12663_v16  ;;  %11124 = vmatprep.subr.bf16.mxu1 %v12665_v26  ;;  %v761_v16 = vld [vmem:[#allocation2 + $0x1010] sm:$0xff] }
 0x436   :  { %v765_v26 = vld [vmem:[#allocation2 + $0x1030] sm:$0xff] }
 0x437   :  { %v12710_v43 = vcombine.low %v761_v16, %v765_v26 }
 0x438   :  { %10633 = vmatpush1.bf16.msra.mxu0 %v12662_v24  ;;  %11125 = vmatpush1.bf16.msra.mxu1 %v12664_v30  ;;  %v12711_v24 = vcombine.high %v761_v16, %v765_v26  ;;  %v12713_v30 = vcombine.high %v762_v21, %v766_v23 }
 0x439   :  { %10634 = vmatprep.subr.bf16.mxu0 %v12671_v32  ;;  %11126 = vmatprep.subr.bf16.mxu1 %v12673_v33  ;;  %v769_v32 = vld [vmem:[#allocation2 + $0x1050] sm:$0xff] }
 0x43a   :  { %v773_v33 = vld [vmem:[#allocation2 + $0x1070] sm:$0xff] }
 0x43b   :  { %v12718_v11 = vcombine.low %v769_v32, %v773_v33 }
 0x43c   :  { %10635 = vmatpush1.bf16.msra.mxu0 %v12670_v58  ;;  %11127 = vmatpush1.bf16.msra.mxu1 %v12672_v14  ;;  %v12719_v58 = vcombine.high %v769_v32, %v773_v33  ;;  %v12721_v14 = vcombine.high %v770_v39, %v774_v40 }
 0x43d   :  { %10636 = vmatprep.subr.bf16.mxu0 %v12679_v50  ;;  %11128 = vmatprep.subr.bf16.mxu1 %v12681_v51  ;;  %v777_v50 = vld [vmem:[#allocation2 + $0x1090] sm:$0xff] }
 0x43e   :  { %v781_v51 = vld [vmem:[#allocation2 + $0x10b0] sm:$0xff] }
 0x43f   :  { %v12726_v47 = vcombine.low %v777_v50, %v781_v51 }
 0x440   :  { %10637 = vmatpush1.bf16.msra.mxu0 %v12678_v17  ;;  %11129 = vmatpush1.bf16.msra.mxu1 %v12680_v5  ;;  %v12727_v17 = vcombine.high %v777_v50, %v781_v51  ;;  %v12729_v5 = vcombine.high %v778_v53, %v782_v54 }
 0x441   :  { %10638 = vmatprep.subr.bf16.mxu0 %v12687_v18  ;;  %11130 = vmatprep.subr.bf16.mxu1 %v12689_v60  ;;  %v785_v18 = vld [vmem:[#allocation2 + $0x10d0] sm:$0xff] }
 0x442   :  { %v789_v60 = vld [vmem:[#allocation2 + $0x10f0] sm:$0xff] }
 0x443   :  { %v12735_v63 = vcombine.high %v785_v18, %v789_v60  ;;  %v12734_v2 = vcombine.low %v785_v18, %v789_v60 }
 0x444   :  { %10639 = vmatpush1.bf16.msra.mxu0 %v12686_v19  ;;  %11131 = vmatpush1.bf16.msra.mxu1 %v12688_v59  ;;  %v12737_v19 = vcombine.high %v786_v27, %v790_v28  ;;  %v793_v59 = vld [vmem:[#allocation2 + $0x1110] sm:$0xff] }
 0x445   :  { %10640 = vmatprep.subr.bf16.mxu0 %v12695_v62  ;;  %11132 = vmatprep.subr.bf16.mxu1 %v12697_v15  ;;  %v797_v62 = vld [vmem:[#allocation2 + $0x1130] sm:$0xff]  ;;  %v794_v15 = vld [vmem:[#allocation2 + $0x1118] sm:$0xff] }
 0x446   :  { %v12743_v7 = vcombine.high %v793_v59, %v797_v62  ;;  %v12742_v16 = vcombine.low %v793_v59, %v797_v62  ;;  %v12744_v26 = vcombine.low %v794_v15, %v798_v1 }
 0x448   :  { %10641 = vmatpush1.bf16.msra.mxu0 %v12694_v38  ;;  %11133 = vmatpush1.bf16.msra.mxu1 %v12696_v55  ;;  %v801_v38 = vld [vmem:[#allocation2 + $0x1150] sm:$0xff] }
 0x449   :  { %10642 = vmatprep.subr.bf16.mxu0 %v12703_v8  ;;  %11134 = vmatprep.subr.bf16.mxu1 %v12705_v12  ;;  %v805_v55 = vld [vmem:[#allocation2 + $0x1170] sm:$0xff]  ;;  %v802_v8 = vld [vmem:[#allocation2 + $0x1158] sm:$0xff] }
 0x44a   :  { %v806_v12 = vld [vmem:[#allocation2 + $0x1178] sm:$0xff]  ;;  %v12751_v21 = vcombine.high %v801_v38, %v805_v55  ;;  %v12750_v32 = vcombine.low %v801_v38, %v805_v55 }
 0x44b   :  { %v12753_v23 = vcombine.high %v802_v8, %v806_v12  ;;  %v12752_v33 = vcombine.low %v802_v8, %v806_v12 }
 0x44c   :  { %10643 = vmatpush1.bf16.msra.mxu0 %v12702_v0  ;;  %11135 = vmatpush1.bf16.msra.mxu1 %v12704_v22  ;;  %v809_v0 = vld [vmem:[#allocation2 + $0x1190] sm:$0xff] }
 0x44d   :  { %10653 = vmatprep.subr.bf16.mxu0 %v12711_v24  ;;  %11145 = vmatprep.subr.bf16.mxu1 %v12713_v30  ;;  %v813_v22 = vld [vmem:[#allocation2 + $0x11b0] sm:$0xff]  ;;  %v810_v24 = vld [vmem:[#allocation2 + $0x1198] sm:$0xff] }
 0x44e   :  { %v814_v30 = vld [vmem:[#allocation2 + $0x11b8] sm:$0xff]  ;;  %v12759_v39 = vcombine.high %v809_v0, %v813_v22  ;;  %v12758_v50 = vcombine.low %v809_v0, %v813_v22 }
 0x44f   :  { %10645 = vmatmul.mubr.bf16.vlgmr.msra.gmra.mrb[4].mxu0 %v14442_v35  ;;  %11137 = vmatmul.mubr.bf16.vlgmr.msra.gmra.mrb[4].mxu1 %v14442_v35  ;;  %v12728_v35 = vcombine.low %v778_v53, %v782_v54  ;;  %v12761_v40 = vcombine.high %v810_v24, %v814_v30  ;;  %v12760_v51 = vcombine.low %v810_v24, %v814_v30 }
 0x450   :  { %10654 = vmatpush1.bf16.msra.mxu0 %v12710_v43  ;;  %11146 = vmatpush1.bf16.msra.mxu1 %v12712_v46  ;;  %v817_v43 = vld [vmem:[#allocation2 + $0x11d0] sm:$0xff] }
 0x451   :  { %10655 = vmatprep.subr.bf16.mxu0 %v12719_v58  ;;  %11147 = vmatprep.subr.bf16.mxu1 %v12721_v14  ;;  %v821_v46 = vld [vmem:[#allocation2 + $0x11f0] sm:$0xff]  ;;  %v818_v58 = vld [vmem:[#allocation2 + $0x11d8] sm:$0xff] }
 0x452   :  { %10685 = vmatprep.mubr.bf16.mxu0 %v14444_v45  ;;  %11177 = vmatprep.mubr.bf16.mxu1 %v14444_v45  ;;  %v12745_v45 = vcombine.high %v794_v15, %v798_v1  ;;  %v822_v14 = vld [vmem:[#allocation2 + $0x11f8] sm:$0xff]  ;;  %v12767_v53 = vcombine.high %v817_v43, %v821_v46  ;;  %v12766_v18 = vcombine.low %v817_v43, %v821_v46 }
 0x453   :  { %v12769_v54 = vcombine.high %v818_v58, %v822_v14  ;;  %v12768_v60 = vcombine.low %v818_v58, %v822_v14 }
 0x454   :  { %10656 = vmatpush1.bf16.msra.mxu0 %v12718_v11  ;;  %11148 = vmatpush1.bf16.msra.mxu1 %v12720_v57  ;;  %v825_v11 = vld [vmem:[#allocation2 + $0x1210] sm:$0xff] }
 0x455   :  { %10657 = vmatprep.subr.bf16.mxu0 %v12727_v17  ;;  %11149 = vmatprep.subr.bf16.mxu1 %v12729_v5  ;;  %v829_v57 = vld [vmem:[#allocation2 + $0x1230] sm:$0xff]  ;;  %v826_v17 = vld [vmem:[#allocation2 + $0x1218] sm:$0xff] }
 0x456   :  { %v830_v5 = vld [vmem:[#allocation2 + $0x1238] sm:$0xff]  ;;  %v12775_v27 = vcombine.high %v825_v11, %v829_v57  ;;  %v12774_v59 = vcombine.low %v825_v11, %v829_v57 }
 0x457   :  { %v12777_v28 = vcombine.high %v826_v17, %v830_v5  ;;  %v12776_v62 = vcombine.low %v826_v17, %v830_v5 }
 0x458   :  { %10658 = vmatpush1.bf16.msra.mxu0 %v12726_v47  ;;  %11150 = vmatpush1.bf16.msra.mxu1 %v12728_v35  ;;  %v833_v47 = vld [vmem:[#allocation2 + $0x1250] sm:$0xff] }
 0x459   :  { %10659 = vmatprep.subr.bf16.mxu0 %v12735_v63  ;;  %11151 = vmatprep.subr.bf16.mxu1 %v12737_v19  ;;  %v837_v35 = vld [vmem:[#allocation2 + $0x1270] sm:$0xff]  ;;  %v834_v63 = vld [vmem:[#allocation2 + $0x1258] sm:$0xff] }
 0x45a   :  { %v838_v19 = vld [vmem:[#allocation2 + $0x1278] sm:$0xff]  ;;  %v12783_v15 = vcombine.high %v833_v47, %v837_v35  ;;  %v12782_v38 = vcombine.low %v833_v47, %v837_v35 }
 0x45b   :  { %v12785_v1 = vcombine.high %v834_v63, %v838_v19  ;;  %v12784_v55 = vcombine.low %v834_v63, %v838_v19 }
 0x45c   :  { %10660 = vmatpush1.bf16.msra.mxu0 %v12734_v2  ;;  %11152 = vmatpush1.bf16.msra.mxu1 %v12736_v4  ;;  %v841_v2 = vld [vmem:[#allocation2 + $0x1290] sm:$0xff] }
 0x45d   :  { %10661 = vmatprep.subr.bf16.mxu0 %v12743_v7  ;;  %11153 = vmatprep.subr.bf16.mxu1 %v12745_v45  ;;  %v845_v4 = vld [vmem:[#allocation2 + $0x12b0] sm:$0xff]  ;;  %v842_v7 = vld [vmem:[#allocation2 + $0x1298] sm:$0xff] }
 0x45e   :  { %v846_v45 = vld [vmem:[#allocation2 + $0x12b8] sm:$0xff]  ;;  %v12791_v8 = vcombine.high %v841_v2, %v845_v4  ;;  %v12790_v0 = vcombine.low %v841_v2, %v845_v4 }
 0x45f   :  { %v12793_v12 = vcombine.high %v842_v7, %v846_v45  ;;  %v12792_v22 = vcombine.low %v842_v7, %v846_v45 }
 0x460   :  { %10662 = vmatpush1.bf16.msra.mxu0 %v12742_v16  ;;  %11154 = vmatpush1.bf16.msra.mxu1 %v12744_v26  ;;  %v849_v16 = vld [vmem:[#allocation2 + $0x12d0] sm:$0xff] }
 0x461   :  { %10663 = vmatprep.subr.bf16.mxu0 %v12751_v21  ;;  %11155 = vmatprep.subr.bf16.mxu1 %v12753_v23  ;;  %v853_v26 = vld [vmem:[#allocation2 + $0x12f0] sm:$0xff]  ;;  %v850_v21 = vld [vmem:[#allocation2 + $0x12d8] sm:$0xff] }
 0x462   :  { %v854_v23 = vld [vmem:[#allocation2 + $0x12f8] sm:$0xff]  ;;  %v12799_v24 = vcombine.high %v849_v16, %v853_v26  ;;  %v12798_v43 = vcombine.low %v849_v16, %v853_v26 }
 0x463   :  { %v12801_v30 = vcombine.high %v850_v21, %v854_v23  ;;  %v12800_v46 = vcombine.low %v850_v21, %v854_v23 }
 0x464   :  { %10664 = vmatpush1.bf16.msra.mxu0 %v12750_v32  ;;  %11156 = vmatpush1.bf16.msra.mxu1 %v12752_v33  ;;  %v857_v32 = vld [vmem:[#allocation2 + $0x1310] sm:$0xff] }
 0x465   :  { %10665 = vmatprep.subr.bf16.mxu0 %v12759_v39  ;;  %11157 = vmatprep.subr.bf16.mxu1 %v12761_v40  ;;  %v861_v33 = vld [vmem:[#allocation2 + $0x1330] sm:$0xff]  ;;  %v858_v39 = vld [vmem:[#allocation2 + $0x1318] sm:$0xff] }
 0x466   :  { %v862_v40 = vld [vmem:[#allocation2 + $0x1338] sm:$0xff]  ;;  %v12807_v58 = vcombine.high %v857_v32, %v861_v33  ;;  %v12806_v11 = vcombine.low %v857_v32, %v861_v33 }
 0x467   :  { %v12809_v14 = vcombine.high %v858_v39, %v862_v40  ;;  %v12808_v57 = vcombine.low %v858_v39, %v862_v40 }
 0x468   :  { %10666 = vmatpush1.bf16.msra.mxu0 %v12758_v50  ;;  %11158 = vmatpush1.bf16.msra.mxu1 %v12760_v51  ;;  %v865_v50 = vld [vmem:[#allocation2 + $0x1350] sm:$0xff] }
 0x469   :  { %10667 = vmatprep.subr.bf16.mxu0 %v12767_v53  ;;  %11159 = vmatprep.subr.bf16.mxu1 %v12769_v54  ;;  %v869_v51 = vld [vmem:[#allocation2 + $0x1370] sm:$0xff]  ;;  %v866_v53 = vld [vmem:[#allocation2 + $0x1358] sm:$0xff] }
 0x46a   :  { %v870_v54 = vld [vmem:[#allocation2 + $0x1378] sm:$0xff]  ;;  %v12815_v17 = vcombine.high %v865_v50, %v869_v51  ;;  %v12814_v47 = vcombine.low %v865_v50, %v869_v51 }
 0x46b   :  { %v12817_v5 = vcombine.high %v866_v53, %v870_v54  ;;  %v12816_v35 = vcombine.low %v866_v53, %v870_v54 }
 0x46c   :  { %10668 = vmatpush1.bf16.msra.mxu0 %v12766_v18  ;;  %11160 = vmatpush1.bf16.msra.mxu1 %v12768_v60  ;;  %v873_v18 = vld [vmem:[#allocation2 + $0x1390] sm:$0xff] }
 0x46d   :  { %10669 = vmatprep.subr.bf16.mxu0 %v12775_v27  ;;  %11161 = vmatprep.subr.bf16.mxu1 %v12777_v28  ;;  %v877_v60 = vld [vmem:[#allocation2 + $0x13b0] sm:$0xff]  ;;  %v874_v27 = vld [vmem:[#allocation2 + $0x1398] sm:$0xff] }
 0x46e   :  { %v878_v28 = vld [vmem:[#allocation2 + $0x13b8] sm:$0xff]  ;;  %v12823_v63 = vcombine.high %v873_v18, %v877_v60  ;;  %v12822_v2 = vcombine.low %v873_v18, %v877_v60 }
 0x46f   :  { %v12825_v19 = vcombine.high %v874_v27, %v878_v28  ;;  %v12824_v4 = vcombine.low %v874_v27, %v878_v28  ;;  %v921_v28 = vld [vmem:[#allocation2 + $0x1510] sm:$0xff] }
 0x470   :  { %10670 = vmatpush1.bf16.msra.mxu0 %v12774_v59  ;;  %11162 = vmatpush1.bf16.msra.mxu1 %v12776_v62  ;;  %v881_v59 = vld [vmem:[#allocation2 + $0x13d0] sm:$0xff] }
 0x471   :  { %10671 = vmatprep.subr.bf16.mxu0 %v12783_v15  ;;  %11163 = vmatprep.subr.bf16.mxu1 %v12785_v1  ;;  %v885_v62 = vld [vmem:[#allocation2 + $0x13f0] sm:$0xff]  ;;  %v882_v15 = vld [vmem:[#allocation2 + $0x13d8] sm:$0xff] }
 0x472   :  { %v886_v1 = vld [vmem:[#allocation2 + $0x13f8] sm:$0xff]  ;;  %v12831_v7 = vcombine.high %v881_v59, %v885_v62  ;;  %v12830_v16 = vcombine.low %v881_v59, %v885_v62 }
 0x473   :  { %v12833_v45 = vcombine.high %v882_v15, %v886_v1  ;;  %v12832_v26 = vcombine.low %v882_v15, %v886_v1  ;;  %v929_v15 = vld [vmem:[#allocation2 + $0x1550] sm:$0xff] }
 0x474   :  { %10672 = vmatpush1.bf16.msra.mxu0 %v12782_v38  ;;  %11164 = vmatpush1.bf16.msra.mxu1 %v12784_v55  ;;  %v889_v38 = vld [vmem:[#allocation2 + $0x1410] sm:$0xff] }
 0x475   :  { %10673 = vmatprep.subr.bf16.mxu0 %v12791_v8  ;;  %11165 = vmatprep.subr.bf16.mxu1 %v12793_v12  ;;  %v893_v55 = vld [vmem:[#allocation2 + $0x1430] sm:$0xff]  ;;  %v890_v8 = vld [vmem:[#allocation2 + $0x1418] sm:$0xff] }
 0x476   :  { %v894_v12 = vld [vmem:[#allocation2 + $0x1438] sm:$0xff]  ;;  %v12839_v21 = vcombine.high %v889_v38, %v893_v55  ;;  %v12838_v32 = vcombine.low %v889_v38, %v893_v55  ;;  %v933_v1 = vld [vmem:[#allocation2 + $0x1570] sm:$0xff] }
 0x477   :  { %v12841_v23 = vcombine.high %v890_v8, %v894_v12  ;;  %v12840_v33 = vcombine.low %v890_v8, %v894_v12  ;;  %v12879_v38 = vcombine.high %v929_v15, %v933_v1  ;;  %v937_v8 = vld [vmem:[#allocation2 + $0x1590] sm:$0xff] }
 0x478   :  { %10674 = vmatpush1.bf16.msra.mxu0 %v12790_v0  ;;  %11166 = vmatpush1.bf16.msra.mxu1 %v12792_v22  ;;  %v897_v0 = vld [vmem:[#allocation2 + $0x1450] sm:$0xff] }
 0x479   :  { %10675 = vmatprep.subr.bf16.mxu0 %v12799_v24  ;;  %11167 = vmatprep.subr.bf16.mxu1 %v12801_v30  ;;  %v901_v22 = vld [vmem:[#allocation2 + $0x1470] sm:$0xff]  ;;  %v898_v24 = vld [vmem:[#allocation2 + $0x1458] sm:$0xff] }
 0x47a   :  { %v902_v30 = vld [vmem:[#allocation2 + $0x1478] sm:$0xff]  ;;  %v12847_v39 = vcombine.high %v897_v0, %v901_v22  ;;  %v12846_v50 = vcombine.low %v897_v0, %v901_v22  ;;  %v941_v12 = vld [vmem:[#allocation2 + $0x15b0] sm:$0xff] }
 0x47b   :  { %v12849_v40 = vcombine.high %v898_v24, %v902_v30  ;;  %v12848_v51 = vcombine.low %v898_v24, %v902_v30  ;;  %v12887_v0 = vcombine.high %v937_v8, %v941_v12  ;;  %v945_v24 = vld [vmem:[#allocation2 + $0x15d0] sm:$0xff] }
 0x47c   :  { %10676 = vmatpush1.bf16.msra.mxu0 %v12798_v43  ;;  %11168 = vmatpush1.bf16.msra.mxu1 %v12800_v46  ;;  %v905_v43 = vld [vmem:[#allocation2 + $0x1490] sm:$0xff] }
 0x47d   :  { %10677 = vmatprep.subr.bf16.mxu0 %v12807_v58  ;;  %11169 = vmatprep.subr.bf16.mxu1 %v12809_v14  ;;  %v909_v46 = vld [vmem:[#allocation2 + $0x14b0] sm:$0xff]  ;;  %v906_v58 = vld [vmem:[#allocation2 + $0x1498] sm:$0xff] }
 0x47e   :  { %v910_v14 = vld [vmem:[#allocation2 + $0x14b8] sm:$0xff]  ;;  %v12855_v53 = vcombine.high %v905_v43, %v909_v46  ;;  %v12854_v18 = vcombine.low %v905_v43, %v909_v46  ;;  %v949_v30 = vld [vmem:[#allocation2 + $0x15f0] sm:$0xff] }
 0x47f   :  { %v12857_v54 = vcombine.high %v906_v58, %v910_v14  ;;  %v12895_v43 = vcombine.high %v945_v24, %v949_v30 }
 0x480   :  { %10678 = vmatpush1.bf16.msra.mxu0 %v12806_v11  ;;  %11170 = vmatpush1.bf16.msra.mxu1 %v12808_v57  ;;  %v913_v11 = vld [vmem:[#allocation2 + $0x14d0] sm:$0xff] }
 0x481   :  { %10679 = vmatprep.subr.bf16.mxu0 %v12815_v17  ;;  %11171 = vmatprep.subr.bf16.mxu1 %v12817_v5  ;;  %v917_v57 = vld [vmem:[#allocation2 + $0x14f0] sm:$0xff]  ;;  %v914_v17 = vld [vmem:[#allocation2 + $0x14d8] sm:$0xff] }
 0x482   :  { %v918_v5 = vld [vmem:[#allocation2 + $0x14f8] sm:$0xff]  ;;  %v12863_v60 = vcombine.high %v913_v11, %v917_v57 }
 0x483   :  { %v12865_v27 = vcombine.high %v914_v17, %v918_v5  ;;  %v12864_v59 = vcombine.low %v914_v17, %v918_v5  ;;  %v961_v17 = vld [vmem:[#allocation2 + $0x1650] sm:$0xff] }
 0x484   :  { %10680 = vmatpush1.bf16.msra.mxu0 %v12814_v47  ;;  %11172 = vmatpush1.bf16.msra.mxu1 %v12816_v35  ;;  %v925_v47 = vld [vmem:[#allocation2 + $0x1530] sm:$0xff]  ;;  %v922_v35 = vld [vmem:[#allocation2 + $0x1518] sm:$0xff] }
 0x485   :  { %10681 = vmatprep.subr.bf16.mxu0 %v12823_v63  ;;  %11173 = vmatprep.subr.bf16.mxu1 %v12825_v19  ;;  %v926_v63 = vld [vmem:[#allocation2 + $0x1538] sm:$0xff]  ;;  %v12862_v19 = vcombine.low %v913_v11, %v917_v57  ;;  %v12871_v62 = vcombine.high %v921_v28, %v925_v47  ;;  %v965_v5 = vld [vmem:[#allocation2 + $0x1670] sm:$0xff] }
 0x488   :  { %10682 = vmatpush1.bf16.msra.mxu0 %v12822_v2  ;;  %11174 = vmatpush1.bf16.msra.mxu1 %v12824_v4  ;;  %v930_v2 = vld [vmem:[#allocation2 + $0x1558] sm:$0xff] }
 0x489   :  { %10683 = vmatprep.subr.bf16.mxu0 %v12831_v7  ;;  %11175 = vmatprep.subr.bf16.mxu1 %v12833_v45  ;;  %v934_v4 = vld [vmem:[#allocation2 + $0x1578] sm:$0xff]  ;;  %v12870_v7 = vcombine.low %v921_v28, %v925_v47  ;;  %v12872_v45 = vcombine.low %v922_v35, %v926_v63  ;;  %v12911_v28 = vcombine.high %v961_v17, %v965_v5 }
 0x48a   :  { %v12881_v55 = vcombine.high %v930_v2, %v934_v4 }
 0x48c   :  { %10684 = vmatpush1.bf16.msra.mxu0 %v12830_v16  ;;  %11176 = vmatpush1.bf16.msra.mxu1 %v12832_v26  ;;  %v938_v16 = vld [vmem:[#allocation2 + $0x1598] sm:$0xff] }
 0x48d   :  { %10694 = vmatprep.subr.bf16.mxu0 %v12839_v21  ;;  %11186 = vmatprep.subr.bf16.mxu1 %v12841_v23  ;;  %v942_v26 = vld [vmem:[#allocation2 + $0x15b8] sm:$0xff]  ;;  %v12878_v21 = vcombine.low %v929_v15, %v933_v1  ;;  %v12880_v23 = vcombine.low %v930_v2, %v934_v4  ;;  %v977_v2 = vld [vmem:[#allocation2 + $0x16d0] sm:$0xff] }
 0x48e   :  { %v12889_v22 = vcombine.high %v938_v16, %v942_v26  ;;  %v981_v4 = vld [vmem:[#allocation2 + $0x16f0] sm:$0xff] }
 0x48f   :  { %10686 = vmatmul.mubr.bf16.vlgmr.msra.gmra.mrb[4].mxu0 %v14459_v6  ;;  %11178 = vmatmul.mubr.bf16.vlgmr.msra.gmra.mrb[4].mxu1 %v14459_v6  ;;  %v12856_v6 = vcombine.low %v906_v58, %v910_v14  ;;  %v953_v58 = vld [vmem:[#allocation2 + $0x1610] sm:$0xff] }
 0x490   :  { %10695 = vmatpush1.bf16.msra.mxu0 %v12838_v32  ;;  %11187 = vmatpush1.bf16.msra.mxu1 %v12840_v33  ;;  %v946_v32 = vld [vmem:[#allocation2 + $0x15d8] sm:$0xff]  ;;  %v957_v14 = vld [vmem:[#allocation2 + $0x1630] sm:$0xff] }
 0x491   :  { %10696 = vmatprep.subr.bf16.mxu0 %v12847_v39  ;;  %11188 = vmatprep.subr.bf16.mxu1 %v12849_v40  ;;  %v950_v33 = vld [vmem:[#allocation2 + $0x15f8] sm:$0xff]  ;;  %v12886_v39 = vcombine.low %v937_v8, %v941_v12  ;;  %v12888_v40 = vcombine.low %v938_v16, %v942_v26  ;;  %v12903_v11 = vcombine.high %v953_v58, %v957_v14  ;;  %v985_v16 = vld [vmem:[#allocation2 + $0x1710] sm:$0xff] }
 0x492   :  { %10726 = vmatprep.mubr.bf16.mxu0 %v14461_v37  ;;  %11218 = vmatprep.mubr.bf16.mxu1 %v14461_v37  ;;  %v12873_v37 = vcombine.high %v922_v35, %v926_v63  ;;  %v12897_v46 = vcombine.high %v946_v32, %v950_v33  ;;  %v969_v35 = vld [vmem:[#allocation2 + $0x1690] sm:$0xff]  ;;  %v12927_v8 = vcombine.high %v977_v2, %v981_v4 }
 0x493   :  { %v973_v63 = vld [vmem:[#allocation2 + $0x16b0] sm:$0xff] }
 0x494   :  { %10697 = vmatpush1.bf16.msra.mxu0 %v12846_v50  ;;  %11189 = vmatpush1.bf16.msra.mxu1 %v12848_v51  ;;  %v954_v50 = vld [vmem:[#allocation2 + $0x1618] sm:$0xff]  ;;  %v12919_v15 = vcombine.high %v969_v35, %v973_v63  ;;  %v989_v26 = vld [vmem:[#allocation2 + $0x1730] sm:$0xff] }
 0x495   :  { %10698 = vmatprep.subr.bf16.mxu0 %v12855_v53  ;;  %11190 = vmatprep.subr.bf16.mxu1 %v12857_v54  ;;  %v958_v51 = vld [vmem:[#allocation2 + $0x1638] sm:$0xff]  ;;  %v12894_v53 = vcombine.low %v945_v24, %v949_v30  ;;  %v12896_v54 = vcombine.low %v946_v32, %v950_v33  ;;  %v12935_v24 = vcombine.high %v985_v16, %v989_v26  ;;  %v993_v32 = vld [vmem:[#allocation2 + $0x1750] sm:$0xff] }
 0x496   :  { %v12905_v57 = vcombine.high %v954_v50, %v958_v51  ;;  %v997_v33 = vld [vmem:[#allocation2 + $0x1770] sm:$0xff] }
 0x498   :  { %10699 = vmatpush1.bf16.msra.mxu0 %v12854_v18  ;;  %11191 = vmatpush1.bf16.msra.mxu1 %v12856_v6  ;;  %v962_v18 = vld [vmem:[#allocation2 + $0x1658] sm:$0xff] }
 0x499   :  { %10700 = vmatprep.subr.bf16.mxu0 %v12863_v60  ;;  %11192 = vmatprep.subr.bf16.mxu1 %v12865_v27  ;;  %v966_v6 = vld [vmem:[#allocation2 + $0x1678] sm:$0xff]  ;;  %v12902_v60 = vcombine.low %v953_v58, %v957_v14  ;;  %v12904_v27 = vcombine.low %v954_v50, %v958_v51  ;;  %v12943_v58 = vcombine.high %v993_v32, %v997_v33  ;;  %v1001_v50 = vld [vmem:[#allocation2 + $0x1790] sm:$0xff] }
 0x49a   :  { %v12913_v47 = vcombine.high %v962_v18, %v966_v6  ;;  %v1005_v51 = vld [vmem:[#allocation2 + $0x17b0] sm:$0xff] }
 0x49c   :  { %10701 = vmatpush1.bf16.msra.mxu0 %v12862_v19  ;;  %11193 = vmatpush1.bf16.msra.mxu1 %v12864_v59  ;;  %v970_v19 = vld [vmem:[#allocation2 + $0x1698] sm:$0xff] }
 0x49d   :  { %10702 = vmatprep.subr.bf16.mxu0 %v12871_v62  ;;  %11194 = vmatprep.subr.bf16.mxu1 %v12873_v37  ;;  %v974_v59 = vld [vmem:[#allocation2 + $0x16b8] sm:$0xff]  ;;  %v12910_v62 = vcombine.low %v961_v17, %v965_v5  ;;  %v12912_v37 = vcombine.low %v962_v18, %v966_v6  ;;  %v12951_v17 = vcombine.high %v1001_v50, %v1005_v51  ;;  %v1009_v18 = vld [vmem:[#allocation2 + $0x17d0] sm:$0xff] }
 0x49e   :  { %v12921_v1 = vcombine.high %v970_v19, %v974_v59  ;;  %v1013_v6 = vld [vmem:[#allocation2 + $0x17f0] sm:$0xff] }
 0x4a0   :  { %10703 = vmatpush1.bf16.msra.mxu0 %v12870_v7  ;;  %11195 = vmatpush1.bf16.msra.mxu1 %v12872_v45  ;;  %v978_v7 = vld [vmem:[#allocation2 + $0x16d8] sm:$0xff] }
 0x4a1   :  { %10704 = vmatprep.subr.bf16.mxu0 %v12879_v38  ;;  %11196 = vmatprep.subr.bf16.mxu1 %v12881_v55  ;;  %v982_v45 = vld [vmem:[#allocation2 + $0x16f8] sm:$0xff]  ;;  %v12918_v38 = vcombine.low %v969_v35, %v973_v63  ;;  %v12920_v55 = vcombine.low %v970_v19, %v974_v59  ;;  %v12959_v35 = vcombine.high %v1009_v18, %v1013_v6  ;;  %v1017_v19 = vld [vmem:[#allocation2 + $0x1810] sm:$0xff] }
 0x4a2   :  { %v12929_v12 = vcombine.high %v978_v7, %v982_v45  ;;  %v1021_v59 = vld [vmem:[#allocation2 + $0x1830] sm:$0xff] }
 0x4a4   :  { %10705 = vmatpush1.bf16.msra.mxu0 %v12878_v21  ;;  %11197 = vmatpush1.bf16.msra.mxu1 %v12880_v23  ;;  %v986_v21 = vld [vmem:[#allocation2 + $0x1718] sm:$0xff] }
 0x4a5   :  { %10706 = vmatprep.subr.bf16.mxu0 %v12887_v0  ;;  %11198 = vmatprep.subr.bf16.mxu1 %v12889_v22  ;;  %v990_v23 = vld [vmem:[#allocation2 + $0x1738] sm:$0xff]  ;;  %v12926_v0 = vcombine.low %v977_v2, %v981_v4  ;;  %v12928_v22 = vcombine.low %v978_v7, %v982_v45  ;;  %v12967_v2 = vcombine.high %v1017_v19, %v1021_v59  ;;  %v1025_v7 = vld [vmem:[#allocation2 + $0x1850] sm:$0xff] }
 0x4a6   :  { %v12937_v30 = vcombine.high %v986_v21, %v990_v23  ;;  %v1029_v45 = vld [vmem:[#allocation2 + $0x1870] sm:$0xff] }
 0x4a8   :  { %10707 = vmatpush1.bf16.msra.mxu0 %v12886_v39  ;;  %11199 = vmatpush1.bf16.msra.mxu1 %v12888_v40  ;;  %v994_v39 = vld [vmem:[#allocation2 + $0x1758] sm:$0xff] }
 0x4a9   :  { %10708 = vmatprep.subr.bf16.mxu0 %v12895_v43  ;;  %11200 = vmatprep.subr.bf16.mxu1 %v12897_v46  ;;  %v998_v40 = vld [vmem:[#allocation2 + $0x1778] sm:$0xff]  ;;  %v12934_v43 = vcombine.low %v985_v16, %v989_v26  ;;  %v12936_v46 = vcombine.low %v986_v21, %v990_v23  ;;  %v12975_v16 = vcombine.high %v1025_v7, %v1029_v45  ;;  %v1033_v21 = vld [vmem:[#allocation2 + $0x1890] sm:$0xff] }
 0x4aa   :  { %v12945_v14 = vcombine.high %v994_v39, %v998_v40  ;;  %v1037_v23 = vld [vmem:[#allocation2 + $0x18b0] sm:$0xff] }
 0x4ac   :  { %10709 = vmatpush1.bf16.msra.mxu0 %v12894_v53  ;;  %11201 = vmatpush1.bf16.msra.mxu1 %v12896_v54  ;;  %v1002_v53 = vld [vmem:[#allocation2 + $0x1798] sm:$0xff] }
 0x4ad   :  { %10710 = vmatprep.subr.bf16.mxu0 %v12903_v11  ;;  %11202 = vmatprep.subr.bf16.mxu1 %v12905_v57  ;;  %v1006_v54 = vld [vmem:[#allocation2 + $0x17b8] sm:$0xff]  ;;  %v12942_v11 = vcombine.low %v993_v32, %v997_v33  ;;  %v12944_v57 = vcombine.low %v994_v39, %v998_v40  ;;  %v12983_v32 = vcombine.high %v1033_v21, %v1037_v23  ;;  %v1041_v39 = vld [vmem:[#allocation2 + $0x18d0] sm:$0xff] }
 0x4ae   :  { %v12953_v5 = vcombine.high %v1002_v53, %v1006_v54  ;;  %v1045_v40 = vld [vmem:[#allocation2 + $0x18f0] sm:$0xff] }
 0x4b0   :  { %10711 = vmatpush1.bf16.msra.mxu0 %v12902_v60  ;;  %11203 = vmatpush1.bf16.msra.mxu1 %v12904_v27  ;;  %v1010_v60 = vld [vmem:[#allocation2 + $0x17d8] sm:$0xff] }
 0x4b1   :  { %10712 = vmatprep.subr.bf16.mxu0 %v12911_v28  ;;  %11204 = vmatprep.subr.bf16.mxu1 %v12913_v47  ;;  %v1014_v27 = vld [vmem:[#allocation2 + $0x17f8] sm:$0xff]  ;;  %v12950_v28 = vcombine.low %v1001_v50, %v1005_v51  ;;  %v12952_v47 = vcombine.low %v1002_v53, %v1006_v54  ;;  %v1049_v51 = vld [vmem:[#allocation2 + $0x1910] sm:$0xff] }
 0x4b2   :  { %v12961_v63 = vcombine.high %v1010_v60, %v1014_v27  ;;  %v1053_v53 = vld [vmem:[#allocation2 + $0x1930] sm:$0xff]  ;;  %v1050_v54 = vld [vmem:[#allocation2 + $0x1918] sm:$0xff] }
 0x4b4   :  { %10713 = vmatpush1.bf16.msra.mxu0 %v12910_v62  ;;  %11205 = vmatpush1.bf16.msra.mxu1 %v12912_v37  ;;  %v1018_v62 = vld [vmem:[#allocation2 + $0x1818] sm:$0xff] }
 0x4b5   :  { %10714 = vmatprep.subr.bf16.mxu0 %v12919_v15  ;;  %11206 = vmatprep.subr.bf16.mxu1 %v12921_v1  ;;  %v1022_v37 = vld [vmem:[#allocation2 + $0x1838] sm:$0xff]  ;;  %v12958_v15 = vcombine.low %v1009_v18, %v1013_v6  ;;  %v12960_v1 = vcombine.low %v1010_v60, %v1014_v27  ;;  %v1057_v18 = vld [vmem:[#allocation2 + $0x1950] sm:$0xff] }
 0x4b6   :  { %v12969_v4 = vcombine.high %v1018_v62, %v1022_v37  ;;  %v1061_v6 = vld [vmem:[#allocation2 + $0x1970] sm:$0xff]  ;;  %v1058_v60 = vld [vmem:[#allocation2 + $0x1958] sm:$0xff] }
 0x4b7   :  { %v1062_v27 = vld [vmem:[#allocation2 + $0x1978] sm:$0xff] }
 0x4b8   :  { %10715 = vmatpush1.bf16.msra.mxu0 %v12918_v38  ;;  %11207 = vmatpush1.bf16.msra.mxu1 %v12920_v55  ;;  %v1026_v38 = vld [vmem:[#allocation2 + $0x1858] sm:$0xff] }
 0x4b9   :  { %10716 = vmatprep.subr.bf16.mxu0 %v12927_v8  ;;  %11208 = vmatprep.subr.bf16.mxu1 %v12929_v12  ;;  %v1030_v55 = vld [vmem:[#allocation2 + $0x1878] sm:$0xff]  ;;  %v12966_v8 = vcombine.low %v1017_v19, %v1021_v59  ;;  %v12968_v12 = vcombine.low %v1018_v62, %v1022_v37  ;;  %v1065_v19 = vld [vmem:[#allocation2 + $0x1990] sm:$0xff] }
 0x4ba   :  { %v12977_v26 = vcombine.high %v1026_v38, %v1030_v55  ;;  %v1069_v59 = vld [vmem:[#allocation2 + $0x19b0] sm:$0xff]  ;;  %v1066_v62 = vld [vmem:[#allocation2 + $0x1998] sm:$0xff] }
 0x4bb   :  { %v1070_v37 = vld [vmem:[#allocation2 + $0x19b8] sm:$0xff] }
 0x4bc   :  { %10717 = vmatpush1.bf16.msra.mxu0 %v12926_v0  ;;  %11209 = vmatpush1.bf16.msra.mxu1 %v12928_v22  ;;  %v1034_v0 = vld [vmem:[#allocation2 + $0x1898] sm:$0xff] }
 0x4bd   :  { %10718 = vmatprep.subr.bf16.mxu0 %v12935_v24  ;;  %11210 = vmatprep.subr.bf16.mxu1 %v12937_v30  ;;  %v1038_v22 = vld [vmem:[#allocation2 + $0x18b8] sm:$0xff]  ;;  %v12974_v24 = vcombine.low %v1025_v7, %v1029_v45  ;;  %v12976_v30 = vcombine.low %v1026_v38, %v1030_v55  ;;  %v1073_v7 = vld [vmem:[#allocation2 + $0x19d0] sm:$0xff] }
 0x4be   :  { %v12985_v33 = vcombine.high %v1034_v0, %v1038_v22  ;;  %v1077_v45 = vld [vmem:[#allocation2 + $0x19f0] sm:$0xff]  ;;  %v1074_v38 = vld [vmem:[#allocation2 + $0x19d8] sm:$0xff] }
 0x4bf   :  { %v1078_v55 = vld [vmem:[#allocation2 + $0x19f8] sm:$0xff] }
 0x4c0   :  { %10719 = vmatpush1.bf16.msra.mxu0 %v12934_v43  ;;  %11211 = vmatpush1.bf16.msra.mxu1 %v12936_v46  ;;  %v1042_v43 = vld [vmem:[#allocation2 + $0x18d8] sm:$0xff] }
 0x4c1   :  { %10720 = vmatprep.subr.bf16.mxu0 %v12943_v58  ;;  %11212 = vmatprep.subr.bf16.mxu1 %v12945_v14  ;;  %v1046_v46 = vld [vmem:[#allocation2 + $0x18f8] sm:$0xff]  ;;  %v12982_v58 = vcombine.low %v1033_v21, %v1037_v23  ;;  %v12991_v14 = vcombine.high %v1041_v39, %v1045_v40  ;;  %v1081_v21 = vld [vmem:[#allocation2 + $0x1a10] sm:$0xff] }
 0x4c2   :  { %v12993_v50 = vcombine.high %v1042_v43, %v1046_v46  ;;  %v1085_v23 = vld [vmem:[#allocation2 + $0x1a30] sm:$0xff] }
 0x4c4   :  { %10721 = vmatpush1.bf16.msra.mxu0 %v12942_v11  ;;  %11213 = vmatpush1.bf16.msra.mxu1 %v12944_v57  ;;  %v1054_v11 = vld [vmem:[#allocation2 + $0x1938] sm:$0xff]  ;;  %v12990_v57 = vcombine.low %v1041_v39, %v1045_v40  ;;  %v1089_v39 = vld [vmem:[#allocation2 + $0x1a50] sm:$0xff] }
 0x4c5   :  { %10722 = vmatprep.subr.bf16.mxu0 %v12951_v17  ;;  %11214 = vmatprep.subr.bf16.mxu1 %v12953_v5  ;;  %v12992_v17 = vcombine.low %v1042_v43, %v1046_v46  ;;  %v12999_v5 = vcombine.high %v1049_v51, %v1053_v53  ;;  %v1093_v40 = vld [vmem:[#allocation2 + $0x1a70] sm:$0xff]  ;;  %v1090_v43 = vld [vmem:[#allocation2 + $0x1a58] sm:$0xff] }
 0x4c6   :  { %v1094_v46 = vld [vmem:[#allocation2 + $0x1a78] sm:$0xff] }
 0x4c8   :  { %10723 = vmatpush1.bf16.msra.mxu0 %v12950_v28  ;;  %11215 = vmatpush1.bf16.msra.mxu1 %v12952_v47  ;;  %v12998_v28 = vcombine.low %v1049_v51, %v1053_v53  ;;  %v13000_v47 = vcombine.low %v1050_v54, %v1054_v11  ;;  %v1097_v51 = vld [vmem:[#allocation2 + $0x1a90] sm:$0xff] }
 0x4c9   :  { %10724 = vmatprep.subr.bf16.mxu0 %v12959_v35  ;;  %11216 = vmatprep.subr.bf16.mxu1 %v12961_v63  ;;  %v13007_v35 = vcombine.high %v1057_v18, %v1061_v6  ;;  %v13009_v63 = vcombine.high %v1058_v60, %v1062_v27  ;;  %v1101_v53 = vld [vmem:[#allocation2 + $0x1ab0] sm:$0xff] }
 0x4cc   :  { %10725 = vmatpush1.bf16.msra.mxu0 %v12958_v15  ;;  %11217 = vmatpush1.bf16.msra.mxu1 %v12960_v1  ;;  %v13006_v15 = vcombine.low %v1057_v18, %v1061_v6  ;;  %v13008_v1 = vcombine.low %v1058_v60, %v1062_v27  ;;  %v1105_v18 = vld [vmem:[#allocation2 + $0x1ad0] sm:$0xff]  ;;  %v1106_v60 = vld [vmem:[#allocation2 + $0x1ad8] sm:$0xff] }
 0x4cd   :  { %10735 = vmatprep.subr.bf16.mxu0 %v12967_v2  ;;  %11227 = vmatprep.subr.bf16.mxu1 %v12969_v4  ;;  %v13015_v2 = vcombine.high %v1065_v19, %v1069_v59  ;;  %v13017_v4 = vcombine.high %v1066_v62, %v1070_v37  ;;  %v1109_v6 = vld [vmem:[#allocation2 + $0x1af0] sm:$0xff]  ;;  %v1110_v27 = vld [vmem:[#allocation2 + $0x1af8] sm:$0xff] }
 0x4cf   :  { %10727 = vmatmul.mubr.bf16.vlgmr.msra.gmra.mrb[4].mxu0 %v14480_v49  ;;  %11219 = vmatmul.mubr.bf16.vlgmr.msra.gmra.mrb[4].mxu1 %v14480_v49  ;;  %v12984_v49 = vcombine.low %v1034_v0, %v1038_v22  ;;  %v1082_v0 = vld [vmem:[#allocation2 + $0x1a18] sm:$0xff] }
 0x4d0   :  { %10736 = vmatpush1.bf16.msra.mxu0 %v12966_v8  ;;  %11228 = vmatpush1.bf16.msra.mxu1 %v12968_v12  ;;  %v13014_v8 = vcombine.low %v1065_v19, %v1069_v59  ;;  %v13016_v12 = vcombine.low %v1066_v62, %v1070_v37  ;;  %v1086_v22 = vld [vmem:[#allocation2 + $0x1a38] sm:$0xff]  ;;  %v1113_v19 = vld [vmem:[#allocation2 + $0x1b10] sm:$0xff] }
 0x4d1   :  { %10737 = vmatprep.subr.bf16.mxu0 %v12975_v16  ;;  %11229 = vmatprep.subr.bf16.mxu1 %v12977_v26  ;;  %v13023_v16 = vcombine.high %v1073_v7, %v1077_v45  ;;  %v13025_v26 = vcombine.high %v1074_v38, %v1078_v55  ;;  %v1117_v59 = vld [vmem:[#allocation2 + $0x1b30] sm:$0xff]  ;;  %v1114_v62 = vld [vmem:[#allocation2 + $0x1b18] sm:$0xff] }
 0x4d2   :  { %10767 = vmatprep.mubr.bf16.mxu0 %v14482_v61  ;;  %11259 = vmatprep.mubr.bf16.mxu1 %v14482_v61  ;;  %v13001_v61 = vcombine.high %v1050_v54, %v1054_v11  ;;  %v1098_v54 = vld [vmem:[#allocation2 + $0x1a98] sm:$0xff] }
 0x4d3   :  { %v1102_v11 = vld [vmem:[#allocation2 + $0x1ab8] sm:$0xff] }
 0x4d4   :  { %10738 = vmatpush1.bf16.msra.mxu0 %v12974_v24  ;;  %11230 = vmatpush1.bf16.msra.mxu1 %v12976_v30  ;;  %v13022_v24 = vcombine.low %v1073_v7, %v1077_v45  ;;  %v13024_v30 = vcombine.low %v1074_v38, %v1078_v55  ;;  %v1118_v37 = vld [vmem:[#allocation2 + $0x1b38] sm:$0xff]  ;;  %v1121_v7 = vld [vmem:[#allocation2 + $0x1b50] sm:$0xff] }
 0x4d5   :  { %10739 = vmatprep.subr.bf16.mxu0 %v12983_v32  ;;  %11231 = vmatprep.subr.bf16.mxu1 %v12985_v33  ;;  %v13031_v32 = vcombine.high %v1081_v21, %v1085_v23  ;;  %v13033_v33 = vcombine.high %v1082_v0, %v1086_v22  ;;  %v1125_v45 = vld [vmem:[#allocation2 + $0x1b70] sm:$0xff]  ;;  %v1122_v38 = vld [vmem:[#allocation2 + $0x1b58] sm:$0xff] }
 0x4d6   :  { %v1126_v55 = vld [vmem:[#allocation2 + $0x1b78] sm:$0xff] }
 0x4d8   :  { %10740 = vmatpush1.bf16.msra.mxu0 %v12982_v58  ;;  %11232 = vmatpush1.bf16.msra.mxu1 %v12984_v49  ;;  %v13030_v58 = vcombine.low %v1081_v21, %v1085_v23  ;;  %v13032_v49 = vcombine.low %v1082_v0, %v1086_v22  ;;  %v1129_v21 = vld [vmem:[#allocation2 + $0x1b90] sm:$0xff]  ;;  %v1130_v0 = vld [vmem:[#allocation2 + $0x1b98] sm:$0xff] }
 0x4d9   :  { %10741 = vmatprep.subr.bf16.mxu0 %v12991_v14  ;;  %11233 = vmatprep.subr.bf16.mxu1 %v12993_v50  ;;  %v13039_v14 = vcombine.high %v1089_v39, %v1093_v40  ;;  %v13041_v50 = vcombine.high %v1090_v43, %v1094_v46  ;;  %v1133_v23 = vld [vmem:[#allocation2 + $0x1bb0] sm:$0xff]  ;;  %v1134_v22 = vld [vmem:[#allocation2 + $0x1bb8] sm:$0xff] }
 0x4dc   :  { %10742 = vmatpush1.bf16.msra.mxu0 %v12990_v57  ;;  %11234 = vmatpush1.bf16.msra.mxu1 %v12992_v17  ;;  %v13038_v57 = vcombine.low %v1089_v39, %v1093_v40  ;;  %v13040_v17 = vcombine.low %v1090_v43, %v1094_v46  ;;  %v1137_v39 = vld [vmem:[#allocation2 + $0x1bd0] sm:$0xff]  ;;  %v1138_v43 = vld [vmem:[#allocation2 + $0x1bd8] sm:$0xff] }
 0x4dd   :  { %10743 = vmatprep.subr.bf16.mxu0 %v12999_v5  ;;  %11235 = vmatprep.subr.bf16.mxu1 %v13001_v61  ;;  %v13047_v5 = vcombine.high %v1097_v51, %v1101_v53  ;;  %v13049_v61 = vcombine.high %v1098_v54, %v1102_v11  ;;  %v1141_v40 = vld [vmem:[#allocation2 + $0x1bf0] sm:$0xff]  ;;  %v1142_v46 = vld [vmem:[#allocation2 + $0x1bf8] sm:$0xff] }
 0x4e0   :  { %10744 = vmatpush1.bf16.msra.mxu0 %v12998_v28  ;;  %11236 = vmatpush1.bf16.msra.mxu1 %v13000_v47  ;;  %v13046_v28 = vcombine.low %v1097_v51, %v1101_v53  ;;  %v13048_v47 = vcombine.low %v1098_v54, %v1102_v11  ;;  %v1145_v51 = vld [vmem:[#allocation2 + $0x1c10] sm:$0xff]  ;;  %v1146_v54 = vld [vmem:[#allocation2 + $0x1c18] sm:$0xff] }
 0x4e1   :  { %10745 = vmatprep.subr.bf16.mxu0 %v13007_v35  ;;  %11237 = vmatprep.subr.bf16.mxu1 %v13009_v63  ;;  %v13055_v35 = vcombine.high %v1105_v18, %v1109_v6  ;;  %v13057_v63 = vcombine.high %v1106_v60, %v1110_v27  ;;  %v1149_v53 = vld [vmem:[#allocation2 + $0x1c30] sm:$0xff]  ;;  %v1150_v11 = vld [vmem:[#allocation2 + $0x1c38] sm:$0xff] }
 0x4e4   :  { %10746 = vmatpush1.bf16.msra.mxu0 %v13006_v15  ;;  %11238 = vmatpush1.bf16.msra.mxu1 %v13008_v1  ;;  %v13054_v15 = vcombine.low %v1105_v18, %v1109_v6  ;;  %v13056_v1 = vcombine.low %v1106_v60, %v1110_v27  ;;  %v1153_v18 = vld [vmem:[#allocation2 + $0x1c50] sm:$0xff]  ;;  %v1154_v60 = vld [vmem:[#allocation2 + $0x1c58] sm:$0xff] }
 0x4e5   :  { %10747 = vmatprep.subr.bf16.mxu0 %v13015_v2  ;;  %11239 = vmatprep.subr.bf16.mxu1 %v13017_v4  ;;  %v13063_v2 = vcombine.high %v1113_v19, %v1117_v59  ;;  %v13065_v4 = vcombine.high %v1114_v62, %v1118_v37  ;;  %v1157_v6 = vld [vmem:[#allocation2 + $0x1c70] sm:$0xff]  ;;  %v1158_v27 = vld [vmem:[#allocation2 + $0x1c78] sm:$0xff] }
 0x4e8   :  { %10748 = vmatpush1.bf16.msra.mxu0 %v13014_v8  ;;  %11240 = vmatpush1.bf16.msra.mxu1 %v13016_v12  ;;  %v13062_v8 = vcombine.low %v1113_v19, %v1117_v59  ;;  %v13064_v12 = vcombine.low %v1114_v62, %v1118_v37  ;;  %v1161_v19 = vld [vmem:[#allocation2 + $0x1c90] sm:$0xff]  ;;  %v1162_v62 = vld [vmem:[#allocation2 + $0x1c98] sm:$0xff] }
 0x4e9   :  { %10749 = vmatprep.subr.bf16.mxu0 %v13023_v16  ;;  %11241 = vmatprep.subr.bf16.mxu1 %v13025_v26  ;;  %v13071_v16 = vcombine.high %v1121_v7, %v1125_v45  ;;  %v13073_v26 = vcombine.high %v1122_v38, %v1126_v55  ;;  %v1165_v59 = vld [vmem:[#allocation2 + $0x1cb0] sm:$0xff]  ;;  %v1166_v37 = vld [vmem:[#allocation2 + $0x1cb8] sm:$0xff] }
 0x4ec   :  { %10750 = vmatpush1.bf16.msra.mxu0 %v13022_v24  ;;  %11242 = vmatpush1.bf16.msra.mxu1 %v13024_v30  ;;  %v13070_v24 = vcombine.low %v1121_v7, %v1125_v45  ;;  %v13072_v30 = vcombine.low %v1122_v38, %v1126_v55  ;;  %v1169_v7 = vld [vmem:[#allocation2 + $0x1cd0] sm:$0xff]  ;;  %v1170_v38 = vld [vmem:[#allocation2 + $0x1cd8] sm:$0xff] }
 0x4ed   :  { %10751 = vmatprep.subr.bf16.mxu0 %v13031_v32  ;;  %11243 = vmatprep.subr.bf16.mxu1 %v13033_v33  ;;  %v13079_v32 = vcombine.high %v1129_v21, %v1133_v23  ;;  %v13081_v33 = vcombine.high %v1130_v0, %v1134_v22  ;;  %v1173_v45 = vld [vmem:[#allocation2 + $0x1cf0] sm:$0xff]  ;;  %v1174_v55 = vld [vmem:[#allocation2 + $0x1cf8] sm:$0xff] }
 0x4f0   :  { %10752 = vmatpush1.bf16.msra.mxu0 %v13030_v58  ;;  %11244 = vmatpush1.bf16.msra.mxu1 %v13032_v49  ;;  %v13078_v58 = vcombine.low %v1129_v21, %v1133_v23  ;;  %v13080_v49 = vcombine.low %v1130_v0, %v1134_v22  ;;  %v1181_v21 = vld [vmem:[#allocation2 + $0x1d30] sm:$0xff]  ;;  %v1178_v23 = vld [vmem:[#allocation2 + $0x1d18] sm:$0xff]  ;;  %v13118_v22 = vcombine.low %v1169_v7, %v1173_v45 }
 0x4f1   :  { %10753 = vmatprep.subr.bf16.mxu0 %v13039_v14  ;;  %11245 = vmatprep.subr.bf16.mxu1 %v13041_v50  ;;  %v13087_v14 = vcombine.high %v1137_v39, %v1141_v40  ;;  %v13089_v50 = vcombine.high %v1138_v43, %v1142_v46  ;;  %v1182_v0 = vld [vmem:[#allocation2 + $0x1d38] sm:$0xff] }
 0x4f4   :  { %10754 = vmatpush1.bf16.msra.mxu0 %v13038_v57  ;;  %11246 = vmatpush1.bf16.msra.mxu1 %v13040_v17  ;;  %v13086_v57 = vcombine.low %v1137_v39, %v1141_v40  ;;  %v13088_v17 = vcombine.low %v1138_v43, %v1142_v46  ;;  %v1186_v39 = vld [vmem:[#allocation2 + $0x1d58] sm:$0xff]  ;;  %v13128_v46 = vcombine.low %v1178_v23, %v1182_v0 }
 0x4f5   :  { %10755 = vmatprep.subr.bf16.mxu0 %v13047_v5  ;;  %11247 = vmatprep.subr.bf16.mxu1 %v13049_v61  ;;  %v13095_v5 = vcombine.high %v1145_v51, %v1149_v53  ;;  %v13097_v61 = vcombine.high %v1146_v54, %v1150_v11  ;;  %v1190_v40 = vld [vmem:[#allocation2 + $0x1d78] sm:$0xff] }
 0x4f8   :  { %10756 = vmatpush1.bf16.msra.mxu0 %v13046_v28  ;;  %11248 = vmatpush1.bf16.msra.mxu1 %v13048_v47  ;;  %v13094_v28 = vcombine.low %v1145_v51, %v1149_v53  ;;  %v13096_v47 = vcombine.low %v1146_v54, %v1150_v11  ;;  %v1194_v51 = vld [vmem:[#allocation2 + $0x1d98] sm:$0xff]  ;;  %v13136_v11 = vcombine.low %v1186_v39, %v1190_v40 }
 0x4f9   :  { %10757 = vmatprep.subr.bf16.mxu0 %v13055_v35  ;;  %11249 = vmatprep.subr.bf16.mxu1 %v13057_v63  ;;  %v13103_v35 = vcombine.high %v1153_v18, %v1157_v6  ;;  %v13105_v63 = vcombine.high %v1154_v60, %v1158_v27  ;;  %v1198_v53 = vld [vmem:[#allocation2 + $0x1db8] sm:$0xff] }
 0x4fc   :  { %10758 = vmatpush1.bf16.msra.mxu0 %v13054_v15  ;;  %11250 = vmatpush1.bf16.msra.mxu1 %v13056_v1  ;;  %v13102_v15 = vcombine.low %v1153_v18, %v1157_v6  ;;  %v13104_v1 = vcombine.low %v1154_v60, %v1158_v27  ;;  %v1202_v18 = vld [vmem:[#allocation2 + $0x1dd8] sm:$0xff]  ;;  %v13144_v27 = vcombine.low %v1194_v51, %v1198_v53 }
 0x4fd   :  { %10759 = vmatprep.subr.bf16.mxu0 %v13063_v2  ;;  %11251 = vmatprep.subr.bf16.mxu1 %v13065_v4  ;;  %v13111_v2 = vcombine.high %v1161_v19, %v1165_v59  ;;  %v13113_v4 = vcombine.high %v1162_v62, %v1166_v37  ;;  %v1206_v6 = vld [vmem:[#allocation2 + $0x1df8] sm:$0xff] }
 0x500   :  { %10760 = vmatpush1.bf16.msra.mxu0 %v13062_v8  ;;  %11252 = vmatpush1.bf16.msra.mxu1 %v13064_v12  ;;  %v13110_v8 = vcombine.low %v1161_v19, %v1165_v59  ;;  %v13119_v12 = vcombine.high %v1169_v7, %v1173_v45  ;;  %v1210_v19 = vld [vmem:[#allocation2 + $0x1e18] sm:$0xff] }
 0x501   :  { %10761 = vmatprep.subr.bf16.mxu0 %v13071_v16  ;;  %11253 = vmatprep.subr.bf16.mxu1 %v13073_v26  ;;  %v13121_v16 = vcombine.high %v1170_v38, %v1174_v55  ;;  %v1177_v26 = vld [vmem:[#allocation2 + $0x1d10] sm:$0xff]  ;;  %v1214_v59 = vld [vmem:[#allocation2 + $0x1e38] sm:$0xff] }
 0x502   :  { %v13126_v43 = vcombine.low %v1177_v26, %v1181_v21  ;;  %v1218_v7 = vld [vmem:[#allocation2 + $0x1e58] sm:$0xff] }
 0x503   :  { %v1222_v45 = vld [vmem:[#allocation2 + $0x1e78] sm:$0xff] }
 0x504   :  { %10762 = vmatpush1.bf16.msra.mxu0 %v13070_v24  ;;  %11254 = vmatpush1.bf16.msra.mxu1 %v13072_v30  ;;  %v13120_v24 = vcombine.low %v1170_v38, %v1174_v55  ;;  %v13127_v30 = vcombine.high %v1177_v26, %v1181_v21  ;;  %v13160_v55 = vcombine.low %v1210_v19, %v1214_v59  ;;  %v1226_v26 = vld [vmem:[#allocation2 + $0x1e98] sm:$0xff] }
 0x505   :  { %10763 = vmatprep.subr.bf16.mxu0 %v13079_v32  ;;  %11255 = vmatprep.subr.bf16.mxu1 %v13081_v33  ;;  %v1185_v32 = vld [vmem:[#allocation2 + $0x1d50] sm:$0xff]  ;;  %v1230_v21 = vld [vmem:[#allocation2 + $0x1eb8] sm:$0xff] }
 0x506   :  { %v1189_v33 = vld [vmem:[#allocation2 + $0x1d70] sm:$0xff] }
 0x507   :  { %v13134_v54 = vcombine.low %v1185_v32, %v1189_v33 }
 0x508   :  { %10764 = vmatpush1.bf16.msra.mxu0 %v13078_v58  ;;  %11256 = vmatpush1.bf16.msra.mxu1 %v13080_v49  ;;  %v13135_v58 = vcombine.high %v1185_v32, %v1189_v33  ;;  %v13137_v49 = vcombine.high %v1186_v39, %v1190_v40  ;;  %v1234_v32 = vld [vmem:[#allocation2 + $0x1ed8] sm:$0xff]  ;;  %v13176_v40 = vcombine.low %v1226_v26, %v1230_v21 }
 0x509   :  { %10765 = vmatprep.subr.bf16.mxu0 %v13087_v14  ;;  %11257 = vmatprep.subr.bf16.mxu1 %v13089_v50  ;;  %v1193_v14 = vld [vmem:[#allocation2 + $0x1d90] sm:$0xff]  ;;  %v1238_v33 = vld [vmem:[#allocation2 + $0x1ef8] sm:$0xff] }
 0x50a   :  { %v1197_v50 = vld [vmem:[#allocation2 + $0x1db0] sm:$0xff] }
 0x50b   :  { %v13142_v60 = vcombine.low %v1193_v14, %v1197_v50 }
 0x50c   :  { %10766 = vmatpush1.bf16.msra.mxu0 %v13086_v57  ;;  %11258 = vmatpush1.bf16.msra.mxu1 %v13088_v17  ;;  %v13143_v57 = vcombine.high %v1193_v14, %v1197_v50  ;;  %v13145_v17 = vcombine.high %v1194_v51, %v1198_v53  ;;  %v1242_v14 = vld [vmem:[#allocation2 + $0x1f18] sm:$0xff]  ;;  %v13184_v53 = vcombine.low %v1234_v32, %v1238_v33 }
 0x50d   :  { %10776 = vmatprep.subr.bf16.mxu0 %v13095_v5  ;;  %11268 = vmatprep.subr.bf16.mxu1 %v13097_v61  ;;  %v1201_v5 = vld [vmem:[#allocation2 + $0x1dd0] sm:$0xff]  ;;  %v1246_v50 = vld [vmem:[#allocation2 + $0x1f38] sm:$0xff] }
 0x50e   :  { %v1205_v61 = vld [vmem:[#allocation2 + $0x1df0] sm:$0xff] }
 0x50f   :  { %10768 = vmatmul.mubr.bf16.vlgmr.msra.gmra.mrb[4].mxu0 %v14497_v34  ;;  %11260 = vmatmul.mubr.bf16.vlgmr.msra.gmra.mrb[4].mxu1 %v14497_v34  ;;  %v13112_v34 = vcombine.low %v1162_v62, %v1166_v37  ;;  %v13150_v62 = vcombine.low %v1201_v5, %v1205_v61  ;;  %v13152_v37 = vcombine.low %v1202_v18, %v1206_v6 }
 0x510   :  { %10777 = vmatpush1.bf16.msra.mxu0 %v13094_v28  ;;  %11269 = vmatpush1.bf16.msra.mxu1 %v13096_v47  ;;  %v13151_v28 = vcombine.high %v1201_v5, %v1205_v61  ;;  %v13153_v47 = vcombine.high %v1202_v18, %v1206_v6  ;;  %v1250_v5 = vld [vmem:[#allocation2 + $0x1f58] sm:$0xff]  ;;  %v13192_v6 = vcombine.low %v1242_v14, %v1246_v50 }
 0x511   :  { %10778 = vmatprep.subr.bf16.mxu0 %v13103_v35  ;;  %11270 = vmatprep.subr.bf16.mxu1 %v13105_v63  ;;  %v1209_v35 = vld [vmem:[#allocation2 + $0x1e10] sm:$0xff]  ;;  %v1254_v61 = vld [vmem:[#allocation2 + $0x1f78] sm:$0xff] }
 0x512   :  { %10808 = vmatprep.mubr.bf16.mxu0 %v14499_v48  ;;  %11300 = vmatprep.mubr.bf16.mxu1 %v14499_v48  ;;  %v13129_v48 = vcombine.high %v1178_v23, %v1182_v0  ;;  %v1213_v63 = vld [vmem:[#allocation2 + $0x1e30] sm:$0xff]  ;;  %v13168_v0 = vcombine.low %v1218_v7, %v1222_v45 }
 0x513   :  { %v13158_v38 = vcombine.low %v1209_v35, %v1213_v63 }
 0x514   :  { %10779 = vmatpush1.bf16.msra.mxu0 %v13102_v15  ;;  %11271 = vmatpush1.bf16.msra.mxu1 %v13104_v1  ;;  %v13159_v15 = vcombine.high %v1209_v35, %v1213_v63  ;;  %v13161_v1 = vcombine.high %v1210_v19, %v1214_v59  ;;  %v1258_v35 = vld [vmem:[#allocation2 + $0x1f98] sm:$0xff]  ;;  %v13200_v59 = vcombine.low %v1250_v5, %v1254_v61 }
 0x515   :  { %10780 = vmatprep.subr.bf16.mxu0 %v13111_v2  ;;  %11272 = vmatprep.subr.bf16.mxu1 %v13113_v4  ;;  %v1217_v2 = vld [vmem:[#allocation2 + $0x1e50] sm:$0xff]  ;;  %v1262_v63 = vld [vmem:[#allocation2 + $0x1fb8] sm:$0xff] }
 0x516   :  { %v1221_v4 = vld [vmem:[#allocation2 + $0x1e70] sm:$0xff] }
 0x517   :  { %v13166_v23 = vcombine.low %v1217_v2, %v1221_v4 }
 0x518   :  { %10781 = vmatpush1.bf16.msra.mxu0 %v13110_v8  ;;  %11273 = vmatpush1.bf16.msra.mxu1 %v13112_v34  ;;  %v13167_v8 = vcombine.high %v1217_v2, %v1221_v4  ;;  %v13169_v34 = vcombine.high %v1218_v7, %v1222_v45  ;;  %v1266_v2 = vld [vmem:[#allocation2 + $0x1fd8] sm:$0xff]  ;;  %v13208_v45 = vcombine.low %v1258_v35, %v1262_v63 }
 0x519   :  { %10782 = vmatprep.subr.bf16.mxu0 %v13119_v12  ;;  %11274 = vmatprep.subr.bf16.mxu1 %v13121_v16  ;;  %v1225_v12 = vld [vmem:[#allocation2 + $0x1e90] sm:$0xff]  ;;  %v1270_v4 = vld [vmem:[#allocation2 + $0x1ff8] sm:$0xff] }
 0x51a   :  { %v1229_v16 = vld [vmem:[#allocation2 + $0x1eb0] sm:$0xff] }
 0x51b   :  { %v13174_v39 = vcombine.low %v1225_v12, %v1229_v16 }
 0x51c   :  { %10783 = vmatpush1.bf16.msra.mxu0 %v13118_v22  ;;  %11275 = vmatpush1.bf16.msra.mxu1 %v13120_v24  ;;  %v13175_v22 = vcombine.high %v1225_v12, %v1229_v16  ;;  %v13177_v24 = vcombine.high %v1226_v26, %v1230_v21  ;;  %v1274_v12 = vld [vmem:[#allocation2 + $0x2018] sm:$0xff]  ;;  %v13216_v21 = vcombine.low %v1266_v2, %v1270_v4 }
 0x51d   :  { %10784 = vmatprep.subr.bf16.mxu0 %v13127_v30  ;;  %11276 = vmatprep.subr.bf16.mxu1 %v13129_v48  ;;  %v1233_v30 = vld [vmem:[#allocation2 + $0x1ed0] sm:$0xff]  ;;  %v1278_v16 = vld [vmem:[#allocation2 + $0x2038] sm:$0xff] }
 0x51e   :  { %v1237_v48 = vld [vmem:[#allocation2 + $0x1ef0] sm:$0xff] }
 0x51f   :  { %v13182_v51 = vcombine.low %v1233_v30, %v1237_v48 }
 0x520   :  { %10785 = vmatpush1.bf16.msra.mxu0 %v13126_v43  ;;  %11277 = vmatpush1.bf16.msra.mxu1 %v13128_v46  ;;  %v13183_v43 = vcombine.high %v1233_v30, %v1237_v48  ;;  %v13185_v46 = vcombine.high %v1234_v32, %v1238_v33  ;;  %v1282_v30 = vld [vmem:[#allocation2 + $0x2058] sm:$0xff]  ;;  %v13224_v33 = vcombine.low %v1274_v12, %v1278_v16 }
 0x521   :  { %10786 = vmatprep.subr.bf16.mxu0 %v13135_v58  ;;  %11278 = vmatprep.subr.bf16.mxu1 %v13137_v49  ;;  %v1241_v58 = vld [vmem:[#allocation2 + $0x1f10] sm:$0xff]  ;;  %v1286_v48 = vld [vmem:[#allocation2 + $0x2078] sm:$0xff] }
 0x522   :  { %v1245_v49 = vld [vmem:[#allocation2 + $0x1f30] sm:$0xff] }
 0x523   :  { %v13190_v18 = vcombine.low %v1241_v58, %v1245_v49 }
 0x524   :  { %10787 = vmatpush1.bf16.msra.mxu0 %v13134_v54  ;;  %11279 = vmatpush1.bf16.msra.mxu1 %v13136_v11  ;;  %v13191_v54 = vcombine.high %v1241_v58, %v1245_v49  ;;  %v13193_v11 = vcombine.high %v1242_v14, %v1246_v50  ;;  %v1290_v58 = vld [vmem:[#allocation2 + $0x2098] sm:$0xff]  ;;  %v13232_v50 = vcombine.low %v1282_v30, %v1286_v48 }
 0x525   :  { %10788 = vmatprep.subr.bf16.mxu0 %v13143_v57  ;;  %11280 = vmatprep.subr.bf16.mxu1 %v13145_v17  ;;  %v1249_v57 = vld [vmem:[#allocation2 + $0x1f50] sm:$0xff]  ;;  %v1294_v49 = vld [vmem:[#allocation2 + $0x20b8] sm:$0xff] }
 0x526   :  { %v1253_v17 = vld [vmem:[#allocation2 + $0x1f70] sm:$0xff] }
 0x527   :  { %v13198_v19 = vcombine.low %v1249_v57, %v1253_v17 }
 0x528   :  { %10789 = vmatpush1.bf16.msra.mxu0 %v13142_v60  ;;  %11281 = vmatpush1.bf16.msra.mxu1 %v13144_v27  ;;  %v13199_v60 = vcombine.high %v1249_v57, %v1253_v17  ;;  %v13201_v27 = vcombine.high %v1250_v5, %v1254_v61  ;;  %v1298_v57 = vld [vmem:[#allocation2 + $0x20d8] sm:$0xff] }
 0x529   :  { %10790 = vmatprep.subr.bf16.mxu0 %v13151_v28  ;;  %11282 = vmatprep.subr.bf16.mxu1 %v13153_v47  ;;  %v1257_v28 = vld [vmem:[#allocation2 + $0x1f90] sm:$0xff]  ;;  %v1302_v17 = vld [vmem:[#allocation2 + $0x20f8] sm:$0xff] }
 0x52a   :  { %v1261_v47 = vld [vmem:[#allocation2 + $0x1fb0] sm:$0xff] }
 0x52b   :  { %v13206_v7 = vcombine.low %v1257_v28, %v1261_v47 }
 0x52c   :  { %10791 = vmatpush1.bf16.msra.mxu0 %v13150_v62  ;;  %11283 = vmatpush1.bf16.msra.mxu1 %v13152_v37  ;;  %v13207_v62 = vcombine.high %v1257_v28, %v1261_v47  ;;  %v13209_v37 = vcombine.high %v1258_v35, %v1262_v63  ;;  %v1310_v28 = vld [vmem:[#allocation2 + $0x2138] sm:$0xff]  ;;  %v13248_v35 = vcombine.low %v1298_v57, %v1302_v17 }
 0x52d   :  { %10792 = vmatprep.subr.bf16.mxu0 %v13159_v15  ;;  %11284 = vmatprep.subr.bf16.mxu1 %v13161_v1  ;;  %v1265_v15 = vld [vmem:[#allocation2 + $0x1fd0] sm:$0xff] }
 0x52e   :  { %v1269_v1 = vld [vmem:[#allocation2 + $0x1ff0] sm:$0xff] }
 0x52f   :  { %v13214_v26 = vcombine.low %v1265_v15, %v1269_v1 }
 0x530   :  { %10793 = vmatpush1.bf16.msra.mxu0 %v13158_v38  ;;  %11285 = vmatpush1.bf16.msra.mxu1 %v13160_v55  ;;  %v13215_v38 = vcombine.high %v1265_v15, %v1269_v1  ;;  %v13217_v55 = vcombine.high %v1266_v2, %v1270_v4 }
 0x531   :  { %10794 = vmatprep.subr.bf16.mxu0 %v13167_v8  ;;  %11286 = vmatprep.subr.bf16.mxu1 %v13169_v34  ;;  %v1273_v8 = vld [vmem:[#allocation2 + $0x2010] sm:$0xff] }
 0x532   :  { %v1277_v34 = vld [vmem:[#allocation2 + $0x2030] sm:$0xff] }
 0x533   :  { %v13222_v32 = vcombine.low %v1273_v8, %v1277_v34 }
 0x534   :  { %10795 = vmatpush1.bf16.msra.mxu0 %v13166_v23  ;;  %11287 = vmatpush1.bf16.msra.mxu1 %v13168_v0  ;;  %v13223_v23 = vcombine.high %v1273_v8, %v1277_v34  ;;  %v13225_v0 = vcombine.high %v1274_v12, %v1278_v16 }
 0x535   :  { %10796 = vmatprep.subr.bf16.mxu0 %v13175_v22  ;;  %11288 = vmatprep.subr.bf16.mxu1 %v13177_v24  ;;  %v1281_v22 = vld [vmem:[#allocation2 + $0x2050] sm:$0xff] }
 0x536   :  { %v1285_v24 = vld [vmem:[#allocation2 + $0x2070] sm:$0xff] }
 0x537   :  { %v13230_v14 = vcombine.low %v1281_v22, %v1285_v24 }
 0x538   :  { %10797 = vmatpush1.bf16.msra.mxu0 %v13174_v39  ;;  %11289 = vmatpush1.bf16.msra.mxu1 %v13176_v40  ;;  %v13231_v39 = vcombine.high %v1281_v22, %v1285_v24  ;;  %v13233_v40 = vcombine.high %v1282_v30, %v1286_v48 }
 0x539   :  { %10798 = vmatprep.subr.bf16.mxu0 %v13183_v43  ;;  %11290 = vmatprep.subr.bf16.mxu1 %v13185_v46  ;;  %v1289_v43 = vld [vmem:[#allocation2 + $0x2090] sm:$0xff] }
 0x53a   :  { %v1293_v46 = vld [vmem:[#allocation2 + $0x20b0] sm:$0xff] }
 0x53b   :  { %v13238_v5 = vcombine.low %v1289_v43, %v1293_v46 }
 0x53c   :  { %10799 = vmatpush1.bf16.msra.mxu0 %v13182_v51  ;;  %11291 = vmatpush1.bf16.msra.mxu1 %v13184_v53  ;;  %v13239_v51 = vcombine.high %v1289_v43, %v1293_v46  ;;  %v13241_v53 = vcombine.high %v1290_v58, %v1294_v49 }
 0x53d   :  { %10800 = vmatprep.subr.bf16.mxu0 %v13191_v54  ;;  %11292 = vmatprep.subr.bf16.mxu1 %v13193_v11  ;;  %v1297_v54 = vld [vmem:[#allocation2 + $0x20d0] sm:$0xff] }
 0x53e   :  { %v1301_v11 = vld [vmem:[#allocation2 + $0x20f0] sm:$0xff] }
 0x53f   :  { %v13247_v61 = vcombine.high %v1297_v54, %v1301_v11  ;;  %v13246_v47 = vcombine.low %v1297_v54, %v1301_v11 }
 0x540   :  { %10801 = vmatpush1.bf16.msra.mxu0 %v13190_v18  ;;  %11293 = vmatpush1.bf16.msra.mxu1 %v13192_v6  ;;  %v13249_v18 = vcombine.high %v1298_v57, %v1302_v17  ;;  %v1305_v6 = vld [vmem:[#allocation2 + $0x2110] sm:$0xff] }
 0x541   :  { %10802 = vmatprep.subr.bf16.mxu0 %v13199_v60  ;;  %11294 = vmatprep.subr.bf16.mxu1 %v13201_v27  ;;  %v1309_v60 = vld [vmem:[#allocation2 + $0x2130] sm:$0xff]  ;;  %v1306_v27 = vld [vmem:[#allocation2 + $0x2118] sm:$0xff] }
 0x542   :  { %v13255_v63 = vcombine.high %v1305_v6, %v1309_v60  ;;  %v13254_v15 = vcombine.low %v1305_v6, %v1309_v60  ;;  %v13256_v1 = vcombine.low %v1306_v27, %v1310_v28 }
 0x544   :  { %10803 = vmatpush1.bf16.msra.mxu0 %v13198_v19  ;;  %11295 = vmatpush1.bf16.msra.mxu1 %v13200_v59  ;;  %v1313_v19 = vld [vmem:[#allocation2 + $0x2150] sm:$0xff] }
 0x545   :  { %10804 = vmatprep.subr.bf16.mxu0 %v13207_v62  ;;  %11296 = vmatprep.subr.bf16.mxu1 %v13209_v37  ;;  %v1317_v59 = vld [vmem:[#allocation2 + $0x2170] sm:$0xff]  ;;  %v1314_v62 = vld [vmem:[#allocation2 + $0x2158] sm:$0xff] }
 0x546   :  { %v1318_v37 = vld [vmem:[#allocation2 + $0x2178] sm:$0xff]  ;;  %v13263_v2 = vcombine.high %v1313_v19, %v1317_v59  ;;  %v13262_v8 = vcombine.low %v1313_v19, %v1317_v59 }
 0x547   :  { %v13265_v4 = vcombine.high %v1314_v62, %v1318_v37  ;;  %v13264_v34 = vcombine.low %v1314_v62, %v1318_v37 }
 0x548   :  { %10805 = vmatpush1.bf16.msra.mxu0 %v13206_v7  ;;  %11297 = vmatpush1.bf16.msra.mxu1 %v13208_v45  ;;  %v1321_v7 = vld [vmem:[#allocation2 + $0x2190] sm:$0xff] }
 0x549   :  { %10806 = vmatprep.subr.bf16.mxu0 %v13215_v38  ;;  %11298 = vmatprep.subr.bf16.mxu1 %v13217_v55  ;;  %v1325_v45 = vld [vmem:[#allocation2 + $0x21b0] sm:$0xff]  ;;  %v1322_v38 = vld [vmem:[#allocation2 + $0x2198] sm:$0xff] }
 0x54a   :  { %v1326_v55 = vld [vmem:[#allocation2 + $0x21b8] sm:$0xff]  ;;  %v13271_v12 = vcombine.high %v1321_v7, %v1325_v45  ;;  %v13270_v22 = vcombine.low %v1321_v7, %v1325_v45 }
 0x54b   :  { %v13273_v16 = vcombine.high %v1322_v38, %v1326_v55  ;;  %v13272_v24 = vcombine.low %v1322_v38, %v1326_v55 }
 0x54c   :  { %10807 = vmatpush1.bf16.msra.mxu0 %v13214_v26  ;;  %11299 = vmatpush1.bf16.msra.mxu1 %v13216_v21  ;;  %v1329_v26 = vld [vmem:[#allocation2 + $0x21d0] sm:$0xff] }
 0x54d   :  { %10817 = vmatprep.subr.bf16.mxu0 %v13223_v23  ;;  %11309 = vmatprep.subr.bf16.mxu1 %v13225_v0  ;;  %v1333_v21 = vld [vmem:[#allocation2 + $0x21f0] sm:$0xff]  ;;  %v1330_v23 = vld [vmem:[#allocation2 + $0x21d8] sm:$0xff] }
 0x54e   :  { %v1334_v0 = vld [vmem:[#allocation2 + $0x21f8] sm:$0xff]  ;;  %v13279_v30 = vcombine.high %v1329_v26, %v1333_v21  ;;  %v13278_v43 = vcombine.low %v1329_v26, %v1333_v21 }
 0x54f   :  { %10809 = vmatmul.mubr.bf16.vlgmr.msra.gmra.mrb[4].mxu0 %v14518_v29  ;;  %11301 = vmatmul.mubr.bf16.vlgmr.msra.gmra.mrb[4].mxu1 %v14518_v29  ;;  %v13240_v29 = vcombine.low %v1290_v58, %v1294_v49  ;;  %v13281_v48 = vcombine.high %v1330_v23, %v1334_v0  ;;  %v13280_v46 = vcombine.low %v1330_v23, %v1334_v0 }
 0x550   :  { %10818 = vmatpush1.bf16.msra.mxu0 %v13222_v32  ;;  %11310 = vmatpush1.bf16.msra.mxu1 %v13224_v33  ;;  %v1337_v32 = vld [vmem:[#allocation2 + $0x2210] sm:$0xff] }
 0x551   :  { %10819 = vmatprep.subr.bf16.mxu0 %v13231_v39  ;;  %11311 = vmatprep.subr.bf16.mxu1 %v13233_v40  ;;  %v1341_v33 = vld [vmem:[#allocation2 + $0x2230] sm:$0xff]  ;;  %v1338_v39 = vld [vmem:[#allocation2 + $0x2218] sm:$0xff] }
 0x552   :  { %10849 = vmatprep.mubr.bf16.mxu0 %v14520_v42  ;;  %11341 = vmatprep.mubr.bf16.mxu1 %v14520_v42  ;;  %v13257_v42 = vcombine.high %v1306_v27, %v1310_v28  ;;  %v1342_v40 = vld [vmem:[#allocation2 + $0x2238] sm:$0xff]  ;;  %v13287_v58 = vcombine.high %v1337_v32, %v1341_v33  ;;  %v13286_v54 = vcombine.low %v1337_v32, %v1341_v33 }
 0x553   :  { %v13289_v49 = vcombine.high %v1338_v39, %v1342_v40  ;;  %v13288_v11 = vcombine.low %v1338_v39, %v1342_v40 }
 0x554   :  { %10820 = vmatpush1.bf16.msra.mxu0 %v13230_v14  ;;  %11312 = vmatpush1.bf16.msra.mxu1 %v13232_v50  ;;  %v1345_v14 = vld [vmem:[#allocation2 + $0x2250] sm:$0xff] }
 0x555   :  { %10821 = vmatprep.subr.bf16.mxu0 %v13239_v51  ;;  %11313 = vmatprep.subr.bf16.mxu1 %v13241_v53  ;;  %v1349_v50 = vld [vmem:[#allocation2 + $0x2270] sm:$0xff]  ;;  %v1346_v51 = vld [vmem:[#allocation2 + $0x2258] sm:$0xff] }
 0x556   :  { %v1350_v53 = vld [vmem:[#allocation2 + $0x2278] sm:$0xff]  ;;  %v13295_v57 = vcombine.high %v1345_v14, %v1349_v50  ;;  %v13294_v6 = vcombine.low %v1345_v14, %v1349_v50 }
 0x557   :  { %v13297_v17 = vcombine.high %v1346_v51, %v1350_v53  ;;  %v13296_v60 = vcombine.low %v1346_v51, %v1350_v53 }
 0x558   :  { %10822 = vmatpush1.bf16.msra.mxu0 %v13238_v5  ;;  %11314 = vmatpush1.bf16.msra.mxu1 %v13240_v29  ;;  %v1353_v5 = vld [vmem:[#allocation2 + $0x2290] sm:$0xff] }
 0x559   :  { %10823 = vmatprep.subr.bf16.mxu0 %v13247_v61  ;;  %11315 = vmatprep.subr.bf16.mxu1 %v13249_v18  ;;  %v1357_v29 = vld [vmem:[#allocation2 + $0x22b0] sm:$0xff]  ;;  %v1354_v61 = vld [vmem:[#allocation2 + $0x2298] sm:$0xff] }
 0x55a   :  { %v1358_v18 = vld [vmem:[#allocation2 + $0x22b8] sm:$0xff]  ;;  %v13303_v27 = vcombine.high %v1353_v5, %v1357_v29  ;;  %v13302_v19 = vcombine.low %v1353_v5, %v1357_v29 }
 0x55b   :  { %v13305_v28 = vcombine.high %v1354_v61, %v1358_v18  ;;  %v13304_v59 = vcombine.low %v1354_v61, %v1358_v18 }
 0x55c   :  { %10824 = vmatpush1.bf16.msra.mxu0 %v13246_v47  ;;  %11316 = vmatpush1.bf16.msra.mxu1 %v13248_v35  ;;  %v1361_v47 = vld [vmem:[#allocation2 + $0x22d0] sm:$0xff] }
 0x55d   :  { %10825 = vmatprep.subr.bf16.mxu0 %v13255_v63  ;;  %11317 = vmatprep.subr.bf16.mxu1 %v13257_v42  ;;  %v1365_v35 = vld [vmem:[#allocation2 + $0x22f0] sm:$0xff]  ;;  %v1362_v63 = vld [vmem:[#allocation2 + $0x22d8] sm:$0xff] }
 0x55e   :  { %v1366_v42 = vld [vmem:[#allocation2 + $0x22f8] sm:$0xff]  ;;  %v13311_v62 = vcombine.high %v1361_v47, %v1365_v35  ;;  %v13310_v7 = vcombine.low %v1361_v47, %v1365_v35 }
 0x55f   :  { %v13313_v37 = vcombine.high %v1362_v63, %v1366_v42  ;;  %v13312_v45 = vcombine.low %v1362_v63, %v1366_v42 }
 0x560   :  { %10826 = vmatpush1.bf16.msra.mxu0 %v13254_v15  ;;  %11318 = vmatpush1.bf16.msra.mxu1 %v13256_v1  ;;  %v1369_v15 = vld [vmem:[#allocation2 + $0x2310] sm:$0xff] }
 0x561   :  { %10827 = vmatprep.subr.bf16.mxu0 %v13263_v2  ;;  %11319 = vmatprep.subr.bf16.mxu1 %v13265_v4  ;;  %v1373_v1 = vld [vmem:[#allocation2 + $0x2330] sm:$0xff]  ;;  %v1370_v2 = vld [vmem:[#allocation2 + $0x2318] sm:$0xff] }
 0x562   :  { %v1374_v4 = vld [vmem:[#allocation2 + $0x2338] sm:$0xff]  ;;  %v13319_v38 = vcombine.high %v1369_v15, %v1373_v1  ;;  %v13318_v26 = vcombine.low %v1369_v15, %v1373_v1 }
 0x563   :  { %v13321_v55 = vcombine.high %v1370_v2, %v1374_v4  ;;  %v13320_v21 = vcombine.low %v1370_v2, %v1374_v4 }
 0x564   :  { %10828 = vmatpush1.bf16.msra.mxu0 %v13262_v8  ;;  %11320 = vmatpush1.bf16.msra.mxu1 %v13264_v34  ;;  %v1377_v8 = vld [vmem:[#allocation2 + $0x2350] sm:$0xff] }
 0x565   :  { %10829 = vmatprep.subr.bf16.mxu0 %v13271_v12  ;;  %11321 = vmatprep.subr.bf16.mxu1 %v13273_v16  ;;  %v1381_v34 = vld [vmem:[#allocation2 + $0x2370] sm:$0xff]  ;;  %v1378_v12 = vld [vmem:[#allocation2 + $0x2358] sm:$0xff] }
 0x566   :  { %v1382_v16 = vld [vmem:[#allocation2 + $0x2378] sm:$0xff]  ;;  %v13327_v23 = vcombine.high %v1377_v8, %v1381_v34  ;;  %v13326_v32 = vcombine.low %v1377_v8, %v1381_v34 }
 0x567   :  { %v13329_v0 = vcombine.high %v1378_v12, %v1382_v16  ;;  %v13328_v33 = vcombine.low %v1378_v12, %v1382_v16  ;;  %v1433_v16 = vld [vmem:[#allocation2 + $0x2510] sm:$0xff] }
 0x568   :  { %10830 = vmatpush1.bf16.msra.mxu0 %v13270_v22  ;;  %11322 = vmatpush1.bf16.msra.mxu1 %v13272_v24  ;;  %v1385_v22 = vld [vmem:[#allocation2 + $0x2390] sm:$0xff] }
 0x569   :  { %10831 = vmatprep.subr.bf16.mxu0 %v13279_v30  ;;  %11323 = vmatprep.subr.bf16.mxu1 %v13281_v48  ;;  %v1389_v24 = vld [vmem:[#allocation2 + $0x23b0] sm:$0xff]  ;;  %v1386_v30 = vld [vmem:[#allocation2 + $0x2398] sm:$0xff] }
 0x56a   :  { %v1390_v48 = vld [vmem:[#allocation2 + $0x23b8] sm:$0xff]  ;;  %v13335_v39 = vcombine.high %v1385_v22, %v1389_v24  ;;  %v13334_v14 = vcombine.low %v1385_v22, %v1389_v24 }
 0x56b   :  { %v13337_v40 = vcombine.high %v1386_v30, %v1390_v48  ;;  %v13336_v50 = vcombine.low %v1386_v30, %v1390_v48  ;;  %v1441_v30 = vld [vmem:[#allocation2 + $0x2550] sm:$0xff] }
 0x56c   :  { %10832 = vmatpush1.bf16.msra.mxu0 %v13278_v43  ;;  %11324 = vmatpush1.bf16.msra.mxu1 %v13280_v46  ;;  %v1393_v43 = vld [vmem:[#allocation2 + $0x23d0] sm:$0xff] }
 0x56d   :  { %10833 = vmatprep.subr.bf16.mxu0 %v13287_v58  ;;  %11325 = vmatprep.subr.bf16.mxu1 %v13289_v49  ;;  %v1397_v46 = vld [vmem:[#allocation2 + $0x23f0] sm:$0xff]  ;;  %v1394_v58 = vld [vmem:[#allocation2 + $0x23d8] sm:$0xff] }
 0x56e   :  { %v1398_v49 = vld [vmem:[#allocation2 + $0x23f8] sm:$0xff]  ;;  %v13343_v51 = vcombine.high %v1393_v43, %v1397_v46  ;;  %v13342_v5 = vcombine.low %v1393_v43, %v1397_v46  ;;  %v1445_v48 = vld [vmem:[#allocation2 + $0x2570] sm:$0xff] }
 0x56f   :  { %v13345_v53 = vcombine.high %v1394_v58, %v1398_v49  ;;  %v13344_v29 = vcombine.low %v1394_v58, %v1398_v49  ;;  %v13391_v43 = vcombine.high %v1441_v30, %v1445_v48  ;;  %v1449_v58 = vld [vmem:[#allocation2 + $0x2590] sm:$0xff] }
 0x570   :  { %10834 = vmatpush1.bf16.msra.mxu0 %v13286_v54  ;;  %11326 = vmatpush1.bf16.msra.mxu1 %v13288_v11  ;;  %v1401_v54 = vld [vmem:[#allocation2 + $0x2410] sm:$0xff] }
 0x571   :  { %10835 = vmatprep.subr.bf16.mxu0 %v13295_v57  ;;  %11327 = vmatprep.subr.bf16.mxu1 %v13297_v17  ;;  %v1405_v11 = vld [vmem:[#allocation2 + $0x2430] sm:$0xff]  ;;  %v1402_v57 = vld [vmem:[#allocation2 + $0x2418] sm:$0xff] }
 0x572   :  { %v1406_v17 = vld [vmem:[#allocation2 + $0x2438] sm:$0xff]  ;;  %v13351_v61 = vcombine.high %v1401_v54, %v1405_v11  ;;  %v13350_v47 = vcombine.low %v1401_v54, %v1405_v11  ;;  %v1453_v49 = vld [vmem:[#allocation2 + $0x25b0] sm:$0xff] }
 0x573   :  { %v13353_v18 = vcombine.high %v1402_v57, %v1406_v17  ;;  %v13352_v35 = vcombine.low %v1402_v57, %v1406_v17  ;;  %v13399_v54 = vcombine.high %v1449_v58, %v1453_v49  ;;  %v1457_v57 = vld [vmem:[#allocation2 + $0x25d0] sm:$0xff] }
 0x574   :  { %10836 = vmatpush1.bf16.msra.mxu0 %v13294_v6  ;;  %11328 = vmatpush1.bf16.msra.mxu1 %v13296_v60  ;;  %v1409_v6 = vld [vmem:[#allocation2 + $0x2450] sm:$0xff] }
 0x575   :  { %10837 = vmatprep.subr.bf16.mxu0 %v13303_v27  ;;  %11329 = vmatprep.subr.bf16.mxu1 %v13305_v28  ;;  %v1413_v60 = vld [vmem:[#allocation2 + $0x2470] sm:$0xff]  ;;  %v1410_v27 = vld [vmem:[#allocation2 + $0x2458] sm:$0xff] }
 0x576   :  { %v1414_v28 = vld [vmem:[#allocation2 + $0x2478] sm:$0xff]  ;;  %v13359_v63 = vcombine.high %v1409_v6, %v1413_v60  ;;  %v13358_v15 = vcombine.low %v1409_v6, %v1413_v60  ;;  %v1461_v17 = vld [vmem:[#allocation2 + $0x25f0] sm:$0xff] }
 0x577   :  { %v13361_v42 = vcombine.high %v1410_v27, %v1414_v28  ;;  %v13360_v1 = vcombine.low %v1410_v27, %v1414_v28  ;;  %v13407_v6 = vcombine.high %v1457_v57, %v1461_v17  ;;  %v1465_v27 = vld [vmem:[#allocation2 + $0x2610] sm:$0xff] }
 0x578   :  { %10838 = vmatpush1.bf16.msra.mxu0 %v13302_v19  ;;  %11330 = vmatpush1.bf16.msra.mxu1 %v13304_v59  ;;  %v1417_v19 = vld [vmem:[#allocation2 + $0x2490] sm:$0xff] }
 0x579   :  { %10839 = vmatprep.subr.bf16.mxu0 %v13311_v62  ;;  %11331 = vmatprep.subr.bf16.mxu1 %v13313_v37  ;;  %v1421_v59 = vld [vmem:[#allocation2 + $0x24b0] sm:$0xff]  ;;  %v1418_v62 = vld [vmem:[#allocation2 + $0x2498] sm:$0xff] }
 0x57a   :  { %v1422_v37 = vld [vmem:[#allocation2 + $0x24b8] sm:$0xff]  ;;  %v13367_v2 = vcombine.high %v1417_v19, %v1421_v59  ;;  %v13366_v8 = vcombine.low %v1417_v19, %v1421_v59  ;;  %v1469_v28 = vld [vmem:[#allocation2 + $0x2630] sm:$0xff] }
 0x57b   :  { %v13369_v4 = vcombine.high %v1418_v62, %v1422_v37  ;;  %v13415_v19 = vcombine.high %v1465_v27, %v1469_v28 }
 0x57c   :  { %10840 = vmatpush1.bf16.msra.mxu0 %v13310_v7  ;;  %11332 = vmatpush1.bf16.msra.mxu1 %v13312_v45  ;;  %v1425_v7 = vld [vmem:[#allocation2 + $0x24d0] sm:$0xff] }
 0x57d   :  { %10841 = vmatprep.subr.bf16.mxu0 %v13319_v38  ;;  %11333 = vmatprep.subr.bf16.mxu1 %v13321_v55  ;;  %v1429_v45 = vld [vmem:[#allocation2 + $0x24f0] sm:$0xff]  ;;  %v1426_v38 = vld [vmem:[#allocation2 + $0x24d8] sm:$0xff] }
 0x57e   :  { %v1430_v55 = vld [vmem:[#allocation2 + $0x24f8] sm:$0xff]  ;;  %v13375_v34 = vcombine.high %v1425_v7, %v1429_v45 }
 0x57f   :  { %v13377_v12 = vcombine.high %v1426_v38, %v1430_v55  ;;  %v13376_v22 = vcombine.low %v1426_v38, %v1430_v55  ;;  %v1481_v38 = vld [vmem:[#allocation2 + $0x2690] sm:$0xff] }
 0x580   :  { %10842 = vmatpush1.bf16.msra.mxu0 %v13318_v26  ;;  %11334 = vmatpush1.bf16.msra.mxu1 %v13320_v21  ;;  %v1437_v26 = vld [vmem:[#allocation2 + $0x2530] sm:$0xff]  ;;  %v1434_v21 = vld [vmem:[#allocation2 + $0x2518] sm:$0xff] }
 0x581   :  { %10843 = vmatprep.subr.bf16.mxu0 %v13327_v23  ;;  %11335 = vmatprep.subr.bf16.mxu1 %v13329_v0  ;;  %v1438_v23 = vld [vmem:[#allocation2 + $0x2538] sm:$0xff]  ;;  %v13374_v0 = vcombine.low %v1425_v7, %v1429_v45  ;;  %v13383_v24 = vcombine.high %v1433_v16, %v1437_v26  ;;  %v1485_v55 = vld [vmem:[#allocation2 + $0x26b0] sm:$0xff] }
 0x584   :  { %10844 = vmatpush1.bf16.msra.mxu0 %v13326_v32  ;;  %11336 = vmatpush1.bf16.msra.mxu1 %v13328_v33  ;;  %v1442_v32 = vld [vmem:[#allocation2 + $0x2558] sm:$0xff] }
 0x585   :  { %10845 = vmatprep.subr.bf16.mxu0 %v13335_v39  ;;  %11337 = vmatprep.subr.bf16.mxu1 %v13337_v40  ;;  %v1446_v33 = vld [vmem:[#allocation2 + $0x2578] sm:$0xff]  ;;  %v13382_v39 = vcombine.low %v1433_v16, %v1437_v26  ;;  %v13384_v40 = vcombine.low %v1434_v21, %v1438_v23  ;;  %v13431_v16 = vcombine.high %v1481_v38, %v1485_v55 }
 0x586   :  { %v13393_v46 = vcombine.high %v1442_v32, %v1446_v33 }
 0x588   :  { %10846 = vmatpush1.bf16.msra.mxu0 %v13334_v14  ;;  %11338 = vmatpush1.bf16.msra.mxu1 %v13336_v50  ;;  %v1450_v14 = vld [vmem:[#allocation2 + $0x2598] sm:$0xff] }
 0x589   :  { %10847 = vmatprep.subr.bf16.mxu0 %v13343_v51  ;;  %11339 = vmatprep.subr.bf16.mxu1 %v13345_v53  ;;  %v1454_v50 = vld [vmem:[#allocation2 + $0x25b8] sm:$0xff]  ;;  %v13390_v51 = vcombine.low %v1441_v30, %v1445_v48  ;;  %v13392_v53 = vcombine.low %v1442_v32, %v1446_v33  ;;  %v1497_v32 = vld [vmem:[#allocation2 + $0x2710] sm:$0xff] }
 0x58a   :  { %v13401_v11 = vcombine.high %v1450_v14, %v1454_v50  ;;  %v1501_v33 = vld [vmem:[#allocation2 + $0x2730] sm:$0xff] }
 0x58c   :  { %10848 = vmatpush1.bf16.msra.mxu0 %v13342_v5  ;;  %11340 = vmatpush1.bf16.msra.mxu1 %v13344_v29  ;;  %v1458_v5 = vld [vmem:[#allocation2 + $0x25d8] sm:$0xff] }
 0x58d   :  { %10858 = vmatprep.subr.bf16.mxu0 %v13351_v61  ;;  %11350 = vmatprep.subr.bf16.mxu1 %v13353_v18  ;;  %v1462_v29 = vld [vmem:[#allocation2 + $0x25f8] sm:$0xff]  ;;  %v13398_v61 = vcombine.low %v1449_v58, %v1453_v49  ;;  %v13400_v18 = vcombine.low %v1450_v14, %v1454_v50  ;;  %v13447_v58 = vcombine.high %v1497_v32, %v1501_v33  ;;  %v1505_v14 = vld [vmem:[#allocation2 + $0x2750] sm:$0xff] }
 0x58e   :  { %v13409_v60 = vcombine.high %v1458_v5, %v1462_v29  ;;  %v1509_v50 = vld [vmem:[#allocation2 + $0x2770] sm:$0xff] }
 0x58f   :  { %10850 = vmatmul.mubr.bf16.vlgmr.msra.gmra.mrb[4].mxu0 %v14535_v31  ;;  %11342 = vmatmul.mubr.bf16.vlgmr.msra.gmra.mrb[4].mxu1 %v14535_v31  ;;  %v13368_v31 = vcombine.low %v1418_v62, %v1422_v37  ;;  %v1473_v62 = vld [vmem:[#allocation2 + $0x2650] sm:$0xff] }
 0x590   :  { %10859 = vmatpush1.bf16.msra.mxu0 %v13350_v47  ;;  %11351 = vmatpush1.bf16.msra.mxu1 %v13352_v35  ;;  %v1466_v47 = vld [vmem:[#allocation2 + $0x2618] sm:$0xff]  ;;  %v1477_v37 = vld [vmem:[#allocation2 + $0x2670] sm:$0xff] }
 0x591   :  { %10860 = vmatprep.subr.bf16.mxu0 %v13359_v63  ;;  %11352 = vmatprep.subr.bf16.mxu1 %v13361_v42  ;;  %v1470_v35 = vld [vmem:[#allocation2 + $0x2638] sm:$0xff]  ;;  %v13406_v63 = vcombine.low %v1457_v57, %v1461_v17  ;;  %v13408_v42 = vcombine.low %v1458_v5, %v1462_v29  ;;  %v13423_v7 = vcombine.high %v1473_v62, %v1477_v37  ;;  %v1513_v5 = vld [vmem:[#allocation2 + $0x2790] sm:$0xff] }
 0x592   :  { %10890 = vmatprep.mubr.bf16.mxu0 %v14537_v3  ;;  %11382 = vmatprep.mubr.bf16.mxu1 %v14537_v3  ;;  %v13385_v3 = vcombine.high %v1434_v21, %v1438_v23  ;;  %v13417_v59 = vcombine.high %v1466_v47, %v1470_v35  ;;  %v1489_v21 = vld [vmem:[#allocation2 + $0x26d0] sm:$0xff]  ;;  %v13455_v57 = vcombine.high %v1505_v14, %v1509_v50 }
 0x593   :  { %v1493_v23 = vld [vmem:[#allocation2 + $0x26f0] sm:$0xff] }
 0x594   :  { %10861 = vmatpush1.bf16.msra.mxu0 %v13358_v15  ;;  %11353 = vmatpush1.bf16.msra.mxu1 %v13360_v1  ;;  %v1474_v15 = vld [vmem:[#allocation2 + $0x2658] sm:$0xff]  ;;  %v13439_v30 = vcombine.high %v1489_v21, %v1493_v23  ;;  %v1517_v29 = vld [vmem:[#allocation2 + $0x27b0] sm:$0xff] }
 0x595   :  { %10862 = vmatprep.subr.bf16.mxu0 %v13367_v2  ;;  %11354 = vmatprep.subr.bf16.mxu1 %v13369_v4  ;;  %v1478_v1 = vld [vmem:[#allocation2 + $0x2678] sm:$0xff]  ;;  %v13414_v2 = vcombine.low %v1465_v27, %v1469_v28  ;;  %v13416_v4 = vcombine.low %v1466_v47, %v1470_v35  ;;  %v13463_v27 = vcombine.high %v1513_v5, %v1517_v29  ;;  %v1521_v47 = vld [vmem:[#allocation2 + $0x27d0] sm:$0xff] }
 0x596   :  { %v13425_v45 = vcombine.high %v1474_v15, %v1478_v1  ;;  %v1525_v35 = vld [vmem:[#allocation2 + $0x27f0] sm:$0xff] }
 0x598   :  { %10863 = vmatpush1.bf16.msra.mxu0 %v13366_v8  ;;  %11355 = vmatpush1.bf16.msra.mxu1 %v13368_v31  ;;  %v1482_v8 = vld [vmem:[#allocation2 + $0x2698] sm:$0xff] }
 0x599   :  { %10864 = vmatprep.subr.bf16.mxu0 %v13375_v34  ;;  %11356 = vmatprep.subr.bf16.mxu1 %v13377_v12  ;;  %v1486_v31 = vld [vmem:[#allocation2 + $0x26b8] sm:$0xff]  ;;  %v13422_v34 = vcombine.low %v1473_v62, %v1477_v37  ;;  %v13424_v12 = vcombine.low %v1474_v15, %v1478_v1  ;;  %v13471_v62 = vcombine.high %v1521_v47, %v1525_v35  ;;  %v1529_v15 = vld [vmem:[#allocation2 + $0x2810] sm:$0xff] }
 0x59a   :  { %v13433_v26 = vcombine.high %v1482_v8, %v1486_v31  ;;  %v1533_v1 = vld [vmem:[#allocation2 + $0x2830] sm:$0xff] }
 0x59c   :  { %10865 = vmatpush1.bf16.msra.mxu0 %v13374_v0  ;;  %11357 = vmatpush1.bf16.msra.mxu1 %v13376_v22  ;;  %v1490_v0 = vld [vmem:[#allocation2 + $0x26d8] sm:$0xff] }
 0x59d   :  { %10866 = vmatprep.subr.bf16.mxu0 %v13383_v24  ;;  %11358 = vmatprep.subr.bf16.mxu1 %v13385_v3  ;;  %v1494_v22 = vld [vmem:[#allocation2 + $0x26f8] sm:$0xff]  ;;  %v13430_v24 = vcombine.low %v1481_v38, %v1485_v55  ;;  %v13432_v3 = vcombine.low %v1482_v8, %v1486_v31  ;;  %v13479_v38 = vcombine.high %v1529_v15, %v1533_v1  ;;  %v1537_v8 = vld [vmem:[#allocation2 + $0x2850] sm:$0xff] }
 0x59e   :  { %v13441_v48 = vcombine.high %v1490_v0, %v1494_v22  ;;  %v1541_v31 = vld [vmem:[#allocation2 + $0x2870] sm:$0xff] }
 0x5a0   :  { %10867 = vmatpush1.bf16.msra.mxu0 %v13382_v39  ;;  %11359 = vmatpush1.bf16.msra.mxu1 %v13384_v40  ;;  %v1498_v39 = vld [vmem:[#allocation2 + $0x2718] sm:$0xff] }
 0x5a1   :  { %10868 = vmatprep.subr.bf16.mxu0 %v13391_v43  ;;  %11360 = vmatprep.subr.bf16.mxu1 %v13393_v46  ;;  %v1502_v40 = vld [vmem:[#allocation2 + $0x2738] sm:$0xff]  ;;  %v13438_v43 = vcombine.low %v1489_v21, %v1493_v23  ;;  %v13440_v46 = vcombine.low %v1490_v0, %v1494_v22  ;;  %v13487_v21 = vcombine.high %v1537_v8, %v1541_v31  ;;  %v1545_v0 = vld [vmem:[#allocation2 + $0x2890] sm:$0xff] }
 0x5a2   :  { %v13449_v49 = vcombine.high %v1498_v39, %v1502_v40  ;;  %v1549_v22 = vld [vmem:[#allocation2 + $0x28b0] sm:$0xff] }
 0x5a4   :  { %10869 = vmatpush1.bf16.msra.mxu0 %v13390_v51  ;;  %11361 = vmatpush1.bf16.msra.mxu1 %v13392_v53  ;;  %v1506_v51 = vld [vmem:[#allocation2 + $0x2758] sm:$0xff] }
 0x5a5   :  { %10870 = vmatprep.subr.bf16.mxu0 %v13399_v54  ;;  %11362 = vmatprep.subr.bf16.mxu1 %v13401_v11  ;;  %v1510_v53 = vld [vmem:[#allocation2 + $0x2778] sm:$0xff]  ;;  %v13446_v54 = vcombine.low %v1497_v32, %v1501_v33  ;;  %v13448_v11 = vcombine.low %v1498_v39, %v1502_v40  ;;  %v13495_v32 = vcombine.high %v1545_v0, %v1549_v22  ;;  %v1553_v39 = vld [vmem:[#allocation2 + $0x28d0] sm:$0xff] }
 0x5a6   :  { %v13457_v17 = vcombine.high %v1506_v51, %v1510_v53  ;;  %v1557_v40 = vld [vmem:[#allocation2 + $0x28f0] sm:$0xff] }
 0x5a8   :  { %10871 = vmatpush1.bf16.msra.mxu0 %v13398_v61  ;;  %11363 = vmatpush1.bf16.msra.mxu1 %v13400_v18  ;;  %v1514_v61 = vld [vmem:[#allocation2 + $0x2798] sm:$0xff] }
 0x5a9   :  { %10872 = vmatprep.subr.bf16.mxu0 %v13407_v6  ;;  %11364 = vmatprep.subr.bf16.mxu1 %v13409_v60  ;;  %v1518_v18 = vld [vmem:[#allocation2 + $0x27b8] sm:$0xff]  ;;  %v13454_v6 = vcombine.low %v1505_v14, %v1509_v50  ;;  %v13456_v60 = vcombine.low %v1506_v51, %v1510_v53  ;;  %v1561_v50 = vld [vmem:[#allocation2 + $0x2910] sm:$0xff] }
 0x5aa   :  { %v13465_v28 = vcombine.high %v1514_v61, %v1518_v18  ;;  %v1565_v51 = vld [vmem:[#allocation2 + $0x2930] sm:$0xff]  ;;  %v1562_v53 = vld [vmem:[#allocation2 + $0x2918] sm:$0xff] }
 0x5ac   :  { %10873 = vmatpush1.bf16.msra.mxu0 %v13406_v63  ;;  %11365 = vmatpush1.bf16.msra.mxu1 %v13408_v42  ;;  %v1522_v63 = vld [vmem:[#allocation2 + $0x27d8] sm:$0xff] }
 0x5ad   :  { %10874 = vmatprep.subr.bf16.mxu0 %v13415_v19  ;;  %11366 = vmatprep.subr.bf16.mxu1 %v13417_v59  ;;  %v1526_v42 = vld [vmem:[#allocation2 + $0x27f8] sm:$0xff]  ;;  %v13462_v19 = vcombine.low %v1513_v5, %v1517_v29  ;;  %v13464_v59 = vcombine.low %v1514_v61, %v1518_v18  ;;  %v1569_v5 = vld [vmem:[#allocation2 + $0x2950] sm:$0xff] }
 0x5ae   :  { %v13473_v37 = vcombine.high %v1522_v63, %v1526_v42  ;;  %v1573_v29 = vld [vmem:[#allocation2 + $0x2970] sm:$0xff]  ;;  %v1570_v61 = vld [vmem:[#allocation2 + $0x2958] sm:$0xff] }
 0x5af   :  { %v1574_v18 = vld [vmem:[#allocation2 + $0x2978] sm:$0xff] }
 0x5b0   :  { %10875 = vmatpush1.bf16.msra.mxu0 %v13414_v2  ;;  %11367 = vmatpush1.bf16.msra.mxu1 %v13416_v4  ;;  %v1530_v2 = vld [vmem:[#allocation2 + $0x2818] sm:$0xff] }
 0x5b1   :  { %10876 = vmatprep.subr.bf16.mxu0 %v13423_v7  ;;  %11368 = vmatprep.subr.bf16.mxu1 %v13425_v45  ;;  %v1534_v4 = vld [vmem:[#allocation2 + $0x2838] sm:$0xff]  ;;  %v13470_v7 = vcombine.low %v1521_v47, %v1525_v35  ;;  %v13472_v45 = vcombine.low %v1522_v63, %v1526_v42  ;;  %v1577_v47 = vld [vmem:[#allocation2 + $0x2990] sm:$0xff] }
 0x5b2   :  { %v13481_v55 = vcombine.high %v1530_v2, %v1534_v4  ;;  %v1581_v35 = vld [vmem:[#allocation2 + $0x29b0] sm:$0xff]  ;;  %v1578_v63 = vld [vmem:[#allocation2 + $0x2998] sm:$0xff] }
 0x5b3   :  { %v1582_v42 = vld [vmem:[#allocation2 + $0x29b8] sm:$0xff] }
 0x5b4   :  { %10877 = vmatpush1.bf16.msra.mxu0 %v13422_v34  ;;  %11369 = vmatpush1.bf16.msra.mxu1 %v13424_v12  ;;  %v1538_v34 = vld [vmem:[#allocation2 + $0x2858] sm:$0xff] }
 0x5b5   :  { %10878 = vmatprep.subr.bf16.mxu0 %v13431_v16  ;;  %11370 = vmatprep.subr.bf16.mxu1 %v13433_v26  ;;  %v1542_v12 = vld [vmem:[#allocation2 + $0x2878] sm:$0xff]  ;;  %v13478_v16 = vcombine.low %v1529_v15, %v1533_v1  ;;  %v13480_v26 = vcombine.low %v1530_v2, %v1534_v4  ;;  %v1585_v15 = vld [vmem:[#allocation2 + $0x29d0] sm:$0xff] }
 0x5b6   :  { %v13489_v23 = vcombine.high %v1538_v34, %v1542_v12  ;;  %v1589_v1 = vld [vmem:[#allocation2 + $0x29f0] sm:$0xff]  ;;  %v1586_v2 = vld [vmem:[#allocation2 + $0x29d8] sm:$0xff] }
 0x5b7   :  { %v1590_v4 = vld [vmem:[#allocation2 + $0x29f8] sm:$0xff] }
 0x5b8   :  { %10879 = vmatpush1.bf16.msra.mxu0 %v13430_v24  ;;  %11371 = vmatpush1.bf16.msra.mxu1 %v13432_v3  ;;  %v1546_v24 = vld [vmem:[#allocation2 + $0x2898] sm:$0xff] }
 0x5b9   :  { %10880 = vmatprep.subr.bf16.mxu0 %v13439_v30  ;;  %11372 = vmatprep.subr.bf16.mxu1 %v13441_v48  ;;  %v1550_v3 = vld [vmem:[#allocation2 + $0x28b8] sm:$0xff]  ;;  %v13486_v30 = vcombine.low %v1537_v8, %v1541_v31  ;;  %v13488_v48 = vcombine.low %v1538_v34, %v1542_v12  ;;  %v1593_v8 = vld [vmem:[#allocation2 + $0x2a10] sm:$0xff] }
 0x5ba   :  { %v13497_v33 = vcombine.high %v1546_v24, %v1550_v3  ;;  %v1597_v31 = vld [vmem:[#allocation2 + $0x2a30] sm:$0xff]  ;;  %v1594_v34 = vld [vmem:[#allocation2 + $0x2a18] sm:$0xff] }
 0x5bb   :  { %v1598_v12 = vld [vmem:[#allocation2 + $0x2a38] sm:$0xff] }
 0x5bc   :  { %10881 = vmatpush1.bf16.msra.mxu0 %v13438_v43  ;;  %11373 = vmatpush1.bf16.msra.mxu1 %v13440_v46  ;;  %v1554_v43 = vld [vmem:[#allocation2 + $0x28d8] sm:$0xff] }
 0x5bd   :  { %10882 = vmatprep.subr.bf16.mxu0 %v13447_v58  ;;  %11374 = vmatprep.subr.bf16.mxu1 %v13449_v49  ;;  %v1558_v46 = vld [vmem:[#allocation2 + $0x28f8] sm:$0xff]  ;;  %v13494_v58 = vcombine.low %v1545_v0, %v1549_v22  ;;  %v13503_v49 = vcombine.high %v1553_v39, %v1557_v40  ;;  %v1601_v0 = vld [vmem:[#allocation2 + $0x2a50] sm:$0xff] }
 0x5be   :  { %v13505_v14 = vcombine.high %v1554_v43, %v1558_v46  ;;  %v1605_v22 = vld [vmem:[#allocation2 + $0x2a70] sm:$0xff] }
 0x5c0   :  { %10883 = vmatpush1.bf16.msra.mxu0 %v13446_v54  ;;  %11375 = vmatpush1.bf16.msra.mxu1 %v13448_v11  ;;  %v1566_v54 = vld [vmem:[#allocation2 + $0x2938] sm:$0xff]  ;;  %v13502_v11 = vcombine.low %v1553_v39, %v1557_v40  ;;  %v1609_v39 = vld [vmem:[#allocation2 + $0x2a90] sm:$0xff] }
 0x5c1   :  { %10884 = vmatprep.subr.bf16.mxu0 %v13455_v57  ;;  %11376 = vmatprep.subr.bf16.mxu1 %v13457_v17  ;;  %v13504_v57 = vcombine.low %v1554_v43, %v1558_v46  ;;  %v13511_v17 = vcombine.high %v1561_v50, %v1565_v51  ;;  %v1613_v40 = vld [vmem:[#allocation2 + $0x2ab0] sm:$0xff]  ;;  %v1610_v43 = vld [vmem:[#allocation2 + $0x2a98] sm:$0xff] }
 0x5c2   :  { %v1614_v46 = vld [vmem:[#allocation2 + $0x2ab8] sm:$0xff] }
 0x5c4   :  { %10885 = vmatpush1.bf16.msra.mxu0 %v13454_v6  ;;  %11377 = vmatpush1.bf16.msra.mxu1 %v13456_v60  ;;  %v13510_v6 = vcombine.low %v1561_v50, %v1565_v51  ;;  %v13512_v60 = vcombine.low %v1562_v53, %v1566_v54  ;;  %v1617_v50 = vld [vmem:[#allocation2 + $0x2ad0] sm:$0xff] }
 0x5c5   :  { %10886 = vmatprep.subr.bf16.mxu0 %v13463_v27  ;;  %11378 = vmatprep.subr.bf16.mxu1 %v13465_v28  ;;  %v13519_v27 = vcombine.high %v1569_v5, %v1573_v29  ;;  %v13521_v28 = vcombine.high %v1570_v61, %v1574_v18  ;;  %v1621_v51 = vld [vmem:[#allocation2 + $0x2af0] sm:$0xff] }
 0x5c8   :  { %10887 = vmatpush1.bf16.msra.mxu0 %v13462_v19  ;;  %11379 = vmatpush1.bf16.msra.mxu1 %v13464_v59  ;;  %v13518_v19 = vcombine.low %v1569_v5, %v1573_v29  ;;  %v13520_v59 = vcombine.low %v1570_v61, %v1574_v18  ;;  %v1625_v5 = vld [vmem:[#allocation2 + $0x2b10] sm:$0xff]  ;;  %v1626_v61 = vld [vmem:[#allocation2 + $0x2b18] sm:$0xff] }
 0x5c9   :  { %10888 = vmatprep.subr.bf16.mxu0 %v13471_v62  ;;  %11380 = vmatprep.subr.bf16.mxu1 %v13473_v37  ;;  %v13527_v62 = vcombine.high %v1577_v47, %v1581_v35  ;;  %v13529_v37 = vcombine.high %v1578_v63, %v1582_v42  ;;  %v1629_v29 = vld [vmem:[#allocation2 + $0x2b30] sm:$0xff]  ;;  %v1630_v18 = vld [vmem:[#allocation2 + $0x2b38] sm:$0xff] }
 0x5cc   :  { %10889 = vmatpush1.bf16.msra.mxu0 %v13470_v7  ;;  %11381 = vmatpush1.bf16.msra.mxu1 %v13472_v45  ;;  %v13526_v7 = vcombine.low %v1577_v47, %v1581_v35  ;;  %v13528_v45 = vcombine.low %v1578_v63, %v1582_v42  ;;  %v1633_v47 = vld [vmem:[#allocation2 + $0x2b50] sm:$0xff]  ;;  %v1634_v63 = vld [vmem:[#allocation2 + $0x2b58] sm:$0xff] }
 0x5cd   :  { %10899 = vmatprep.subr.bf16.mxu0 %v13479_v38  ;;  %11391 = vmatprep.subr.bf16.mxu1 %v13481_v55  ;;  %v13535_v38 = vcombine.high %v1585_v15, %v1589_v1  ;;  %v13537_v55 = vcombine.high %v1586_v2, %v1590_v4  ;;  %v1637_v35 = vld [vmem:[#allocation2 + $0x2b70] sm:$0xff]  ;;  %v1638_v42 = vld [vmem:[#allocation2 + $0x2b78] sm:$0xff] }
 0x5cf   :  { %10891 = vmatmul.mubr.bf16.vlgmr.msra.gmra.mrb[4].mxu0 %v14556_v44  ;;  %11383 = vmatmul.mubr.bf16.vlgmr.msra.gmra.mrb[4].mxu1 %v14556_v44  ;;  %v13496_v44 = vcombine.low %v1546_v24, %v1550_v3  ;;  %v1602_v24 = vld [vmem:[#allocation2 + $0x2a58] sm:$0xff] }
 0x5d0   :  { %10900 = vmatpush1.bf16.msra.mxu0 %v13478_v16  ;;  %11392 = vmatpush1.bf16.msra.mxu1 %v13480_v26  ;;  %v13534_v16 = vcombine.low %v1585_v15, %v1589_v1  ;;  %v13536_v26 = vcombine.low %v1586_v2, %v1590_v4  ;;  %v1606_v3 = vld [vmem:[#allocation2 + $0x2a78] sm:$0xff]  ;;  %v1641_v15 = vld [vmem:[#allocation2 + $0x2b90] sm:$0xff] }
 0x5d1   :  { %10901 = vmatprep.subr.bf16.mxu0 %v13487_v21  ;;  %11393 = vmatprep.subr.bf16.mxu1 %v13489_v23  ;;  %v13543_v21 = vcombine.high %v1593_v8, %v1597_v31  ;;  %v13545_v23 = vcombine.high %v1594_v34, %v1598_v12  ;;  %v1645_v1 = vld [vmem:[#allocation2 + $0x2bb0] sm:$0xff]  ;;  %v1642_v2 = vld [vmem:[#allocation2 + $0x2b98] sm:$0xff] }
 0x5d2   :  { %10931 = vmatprep.mubr.bf16.mxu0 %v14558_v56  ;;  %11423 = vmatprep.mubr.bf16.mxu1 %v14558_v56  ;;  %v13513_v56 = vcombine.high %v1562_v53, %v1566_v54  ;;  %v1618_v53 = vld [vmem:[#allocation2 + $0x2ad8] sm:$0xff] }
 0x5d3   :  { %v1622_v54 = vld [vmem:[#allocation2 + $0x2af8] sm:$0xff] }
 0x5d4   :  { %10902 = vmatpush1.bf16.msra.mxu0 %v13486_v30  ;;  %11394 = vmatpush1.bf16.msra.mxu1 %v13488_v48  ;;  %v13542_v30 = vcombine.low %v1593_v8, %v1597_v31  ;;  %v13544_v48 = vcombine.low %v1594_v34, %v1598_v12  ;;  %v1646_v4 = vld [vmem:[#allocation2 + $0x2bb8] sm:$0xff]  ;;  %v1649_v8 = vld [vmem:[#allocation2 + $0x2bd0] sm:$0xff] }
 0x5d5   :  { %10903 = vmatprep.subr.bf16.mxu0 %v13495_v32  ;;  %11395 = vmatprep.subr.bf16.mxu1 %v13497_v33  ;;  %v13551_v32 = vcombine.high %v1601_v0, %v1605_v22  ;;  %v13553_v33 = vcombine.high %v1602_v24, %v1606_v3  ;;  %v1653_v31 = vld [vmem:[#allocation2 + $0x2bf0] sm:$0xff]  ;;  %v1650_v34 = vld [vmem:[#allocation2 + $0x2bd8] sm:$0xff] }
 0x5d6   :  { %v1654_v12 = vld [vmem:[#allocation2 + $0x2bf8] sm:$0xff] }
 0x5d8   :  { %10904 = vmatpush1.bf16.msra.mxu0 %v13494_v58  ;;  %11396 = vmatpush1.bf16.msra.mxu1 %v13496_v44  ;;  %v13550_v58 = vcombine.low %v1601_v0, %v1605_v22  ;;  %v13552_v44 = vcombine.low %v1602_v24, %v1606_v3  ;;  %v1657_v0 = vld [vmem:[#allocation2 + $0x2c10] sm:$0xff]  ;;  %v1658_v24 = vld [vmem:[#allocation2 + $0x2c18] sm:$0xff] }
 0x5d9   :  { %10905 = vmatprep.subr.bf16.mxu0 %v13503_v49  ;;  %11397 = vmatprep.subr.bf16.mxu1 %v13505_v14  ;;  %v13559_v49 = vcombine.high %v1609_v39, %v1613_v40  ;;  %v13561_v14 = vcombine.high %v1610_v43, %v1614_v46  ;;  %v1661_v22 = vld [vmem:[#allocation2 + $0x2c30] sm:$0xff]  ;;  %v1662_v3 = vld [vmem:[#allocation2 + $0x2c38] sm:$0xff] }
 0x5dc   :  { %10906 = vmatpush1.bf16.msra.mxu0 %v13502_v11  ;;  %11398 = vmatpush1.bf16.msra.mxu1 %v13504_v57  ;;  %v13558_v11 = vcombine.low %v1609_v39, %v1613_v40  ;;  %v13560_v57 = vcombine.low %v1610_v43, %v1614_v46  ;;  %v1665_v39 = vld [vmem:[#allocation2 + $0x2c50] sm:$0xff]  ;;  %v1666_v43 = vld [vmem:[#allocation2 + $0x2c58] sm:$0xff] }
 0x5dd   :  { %10907 = vmatprep.subr.bf16.mxu0 %v13511_v17  ;;  %11399 = vmatprep.subr.bf16.mxu1 %v13513_v56  ;;  %v13567_v17 = vcombine.high %v1617_v50, %v1621_v51  ;;  %v13569_v56 = vcombine.high %v1618_v53, %v1622_v54  ;;  %v1669_v40 = vld [vmem:[#allocation2 + $0x2c70] sm:$0xff]  ;;  %v1670_v46 = vld [vmem:[#allocation2 + $0x2c78] sm:$0xff] }
 0x5e0   :  { %10908 = vmatpush1.bf16.msra.mxu0 %v13510_v6  ;;  %11400 = vmatpush1.bf16.msra.mxu1 %v13512_v60  ;;  %v13566_v6 = vcombine.low %v1617_v50, %v1621_v51  ;;  %v13568_v60 = vcombine.low %v1618_v53, %v1622_v54  ;;  %v1673_v50 = vld [vmem:[#allocation2 + $0x2c90] sm:$0xff]  ;;  %v1674_v53 = vld [vmem:[#allocation2 + $0x2c98] sm:$0xff] }
 0x5e1   :  { %10909 = vmatprep.subr.bf16.mxu0 %v13519_v27  ;;  %11401 = vmatprep.subr.bf16.mxu1 %v13521_v28  ;;  %v13575_v27 = vcombine.high %v1625_v5, %v1629_v29  ;;  %v13577_v28 = vcombine.high %v1626_v61, %v1630_v18  ;;  %v1677_v51 = vld [vmem:[#allocation2 + $0x2cb0] sm:$0xff]  ;;  %v1678_v54 = vld [vmem:[#allocation2 + $0x2cb8] sm:$0xff] }
 0x5e4   :  { %10910 = vmatpush1.bf16.msra.mxu0 %v13518_v19  ;;  %11402 = vmatpush1.bf16.msra.mxu1 %v13520_v59  ;;  %v13574_v19 = vcombine.low %v1625_v5, %v1629_v29  ;;  %v13576_v59 = vcombine.low %v1626_v61, %v1630_v18  ;;  %v1681_v5 = vld [vmem:[#allocation2 + $0x2cd0] sm:$0xff]  ;;  %v1682_v61 = vld [vmem:[#allocation2 + $0x2cd8] sm:$0xff] }
 0x5e5   :  { %10911 = vmatprep.subr.bf16.mxu0 %v13527_v62  ;;  %11403 = vmatprep.subr.bf16.mxu1 %v13529_v37  ;;  %v13583_v62 = vcombine.high %v1633_v47, %v1637_v35  ;;  %v13585_v37 = vcombine.high %v1634_v63, %v1638_v42  ;;  %v1685_v29 = vld [vmem:[#allocation2 + $0x2cf0] sm:$0xff]  ;;  %v1686_v18 = vld [vmem:[#allocation2 + $0x2cf8] sm:$0xff] }
 0x5e8   :  { %10912 = vmatpush1.bf16.msra.mxu0 %v13526_v7  ;;  %11404 = vmatpush1.bf16.msra.mxu1 %v13528_v45  ;;  %v13582_v7 = vcombine.low %v1633_v47, %v1637_v35  ;;  %v13584_v45 = vcombine.low %v1634_v63, %v1638_v42  ;;  %v1693_v47 = vld [vmem:[#allocation2 + $0x2d30] sm:$0xff]  ;;  %v1690_v35 = vld [vmem:[#allocation2 + $0x2d18] sm:$0xff]  ;;  %v13630_v42 = vcombine.low %v1681_v5, %v1685_v29 }
 0x5e9   :  { %10913 = vmatprep.subr.bf16.mxu0 %v13535_v38  ;;  %11405 = vmatprep.subr.bf16.mxu1 %v13537_v55  ;;  %v13591_v38 = vcombine.high %v1641_v15, %v1645_v1  ;;  %v13593_v55 = vcombine.high %v1642_v2, %v1646_v4  ;;  %v1694_v63 = vld [vmem:[#allocation2 + $0x2d38] sm:$0xff] }
 0x5ec   :  { %10914 = vmatpush1.bf16.msra.mxu0 %v13534_v16  ;;  %11406 = vmatpush1.bf16.msra.mxu1 %v13536_v26  ;;  %v13590_v16 = vcombine.low %v1641_v15, %v1645_v1  ;;  %v13592_v26 = vcombine.low %v1642_v2, %v1646_v4  ;;  %v1698_v15 = vld [vmem:[#allocation2 + $0x2d58] sm:$0xff]  ;;  %v13640_v4 = vcombine.low %v1690_v35, %v1694_v63 }
 0x5ed   :  { %10915 = vmatprep.subr.bf16.mxu0 %v13543_v21  ;;  %11407 = vmatprep.subr.bf16.mxu1 %v13545_v23  ;;  %v13599_v21 = vcombine.high %v1649_v8, %v1653_v31  ;;  %v13601_v23 = vcombine.high %v1650_v34, %v1654_v12  ;;  %v1702_v1 = vld [vmem:[#allocation2 + $0x2d78] sm:$0xff] }
 0x5f0   :  { %10916 = vmatpush1.bf16.msra.mxu0 %v13542_v30  ;;  %11408 = vmatpush1.bf16.msra.mxu1 %v13544_v48  ;;  %v13598_v30 = vcombine.low %v1649_v8, %v1653_v31  ;;  %v13600_v48 = vcombine.low %v1650_v34, %v1654_v12  ;;  %v1706_v8 = vld [vmem:[#allocation2 + $0x2d98] sm:$0xff]  ;;  %v13648_v12 = vcombine.low %v1698_v15, %v1702_v1 }
 0x5f1   :  { %10917 = vmatprep.subr.bf16.mxu0 %v13551_v32  ;;  %11409 = vmatprep.subr.bf16.mxu1 %v13553_v33  ;;  %v13607_v32 = vcombine.high %v1657_v0, %v1661_v22  ;;  %v13609_v33 = vcombine.high %v1658_v24, %v1662_v3  ;;  %v1710_v31 = vld [vmem:[#allocation2 + $0x2db8] sm:$0xff] }
 0x5f4   :  { %10918 = vmatpush1.bf16.msra.mxu0 %v13550_v58  ;;  %11410 = vmatpush1.bf16.msra.mxu1 %v13552_v44  ;;  %v13606_v58 = vcombine.low %v1657_v0, %v1661_v22  ;;  %v13608_v44 = vcombine.low %v1658_v24, %v1662_v3  ;;  %v1714_v0 = vld [vmem:[#allocation2 + $0x2dd8] sm:$0xff]  ;;  %v13656_v3 = vcombine.low %v1706_v8, %v1710_v31 }
 0x5f5   :  { %10919 = vmatprep.subr.bf16.mxu0 %v13559_v49  ;;  %11411 = vmatprep.subr.bf16.mxu1 %v13561_v14  ;;  %v13615_v49 = vcombine.high %v1665_v39, %v1669_v40  ;;  %v13617_v14 = vcombine.high %v1666_v43, %v1670_v46  ;;  %v1718_v22 = vld [vmem:[#allocation2 + $0x2df8] sm:$0xff] }
 0x5f8   :  { %10920 = vmatpush1.bf16.msra.mxu0 %v13558_v11  ;;  %11412 = vmatpush1.bf16.msra.mxu1 %v13560_v57  ;;  %v13614_v11 = vcombine.low %v1665_v39, %v1669_v40  ;;  %v13616_v57 = vcombine.low %v1666_v43, %v1670_v46  ;;  %v1722_v39 = vld [vmem:[#allocation2 + $0x2e18] sm:$0xff]  ;;  %v13664_v46 = vcombine.low %v1714_v0, %v1718_v22 }
 0x5f9   :  { %10921 = vmatprep.subr.bf16.mxu0 %v13567_v17  ;;  %11413 = vmatprep.subr.bf16.mxu1 %v13569_v56  ;;  %v13623_v17 = vcombine.high %v1673_v50, %v1677_v51  ;;  %v13625_v56 = vcombine.high %v1674_v53, %v1678_v54  ;;  %v1726_v40 = vld [vmem:[#allocation2 + $0x2e38] sm:$0xff] }
 0x5fc   :  { %10922 = vmatpush1.bf16.msra.mxu0 %v13566_v6  ;;  %11414 = vmatpush1.bf16.msra.mxu1 %v13568_v60  ;;  %v13622_v6 = vcombine.low %v1673_v50, %v1677_v51  ;;  %v13631_v60 = vcombine.high %v1681_v5, %v1685_v29  ;;  %v1730_v50 = vld [vmem:[#allocation2 + $0x2e58] sm:$0xff] }
 0x5fd   :  { %10923 = vmatprep.subr.bf16.mxu0 %v13575_v27  ;;  %11415 = vmatprep.subr.bf16.mxu1 %v13577_v28  ;;  %v13633_v27 = vcombine.high %v1682_v61, %v1686_v18  ;;  %v1689_v28 = vld [vmem:[#allocation2 + $0x2d10] sm:$0xff]  ;;  %v1734_v51 = vld [vmem:[#allocation2 + $0x2e78] sm:$0xff] }
 0x5fe   :  { %v13638_v2 = vcombine.low %v1689_v28, %v1693_v47  ;;  %v1738_v5 = vld [vmem:[#allocation2 + $0x2e98] sm:$0xff] }
 0x5ff   :  { %v1742_v29 = vld [vmem:[#allocation2 + $0x2eb8] sm:$0xff] }
 0x600   :  { %10924 = vmatpush1.bf16.msra.mxu0 %v13574_v19  ;;  %11416 = vmatpush1.bf16.msra.mxu1 %v13576_v59  ;;  %v13632_v19 = vcombine.low %v1682_v61, %v1686_v18  ;;  %v13639_v59 = vcombine.high %v1689_v28, %v1693_v47  ;;  %v13680_v18 = vcombine.low %v1730_v50, %v1734_v51  ;;  %v1746_v28 = vld [vmem:[#allocation2 + $0x2ed8] sm:$0xff] }
 0x601   :  { %10925 = vmatprep.subr.bf16.mxu0 %v13583_v62  ;;  %11417 = vmatprep.subr.bf16.mxu1 %v13585_v37  ;;  %v1697_v62 = vld [vmem:[#allocation2 + $0x2d50] sm:$0xff]  ;;  %v1750_v47 = vld [vmem:[#allocation2 + $0x2ef8] sm:$0xff] }
 0x602   :  { %v1701_v37 = vld [vmem:[#allocation2 + $0x2d70] sm:$0xff] }
 0x603   :  { %v13646_v34 = vcombine.low %v1697_v62, %v1701_v37 }
 0x604   :  { %10926 = vmatpush1.bf16.msra.mxu0 %v13582_v7  ;;  %11418 = vmatpush1.bf16.msra.mxu1 %v13584_v45  ;;  %v13647_v7 = vcombine.high %v1697_v62, %v1701_v37  ;;  %v13649_v45 = vcombine.high %v1698_v15, %v1702_v1  ;;  %v1754_v62 = vld [vmem:[#allocation2 + $0x2f18] sm:$0xff]  ;;  %v13696_v1 = vcombine.low %v1746_v28, %v1750_v47 }
 0x605   :  { %10927 = vmatprep.subr.bf16.mxu0 %v13591_v38  ;;  %11419 = vmatprep.subr.bf16.mxu1 %v13593_v55  ;;  %v1705_v38 = vld [vmem:[#allocation2 + $0x2d90] sm:$0xff]  ;;  %v1758_v37 = vld [vmem:[#allocation2 + $0x2f38] sm:$0xff] }
 0x606   :  { %v1709_v55 = vld [vmem:[#allocation2 + $0x2db0] sm:$0xff] }
 0x607   :  { %v13654_v24 = vcombine.low %v1705_v38, %v1709_v55 }
 0x608   :  { %10928 = vmatpush1.bf16.msra.mxu0 %v13590_v16  ;;  %11420 = vmatpush1.bf16.msra.mxu1 %v13592_v26  ;;  %v13655_v16 = vcombine.high %v1705_v38, %v1709_v55  ;;  %v13657_v26 = vcombine.high %v1706_v8, %v1710_v31  ;;  %v1791_v38 = vsub.s32 1, %v14354_v52  ;;  %v1762_v55 = vld [vmem:[#allocation2 + $0x2f58] sm:$0xff]  ;;  %v14642_v31 = vld [vmem:[#allocation5] sm:$0xff] }
 0x609   :  { %10929 = vmatprep.subr.bf16.mxu0 %v13599_v21  ;;  %11421 = vmatprep.subr.bf16.mxu1 %v13601_v23  ;;  %v1713_v21 = vld [vmem:[#allocation2 + $0x2dd0] sm:$0xff]  ;;  %v1766_v8 = vld [vmem:[#allocation2 + $0x2f78] sm:$0xff] }
 0x60a   :  { %v1717_v23 = vld [vmem:[#allocation2 + $0x2df0] sm:$0xff] }
 0x60b   :  { %v13662_v43 = vcombine.low %v1713_v21, %v1717_v23 }
 0x60c   :  { %10930 = vmatpush1.bf16.msra.mxu0 %v13598_v30  ;;  %11422 = vmatpush1.bf16.msra.mxu1 %v13600_v48  ;;  %v13663_v30 = vcombine.high %v1713_v21, %v1717_v23  ;;  %v13665_v48 = vcombine.high %v1714_v0, %v1718_v22  ;;  %v13713_v21 = vcombine.high %v1762_v55, %v1766_v8  ;;  %v1769_v23 = vld [vmem:[#allocation2 + $0x2f90] sm:$0xff] }
 0x60d   :  { %10940 = vmatprep.subr.bf16.mxu0 %v13607_v32  ;;  %11432 = vmatprep.subr.bf16.mxu1 %v13609_v33  ;;  %v1721_v32 = vld [vmem:[#allocation2 + $0x2e10] sm:$0xff]  ;;  %v1792_v22 = vrot.slane %v14642_v31, %v1791_v38 }
 0x60e   :  { %v1725_v33 = vld [vmem:[#allocation2 + $0x2e30] sm:$0xff] }
 0x60f   :  { %10932 = vmatmul.mubr.bf16.vlgmr.msra.gmra.mrb[4].mxu0 %v14573_v13  ;;  %11424 = vmatmul.mubr.bf16.vlgmr.msra.gmra.mrb[4].mxu1 %v14573_v13  ;;  %v13624_v13 = vcombine.low %v1674_v53, %v1678_v54  ;;  %v13670_v53 = vcombine.low %v1721_v32, %v1725_v33  ;;  %v13672_v54 = vcombine.low %v1722_v39, %v1726_v40  ;;  %v1773_v0 = vld [vmem:[#allocation2 + $0x2fb0] sm:$0xff] }
 0x610   :  { %10941 = vmatpush1.bf16.msra.mxu0 %v13606_v58  ;;  %11433 = vmatpush1.bf16.msra.mxu1 %v13608_v44  ;;  %v13671_v58 = vcombine.high %v1721_v32, %v1725_v33  ;;  %v13673_v44 = vcombine.high %v1722_v39, %v1726_v40  ;;  %v13712_v32 = vcombine.low %v1762_v55, %v1766_v8  ;;  %v1777_v40 = vld [vmem:[#allocation2 + $0x2fd0] sm:$0xff] }
 0x611   :  { %10942 = vmatprep.subr.bf16.mxu0 %v13615_v49  ;;  %11434 = vmatprep.subr.bf16.mxu1 %v13617_v14  ;;  %v1729_v49 = vld [vmem:[#allocation2 + $0x2e50] sm:$0xff]  ;;  %v13719_v33 = vcombine.high %v1769_v23, %v1773_v0 }
 0x612   :  { %10972 = vmatprep.mubr.bf16.mxu0 %v14575_v10  ;;  %11464 = vmatprep.mubr.bf16.mxu1 %v14575_v10  ;;  %v13641_v10 = vcombine.high %v1690_v35, %v1694_v63  ;;  %v1733_v14 = vld [vmem:[#allocation2 + $0x2e70] sm:$0xff]  ;;  %v13688_v63 = vcombine.low %v1738_v5, %v1742_v29 }
 0x613   :  { %v13678_v61 = vcombine.low %v1729_v49, %v1733_v14  ;;  %v14098_v55 = vld [vmem:[#allocation7 + $0xe8] sm:$0xff]  }
 0x614   :  { %10943 = vmatpush1.bf16.msra.mxu0 %v13614_v11  ;;  %11435 = vmatpush1.bf16.msra.mxu1 %v13616_v57  ;;  %v13679_v11 = vcombine.high %v1729_v49, %v1733_v14  ;;  %v13681_v57 = vcombine.high %v1730_v50, %v1734_v51  ;;  %v13718_v14 = vcombine.low %v1769_v23, %v1773_v0  ;;  %v14099_v8 = vld [vmem:[#allocation7 + $0x28] sm:$0xff]   ;;  %v14103_v23 = vld [vmem:[#allocation7 + $0x30] sm:$0xff]  }
 0x615   :  { %10944 = vmatprep.subr.bf16.mxu0 %v13623_v17  ;;  %11436 = vmatprep.subr.bf16.mxu1 %v13625_v56  ;;  %v1737_v17 = vld [vmem:[#allocation2 + $0x2e90] sm:$0xff] }
 0x616   :  { %v1741_v56 = vld [vmem:[#allocation2 + $0x2eb0] sm:$0xff] }
 0x617   :  { %v13686_v35 = vcombine.low %v1737_v17, %v1741_v56 }
 0x618   :  { %10945 = vmatpush1.bf16.msra.mxu0 %v13622_v6  ;;  %11437 = vmatpush1.bf16.msra.mxu1 %v13624_v13  ;;  %v13687_v6 = vcombine.high %v1737_v17, %v1741_v56  ;;  %v13689_v13 = vcombine.high %v1738_v5, %v1742_v29  ;;  %v14078_v56 = vld [vmem:[#allocation7 + $0xc0] sm:$0xff]  }
 0x619   :  { %10946 = vmatprep.subr.bf16.mxu0 %v13631_v60  ;;  %11438 = vmatprep.subr.bf16.mxu1 %v13633_v27  ;;  %v1745_v60 = vld [vmem:[#allocation2 + $0x2ed0] sm:$0xff]  ;;  %v14079_v29 = vld [vmem:[#allocation7] sm:$0xff]  }
 0x61a   :  { %v1749_v27 = vld [vmem:[#allocation2 + $0x2ef0] sm:$0xff] }
 0x61b   :  { %v13694_v15 = vcombine.low %v1745_v60, %v1749_v27 }
 0x61c   :  { %10947 = vmatpush1.bf16.msra.mxu0 %v13630_v42  ;;  %11439 = vmatpush1.bf16.msra.mxu1 %v13632_v19  ;;  %v13695_v42 = vcombine.high %v1745_v60, %v1749_v27  ;;  %v13697_v19 = vcombine.high %v1746_v28, %v1750_v47  ;;  %v14083_v27 = vld [vmem:[#allocation7 + $0x8] sm:$0xff]   ;;  %v14085_v47 = vld [vmem:[#allocation7 + $0x50] sm:$0xff]  }
 0x61d   :  { %10948 = vmatprep.subr.bf16.mxu0 %v13639_v59  ;;  %11440 = vmatprep.subr.bf16.mxu1 %v13641_v10  ;;  %v1753_v59 = vld [vmem:[#allocation2 + $0x2f10] sm:$0xff] }
 0x61e   :  { %v1757_v10 = vld [vmem:[#allocation2 + $0x2f30] sm:$0xff] }
 0x61f   :  { %v14084_v28 = vld [vmem:[#allocation7 + $0x88] sm:$0xff]  }
 0x620   :  { %10949 = vmatpush1.bf16.msra.mxu0 %v13638_v2  ;;  %11441 = vmatpush1.bf16.msra.mxu1 %v13640_v4  ;;  %v13703_v2 = vcombine.high %v1753_v59, %v1757_v10  ;;  %v13705_v4 = vcombine.high %v1754_v62, %v1758_v37 }
 0x621   :  { %10950 = vmatprep.subr.bf16.mxu0 %v13647_v7  ;;  %11442 = vmatprep.subr.bf16.mxu1 %v13649_v45  ;;  %v1761_v7 = vld [vmem:[#allocation2 + $0x2f50] sm:$0xff] }
 0x622   :  { %v1765_v45 = vld [vmem:[#allocation2 + $0x2f70] sm:$0xff] }
 0x624   :  { %10951 = vmatpush1.bf16.msra.mxu0 %v13646_v34  ;;  %11443 = vmatpush1.bf16.msra.mxu1 %v13648_v12  ;;  %v1799_v34 = vsub.s32 3, %v14354_v52  ;;  %v13702_v12 = vcombine.low %v1753_v59, %v1757_v10  ;;  %v14090_v59 = vld [vmem:[#allocation7 + $0xd8] sm:$0xff]   ;;  %v1787_v10 = vsub.s32 0, %v14354_v52 }
 0x625   :  { %10952 = vmatprep.subr.bf16.mxu0 %v13655_v16  ;;  %11444 = vmatprep.subr.bf16.mxu1 %v13657_v26  ;;  %v13704_v16 = vcombine.low %v1754_v62, %v1758_v37  ;;  %v13711_v26 = vcombine.high %v1761_v7, %v1765_v45  ;;  %v14092_v62 = vld [vmem:[#allocation7 + $0x98] sm:$0xff]   ;;  %v14093_v37 = vld [vmem:[#allocation7 + $0x60] sm:$0xff]  }
 0x628   :  { %10953 = vmatpush1.bf16.msra.mxu0 %v13654_v24  ;;  %11445 = vmatpush1.bf16.msra.mxu1 %v13656_v3  ;;  %v1770_v24 = vld [vmem:[#allocation2 + $0x2f98] sm:$0xff] }
 0x629   :  { %10954 = vmatprep.subr.bf16.mxu0 %v13663_v30  ;;  %11446 = vmatprep.subr.bf16.mxu1 %v13665_v48  ;;  %v1774_v3 = vld [vmem:[#allocation2 + $0x2fb8] sm:$0xff]  ;;  %v1800_v30 = vrot.slane %v14642_v31, %v1799_v34  ;;  %v13710_v48 = vcombine.low %v1761_v7, %v1765_v45  ;;  %v14096_v7 = vld [vmem:[#allocation7 + $0xa0] sm:$0xff]   ;;  %v14097_v45 = vld [vmem:[#allocation7 + $0x68] sm:$0xff]  }
 0x62a   :  { %v13721_v39 = vcombine.high %v1770_v24, %v1774_v3  ;;  %v13720_v50 = vcombine.low %v1770_v24, %v1774_v3  ;;  %v14105_v24 = vld [vmem:[#allocation7 + $0x78] sm:$0xff]  }
 0x62b   :  { %v13886_v49 = vadd.f32 %v14607_v41, %v1800_v30  ;;  %v14106_v30 = vld [vmem:[#allocation7 + $0xf8] sm:$0xff]  }
 0x62c   :  { %10955 = vmatpush1.bf16.msra.mxu0 %v13662_v43  ;;  %11447 = vmatpush1.bf16.msra.mxu1 %v13664_v46  ;;  %v1781_v43 = vld [vmem:[#allocation2 + $0x2ff0] sm:$0xff]  ;;  %v13884_v46 = vadd.f32 %v14605_v9, %v1792_v22  ;;  %v14077_v9 = vld [vmem:[#allocation7 + $0x40] sm:$0xff]   ;;  %v14104_v22 = vld [vmem:[#allocation7 + $0xb0] sm:$0xff]  }
 0x62d   :  { %10956 = vmatprep.subr.bf16.mxu0 %v13671_v58  ;;  %11448 = vmatprep.subr.bf16.mxu1 %v13673_v44  ;;  %v1778_v58 = vld [vmem:[#allocation2 + $0x2fd8] sm:$0xff]  ;;  %v13727_v51 = vcombine.high %v1777_v40, %v1781_v43 }
 0x62e   :  { %v1782_v44 = vld [vmem:[#allocation2 + $0x2ff8] sm:$0xff] }
 0x62f   :  { %v13728_v17 = vcombine.low %v1778_v58, %v1782_v44 }
 0x630   :  { %10957 = vmatpush1.bf16.msra.mxu0 %v13670_v53  ;;  %11449 = vmatpush1.bf16.msra.mxu1 %v13672_v54  ;;  %v13729_v53 = vcombine.high %v1778_v58, %v1782_v44  ;;  %v11474_v54 = vmul.f32 0.01, %v13884_v46  ;;  %v14113_v58 = vld [vmem:[#allocation7 + $0x148] sm:$0xff]  }
 0x631   :  { %10958 = vmatprep.subr.bf16.mxu0 %v13679_v11  ;;  %11450 = vmatprep.subr.bf16.mxu1 %v13681_v57  ;;  %v11476_v11 = vmul.f32 0.01, %v13886_v49  ;;  %v13726_v57 = vcombine.low %v1777_v40, %v1781_v43  ;;  %v14111_v40 = vld [vmem:[#allocation7 + $0x100] sm:$0xff]  }
 0x632   :  { %v11482_v5 = vmax.f32 %v13884_v46, %v11474_v54  ;;  %v14112_v46 = vld [vmem:[#allocation7 + $0x180] sm:$0xff]   ;;  %v14119_v54 = vld [vmem:[#allocation7 + $0x110] sm:$0xff]  }
 0x633   :  { %v11484_v41 = vmax.f32 %v13886_v49, %v11476_v11  ;;  %v14114_v49 = vld [vmem:[#allocation7 + $0x1c8] sm:$0xff]   ;;  %v14120_v11 = vld [vmem:[#allocation7 + $0x190] sm:$0xff]  }
 0x634   :  { %10959 = vmatpush1.bf16.msra.mxu0 %v13678_v61  ;;  %11451 = vmatpush1.bf16.msra.mxu1 %v13680_v18  ;;  %v14080_v61 = vld [vmem:[#allocation7 + $0x80] sm:$0xff]   ;;  %v14081_v18 = vld [vmem:[#allocation7 + $0x48] sm:$0xff]  }
 0x635   :  { %10960 = vmatprep.subr.bf16.mxu0 %v13687_v6  ;;  %11452 = vmatprep.subr.bf16.mxu1 %v13689_v13  ;;  %v11490_v6 = vpack.c.bf16 %v11482_v5, %v11482_v5  ;;  %v14082_v13 = vld [vmem:[#allocation7 + $0xc8] sm:$0xff]   ;;  %v11492_v60 = vpack.c.bf16 %v11484_v41, %v11484_v41  ;;  %v14125_v5 = vld [vmem:[#allocation7 + $0x160] sm:$0xff]  }
 0x636   :  { %v14126_v41 = vld [vmem:[#allocation7 + $0x1e0] sm:$0xff]  }
 0x638   :  { %10961 = vmatpush1.bf16.msra.mxu0 %v13686_v35  ;;  %11453 = vmatpush1.bf16.msra.mxu1 %v13688_v63  ;;  %v14086_v35 = vld [vmem:[#allocation7 + $0xd0] sm:$0xff]  }
 0x639   :  { %10962 = vmatprep.subr.bf16.mxu0 %v13695_v42  ;;  %11454 = vmatprep.subr.bf16.mxu1 %v13697_v19  ;;  %v14087_v63 = vld [vmem:[#allocation7 + $0x10] sm:$0xff]   ;;  %v14089_v19 = vld [vmem:[#allocation7 + $0x58] sm:$0xff]  }
 0x63a   :  { %v14088_v42 = vld [vmem:[#allocation7 + $0x90] sm:$0xff]  }
 0x63c   :  { %10963 = vmatpush1.bf16.msra.mxu0 %v13694_v15  ;;  %11455 = vmatpush1.bf16.msra.mxu1 %v13696_v1  ;;  %v1795_v15 = vsub.s32 2, %v14354_v52  ;;  %v14094_v1 = vld [vmem:[#allocation7 + $0xe0] sm:$0xff]  }
 0x63d   :  { %10964 = vmatprep.subr.bf16.mxu0 %v13703_v2  ;;  %11456 = vmatprep.subr.bf16.mxu1 %v13705_v4  ;;  %v14095_v2 = vld [vmem:[#allocation7 + $0x20] sm:$0xff]   ;;  %v1788_v4 = vrot.slane %v14642_v31, %v1787_v10  ;;  %v1811_v10 = vsub.s32 6, %v14354_v52 }
 0x63e   :  { %v1796_v38 = vrot.slane %v14642_v31, %v1795_v15 }
 0x63f   :  { %v13883_v34 = vadd.f32 %v14601_v25, %v1788_v4  ;;  %v14107_v25 = vld [vmem:[#allocation7 + $0x38] sm:$0xff]  }
 0x640   :  { %10965 = vmatpush1.bf16.msra.mxu0 %v13702_v12  ;;  %11457 = vmatpush1.bf16.msra.mxu1 %v13704_v16  ;;  %v14100_v12 = vld [vmem:[#allocation7 + $0xa8] sm:$0xff]   ;;  %v14101_v16 = vld [vmem:[#allocation7 + $0x70] sm:$0xff]  }
 0x641   :  { %10966 = vmatprep.subr.bf16.mxu0 %v13711_v26  ;;  %11458 = vmatprep.subr.bf16.mxu1 %v13713_v21  ;;  %v13885_v26 = vadd.f32 %v14603_v36, %v1796_v38  ;;  %v14102_v21 = vld [vmem:[#allocation7 + $0xf0] sm:$0xff]   ;;  %v11473_v0 = vmul.f32 0.01, %v13883_v34 }
 0x643   :  { %v11475_v3 = vmul.f32 0.01, %v13885_v26 }
 0x644   :  { %10967 = vmatpush1.bf16.msra.mxu0 %v13710_v48  ;;  %11459 = vmatpush1.bf16.msra.mxu1 %v13712_v32  ;;  %v11481_v48 = vmax.f32 %v13883_v34, %v11473_v0  ;;  %v14108_v32 = vld [vmem:[#allocation7 + $0xb8] sm:$0xff]  }
 0x645   :  { %10968 = vmatprep.subr.bf16.mxu0 %v13719_v33  ;;  %11460 = vmatprep.subr.bf16.mxu1 %v13721_v39  ;;  %v14109_v33 = vld [vmem:[#allocation7 + $0x140] sm:$0xff]   ;;  %v11483_v36 = vmax.f32 %v13885_v26, %v11475_v3 }
 0x646   :  { %v14110_v39 = vld [vmem:[#allocation7 + $0x1c0] sm:$0xff]   ;;  %v11489_v43 = vpack.c.bf16 %v11481_v48, %v11481_v48 }
 0x647   :  { %v11491_v44 = vpack.c.bf16 %v11483_v36, %v11483_v36 }
 0x648   :  { %10969 = vmatpush1.bf16.msra.mxu0 %v13718_v14  ;;  %11461 = vmatpush1.bf16.msra.mxu1 %v13720_v50  ;;  %v14115_v14 = vld [vmem:[#allocation7 + $0x108] sm:$0xff]  }
 0x649   :  { %10970 = vmatprep.subr.bf16.mxu0 %v13727_v51  ;;  %11462 = vmatprep.subr.bf16.mxu1 %v13729_v53  ;;  %v14116_v50 = vld [vmem:[#allocation7 + $0x188] sm:$0xff]   ;;  %v14117_v51 = vld [vmem:[#allocation7 + $0x150] sm:$0xff]  }
 0x64a   :  { %v14118_v53 = vld [vmem:[#allocation7 + $0x1d0] sm:$0xff]  }
 0x64c   :  { %10971 = vmatpush1.bf16.msra.mxu0 %v13726_v57  ;;  %11463 = vmatpush1.bf16.msra.mxu1 %v13728_v17  ;;  %v14121_v57 = vld [vmem:[#allocation7 + $0x158] sm:$0xff]  }
 0x64d   :  { %13795 = vmatprep.subr.bf16.mxu0 %v14077_v9  ;;  %13817 = vmatprep.subr.bf16.mxu1 %v14078_v56  ;;  %v14122_v17 = vld [vmem:[#allocation7 + $0x1d8] sm:$0xff]  }
 0x64e   :  { %v14123_v9 = vld [vmem:[#allocation7 + $0x118] sm:$0xff]  }
 0x64f   :  { %10973 = vmatmul.mubr.bf16.vlgmr.msra.gmra.mrb[4].mxu0 %v14583_v20  ;;  %11465 = vmatmul.mubr.bf16.vlgmr.msra.gmra.mrb[4].mxu1 %v14583_v20  ;;  %v14091_v20 = vld [vmem:[#allocation7 + $0x18] sm:$0xff]  }
 0x650   :  { %13796 = vmatpush3.bf16.msra.mxu0 %v14079_v29  ;;  %12048 = vmatprep.mubr.bf16.mxu0 %v11490_v6  ;;  %v14124_v56 = vld [vmem:[#allocation7 + $0x198] sm:$0xff]   ;;  %v14127_v29 = vld [vmem:[#allocation7 + $0x120] sm:$0xff]   ;;  %v14130_v6 = vld [vmem:[#allocation7 + $0x1e8] sm:$0xff]  }
 0x651   :  { %13818 = vmatpush3.bf16.msra.mxu1 %v14080_v61  ;;  %12088 = vmatprep.mubr.bf16.mxu1 %v11492_v60  ;;  %v14128_v61 = vld [vmem:[#allocation7 + $0x1a0] sm:$0xff]   ;;  %v14132_v60 = vld [vmem:[#allocation7 + $0x1a8] sm:$0xff]  }
 0x652   :  { %13797 = vmatprep.subr.bf16.mxu0 %v14081_v18  ;;  %13819 = vmatprep.subr.bf16.mxu1 %v14082_v13  ;;  %v14129_v18 = vld [vmem:[#allocation7 + $0x168] sm:$0xff]  }
 0x653   :  { %v14131_v13 = vld [vmem:[#allocation7 + $0x128] sm:$0xff]  }
 0x654   :  { %13798 = vmatpush3.bf16.msra.mxu0 %v14083_v27  ;;  %v14133_v27 = vld [vmem:[#allocation7 + $0x170] sm:$0xff]  }
 0x655   :  { %13820 = vmatpush3.bf16.msra.mxu1 %v14084_v28  ;;  %13799 = vmatprep.subr.bf16.mxu0 %v14085_v47  ;;  %v14134_v28 = vld [vmem:[#allocation7 + $0x1f0] sm:$0xff]  }
 0x656   :  { %13821 = vmatprep.subr.bf16.mxu1 %v14086_v35  ;;  %v14135_v47 = vld [vmem:[#allocation7 + $0x130] sm:$0xff]  }
 0x657   :  { %v14136_v35 = vld [vmem:[#allocation7 + $0x1b0] sm:$0xff]  }
 0x658   :  { %13800 = vmatpush3.bf16.msra.mxu0 %v14087_v63  ;;  %v14137_v63 = vld [vmem:[#allocation7 + $0x178] sm:$0xff]  }
 0x659   :  { %13822 = vmatpush3.bf16.msra.mxu1 %v14088_v42  ;;  %13801 = vmatprep.subr.bf16.mxu0 %v14089_v19  ;;  %v14138_v42 = vld [vmem:[#allocation7 + $0x1f8] sm:$0xff]  }
 0x65a   :  { %13823 = vmatprep.subr.bf16.mxu1 %v14090_v59  ;;  %v14139_v19 = vld [vmem:[#allocation7 + $0x138] sm:$0xff]  }
 0x65b   :  { %v14140_v59 = vld [vmem:[#allocation7 + $0x1b8] sm:$0xff]  }
 0x65c   :  { %13802 = vmatpush3.bf16.msra.mxu0 %v14091_v20  ;;  %v1803_v20 = vsub.s32 4, %v14354_v52 }
 0x65d   :  { %13824 = vmatpush3.bf16.msra.mxu1 %v14092_v62  ;;  %13803 = vmatprep.subr.bf16.mxu0 %v14093_v37  ;;  %v1807_v62 = vsub.s32 5, %v14354_v52  ;;  %v1815_v37 = vsub.s32 7, %v14354_v52 }
 0x65e   :  { %13825 = vmatprep.subr.bf16.mxu1 %v14094_v1  ;;  %v1804_v15 = vrot.slane %v14642_v31, %v1803_v20  ;;  %v1812_v1 = vrot.slane %v14642_v31, %v1811_v10 }
 0x65f   :  { %v1816_v4 = vrot.slane %v14642_v31, %v1815_v37 }
 0x660   :  { %13804 = vmatpush3.bf16.msra.mxu0 %v14095_v2  ;;  %v1808_v2 = vrot.slane %v14642_v31, %v1807_v62 }
 0x661   :  { %13826 = vmatpush3.bf16.msra.mxu1 %v14096_v7  ;;  %13805 = vmatprep.subr.bf16.mxu0 %v14097_v45 }
 0x662   :  { %13827 = vmatprep.subr.bf16.mxu1 %v14098_v55 }
 0x664   :  { %13806 = vmatpush3.bf16.msra.mxu0 %v14099_v8 }
 0x665   :  { %13828 = vmatpush3.bf16.msra.mxu1 %v14100_v12  ;;  %13807 = vmatprep.subr.bf16.mxu0 %v14101_v16 }
 0x666   :  { %13829 = vmatprep.subr.bf16.mxu1 %v14102_v21 }
 0x668   :  { %13808 = vmatpush3.bf16.msra.mxu0 %v14103_v23 }
 0x669   :  { %13830 = vmatpush3.bf16.msra.mxu1 %v14104_v22  ;;  %13809 = vmatprep.subr.bf16.mxu0 %v14105_v24 }
 0x66a   :  { %13831 = vmatprep.subr.bf16.mxu1 %v14106_v30 }
 0x66c   :  { %13810 = vmatpush3.bf16.msra.mxu0 %v14107_v25 }
 0x66d   :  { %13832 = vmatpush3.bf16.msra.mxu1 %v14108_v32  ;;  %13839 = vmatprep.subr.bf16.mxu0 %v14109_v33 }
 0x66e   :  { %13861 = vmatprep.subr.bf16.mxu1 %v14110_v39 }
 0x66f   :  { %12049 = vmatmul.mubr.bf16.vlgmr.msra.gmra.mrb[8].mxu0 %v11489_v43 }
 0x670   :  { %12089 = vmatmul.mubr.bf16.vlgmr.msra.gmra.mrb[8].mxu1 %v11491_v44  ;;  %13840 = vmatpush3.bf16.msra.mxu0 %v14111_v40 }
 0x671   :  { %13862 = vmatpush3.bf16.msra.mxu1 %v14112_v46  ;;  %13841 = vmatprep.subr.bf16.mxu0 %v14113_v58  ;;  %v13730_v46 = vld [vmem:[#allocation8] ss:$0 sm:$0xff] }
 0x672   :  { %13863 = vmatprep.subr.bf16.mxu1 %v14114_v49 }
 0x674   :  { %13842 = vmatpush3.bf16.msra.mxu0 %v14115_v14 }
 0x675   :  { %13864 = vmatpush3.bf16.msra.mxu1 %v14116_v50  ;;  %13843 = vmatprep.subr.bf16.mxu0 %v14117_v51 }
 0x676   :  { %13865 = vmatprep.subr.bf16.mxu1 %v14118_v53 }
 0x678   :  { %13844 = vmatpush3.bf16.msra.mxu0 %v14119_v54 }
 0x679   :  { %13866 = vmatpush3.bf16.msra.mxu1 %v14120_v11  ;;  %13845 = vmatprep.subr.bf16.mxu0 %v14121_v57 }
 0x67a   :  { %13867 = vmatprep.subr.bf16.mxu1 %v14122_v17 }
 0x67c   :  { %13846 = vmatpush3.bf16.msra.mxu0 %v14123_v9 }
 0x67d   :  { %13868 = vmatpush3.bf16.msra.mxu1 %v14124_v56  ;;  %13847 = vmatprep.subr.bf16.mxu0 %v14125_v5 }
 0x67e   :  { %13869 = vmatprep.subr.bf16.mxu1 %v14126_v41 }
 0x680   :  { %13848 = vmatpush3.bf16.msra.mxu0 %v14127_v29 }
 0x681   :  { %13870 = vmatpush3.bf16.msra.mxu1 %v14128_v61  ;;  %13849 = vmatprep.subr.bf16.mxu0 %v14129_v18 }
 0x682   :  { %13871 = vmatprep.subr.bf16.mxu1 %v14130_v6 }
 0x684   :  { %13850 = vmatpush3.bf16.msra.mxu0 %v14131_v13 }
 0x685   :  { %13872 = vmatpush3.bf16.msra.mxu1 %v14132_v60  ;;  %13851 = vmatprep.subr.bf16.mxu0 %v14133_v27 }
 0x686   :  { %13873 = vmatprep.subr.bf16.mxu1 %v14134_v28 }
 0x688   :  { %13852 = vmatpush3.bf16.msra.mxu0 %v14135_v47 }
 0x689   :  { %13874 = vmatpush3.bf16.msra.mxu1 %v14136_v35  ;;  %13853 = vmatprep.subr.bf16.mxu0 %v14137_v63 }
 0x68a   :  { %13875 = vmatprep.subr.bf16.mxu1 %v14138_v42 }
 0x68c   :  { %13854 = vmatpush3.bf16.msra.mxu0 %v14139_v19 }
 0x68d   :  { %13876 = vmatpush3.bf16.msra.mxu1 %v14140_v59 }
 0x722   :  { %v10974_v7 = vpop.f32.mrb[4].mxu0  ;;  %v11466_v38 = vpop.f32.mrb[4].mxu1 }
 0x723   :  { %v13887_v45 = vadd.f32 %v10974_v7, %v1804_v15  ;;  %v10976_v55 = vpop.f32.mrb[5].mxu0  ;;  %v13889_v8 = vadd.f32 %v11466_v38, %v1812_v1  ;;  %v11468_v12 = vpop.f32.mrb[5].mxu1 }
 0x724   :  { %v13888_v34 = vadd.f32 %v10976_v55, %v1808_v2  ;;  %v10978_v16 = vpop.f32.mrb[6].mxu0  ;;  %v13890_v21 = vadd.f32 %v11468_v12, %v1816_v4  ;;  %v11470_v23 = vpop.f32.mrb[6].mxu1 }
 0x725   :  { %v11477_v26 = vmul.f32 0.01, %v13887_v45  ;;  %v10979_v52 = vpop.f32.mrb[7].mxu0  ;;  %v11479_v0 = vmul.f32 0.01, %v13889_v8  ;;  %v11471_v24 = vpop.f32.mrb[7].mxu1 }
 0x726   :  { %v11478_v22 = vmul.f32 0.01, %v13888_v34  ;;  %v11480_v30 = vmul.f32 0.01, %v13890_v21 }
 0x727   :  { %v11485_v3 = vmax.f32 %v13887_v45, %v11477_v26  ;;  %v11487_v25 = vmax.f32 %v13889_v8, %v11479_v0 }
 0x728   :  { %v11486_v48 = vmax.f32 %v13888_v34, %v11478_v22  ;;  %v11488_v31 = vmax.f32 %v13890_v21, %v11480_v30 }
 0x729   :  { %v11493_v33 = vpack.c.bf16 %v11485_v3, %v11485_v3  ;;  %v11495_v39 = vpack.c.bf16 %v11487_v25, %v11487_v25 }
 0x72a   :  { %v11494_v32 = vpack.c.bf16 %v11486_v48, %v11486_v48  ;;  %v11496_v36 = vpack.c.bf16 %v11488_v31, %v11488_v31 }
 0x72c   :  { %12128 = vmatprep.mubr.bf16.mxu0 %v11494_v32  ;;  %12168 = vmatprep.mubr.bf16.mxu1 %v11496_v36 }
 0x72d   :  { %12129 = vmatmul.mubr.bf16.vlgmr.msra.gmra.mrb[12].mxu0 %v11493_v33  ;;  %12169 = vmatmul.mubr.bf16.vlgmr.msra.gmra.mrb[12].mxu1 %v11495_v39 }
 0x742   :  { %v13811_v40 = vpop.f32.mrb[8].mxu0 }
 0x743   :  { %v13833_v43 = vpop.f32.mrb[8].mxu1  ;;  %v13812_v58 = vpop.f32.mrb[9].mxu0 }
 0x744   :  { %v13813_v44 = vadd.f32 %v13812_v58, %v13811_v40  ;;  %v13834_v49 = vpop.f32.mrb[9].mxu1  ;;  %v13814_v14 = vpop.f32.mrb[10].mxu0 }
 0x745   :  { %v13835_v50 = vadd.f32 %v13834_v49, %v13833_v43  ;;  %v13836_v51 = vpop.f32.mrb[10].mxu1  ;;  %v13815_v53 = vpop.f32.mrb[11].mxu0 }
 0x746   :  { %v12051_v54 = vadd.f32 %v13813_v44, %v13730_v46  ;;  %v13837_v11 = vpop.f32.mrb[11].mxu1 }
 0x748   :  { %v12091_v57 = vadd.f32 %v13835_v50, %v12051_v54 }
 0x800   :  { %v13855_v17 = vpop.f32.mrb[12].mxu0  ;;  %v13877_v9 = vpop.f32.mrb[12].mxu1 }
 0x801   :  { %v13856_v56 = vpop.f32.mrb[13].mxu0  ;;  %v13878_v41 = vpop.f32.mrb[13].mxu1 }
 0x802   :  { %v13857_v5 = vadd.f32 %v13856_v56, %v13855_v17  ;;  %v13858_v29 = vpop.f32.mrb[14].mxu0  ;;  %v13879_v61 = vadd.f32 %v13878_v41, %v13877_v9  ;;  %v13880_v18 = vpop.f32.mrb[14].mxu1 }
 0x803   :  { %v13859_v6 = vpop.f32.mrb[15].mxu0  ;;  %v13881_v60 = vpop.f32.mrb[15].mxu1 }
 0x804   :  { %v12131_v13 = vadd.f32 %v13857_v5, %v12091_v57 }
 0x806   :  { %v12171_v27 = vadd.f32 %v13879_v61, %v12131_v13 }
 0x808   :  { %12176 = vst [vmem:[#allocation10] sm:$0x3] %v12171_v27 }
 0x809   :  { %14240 = shalt.err (!%p14237_p8)
}
 0x80a   :  { %s14241_s6 = scalar_lea.hbm %s14682_s5, 32 }
 0x80b   :  { %p14242_p9 = scmp.ne.s32.totalorder %s14682_s5, %s14241_s6  ;;  %p14245_p10 = scmp.lt.u32.totalorder %s14241_s6, %s14682_s5 }
 0x80d   :  { %p14247_p11 = pnand %p14245_p10, %p14242_p9 }
 0x80f   :  { %14250 = shalt.err (!%p14247_p11)
}
 0x810   :  { %12186 = dma.vmem_to_hbm [thread:$0]  %s12184_s1, 32, %s14682_s5, [#allocation4]  }
 0x811   :  { %14257 = dma.done.wait [#allocation4], 32  }
 0x812   :  { %14258 = vsyncadd [#allocation4], 4294967264 }
 0x813   :  { %12190 = vsyncpa [#allocation3], 1 }
 0x814   :  { %12191 = vsyncpa [#allocation6], 1 }
 0x815   :  { %12192 = vsyncpa [#allocation9], 1 }
 0x816   :  { %12193 = vsyncpa [#allocation4], 1 }

</bundles_post_ra>
